<compile_context>
chip_gen: v7x
topology: tpu7x:2x2x1
jax: 0.10.0
libtpu: 0.0.40
codegen_flags: <defaults>
</compile_context>

<pallas_src>
import jax
import jax.numpy as jnp
from jax.experimental import pallas as pl
from jax.experimental.pallas import tpu as pltpu

D_IN = 28 * 28        # 784
D_IN_PAD = 896        # next multiple of 128 (lane-dense K for fc1)
D_H1 = 512
D_H2 = 256
D_OUT = 10
D_OUT_PAD = 128       # lane-dense output (avoids masked partial stores)


def _round_up(x, m):
    return (x + m - 1) // m * m


def mlp_kernel(x_ref, w1_ref, b1_ref, w2_ref, b2_ref, w3_ref, b3_ref, o_ref):
    # All three GEMMs fused; operands bf16, accumulation f32 on the MXU.
    # Bias-add / ReLU ride in free VPU slots in f32 (no bf16 VALU needed on v5e).
    x = x_ref[...]                                                   # (bm, 896) bf16
    h1 = jnp.dot(x, w1_ref[...], preferred_element_type=jnp.float32)
    h1 = jnp.maximum(h1 + b1_ref[...], 0.0)                          # (bm, 512) f32
    h2 = jnp.dot(h1.astype(jnp.bfloat16), w2_ref[...],
                 preferred_element_type=jnp.float32)
    h2 = jnp.maximum(h2 + b2_ref[...], 0.0)                          # (bm, 256) f32
    h3 = jnp.dot(h2.astype(jnp.bfloat16), w3_ref[...],
                 preferred_element_type=jnp.float32)
    o_ref[...] = jnp.maximum(h3 + b3_ref[...], 0.0).astype(o_ref.dtype)   # (bm, 128)


def prepare_params(params):
    """Pad to lane-dense shapes and cast matmul operands to bf16 (do once, reuse)."""
    w1, b1, w2, b2, w3, b3 = params
    w1p = jnp.pad(w1, ((0, D_IN_PAD - D_IN), (0, 0))).astype(jnp.bfloat16)
    w2p = w2.astype(jnp.bfloat16)
    w3p = jnp.pad(w3, ((0, 0), (0, D_OUT_PAD - D_OUT))).astype(jnp.bfloat16)
    b1p = b1.reshape(1, D_H1).astype(jnp.float32)
    b2p = b2.reshape(1, D_H2).astype(jnp.float32)
    b3p = jnp.pad(b3.reshape(1, D_OUT),
                  ((0, 0), (0, D_OUT_PAD - D_OUT))).astype(jnp.float32)
    return (w1p, b1p, w2p, b2p, w3p, b3p)


def _pallas_mlp(x_pad, prepped, bm, single_buffer_weights):
    b_pad = x_pad.shape[0]
    grid = (b_pad // bm,)

    if single_buffer_weights:
        # Weight/bias block index never changes across the grid -> one resident buffer.
        def full(shape):
            return pl.BlockSpec(shape, lambda i: (0,) * len(shape),
                                pipeline_mode=pl.Buffered(1))
    else:
        def full(shape):
            return pl.BlockSpec(shape, lambda i: (0,) * len(shape))

    w1p, b1p, w2p, b2p, w3p, b3p = prepped
    return pl.pallas_call(
        mlp_kernel,
        out_shape=jax.ShapeDtypeStruct((b_pad, D_OUT_PAD), jnp.float32),
        grid_spec=pltpu.PrefetchScalarGridSpec(
            num_scalar_prefetch=0,
            grid=grid,
            in_specs=[
                pl.BlockSpec((bm, D_IN_PAD), lambda i: (i, 0)),      # x tile
                full((D_IN_PAD, D_H1)), full((1, D_H1)),             # fc1
                full((D_H1, D_H2)),     full((1, D_H2)),             # fc2
                full((D_H2, D_OUT_PAD)), full((1, D_OUT_PAD)),       # fc3 (padded N)
            ],
            out_specs=pl.BlockSpec((bm, D_OUT_PAD), lambda i: (i, 0)),
        ),
        compiler_params=pltpu.CompilerParams(
            dimension_semantics=("parallel",),          # shard batch tiles over TCs
            vmem_limit_bytes=48 * 1024 * 1024,          # safe within v7x's 64 MiB
        ),
    )(x_pad, w1p, b1p, w2p, b2p, w3p, b3p)


def mlp_forward(x, params, *, bm=256):
    """x: anything that flattens to (B, 784). Returns f32 (B, 10)."""
    x2d = x.reshape(-1, D_IN)
    B = x2d.shape[0]

    # Batch tile: large enough to feed full MXU passes, multiple of 128, but capped
    # so tiny batches are not over-padded.
    bm = _round_up(min(max(bm, 128), _round_up(B, 128)), 128)
    b_pad = _round_up(B, bm)

    # Zero-pad batch and feature dims, cast activations to bf16 for the MXU.
    x_pad = jnp.pad(x2d, ((0, b_pad - B), (0, D_IN_PAD - D_IN))).astype(jnp.bfloat16)
    prepped = prepare_params(params)

    try:
        out = _pallas_mlp(x_pad, prepped, bm, single_buffer_weights=True)
    except Exception:
        # pipeline_mode=pl.Buffered(1) unsupported on this jax/backend -> default buffering.
        out = _pallas_mlp(x_pad, prepped, bm, single_buffer_weights=False)

    return out[:B, :D_OUT]


def init_params(key):
    """Deterministic synthetic params; stored (in, out) == torch Linear weight.T."""
    ks = jax.random.split(key, 6)
    w1 = jax.random.normal(ks[0], (D_IN, D_H1), jnp.float32) * 0.02
    b1 = jax.random.normal(ks[1], (1, D_H1), jnp.float32) * 0.01
    w2 = jax.random.normal(ks[2], (D_H1, D_H2), jnp.float32) * 0.02
    b2 = jax.random.normal(ks[3], (1, D_H2), jnp.float32) * 0.01
    w3 = jax.random.normal(ks[4], (D_H2, D_OUT), jnp.float32) * 0.02
    b3 = jax.random.normal(ks[5], (1, D_OUT), jnp.float32) * 0.01
    return (w1, b1, w2, b2, w3, b3)


def mlp_reference(x, params, *, bf16_operands=False):
    """Pure-JAX reference. With bf16_operands=True it mimics the kernel's numerics."""
    w1, b1, w2, b2, w3, b3 = params
    x = x.reshape(-1, D_IN)

    def mm(a, w):
        if bf16_operands:
            a = a.astype(jnp.bfloat16)
            w = w.astype(jnp.bfloat16)
        return jnp.dot(a, w, preferred_element_type=jnp.float32)

    h = jnp.maximum(mm(x, w1) + b1, 0.0)
    h = jnp.maximum(mm(h, w2) + b2, 0.0)
    return jnp.maximum(mm(h, w3) + b3, 0.0)


if __name__ == "__main__":
    key = jax.random.PRNGKey(0)
    pkey, xkey = jax.random.split(key)
    params = init_params(pkey)

    # MNIST-shaped inputs (NCHW). B=384 with bm=256 exercises both the batch-padding
    # path and a 2-step "parallel" grid (both TensorCores on v7x).
    B = 384
    x = jax.random.normal(xkey, (B, 1, 28, 28), jnp.float32)

    out = jax.block_until_ready(mlp_forward(x, params, bm=256))
    assert out.shape == (B, D_OUT)

    ref_bf16 = mlp_reference(x, params, bf16_operands=True)   # same numerics as kernel
    ref_f32 = mlp_reference(x, params)                        # full-precision sanity check
    assert jnp.allclose(out, ref_bf16, atol=1e-3, rtol=1e-3), "mismatch vs bf16 reference"
    assert jnp.allclose(out, ref_f32, atol=3e-2, rtol=3e-2), "mismatch vs f32 reference"

    print("KERNEL_OK")
</pallas_src>

<mosaic_0001>
module attributes {stable_mosaic.version = 11 : i64} {
  func.func @mlp_kernel(%arg0: i32, %arg1: memref<256x896xbf16, #tpu.memory_space<vmem>>, %arg2: memref<896x512xbf16, #tpu.memory_space<vmem>>, %arg3: memref<1x512xf32, #tpu.memory_space<vmem>>, %arg4: memref<512x256xbf16, #tpu.memory_space<vmem>>, %arg5: memref<1x256xf32, #tpu.memory_space<vmem>>, %arg6: memref<256x128xbf16, #tpu.memory_space<vmem>>, %arg7: memref<1x128xf32, #tpu.memory_space<vmem>>, %arg8: memref<256x128xf32, #tpu.memory_space<vmem>>) attributes {dimension_semantics = [#tpu.dimension_semantics<parallel>], iteration_bounds = array<i64: 2>, scalar_prefetch = 0 : i64, scratch_operands = 0 : i64, tpu.core_type = #tpu.core_type<tc>, window_params = [{transform_indices = @transform_0, window_bounds = array<i64: 256, 896>}, {pipeline_mode = #tpu.pipeline_mode<synchronous>, transform_indices = @transform_1, window_bounds = array<i64: 896, 512>}, {pipeline_mode = #tpu.pipeline_mode<synchronous>, transform_indices = @transform_2, window_bounds = array<i64: 1, 512>}, {pipeline_mode = #tpu.pipeline_mode<synchronous>, transform_indices = @transform_3, window_bounds = array<i64: 512, 256>}, {pipeline_mode = #tpu.pipeline_mode<synchronous>, transform_indices = @transform_4, window_bounds = array<i64: 1, 256>}, {pipeline_mode = #tpu.pipeline_mode<synchronous>, transform_indices = @transform_5, window_bounds = array<i64: 256, 128>}, {pipeline_mode = #tpu.pipeline_mode<synchronous>, transform_indices = @transform_6, window_bounds = array<i64: 1, 128>}, {transform_indices = @transform_7, window_bounds = array<i64: 256, 128>}]} {
    %c0 = arith.constant 0 : index
    %c0_0 = arith.constant 0 : index
    %0 = vector.load %arg1[%c0, %c0_0] : memref<256x896xbf16, #tpu.memory_space<vmem>>, vector<256x896xbf16>
    %c0_1 = arith.constant 0 : index
    %c0_2 = arith.constant 0 : index
    %1 = vector.load %arg2[%c0_1, %c0_2] : memref<896x512xbf16, #tpu.memory_space<vmem>>, vector<896x512xbf16>
    %cst = arith.constant dense<0.000000e+00> : vector<256x512xf32>
    %2 = tpu.matmul %0, %1, %cst {dimension_numbers = #tpu.dot_dimension_numbers<[1], [0], [0], [1], [0, 0, 1, 1], [], []>} : vector<256x896xbf16>, vector<896x512xbf16>, vector<256x512xf32> -> vector<256x512xf32>
    %c0_3 = arith.constant 0 : index
    %c0_4 = arith.constant 0 : index
    %3 = vector.load %arg3[%c0_3, %c0_4] : memref<1x512xf32, #tpu.memory_space<vmem>>, vector<1x512xf32>
    %4 = vector.broadcast %3 : vector<1x512xf32> to vector<256x512xf32>
    %5 = arith.addf %2, %4 : vector<256x512xf32>
    %cst_5 = arith.constant 0.000000e+00 : f32
    %6 = vector.broadcast %cst_5 : f32 to vector<256x512xf32>
    %7 = arith.maximumf %5, %6 : vector<256x512xf32>
    %8 = arith.truncf %7 : vector<256x512xf32> to vector<256x512xbf16>
    %c0_6 = arith.constant 0 : index
    %c0_7 = arith.constant 0 : index
    %9 = vector.load %arg4[%c0_6, %c0_7] : memref<512x256xbf16, #tpu.memory_space<vmem>>, vector<512x256xbf16>
    %cst_8 = arith.constant dense<0.000000e+00> : vector<256x256xf32>
    %10 = tpu.matmul %8, %9, %cst_8 {dimension_numbers = #tpu.dot_dimension_numbers<[1], [0], [0], [1], [0, 0, 1, 1], [], []>} : vector<256x512xbf16>, vector<512x256xbf16>, vector<256x256xf32> -> vector<256x256xf32>
    %c0_9 = arith.constant 0 : index
    %c0_10 = arith.constant 0 : index
    %11 = vector.load %arg5[%c0_9, %c0_10] : memref<1x256xf32, #tpu.memory_space<vmem>>, vector<1x256xf32>
    %12 = vector.broadcast %11 : vector<1x256xf32> to vector<256x256xf32>
    %13 = arith.addf %10, %12 : vector<256x256xf32>
    %cst_11 = arith.constant 0.000000e+00 : f32
    %14 = vector.broadcast %cst_11 : f32 to vector<256x256xf32>
    %15 = arith.maximumf %13, %14 : vector<256x256xf32>
    %16 = arith.truncf %15 : vector<256x256xf32> to vector<256x256xbf16>
    %c0_12 = arith.constant 0 : index
    %c0_13 = arith.constant 0 : index
    %17 = vector.load %arg6[%c0_12, %c0_13] : memref<256x128xbf16, #tpu.memory_space<vmem>>, vector<256x128xbf16>
    %cst_14 = arith.constant dense<0.000000e+00> : vector<256x128xf32>
    %18 = tpu.matmul %16, %17, %cst_14 {dimension_numbers = #tpu.dot_dimension_numbers<[1], [0], [0], [1], [0, 0, 1, 1], [], []>} : vector<256x256xbf16>, vector<256x128xbf16>, vector<256x128xf32> -> vector<256x128xf32>
    %c0_15 = arith.constant 0 : index
    %c0_16 = arith.constant 0 : index
    %19 = vector.load %arg7[%c0_15, %c0_16] : memref<1x128xf32, #tpu.memory_space<vmem>>, vector<1x128xf32>
    %20 = vector.broadcast %19 : vector<1x128xf32> to vector<256x128xf32>
    %21 = arith.addf %18, %20 : vector<256x128xf32>
    %cst_17 = arith.constant 0.000000e+00 : f32
    %22 = vector.broadcast %cst_17 : f32 to vector<256x128xf32>
    %23 = arith.maximumf %21, %22 : vector<256x128xf32>
    %c0_18 = arith.constant 0 : index
    %c0_19 = arith.constant 0 : index
    %24 = vector.load %arg8[%c0_18, %c0_19] : memref<256x128xf32, #tpu.memory_space<vmem>>, vector<256x128xf32>
    tpu.vector_store %arg8[%c0_18, %c0_19], %23 {strides = array<i32>} : memref<256x128xf32, #tpu.memory_space<vmem>>, vector<256x128xf32>,
    return
  }
  func.func @transform_0(%arg0: i32) -> (i32, i32) {
    %c0_i32 = arith.constant 0 : i32
    %c0_i32_0 = arith.constant 0 : i32
    return %arg0, %c0_i32 : i32, i32
  }
  func.func @transform_1(%arg0: i32) -> (i32, i32) {
    %c0_i32 = arith.constant 0 : i32
    %c0_i32_0 = arith.constant 0 : i32
    %c0_i32_1 = arith.constant 0 : i32
    return %c0_i32, %c0_i32_0 : i32, i32
  }
  func.func @transform_2(%arg0: i32) -> (i32, i32) {
    %c0_i32 = arith.constant 0 : i32
    %c0_i32_0 = arith.constant 0 : i32
    %c0_i32_1 = arith.constant 0 : i32
    return %c0_i32, %c0_i32_0 : i32, i32
  }
  func.func @transform_3(%arg0: i32) -> (i32, i32) {
    %c0_i32 = arith.constant 0 : i32
    %c0_i32_0 = arith.constant 0 : i32
    %c0_i32_1 = arith.constant 0 : i32
    return %c0_i32, %c0_i32_0 : i32, i32
  }
  func.func @transform_4(%arg0: i32) -> (i32, i32) {
    %c0_i32 = arith.constant 0 : i32
    %c0_i32_0 = arith.constant 0 : i32
    %c0_i32_1 = arith.constant 0 : i32
    return %c0_i32, %c0_i32_0 : i32, i32
  }
  func.func @transform_5(%arg0: i32) -> (i32, i32) {
    %c0_i32 = arith.constant 0 : i32
    %c0_i32_0 = arith.constant 0 : i32
    %c0_i32_1 = arith.constant 0 : i32
    return %c0_i32, %c0_i32_0 : i32, i32
  }
  func.func @transform_6(%arg0: i32) -> (i32, i32) {
    %c0_i32 = arith.constant 0 : i32
    %c0_i32_0 = arith.constant 0 : i32
    %c0_i32_1 = arith.constant 0 : i32
    return %c0_i32, %c0_i32_0 : i32, i32
  }
  func.func @transform_7(%arg0: i32) -> (i32, i32) {
    %c0_i32 = arith.constant 0 : i32
    %c0_i32_0 = arith.constant 0 : i32
    return %arg0, %c0_i32 : i32, i32
  }
}

module attributes {stable_mosaic.version = 11 : i64} {
  func.func @mlp_kernel(%arg0: i32, %arg1: memref<256x896xbf16, #tpu.memory_space<vmem>>, %arg2: memref<896x512xbf16, #tpu.memory_space<vmem>>, %arg3: memref<1x512xf32, #tpu.memory_space<vmem>>, %arg4: memref<512x256xbf16, #tpu.memory_space<vmem>>, %arg5: memref<1x256xf32, #tpu.memory_space<vmem>>, %arg6: memref<256x128xbf16, #tpu.memory_space<vmem>>, %arg7: memref<1x128xf32, #tpu.memory_space<vmem>>, %arg8: memref<256x128xf32, #tpu.memory_space<vmem>>) attributes {dimension_semantics = [#tpu.dimension_semantics<parallel>], iteration_bounds = array<i64: 2>, scalar_prefetch = 0 : i64, scratch_operands = 0 : i64, tpu.core_type = #tpu.core_type<tc>, window_params = [{transform_indices = @transform_0, window_bounds = array<i64: 256, 896>}, {pipeline_mode = #tpu.pipeline_mode<synchronous>, transform_indices = @transform_1, window_bounds = array<i64: 896, 512>}, {pipeline_mode = #tpu.pipeline_mode<synchronous>, transform_indices = @transform_2, window_bounds = array<i64: 1, 512>}, {pipeline_mode = #tpu.pipeline_mode<synchronous>, transform_indices = @transform_3, window_bounds = array<i64: 512, 256>}, {pipeline_mode = #tpu.pipeline_mode<synchronous>, transform_indices = @transform_4, window_bounds = array<i64: 1, 256>}, {pipeline_mode = #tpu.pipeline_mode<synchronous>, transform_indices = @transform_5, window_bounds = array<i64: 256, 128>}, {pipeline_mode = #tpu.pipeline_mode<synchronous>, transform_indices = @transform_6, window_bounds = array<i64: 1, 128>}, {transform_indices = @transform_7, window_bounds = array<i64: 256, 128>}]} {
    %c0 = arith.constant 0 : index
    %c0_0 = arith.constant 0 : index
    %0 = vector.load %arg1[%c0, %c0_0] : memref<256x896xbf16, #tpu.memory_space<vmem>>, vector<256x896xbf16>
    %c0_1 = arith.constant 0 : index
    %c0_2 = arith.constant 0 : index
    %1 = vector.load %arg2[%c0_1, %c0_2] : memref<896x512xbf16, #tpu.memory_space<vmem>>, vector<896x512xbf16>
    %cst = arith.constant dense<0.000000e+00> : vector<256x512xf32>
    %2 = tpu.matmul %0, %1, %cst {dimension_numbers = #tpu.dot_dimension_numbers<[1], [0], [0], [1], [0, 0, 1, 1], [], []>} : vector<256x896xbf16>, vector<896x512xbf16>, vector<256x512xf32> -> vector<256x512xf32>
    %c0_3 = arith.constant 0 : index
    %c0_4 = arith.constant 0 : index
    %3 = vector.load %arg3[%c0_3, %c0_4] : memref<1x512xf32, #tpu.memory_space<vmem>>, vector<1x512xf32>
    %4 = vector.broadcast %3 : vector<1x512xf32> to vector<256x512xf32>
    %5 = arith.addf %2, %4 : vector<256x512xf32>
    %cst_5 = arith.constant 0.000000e+00 : f32
    %6 = vector.broadcast %cst_5 : f32 to vector<256x512xf32>
    %7 = arith.maximumf %5, %6 : vector<256x512xf32>
    %8 = arith.truncf %7 : vector<256x512xf32> to vector<256x512xbf16>
    %c0_6 = arith.constant 0 : index
    %c0_7 = arith.constant 0 : index
    %9 = vector.load %arg4[%c0_6, %c0_7] : memref<512x256xbf16, #tpu.memory_space<vmem>>, vector<512x256xbf16>
    %cst_8 = arith.constant dense<0.000000e+00> : vector<256x256xf32>
    %10 = tpu.matmul %8, %9, %cst_8 {dimension_numbers = #tpu.dot_dimension_numbers<[1], [0], [0], [1], [0, 0, 1, 1], [], []>} : vector<256x512xbf16>, vector<512x256xbf16>, vector<256x256xf32> -> vector<256x256xf32>
    %c0_9 = arith.constant 0 : index
    %c0_10 = arith.constant 0 : index
    %11 = vector.load %arg5[%c0_9, %c0_10] : memref<1x256xf32, #tpu.memory_space<vmem>>, vector<1x256xf32>
    %12 = vector.broadcast %11 : vector<1x256xf32> to vector<256x256xf32>
    %13 = arith.addf %10, %12 : vector<256x256xf32>
    %cst_11 = arith.constant 0.000000e+00 : f32
    %14 = vector.broadcast %cst_11 : f32 to vector<256x256xf32>
    %15 = arith.maximumf %13, %14 : vector<256x256xf32>
    %16 = arith.truncf %15 : vector<256x256xf32> to vector<256x256xbf16>
    %c0_12 = arith.constant 0 : index
    %c0_13 = arith.constant 0 : index
    %17 = vector.load %arg6[%c0_12, %c0_13] : memref<256x128xbf16, #tpu.memory_space<vmem>>, vector<256x128xbf16>
    %cst_14 = arith.constant dense<0.000000e+00> : vector<256x128xf32>
    %18 = tpu.matmul %16, %17, %cst_14 {dimension_numbers = #tpu.dot_dimension_numbers<[1], [0], [0], [1], [0, 0, 1, 1], [], []>} : vector<256x256xbf16>, vector<256x128xbf16>, vector<256x128xf32> -> vector<256x128xf32>
    %c0_15 = arith.constant 0 : index
    %c0_16 = arith.constant 0 : index
    %19 = vector.load %arg7[%c0_15, %c0_16] : memref<1x128xf32, #tpu.memory_space<vmem>>, vector<1x128xf32>
    %20 = vector.broadcast %19 : vector<1x128xf32> to vector<256x128xf32>
    %21 = arith.addf %18, %20 : vector<256x128xf32>
    %cst_17 = arith.constant 0.000000e+00 : f32
    %22 = vector.broadcast %cst_17 : f32 to vector<256x128xf32>
    %23 = arith.maximumf %21, %22 : vector<256x128xf32>
    %c0_18 = arith.constant 0 : index
    %c0_19 = arith.constant 0 : index
    %24 = vector.load %arg8[%c0_18, %c0_19] : memref<256x128xf32, #tpu.memory_space<vmem>>, vector<256x128xf32>
    tpu.vector_store %arg8[%c0_18, %c0_19], %23 {strides = array<i32>} : memref<256x128xf32, #tpu.memory_space<vmem>>, vector<256x128xf32>,
    return
  }
  func.func @transform_0(%arg0: i32) -> (i32, i32) {
    %c0_i32 = arith.constant 0 : i32
    %c0_i32_0 = arith.constant 0 : i32
    return %arg0, %c0_i32 : i32, i32
  }
  func.func @transform_1(%arg0: i32) -> (i32, i32) {
    %c0_i32 = arith.constant 0 : i32
    %c0_i32_0 = arith.constant 0 : i32
    %c0_i32_1 = arith.constant 0 : i32
    return %c0_i32, %c0_i32_0 : i32, i32
  }
  func.func @transform_2(%arg0: i32) -> (i32, i32) {
    %c0_i32 = arith.constant 0 : i32
    %c0_i32_0 = arith.constant 0 : i32
    %c0_i32_1 = arith.constant 0 : i32
    return %c0_i32, %c0_i32_0 : i32, i32
  }
  func.func @transform_3(%arg0: i32) -> (i32, i32) {
    %c0_i32 = arith.constant 0 : i32
    %c0_i32_0 = arith.constant 0 : i32
    %c0_i32_1 = arith.constant 0 : i32
    return %c0_i32, %c0_i32_0 : i32, i32
  }
  func.func @transform_4(%arg0: i32) -> (i32, i32) {
    %c0_i32 = arith.constant 0 : i32
    %c0_i32_0 = arith.constant 0 : i32
    %c0_i32_1 = arith.constant 0 : i32
    return %c0_i32, %c0_i32_0 : i32, i32
  }
  func.func @transform_5(%arg0: i32) -> (i32, i32) {
    %c0_i32 = arith.constant 0 : i32
    %c0_i32_0 = arith.constant 0 : i32
    %c0_i32_1 = arith.constant 0 : i32
    return %c0_i32, %c0_i32_0 : i32, i32
  }
  func.func @transform_6(%arg0: i32) -> (i32, i32) {
    %c0_i32 = arith.constant 0 : i32
    %c0_i32_0 = arith.constant 0 : i32
    %c0_i32_1 = arith.constant 0 : i32
    return %c0_i32, %c0_i32_0 : i32, i32
  }
  func.func @transform_7(%arg0: i32) -> (i32, i32) {
    %c0_i32 = arith.constant 0 : i32
    %c0_i32_0 = arith.constant 0 : i32
    return %arg0, %c0_i32 : i32, i32
  }
}

</mosaic_0001>

<bundles_post_ra>
// kernel: tpu_custom_call.1
= control target key start
LH: loop header
LB: loop body
LE: loop exit
PB: predicated region body
PF: predicated region fallthrough
CT: control target
= control target key end

     0   :  { %s8880_s0 = inlined_call_operand.hbm [shape: bf16[512,896], index: 0, kind: input, shape index: {}]   ;;  %s8881_s1 = inlined_call_operand.hbm [shape: bf16[896,512], index: 1, kind: input, shape index: {}]   ;;  %s8882_s2 = inlined_call_operand.vmem [shape: f32[1,512], index: 2, kind: input, shape index: {}]   ;;  %s8883_s3 = inlined_call_operand.hbm [shape: bf16[512,256], index: 3, kind: input, shape index: {}]   ;;  %s8884_s4 = inlined_call_operand.vmem [shape: f32[1,256], index: 4, kind: input, shape index: {}]   ;;  %s8885_s5 = inlined_call_operand.hbm [shape: bf16[256,128], index: 5, kind: input, shape index: {}]   ;;  %s8886_s6 = inlined_call_operand.vmem [shape: f32[1,128], index: 6, kind: input, shape index: {}]   ;;  %s8887_s7 = inlined_call_operand.hbm [shape: f32[512,128], index: 7, kind: output, shape index: {}]  }
   0x1   :  { %8893 = sst [smem:[#allocation26_spill]] %s8881_s1 }
   0x2   :  { %12 = vsyncpa [#allocation3], 0 }
   0x3   :  { %14 = vsyncpa [#allocation3 + $0x1], 0 }
   0x4   :  { %15 = vsyncpa [#allocation6], 0 }
   0x5   :  { %16 = vsyncpa [#allocation9], 0 }
   0x6   :  { %17 = vsyncpa [#allocation4], 0 }
   0x7   :  { %19 = vsyncpa [#allocation4 + $0x1], 0  ;;  %s7687_s24 = smov 0   ;;  %s7689_s25 = smov 0  }
   0x8   :  { %s7691_s26 = smov 0   ;;  %s7693_s27 = smov 0  }
   0x9 LB: > { %s7708_s28 = sadd.s32 4294967295, %s7629_s27   ;;  %s5505_s29 = sadd.s32 4294967294, %s7629_s27   ;;  %s7629_s27 = sphi %s7693_s27, %s8937_s27   ;;  %s7625_s26 = sphi %s7691_s26, %s8936_s26   ;;  %s7621_s25 = sphi %s7689_s25, %s8935_s25   ;;  %s7617_s24 = sphi %s7687_s24, %s8934_s24  }
   0xa   : > { %p45_p0 = scmp.ne.s32.totalorder %s7621_s25, %s7617_s24  ;;  %p8888_p1 = scmp.eq.s32.totalorder %s7708_s28, 0 }
   0xb   : > { %p201_p3 = scmp.eq.s32.totalorder %s5505_s29, 1  ;;  %p5506_p5 = scmp.ge.s32.totalorder %s7629_s27, 1 }
   0xc   : > { %p7717_p4 = por %p8888_p1, %p45_p0  ;;  %p208_p7 = scmp.lt.s32.totalorder %s7629_s27, 3 }
   0xd   : > { %p7722_p6 = por %p201_p3, %p45_p0  ;;  %s7631_s10 = smov [#allocation5]  }
   0xe   : > { %s8894_s30 = scalar_select %p7717_p4, 1, 0 }
   0xf   : > { %s8895_s8 = scalar_select %p7722_p6, 1, 0 }
  0x10   : > { %p7727_p8 = pnand %p5506_p5, %p208_p7  ;;  %s220_s11 = sshll.u32 %s7631_s10, 4  ;;  %s7731_s11 = int_to_ptr.vmem [resolvable:$true] %s220_s11 }
  0x11   : > { %s7632_s13 = smov [#allocation7]   ;;  %s8898_s1 = sld [smem:[#allocation26_spill]] }
  0x12   : > { %s8896_s9 = scalar_select %p7727_p8, 1, 0 }
  0x13   : > { %p6745_p9 = pneg %p7727_p8  ;;  %s236_s14 = sshll.u32 %s7632_s13, 4  ;;  %s7742_s14 = int_to_ptr.vmem [resolvable:$true] %s236_s14 }
  0x15   : > { %p7738_p11 = pnand %p6745_p9, %p8888_p1 }
  0x17   : > { %s7441_s17 = scalar_lea.hbm %s8898_s1, 28672  ;;  %p7752_p13 = pneg %p7738_p11 }
  0x18   : > { %p7442_p12 = scmp.ne.s32.totalorder %s8898_s1, %s7441_s17  ;;  %p7448_p5 = scmp.lt.u32.totalorder %s7441_s17, %s8898_s1 }
  0x1a   : > { %p7444_p0 = pnand %p7752_p13, %p7442_p12 }
  0x1c   : > { %p7445_p3 = pneg %p7444_p0 }
  0x1e   : > { %p7450_p7 = pnand %p7448_p5, %p7445_p3 }
  0x20   : > { %7453 = shalt.err (!%p7450_p7)
}
  0x21   : > { %s7454_s23 = scalar_lea.vmem %s7731_s11, 28672  ;;  %p7462_p2 = scmp.lt.s32.totalorder %s7731_s11, %s7731_s11 }
  0x22   : > { %p7455_p9 = scmp.ne.s32.totalorder %s7731_s11, %s7454_s23  ;;  %p7463_p6 = scmp.lt.s32.totalorder %s7454_s23, %s7454_s23 }
  0x24   : > { %p7457_p10 = pnand %p7455_p9, %p7752_p13  ;;  %p7464_p12 = por %p7463_p6, %p7462_p2 }
  0x26   : > { %p7458_p1 = pneg %p7457_p10 }
  0x28   : > { %p7465_p0 = pnand %p7464_p12, %p7458_p1 }
  0x2a   : > { %7468 = shalt.err (!%p7465_p0)
}
  0x2b   : > { %s7633_s29 = smov 256   ;;  %s7634_s10 = smov 16  }
  0x2c   : > { %6748 = dma.hbm_to_vmem [thread:$0]  (!%p7738_p11), %s8898_s1, 28672, %s7731_s11, [#allocation6], %s7633_s29, %s7633_s29, %s7634_s10  }
  0x2d   : > { %s7469_s18 = scalar_lea.hbm %s8883_s3, 8192 }
  0x2e   : > { %p7470_p2 = scmp.ne.s32.totalorder %s8883_s3, %s7469_s18  ;;  %p7476_p10 = scmp.lt.u32.totalorder %s7469_s18, %s8883_s3 }
  0x30   : > { %p7472_p1 = pnand %p7470_p2, %p7752_p13 }
  0x32   : > { %p7473_p6 = pneg %p7472_p1 }
  0x34   : > { %p7478_p3 = pnand %p7476_p10, %p7473_p6 }
  0x36   : > { %7481 = shalt.err (!%p7478_p3)
}
  0x37   : > { %s7482_s11 = scalar_lea.vmem %s7742_s14, 8192  ;;  %p7490_p12 = scmp.lt.s32.totalorder %s7742_s14, %s7742_s14 }
  0x38   : > { %p7483_p5 = scmp.ne.s32.totalorder %s7742_s14, %s7482_s11  ;;  %p7491_p0 = scmp.lt.s32.totalorder %s7482_s11, %s7482_s11 }
  0x3a   : > { %p7485_p7 = pnand %p7483_p5, %p7752_p13  ;;  %p7492_p2 = por %p7491_p0, %p7490_p12 }
  0x3c   : > { %p7486_p9 = pneg %p7485_p7 }
  0x3e   : > { %p7493_p1 = pnand %p7492_p2, %p7486_p9 }
  0x40   : > { %7496 = shalt.err (!%p7493_p1)
}
  0x41   : > { %s7635_s29 = smov 128   ;;  %s7636_s10 = smov 8  }
  0x42   : > { %6751 = dma.hbm_to_vmem [thread:$0]  (!%p7738_p11), %s8883_s3, 8192, %s7742_s14, [#allocation6], %s7635_s29, %s7635_s29, %s7636_s10  }
  0x43   : > { %s7637_s16 = smov [#allocation8]   ;;  %s7497_s21 = scalar_lea.hbm %s8885_s5, 2048 }
  0x44   : > { %s252_s17 = sshll.u32 %s7637_s16, 4  ;;  %p7498_p6 = scmp.ne.s32.totalorder %s8885_s5, %s7497_s21  ;;  %s253_s17 = int_to_ptr.vmem [resolvable:$true] %s252_s17 }
  0x45   : > { %p7504_p5 = scmp.lt.u32.totalorder %s7497_s21, %s8885_s5 }
  0x46   : > { %p7500_p10 = pnand %p7498_p6, %p7752_p13 }
  0x48   : > { %p7501_p3 = pneg %p7500_p10 }
  0x4a   : > { %p7506_p7 = pnand %p7504_p5, %p7501_p3 }
  0x4c   : > { %7509 = shalt.err (!%p7506_p7)
}
  0x4d   : > { %s7510_s14 = scalar_lea.vmem %s253_s17, 2048  ;;  %p7518_p2 = scmp.lt.s32.totalorder %s253_s17, %s253_s17 }
  0x4e   : > { %p7511_p9 = scmp.ne.s32.totalorder %s253_s17, %s7510_s14  ;;  %p7519_p1 = scmp.lt.s32.totalorder %s7510_s14, %s7510_s14 }
  0x50   : > { %p7513_p12 = pnand %p7511_p9, %p7752_p13  ;;  %p7520_p4 = por %p7519_p1, %p7518_p2 }
  0x52   : > { %p7514_p0 = pneg %p7513_p12 }
  0x54   : > { %p7521_p8 = pnand %p7520_p4, %p7514_p0 }
  0x56   : > { %7524 = shalt.err (!%p7521_p8)
}
  0x57   : > { %s7638_s29 = smov 64   ;;  %s7639_s1 = smov 4  }
  0x58   : > { %6754 = dma.hbm_to_vmem [thread:$0]  (!%p7738_p11), %s8885_s5, 2048, %s253_s17, [#allocation9], %s7638_s29, %s7638_s29, %s7639_s1  }
  0x59   : > { %s7815_s13 = sadd.s32 1, %s7629_s27   ;;  %s32_s16 = sadd.s32 1, %s7625_s26 }
  0x5a   : > { %s29_s15 = ssub.s32 %s7629_s27, %s7815_s13  ;;  %p39_p8 = scmp.ne.s32.totalorder %s7625_s26, %s7621_s25 }
  0x5b   : > { %p30_p4 = scmp.eq.s32.totalorder %s29_s15, 0  ;;  %p40_p13 = scmp.eq.s32.totalorder %s7629_s27, 0 }
  0x5c   : > { %p6766_p6 = scmp.lt.s32.totalorder %s7629_s27, 2  ;;  %p8900_p3 = scmp.eq.s32.totalorder %s7708_s28, 1 }
  0x5d   : > { %s7825_s18 = scalar_select %p30_p4, %s7625_s26, %s32_s16  }
  0x5e   : > { %p41_p10 = por %p40_p13, %p39_p8  ;;  %p7829_p5 = por %p8900_p3, %p39_p8 }
  0x5f   : > { %s269_s12 = sand.u32 1, %s7625_s26   ;;  %s6727_s21 = smul.u32 14336, %s7629_s27 }
  0x60   : > { %s6726_s17 = smul.u32 896, %s269_s12  ;;  %p7840_p11 = pnand %p6766_p6, %p41_p10 }
  0x61   : > { %s7838_s11 = scalar_lea.hbm %s8880_s0, %s6727_s21  ;;  %s7846_s20 = scalar_lea.sflag [#allocation3], %s269_s12 }
  0x62   : > { %s273_s29 = scalar_lea.vmem [#allocation2], %s6726_s17  ;;  %s7525_s10 = scalar_lea.hbm %s7838_s11, 14336 }
  0x63   : > { %s281_s1 = sshll.u32 %s273_s29, 4  ;;  %p7526_p7 = scmp.ne.s32.totalorder %s7838_s11, %s7525_s10  ;;  %s7844_s1 = int_to_ptr.vmem [resolvable:$true] %s281_s1 }
  0x64   : > { %p7527_p9 = pneg %p7840_p11  ;;  %s7530_s21 = scalar_lea.hbm %s8880_s0, 28672 }
  0x65   : > { %p7531_p2 = scmp.lt.u32.totalorder %s7838_s11, %s8880_s0  ;;  %p7532_p1 = scmp.lt.u32.totalorder %s7530_s21, %s7525_s10 }
  0x66   : > { %p7528_p12 = pnand %p7527_p9, %p7526_p7  ;;  %p7534_p8 = scmp.lt.u32.totalorder %s7525_s10, %s7838_s11 }
  0x67   : > { %p7533_p4 = por %p7532_p1, %p7531_p2 }
  0x68   : > { %p7529_p0 = pneg %p7528_p12 }
  0x69   : > { %p7535_p13 = por %p7534_p8, %p7533_p4 }
  0x6b   : > { %p7536_p6 = pnand %p7535_p13, %p7529_p0 }
  0x6d   : > { %7539 = shalt.err (!%p7536_p6)
}
  0x6e   : > { %s7540_s12 = scalar_lea.vmem %s7844_s1, 14336  ;;  %s7640_s17 = smov [#allocation2]  }
  0x6f   : > { %p7541_p10 = scmp.ne.s32.totalorder %s7844_s1, %s7540_s12  ;;  %s7545_s29 = sshll.u32 %s7640_s17, 4  ;;  %s7546_s29 = int_to_ptr.vmem [resolvable:$false] %s7545_s29 }
  0x70   : > { %s7547_s15 = scalar_lea.vmem %s7546_s29, 28672  ;;  %p7548_p12 = scmp.lt.s32.totalorder %s7844_s1, %s7546_s29 }
  0x71   : > { %p7543_p3 = pnand %p7541_p10, %p7527_p9  ;;  %p7549_p2 = scmp.lt.s32.totalorder %s7547_s15, %s7540_s12 }
  0x73   : > { %p7544_p7 = pneg %p7543_p3  ;;  %p7550_p1 = por %p7549_p2, %p7548_p12 }
  0x75   : > { %p7551_p4 = pnand %p7550_p1, %p7544_p7 }
  0x77   : > { %7554 = shalt.err (!%p7551_p4)
}
  0x78   : > { %s7641_s10 = smov 448   ;;  %s7642_s16 = smov 28  }
  0x79   : > { %6758 = dma.hbm_to_vmem [thread:$0]  (!%p7840_p11), %s7838_s11, 14336, %s7844_s1, %s7846_s20, %s7641_s10, %s7641_s10, %s7642_s16  }
  0x7a   : > { %p8903_p9 = scmp.ne.s32.totalorder %s8896_s9, 0 }
  0x7c   : > { %293 = sbr.rel (%p8903_p9) target bundleno = 1456 (0x5b0), region = 48 }
  0x83   : > { %s7877_s21 = sand.u32 1, %s7621_s25   ;;  %p8904_p0 = scmp.ne.s32.totalorder %s8894_s30, 0 }
  0x84   : > { %s6728_s22 = smul.u32 896, %s7877_s21  ;;  %s296_s23 = scalar_lea.sflag [#allocation3], %s7877_s21 }
  0x86   : > { %s7881_s12 = scalar_lea.vmem [#allocation2], %s6728_s22 }
  0x87   : > { %7600 = dma.done.wait (%p8904_p0), %s296_s23, 14336  }
  0x88   : > { %7602 = vsyncadd (%p8904_p0), %s296_s23, 4294952960  ;;  %p8905_p11 = scmp.eq.s32.totalorder %s7708_s28, 0 }
  0x8a   : > { %7604 = dma.done.wait (%p8905_p11), [#allocation6], 36864   ;;  %p8906_p8 = pmov %p8905_p11 }
  0x8c   : > { %7606 = vsyncadd (%p8906_p8), [#allocation6], 4294930432  ;;  %p8907_p13 = pmov %p8906_p8 }
  0x8d   : > { %p8908_p6 = pmov %p8906_p8 }
  0x8e   : > { %7608 = dma.done.wait (%p8907_p13), [#allocation9], 2048  }
  0x8f   : > { %7610 = vsyncadd (%p8908_p6), [#allocation9], 4294965248  ;;  %v6817_v0 = vld [vmem:[#allocation5 + $0x4] ss:$16 sps:$4 sm:$0xff]   ;;  %v6819_v1 = vld [vmem:[#allocation5] ss:$16 sps:$4 sm:$0xff]  }
  0x90   : > { %2415 = vmatprep.subr.bf16.mxu0 %v6817_v0  ;;  %6054 = vmatprep.subr.bf16.mxu1 %v6817_v0  ;;  %v6820_v2 = vld [vmem:[#allocation5 + $0x24] ss:$16 sps:$4 sm:$0xff]   ;;  %v6822_v3 = vld [vmem:[#allocation5 + $0x20] ss:$16 sps:$4 sm:$0xff]   ;;  %v6876_v36 = vld [vmem:[#allocation5 + $0xc] ss:$16 sps:$4 sm:$0xff]  }
  0x91   : > { %2416 = vmatpush1.bf16.msra.mxu0 %v6819_v1  ;;  %6070 = vmatpush1.bf16.msra.mxu1 %v6819_v1  ;;  %v6823_v4 = vld [vmem:[#allocation5 + $0x44] ss:$16 sps:$4 sm:$0xff]   ;;  %v6825_v5 = vld [vmem:[#allocation5 + $0x40] ss:$16 sps:$4 sm:$0xff]   ;;  %v6874_v39 = vld [vmem:[#allocation5 + $0x8] ss:$16 sps:$4 sm:$0xff]  }
  0x92   : > { %2417 = vmatprep.subr.bf16.mxu0 %v6820_v2  ;;  %6055 = vmatprep.subr.bf16.mxu1 %v6820_v2  ;;  %v6826_v6 = vld [vmem:[#allocation5 + $0x64] ss:$16 sps:$4 sm:$0xff]   ;;  %v6828_v7 = vld [vmem:[#allocation5 + $0x60] ss:$16 sps:$4 sm:$0xff]   ;;  %v6882_v41 = vld [vmem:[#allocation5 + $0x2c] ss:$16 sps:$4 sm:$0xff]  }
  0x93   : > { %v6829_v8 = vld [vmem:[#allocation5 + $0x84] ss:$16 sps:$4 sm:$0xff]   ;;  %v6831_v9 = vld [vmem:[#allocation5 + $0x80] ss:$16 sps:$4 sm:$0xff]   ;;  %v7905_v42 = vld [vmem:[%s7881_s12 + $0x3c] ss:$28 sps:$4 sm:$0xff]  }
  0x94   : > { %v6832_v10 = vld [vmem:[#allocation5 + $0xa4] ss:$16 sps:$4 sm:$0xff]   ;;  %v6834_v11 = vld [vmem:[#allocation5 + $0xa0] ss:$16 sps:$4 sm:$0xff]   ;;  %v6885_v43 = vld [vmem:[%s7881_s12 + $0x1fc] ss:$28 sps:$4 sm:$0xff]  }
  0x95   : > { %2418 = vmatpush1.bf16.msra.mxu0 %v6822_v3  ;;  %6071 = vmatpush1.bf16.msra.mxu1 %v6822_v3  ;;  %v6835_v12 = vld [vmem:[#allocation5 + $0xc4] ss:$16 sps:$4 sm:$0xff]   ;;  %v6837_v14 = vld [vmem:[#allocation5 + $0xc0] ss:$16 sps:$4 sm:$0xff]   ;;  %v6880_v45 = vld [vmem:[#allocation5 + $0x28] ss:$16 sps:$4 sm:$0xff]  }
  0x96   : > { %2419 = vmatprep.subr.bf16.mxu0 %v6823_v4  ;;  %6056 = vmatprep.subr.bf16.mxu1 %v6823_v4  ;;  %v7896_v13 = vld [vmem:[%s7881_s12 + $0x4] ss:$28 sps:$4 sm:$0xff]   ;;  %v7910_v47 = vld [vmem:[%s7881_s12 + $0x38] ss:$28 sps:$4 sm:$0xff]   ;;  %v6894_v48 = vld [vmem:[#allocation5 + $0x4c] ss:$16 sps:$4 sm:$0xff]  }
  0x97   : > { %v6870_v15 = vld [vmem:[%s7881_s12 + $0x1c4] ss:$28 sps:$4 sm:$0xff]   ;;  %2447 = vmatprep.mubr.bf16.mxu0 %v7896_v13  ;;  %v6888_v49 = vld [vmem:[%s7881_s12 + $0x1f8] ss:$28 sps:$4 sm:$0xff]   ;;  %v6900_v53 = vld [vmem:[#allocation5 + $0x6c] ss:$16 sps:$4 sm:$0xff]  }
  0x98   : > { %v6838_v16 = vld [vmem:[#allocation5 + $0xe4] ss:$16 sps:$4 sm:$0xff]   ;;  %2527 = vmatprep.mubr.bf16.mxu1 %v6870_v15  ;;  %v6840_v17 = vld [vmem:[#allocation5 + $0xe0] ss:$16 sps:$4 sm:$0xff]   ;;  %v6892_v51 = vld [vmem:[#allocation5 + $0x48] ss:$16 sps:$4 sm:$0xff]  }
  0x99   : > { %2420 = vmatpush1.bf16.msra.mxu0 %v6825_v5  ;;  %6072 = vmatpush1.bf16.msra.mxu1 %v6825_v5  ;;  %v6841_v18 = vld [vmem:[#allocation5 + $0x104] ss:$16 sps:$4 sm:$0xff]   ;;  %v6843_v19 = vld [vmem:[#allocation5 + $0x100] ss:$16 sps:$4 sm:$0xff]   ;;  %v6898_v57 = vld [vmem:[#allocation5 + $0x68] ss:$16 sps:$4 sm:$0xff]  }
  0x9a   : > { %2421 = vmatprep.subr.bf16.mxu0 %v6826_v6  ;;  %6057 = vmatprep.subr.bf16.mxu1 %v6826_v6  ;;  %v6844_v20 = vld [vmem:[#allocation5 + $0x124] ss:$16 sps:$4 sm:$0xff]   ;;  %v6846_v21 = vld [vmem:[#allocation5 + $0x120] ss:$16 sps:$4 sm:$0xff]   ;;  %v6912_v60 = vld [vmem:[#allocation5 + $0x8c] ss:$16 sps:$4 sm:$0xff]  }
  0x9b   : > { %v6847_v22 = vld [vmem:[#allocation5 + $0x144] ss:$16 sps:$4 sm:$0xff]   ;;  %v6849_v23 = vld [vmem:[#allocation5 + $0x140] ss:$16 sps:$4 sm:$0xff]   ;;  %v6910_v63 = vld [vmem:[#allocation5 + $0x88] ss:$16 sps:$4 sm:$0xff]  }
  0x9c   : > { %v6850_v24 = vld [vmem:[#allocation5 + $0x164] ss:$16 sps:$4 sm:$0xff]   ;;  %v6852_v25 = vld [vmem:[#allocation5 + $0x160] ss:$16 sps:$4 sm:$0xff]   ;;  %v6918_v1 = vld [vmem:[#allocation5 + $0xac] ss:$16 sps:$4 sm:$0xff]  }
  0x9d   : > { %2422 = vmatpush1.bf16.msra.mxu0 %v6828_v7  ;;  %6073 = vmatpush1.bf16.msra.mxu1 %v6828_v7  ;;  %v6853_v26 = vld [vmem:[#allocation5 + $0x184] ss:$16 sps:$4 sm:$0xff]   ;;  %v6855_v27 = vld [vmem:[#allocation5 + $0x180] ss:$16 sps:$4 sm:$0xff]   ;;  %v7925_v2 = vld [vmem:[%s7881_s12 + $0xac] ss:$28 sps:$4 sm:$0xff]  }
  0x9e   : > { %2423 = vmatprep.subr.bf16.mxu0 %v6829_v8  ;;  %6058 = vmatprep.subr.bf16.mxu1 %v6829_v8  ;;  %v6856_v28 = vld [vmem:[#allocation5 + $0x1a4] ss:$16 sps:$4 sm:$0xff]   ;;  %v6858_v29 = vld [vmem:[#allocation5 + $0x1a0] ss:$16 sps:$4 sm:$0xff]   ;;  %v6921_v3 = vld [vmem:[%s7881_s12 + $0x26c] ss:$28 sps:$4 sm:$0xff]  }
  0x9f   : > { %v6859_v30 = vld [vmem:[#allocation5 + $0x1c4] ss:$16 sps:$4 sm:$0xff]   ;;  %v6861_v31 = vld [vmem:[#allocation5 + $0x1c0] ss:$16 sps:$4 sm:$0xff]   ;;  %v6916_v5 = vld [vmem:[#allocation5 + $0xa8] ss:$16 sps:$4 sm:$0xff]  }
  0xa0   : > { %v6862_v32 = vld [vmem:[#allocation5 + $0x1e4] ss:$16 sps:$4 sm:$0xff]   ;;  %v6864_v33 = vld [vmem:[#allocation5 + $0x1e0] ss:$16 sps:$4 sm:$0xff]   ;;  %v6930_v8 = vld [vmem:[#allocation5 + $0xcc] ss:$16 sps:$4 sm:$0xff]  }
  0xa1   : > { %2424 = vmatpush1.bf16.msra.mxu0 %v6831_v9  ;;  %6074 = vmatpush1.bf16.msra.mxu1 %v6831_v9  ;;  %v6873_v34 = vld [vmem:[#allocation5 + $0x204] ss:$16 sps:$4 sm:$0xff]   ;;  %v7901_v35 = vld [vmem:[%s7881_s12] ss:$28 sps:$4 sm:$0xff]   ;;  %v7920_v59 = vld [vmem:[%s7881_s12 + $0x70] ss:$28 sps:$4 sm:$0xff]  }
  0xa2   : > { %2425 = vmatprep.subr.bf16.mxu0 %v6832_v10  ;;  %6059 = vmatprep.subr.bf16.mxu1 %v6832_v10  ;;  %v6868_v37 = vld [vmem:[%s7881_s12 + $0x1c0] ss:$28 sps:$4 sm:$0xff]   ;;  %v6879_v40 = vld [vmem:[#allocation5 + $0x224] ss:$16 sps:$4 sm:$0xff]   ;;  %v6906_v61 = vld [vmem:[%s7881_s12 + $0x230] ss:$28 sps:$4 sm:$0xff]  }
  0xa3   : > { %v6871_v38 = vld [vmem:[#allocation5 + $0x200] ss:$16 sps:$4 sm:$0xff]   ;;  %v6891_v46 = vld [vmem:[#allocation5 + $0x244] ss:$16 sps:$4 sm:$0xff]   ;;  %s5518_s17 = sshll.u32 %s7877_s21, 8  ;;  %s5941_s15 = sshll.u32 %s7708_s28, 12 }
  0xa4   : > { %v6877_v44 = vld [vmem:[#allocation5 + $0x220] ss:$16 sps:$4 sm:$0xff]   ;;  %v6897_v52 = vld [vmem:[#allocation5 + $0x264] ss:$16 sps:$4 sm:$0xff]   ;;  %s8765_s29 = scalar_lea.vmem [#allocation10], %s5518_s17  ;;  %s8832_s23 = scalar_lea.hbm %s8887_s7, %s5941_s15 }
  0xa5   : > { %2426 = vmatpush1.bf16.msra.mxu0 %v6834_v11  ;;  %6075 = vmatpush1.bf16.msra.mxu1 %v6834_v11  ;;  %v6889_v50 = vld [vmem:[#allocation5 + $0x240] ss:$16 sps:$4 sm:$0xff]   ;;  %v6909_v58 = vld [vmem:[#allocation5 + $0x284] ss:$16 sps:$4 sm:$0xff]   ;;  %v6928_v11 = vld [vmem:[#allocation5 + $0xc8] ss:$16 sps:$4 sm:$0xff]  }
  0xa6   : > { %2427 = vmatprep.subr.bf16.mxu0 %v6835_v12  ;;  %6060 = vmatprep.subr.bf16.mxu1 %v6835_v12  ;;  %v7915_v54 = vld [vmem:[%s7881_s12 + $0x74] ss:$28 sps:$4 sm:$0xff]   ;;  %v7930_v7 = vld [vmem:[%s7881_s12 + $0xa8] ss:$28 sps:$4 sm:$0xff]   ;;  %s5403_s10 = sshll.u32 %s8765_s29, 4  ;;  %s7644_s28 = smov [#allocation10]   ;;  %s8834_s10 = int_to_ptr.vmem [resolvable:$true] %s5403_s10 }
  0xa7   : > { %v6903_v55 = vld [vmem:[%s7881_s12 + $0x234] ss:$28 sps:$4 sm:$0xff]   ;;  %v6924_v9 = vld [vmem:[%s7881_s12 + $0x268] ss:$28 sps:$4 sm:$0xff]   ;;  %s7555_s30 = scalar_lea.vmem %s8834_s10, 4096  ;;  %s7559_s9 = sshll.u32 %s7644_s28, 4  ;;  %s7560_s9 = int_to_ptr.vmem [resolvable:$false] %s7559_s9 }
  0xa8   : > { %v6895_v56 = vld [vmem:[#allocation5 + $0x260] ss:$16 sps:$4 sm:$0xff]   ;;  %v6915_v0 = vld [vmem:[#allocation5 + $0x2a4] ss:$16 sps:$4 sm:$0xff]   ;;  %p7556_p10 = scmp.ne.s32.totalorder %s8834_s10, %s7555_s30  ;;  %s7561_s11 = scalar_lea.vmem %s7560_s9, 8192 }
  0xa9   : > { %2428 = vmatpush1.bf16.msra.mxu0 %v6837_v14  ;;  %6076 = vmatpush1.bf16.msra.mxu1 %v6837_v14  ;;  %v6907_v62 = vld [vmem:[#allocation5 + $0x280] ss:$16 sps:$4 sm:$0xff]   ;;  %v6927_v6 = vld [vmem:[#allocation5 + $0x2c4] ss:$16 sps:$4 sm:$0xff]   ;;  %v6936_v14 = vld [vmem:[#allocation5 + $0xec] ss:$16 sps:$4 sm:$0xff]   ;;  %p7562_p12 = scmp.lt.s32.totalorder %s8834_s10, %s7560_s9  ;;  %p7563_p2 = scmp.lt.s32.totalorder %s7561_s11, %s7555_s30 }
  0xaa   : > { %2429 = vmatprep.subr.bf16.mxu0 %v6838_v16  ;;  %6061 = vmatprep.subr.bf16.mxu1 %v6838_v16  ;;  %v6913_v4 = vld [vmem:[#allocation5 + $0x2a0] ss:$16 sps:$4 sm:$0xff]   ;;  %v6933_v12 = vld [vmem:[#allocation5 + $0x2e4] ss:$16 sps:$4 sm:$0xff]   ;;  %p7557_p3 = pnand %p7556_p10, %p7829_p5 }
  0xab   : > { %v6925_v10 = vld [vmem:[#allocation5 + $0x2c0] ss:$16 sps:$4 sm:$0xff]   ;;  %p7564_p1 = por %p7563_p2, %p7562_p12 }
  0xac   : > { %v7935_v15 = vld [vmem:[%s7881_s12 + $0xe4] ss:$28 sps:$4 sm:$0xff]   ;;  %p7558_p7 = pneg %p7557_p3 }
  0xad   : > { %2430 = vmatpush1.bf16.msra.mxu0 %v6840_v17  ;;  %6077 = vmatpush1.bf16.msra.mxu1 %v6840_v17  ;;  %v6939_v16 = vld [vmem:[%s7881_s12 + $0x2a4] ss:$28 sps:$4 sm:$0xff]  }
  0xae   : > { %2431 = vmatprep.subr.bf16.mxu0 %v6841_v18  ;;  %6062 = vmatprep.subr.bf16.mxu1 %v6841_v18  ;;  %v6931_v17 = vld [vmem:[#allocation5 + $0x2e0] ss:$16 sps:$4 sm:$0xff]   ;;  %v6934_v18 = vld [vmem:[#allocation5 + $0xe8] ss:$16 sps:$4 sm:$0xff]   ;;  %p7565_p4 = pnand %p7564_p1, %p7558_p7 }
  0xb1   : > { %2432 = vmatpush1.bf16.msra.mxu0 %v6843_v19  ;;  %6078 = vmatpush1.bf16.msra.mxu1 %v6843_v19  ;;  %v6945_v19 = vld [vmem:[#allocation5 + $0x304] ss:$16 sps:$4 sm:$0xff]  }
  0xb2   : > { %2433 = vmatprep.subr.bf16.mxu0 %v6844_v20  ;;  %6063 = vmatprep.subr.bf16.mxu1 %v6844_v20  ;;  %v7940_v20 = vld [vmem:[%s7881_s12 + $0xe0] ss:$28 sps:$4 sm:$0xff]  }
  0xb5   : > { %2434 = vmatpush1.bf16.msra.mxu0 %v6846_v21  ;;  %6079 = vmatpush1.bf16.msra.mxu1 %v6846_v21  ;;  %v6948_v21 = vld [vmem:[#allocation5 + $0x10c] ss:$16 sps:$4 sm:$0xff]  }
  0xb6   : > { %2435 = vmatprep.subr.bf16.mxu0 %v6847_v22  ;;  %6064 = vmatprep.subr.bf16.mxu1 %v6847_v22  ;;  %v6942_v22 = vld [vmem:[%s7881_s12 + $0x2a0] ss:$28 sps:$4 sm:$0xff]  }
  0xb9   : > { %2436 = vmatpush1.bf16.msra.mxu0 %v6849_v23  ;;  %6080 = vmatpush1.bf16.msra.mxu1 %v6849_v23  ;;  %v6943_v23 = vld [vmem:[#allocation5 + $0x300] ss:$16 sps:$4 sm:$0xff]  }
  0xba   : > { %2437 = vmatprep.subr.bf16.mxu0 %v6850_v24  ;;  %6065 = vmatprep.subr.bf16.mxu1 %v6850_v24  ;;  %v6946_v24 = vld [vmem:[#allocation5 + $0x108] ss:$16 sps:$4 sm:$0xff]  }
  0xbd   : > { %2438 = vmatpush1.bf16.msra.mxu0 %v6852_v25  ;;  %6081 = vmatpush1.bf16.msra.mxu1 %v6852_v25  ;;  %v6951_v25 = vld [vmem:[#allocation5 + $0x324] ss:$16 sps:$4 sm:$0xff]  }
  0xbe   : > { %2439 = vmatprep.subr.bf16.mxu0 %v6853_v26  ;;  %6066 = vmatprep.subr.bf16.mxu1 %v6853_v26  ;;  %v6954_v26 = vld [vmem:[#allocation5 + $0x12c] ss:$16 sps:$4 sm:$0xff]  }
  0xc1   : > { %2440 = vmatpush1.bf16.msra.mxu0 %v6855_v27  ;;  %6082 = vmatpush1.bf16.msra.mxu1 %v6855_v27  ;;  %v7945_v27 = vld [vmem:[%s7881_s12 + $0x11c] ss:$28 sps:$4 sm:$0xff]  }
  0xc2   : > { %2441 = vmatprep.subr.bf16.mxu0 %v6856_v28  ;;  %6067 = vmatprep.subr.bf16.mxu1 %v6856_v28  ;;  %v6957_v28 = vld [vmem:[%s7881_s12 + $0x2dc] ss:$28 sps:$4 sm:$0xff]  }
  0xc5   : > { %2442 = vmatpush1.bf16.msra.mxu0 %v6858_v29  ;;  %6083 = vmatpush1.bf16.msra.mxu1 %v6858_v29  ;;  %v6949_v29 = vld [vmem:[#allocation5 + $0x320] ss:$16 sps:$4 sm:$0xff]  }
  0xc6   : > { %2443 = vmatprep.subr.bf16.mxu0 %v6859_v30  ;;  %6068 = vmatprep.subr.bf16.mxu1 %v6859_v30  ;;  %v6952_v30 = vld [vmem:[#allocation5 + $0x128] ss:$16 sps:$4 sm:$0xff]  }
  0xc9   : > { %2444 = vmatpush1.bf16.msra.mxu0 %v6861_v31  ;;  %6084 = vmatpush1.bf16.msra.mxu1 %v6861_v31  ;;  %v6963_v31 = vld [vmem:[#allocation5 + $0x344] ss:$16 sps:$4 sm:$0xff]  }
  0xca   : > { %2445 = vmatprep.subr.bf16.mxu0 %v6862_v32  ;;  %6069 = vmatprep.subr.bf16.mxu1 %v6862_v32  ;;  %v7950_v32 = vld [vmem:[%s7881_s12 + $0x118] ss:$28 sps:$4 sm:$0xff]  }
  0xcd   : > { %2446 = vmatpush1.bf16.msra.mxu0 %v6864_v33  ;;  %6085 = vmatpush1.bf16.msra.mxu1 %v6864_v33  ;;  %v6966_v33 = vld [vmem:[#allocation5 + $0x14c] ss:$16 sps:$4 sm:$0xff]  }
  0xce   : > { %2608 = vmatprep.subr.bf16.mxu0 %v6873_v34  ;;  %3187 = vmatprep.subr.bf16.mxu1 %v6876_v36  ;;  %v6960_v34 = vld [vmem:[%s7881_s12 + $0x2d8] ss:$28 sps:$4 sm:$0xff]   ;;  %v6961_v36 = vld [vmem:[#allocation5 + $0x340] ss:$16 sps:$4 sm:$0xff]  }
  0xd0   : > { %2448 = vmatmul.mubr.bf16.vlgmr.msra.gmra.mrb[0].mxu0 %v7901_v35  ;;  %2528 = vmatmul.mubr.bf16.vlgmr.msra.gmra.mrb[0].mxu1 %v6868_v37  ;;  %v6964_v37 = vld [vmem:[#allocation5 + $0x148] ss:$16 sps:$4 sm:$0xff]  }
  0xd1   : > { %2609 = vmatpush1.bf16.msra.mxu0 %v6871_v38  ;;  %3188 = vmatpush1.bf16.msra.mxu1 %v6874_v39  ;;  %v6969_v38 = vld [vmem:[#allocation5 + $0x364] ss:$16 sps:$4 sm:$0xff]   ;;  %v6972_v39 = vld [vmem:[#allocation5 + $0x16c] ss:$16 sps:$4 sm:$0xff]  }
  0xd2   : > { %2610 = vmatprep.subr.bf16.mxu0 %v6879_v40  ;;  %3189 = vmatprep.subr.bf16.mxu1 %v6882_v41  ;;  %v7955_v40 = vld [vmem:[%s7881_s12 + $0x154] ss:$28 sps:$4 sm:$0xff]  }
  0xd3   : > { %2457 = vmatprep.mubr.bf16.mxu0 %v7905_v42  ;;  %2537 = vmatprep.mubr.bf16.mxu1 %v6885_v43  ;;  %v6975_v41 = vld [vmem:[%s7881_s12 + $0x314] ss:$28 sps:$4 sm:$0xff]  }
  0xd4   : > { %v6967_v43 = vld [vmem:[#allocation5 + $0x360] ss:$16 sps:$4 sm:$0xff]  }
  0xd5   : > { %2611 = vmatpush1.bf16.msra.mxu0 %v6877_v44  ;;  %3190 = vmatpush1.bf16.msra.mxu1 %v6880_v45  ;;  %v6970_v44 = vld [vmem:[#allocation5 + $0x168] ss:$16 sps:$4 sm:$0xff]   ;;  %v6981_v45 = vld [vmem:[#allocation5 + $0x384] ss:$16 sps:$4 sm:$0xff]  }
  0xd6   : > { %2612 = vmatprep.subr.bf16.mxu0 %v6891_v46  ;;  %3191 = vmatprep.subr.bf16.mxu1 %v6894_v48  ;;  %v7960_v46 = vld [vmem:[%s7881_s12 + $0x150] ss:$28 sps:$4 sm:$0xff]  }
  0xd7   : > { %v6984_v48 = vld [vmem:[#allocation5 + $0x18c] ss:$16 sps:$4 sm:$0xff]  }
  0xd8   : > { %2458 = vmatmul.mubr.bf16.gmra.mrb[4].mxu0 %v7910_v47  ;;  %2538 = vmatmul.mubr.bf16.gmra.mrb[4].mxu1 %v6888_v49  ;;  %v6978_v49 = vld [vmem:[%s7881_s12 + $0x310] ss:$28 sps:$4 sm:$0xff]  }
  0xd9   : > { %2613 = vmatpush1.bf16.msra.mxu0 %v6889_v50  ;;  %3192 = vmatpush1.bf16.msra.mxu1 %v6892_v51  ;;  %v6979_v50 = vld [vmem:[#allocation5 + $0x380] ss:$16 sps:$4 sm:$0xff]   ;;  %v6982_v51 = vld [vmem:[#allocation5 + $0x188] ss:$16 sps:$4 sm:$0xff]  }
  0xda   : > { %2614 = vmatprep.subr.bf16.mxu0 %v6897_v52  ;;  %3193 = vmatprep.subr.bf16.mxu1 %v6900_v53  ;;  %v6987_v52 = vld [vmem:[#allocation5 + $0x3a4] ss:$16 sps:$4 sm:$0xff]   ;;  %v6990_v53 = vld [vmem:[#allocation5 + $0x1ac] ss:$16 sps:$4 sm:$0xff]  }
  0xdb   : > { %2467 = vmatprep.mubr.bf16.mxu0 %v7915_v54  ;;  %2547 = vmatprep.mubr.bf16.mxu1 %v6903_v55  ;;  %v7965_v55 = vld [vmem:[%s7881_s12 + $0x18c] ss:$28 sps:$4 sm:$0xff]  }
  0xdd   : > { %2615 = vmatpush1.bf16.msra.mxu0 %v6895_v56  ;;  %3194 = vmatpush1.bf16.msra.mxu1 %v6898_v57  ;;  %v6993_v56 = vld [vmem:[%s7881_s12 + $0x34c] ss:$28 sps:$4 sm:$0xff]   ;;  %v6985_v57 = vld [vmem:[#allocation5 + $0x3a0] ss:$16 sps:$4 sm:$0xff]  }
  0xde   : > { %2616 = vmatprep.subr.bf16.mxu0 %v6909_v58  ;;  %3195 = vmatprep.subr.bf16.mxu1 %v6912_v60  ;;  %v6988_v58 = vld [vmem:[#allocation5 + $0x1a8] ss:$16 sps:$4 sm:$0xff]   ;;  %v6999_v60 = vld [vmem:[#allocation5 + $0x3c4] ss:$16 sps:$4 sm:$0xff]  }
  0xe0   : > { %2468 = vmatmul.mubr.bf16.gmra.mrb[8].mxu0 %v7920_v59  ;;  %2548 = vmatmul.mubr.bf16.gmra.mrb[8].mxu1 %v6906_v61  ;;  %v7002_v61 = vld [vmem:[#allocation5 + $0x1cc] ss:$16 sps:$4 sm:$0xff]  }
  0xe1   : > { %2617 = vmatpush1.bf16.msra.mxu0 %v6907_v62  ;;  %3196 = vmatpush1.bf16.msra.mxu1 %v6910_v63  ;;  %v7971_v62 = vld [vmem:[%s7881_s12 + $0x188] ss:$28 sps:$4 sm:$0xff]  }
  0xe2   : > { %2618 = vmatprep.subr.bf16.mxu0 %v6915_v0  ;;  %3197 = vmatprep.subr.bf16.mxu1 %v6918_v1  ;;  %v6996_v63 = vld [vmem:[%s7881_s12 + $0x348] ss:$28 sps:$4 sm:$0xff]   ;;  %v6997_v0 = vld [vmem:[#allocation5 + $0x3c0] ss:$16 sps:$4 sm:$0xff]  }
  0xe3   : > { %2477 = vmatprep.mubr.bf16.mxu0 %v7925_v2  ;;  %2557 = vmatprep.mubr.bf16.mxu1 %v6921_v3  ;;  %v7000_v1 = vld [vmem:[#allocation5 + $0x1c8] ss:$16 sps:$4 sm:$0xff]   ;;  %v7005_v3 = vld [vmem:[#allocation5 + $0x3e4] ss:$16 sps:$4 sm:$0xff]  }
  0xe5   : > { %2619 = vmatpush1.bf16.msra.mxu0 %v6913_v4  ;;  %3198 = vmatpush1.bf16.msra.mxu1 %v6916_v5  ;;  %v7008_v4 = vld [vmem:[#allocation5 + $0x1ec] ss:$16 sps:$4 sm:$0xff]  }
  0xe6   : > { %2620 = vmatprep.subr.bf16.mxu0 %v6927_v6  ;;  %3199 = vmatprep.subr.bf16.mxu1 %v6930_v8  ;;  %v7975_v5 = vld [vmem:[%s7881_s12 + $0xc] ss:$28 sps:$4 sm:$0xff]   ;;  %v7003_v6 = vld [vmem:[#allocation5 + $0x3e0] ss:$16 sps:$4 sm:$0xff]  }
  0xe7   : > { %v7006_v8 = vld [vmem:[#allocation5 + $0x1e8] ss:$16 sps:$4 sm:$0xff]  }
  0xe8   : > { %2478 = vmatmul.mubr.bf16.gmra.mrb[12].mxu0 %v7930_v7  ;;  %2558 = vmatmul.mubr.bf16.gmra.mrb[12].mxu1 %v6924_v9  ;;  %v7014_v9 = vld [vmem:[#allocation5 + $0x404] ss:$16 sps:$4 sm:$0xff]  }
  0xe9   : > { %2621 = vmatpush1.bf16.msra.mxu0 %v6925_v10  ;;  %3200 = vmatpush1.bf16.msra.mxu1 %v6928_v11  ;;  %v7017_v10 = vld [vmem:[#allocation5 + $0x20c] ss:$16 sps:$4 sm:$0xff]   ;;  %v7981_v11 = vld [vmem:[%s7881_s12 + $0x8] ss:$28 sps:$4 sm:$0xff]  }
  0xea   : > { %2622 = vmatprep.subr.bf16.mxu0 %v6933_v12  ;;  %3201 = vmatprep.subr.bf16.mxu1 %v6936_v14  ;;  %v7012_v12 = vld [vmem:[#allocation5 + $0x400] ss:$16 sps:$4 sm:$0xff]   ;;  %v7015_v14 = vld [vmem:[#allocation5 + $0x208] ss:$16 sps:$4 sm:$0xff]  }
  0xeb   : > { %2487 = vmatprep.mubr.bf16.mxu0 %v7935_v15  ;;  %2567 = vmatprep.mubr.bf16.mxu1 %v6939_v16  ;;  %v7984_v16 = vld [vmem:[%s7881_s12 + $0x44] ss:$28 sps:$4 sm:$0xff]  }
  0xed   : > { %2623 = vmatpush1.bf16.msra.mxu0 %v6931_v17  ;;  %3202 = vmatpush1.bf16.msra.mxu1 %v6934_v18  ;;  %v7023_v17 = vld [vmem:[#allocation5 + $0x424] ss:$16 sps:$4 sm:$0xff]   ;;  %v7026_v18 = vld [vmem:[#allocation5 + $0x22c] ss:$16 sps:$4 sm:$0xff]  }
  0xee   : > { %2624 = vmatprep.subr.bf16.mxu0 %v6945_v19  ;;  %3203 = vmatprep.subr.bf16.mxu1 %v6948_v21  ;;  %v7021_v19 = vld [vmem:[#allocation5 + $0x420] ss:$16 sps:$4 sm:$0xff]   ;;  %v7032_v21 = vld [vmem:[#allocation5 + $0x444] ss:$16 sps:$4 sm:$0xff]  }
  0xf0   : > { %2488 = vmatmul.mubr.bf16.gmra.mrb[16].mxu0 %v7940_v20  ;;  %2568 = vmatmul.mubr.bf16.gmra.mrb[16].mxu1 %v6942_v22  ;;  %v7035_v22 = vld [vmem:[#allocation5 + $0x24c] ss:$16 sps:$4 sm:$0xff]  }
  0xf1   : > { %2625 = vmatpush1.bf16.msra.mxu0 %v6943_v23  ;;  %3204 = vmatpush1.bf16.msra.mxu1 %v6946_v24  ;;  %v7991_v23 = vld [vmem:[%s7881_s12 + $0x40] ss:$28 sps:$4 sm:$0xff]  }
  0xf2   : > { %2626 = vmatprep.subr.bf16.mxu0 %v6951_v25  ;;  %3205 = vmatprep.subr.bf16.mxu1 %v6954_v26  ;;  %v7994_v24 = vld [vmem:[%s7881_s12 + $0x7c] ss:$28 sps:$4 sm:$0xff]   ;;  %v7030_v25 = vld [vmem:[#allocation5 + $0x440] ss:$16 sps:$4 sm:$0xff]   ;;  %v7041_v26 = vld [vmem:[#allocation5 + $0x464] ss:$16 sps:$4 sm:$0xff]  }
  0xf3   : > { %2497 = vmatprep.mubr.bf16.mxu0 %v7945_v27  ;;  %2577 = vmatprep.mubr.bf16.mxu1 %v6957_v28  ;;  %v7044_v28 = vld [vmem:[#allocation5 + $0x26c] ss:$16 sps:$4 sm:$0xff]  }
  0xf5   : > { %2627 = vmatpush1.bf16.msra.mxu0 %v6949_v29  ;;  %3206 = vmatpush1.bf16.msra.mxu1 %v6952_v30  ;;  %v7042_v29 = vld [vmem:[#allocation5 + $0x268] ss:$16 sps:$4 sm:$0xff]   ;;  %v7050_v30 = vld [vmem:[#allocation5 + $0x484] ss:$16 sps:$4 sm:$0xff]  }
  0xf6   : > { %2628 = vmatprep.subr.bf16.mxu0 %v6963_v31  ;;  %3207 = vmatprep.subr.bf16.mxu1 %v6966_v33  ;;  %v7053_v31 = vld [vmem:[#allocation5 + $0x28c] ss:$16 sps:$4 sm:$0xff]   ;;  %v8001_v33 = vld [vmem:[%s7881_s12 + $0x78] ss:$28 sps:$4 sm:$0xff]  }
  0xf8   : > { %2498 = vmatmul.mubr.bf16.gmra.mrb[20].mxu0 %v7950_v32  ;;  %2578 = vmatmul.mubr.bf16.gmra.mrb[20].mxu1 %v6960_v34  ;;  %v8004_v34 = vld [vmem:[%s7881_s12 + $0xb4] ss:$28 sps:$4 sm:$0xff]  }
  0xf9   : > { %2629 = vmatpush1.bf16.msra.mxu0 %v6961_v36  ;;  %3208 = vmatpush1.bf16.msra.mxu1 %v6964_v37  ;;  %v7048_v36 = vld [vmem:[#allocation5 + $0x480] ss:$16 sps:$4 sm:$0xff]   ;;  %v7051_v37 = vld [vmem:[#allocation5 + $0x288] ss:$16 sps:$4 sm:$0xff]  }
  0xfa   : > { %2630 = vmatprep.subr.bf16.mxu0 %v6969_v38  ;;  %3209 = vmatprep.subr.bf16.mxu1 %v6972_v39  ;;  %v7057_v38 = vld [vmem:[#allocation5 + $0x4a0] ss:$16 sps:$4 sm:$0xff]   ;;  %v7060_v39 = vld [vmem:[#allocation5 + $0x2a8] ss:$16 sps:$4 sm:$0xff]  }
  0xfb   : > { %2507 = vmatprep.mubr.bf16.mxu0 %v7955_v40  ;;  %2587 = vmatprep.mubr.bf16.mxu1 %v6975_v41  ;;  %v7068_v41 = vld [vmem:[#allocation5 + $0x4c4] ss:$16 sps:$4 sm:$0xff]  }
  0xfd   : > { %2631 = vmatpush1.bf16.msra.mxu0 %v6967_v43  ;;  %3210 = vmatpush1.bf16.msra.mxu1 %v6970_v44  ;;  %v7071_v43 = vld [vmem:[#allocation5 + $0x2cc] ss:$16 sps:$4 sm:$0xff]  }
  0xfe   : > { %2632 = vmatprep.subr.bf16.mxu0 %v6981_v45  ;;  %3211 = vmatprep.subr.bf16.mxu1 %v6984_v48  ;;  %v8011_v44 = vld [vmem:[%s7881_s12 + $0xb0] ss:$28 sps:$4 sm:$0xff]  }
  0xff   : > { %v8014_v45 = vld [vmem:[%s7881_s12 + $0xec] ss:$28 sps:$4 sm:$0xff]   ;;  %v7066_v48 = vld [vmem:[#allocation5 + $0x4c0] ss:$16 sps:$4 sm:$0xff]  }
 0x100   : > { %2508 = vmatmul.mubr.bf16.gmra.mrb[24].mxu0 %v7960_v46  ;;  %2588 = vmatmul.mubr.bf16.gmra.mrb[24].mxu1 %v6978_v49  ;;  %v7069_v49 = vld [vmem:[#allocation5 + $0x2c8] ss:$16 sps:$4 sm:$0xff]  }
 0x101   : > { %2633 = vmatpush1.bf16.msra.mxu0 %v6979_v50  ;;  %3212 = vmatpush1.bf16.msra.mxu1 %v6982_v51  ;;  %v7075_v50 = vld [vmem:[#allocation5 + $0x4e0] ss:$16 sps:$4 sm:$0xff]   ;;  %v7078_v51 = vld [vmem:[#allocation5 + $0x2e8] ss:$16 sps:$4 sm:$0xff]  }
 0x102   : > { %2634 = vmatprep.subr.bf16.mxu0 %v6987_v52  ;;  %3213 = vmatprep.subr.bf16.mxu1 %v6990_v53  ;;  %v7086_v52 = vld [vmem:[#allocation5 + $0x504] ss:$16 sps:$4 sm:$0xff]   ;;  %v7089_v53 = vld [vmem:[#allocation5 + $0x30c] ss:$16 sps:$4 sm:$0xff]  }
 0x103   : > { %2517 = vmatprep.mubr.bf16.mxu0 %v7965_v55  ;;  %2597 = vmatprep.mubr.bf16.mxu1 %v6993_v56  ;;  %v8021_v56 = vld [vmem:[%s7881_s12 + $0xe8] ss:$28 sps:$4 sm:$0xff]  }
 0x105   : > { %2635 = vmatpush1.bf16.msra.mxu0 %v6985_v57  ;;  %3214 = vmatpush1.bf16.msra.mxu1 %v6988_v58  ;;  %v8024_v57 = vld [vmem:[%s7881_s12 + $0x124] ss:$28 sps:$4 sm:$0xff]  }
 0x106   : > { %2636 = vmatprep.subr.bf16.mxu0 %v6999_v60  ;;  %3215 = vmatprep.subr.bf16.mxu1 %v7002_v61  ;;  %v7084_v58 = vld [vmem:[#allocation5 + $0x500] ss:$16 sps:$4 sm:$0xff]   ;;  %v7098_v60 = vld [vmem:[#allocation5 + $0x32c] ss:$16 sps:$4 sm:$0xff]  }
 0x107   : > { %v7093_v61 = vld [vmem:[#allocation5 + $0x520] ss:$16 sps:$4 sm:$0xff]  }
 0x108   : > { %2518 = vmatmul.mubr.bf16.gmra.mrb[28].mxu0 %v7971_v62  ;;  %2598 = vmatmul.mubr.bf16.gmra.mrb[28].mxu1 %v6996_v63  ;;  %v8031_v63 = vld [vmem:[%s7881_s12 + $0x120] ss:$28 sps:$4 sm:$0xff]  }
 0x109   : > { %2637 = vmatpush1.bf16.msra.mxu0 %v6997_v0  ;;  %3216 = vmatpush1.bf16.msra.mxu1 %v7000_v1  ;;  %v7096_v0 = vld [vmem:[#allocation5 + $0x328] ss:$16 sps:$4 sm:$0xff]  }
 0x10a   : > { %2638 = vmatprep.subr.bf16.mxu0 %v7005_v3  ;;  %3217 = vmatprep.subr.bf16.mxu1 %v7008_v4  ;;  %v8034_v1 = vld [vmem:[%s7881_s12 + $0x15c] ss:$28 sps:$4 sm:$0xff]   ;;  %v7104_v3 = vld [vmem:[#allocation5 + $0x544] ss:$16 sps:$4 sm:$0xff]  }
 0x10b   : > { %2640 = vmatprep.mubr.bf16.mxu0 %v7975_v5  ;;  %3219 = vmatprep.mubr.bf16.mxu1 %v7896_v13  ;;  %v7024_v13 = vld [vmem:[#allocation5 + $0x228] ss:$16 sps:$4 sm:$0xff]   ;;  %v7107_v4 = vld [vmem:[#allocation5 + $0x34c] ss:$16 sps:$4 sm:$0xff]  }
 0x10d   : > { %2639 = vmatpush1.bf16.msra.mxu0 %v7003_v6  ;;  %3218 = vmatpush1.bf16.msra.mxu1 %v7006_v8  ;;  %v7102_v6 = vld [vmem:[#allocation5 + $0x540] ss:$16 sps:$4 sm:$0xff]   ;;  %v7105_v8 = vld [vmem:[#allocation5 + $0x348] ss:$16 sps:$4 sm:$0xff]  }
 0x10e   : > { %2801 = vmatprep.subr.bf16.mxu0 %v7014_v9  ;;  %3380 = vmatprep.subr.bf16.mxu1 %v7017_v10  ;;  %v7111_v9 = vld [vmem:[#allocation5 + $0x560] ss:$16 sps:$4 sm:$0xff]   ;;  %v7114_v10 = vld [vmem:[#allocation5 + $0x368] ss:$16 sps:$4 sm:$0xff]  }
 0x110   : > { %2641 = vmatmul.mubr.bf16.vlgmr.msra.gmra.mrb[0].mxu0 %v7981_v11  ;;  %3220 = vmatmul.mubr.bf16.vlgmr.msra.gmra.mrb[32].mxu1 %v7901_v35  ;;  %v7033_v35 = vld [vmem:[#allocation5 + $0x248] ss:$16 sps:$4 sm:$0xff]  }
 0x111   : > { %2802 = vmatpush1.bf16.msra.mxu0 %v7012_v12  ;;  %3381 = vmatpush1.bf16.msra.mxu1 %v7015_v14  ;;  %v7122_v12 = vld [vmem:[#allocation5 + $0x584] ss:$16 sps:$4 sm:$0xff]   ;;  %v7125_v14 = vld [vmem:[#allocation5 + $0x38c] ss:$16 sps:$4 sm:$0xff]  }
 0x112   : > { %2650 = vmatprep.mubr.bf16.mxu0 %v7984_v16  ;;  %3229 = vmatprep.mubr.bf16.mxu1 %v7905_v42  ;;  %v7039_v42 = vld [vmem:[#allocation5 + $0x460] ss:$16 sps:$4 sm:$0xff]  }
 0x113   : > { %2803 = vmatprep.subr.bf16.mxu0 %v7023_v17  ;;  %3382 = vmatprep.subr.bf16.mxu1 %v7026_v18  ;;  %v8041_v17 = vld [vmem:[%s7881_s12 + $0x158] ss:$28 sps:$4 sm:$0xff]  }
 0x114   : > { %v8044_v18 = vld [vmem:[%s7881_s12 + $0x194] ss:$28 sps:$4 sm:$0xff]  }
 0x115   : > { %2804 = vmatpush1.bf16.msra.mxu0 %v7021_v19  ;;  %3383 = vmatpush1.bf16.msra.mxu1 %v7024_v13  ;;  %v7120_v19 = vld [vmem:[#allocation5 + $0x580] ss:$16 sps:$4 sm:$0xff]   ;;  %v7123_v13 = vld [vmem:[#allocation5 + $0x388] ss:$16 sps:$4 sm:$0xff]  }
 0x116   : > { %2805 = vmatprep.subr.bf16.mxu0 %v7032_v21  ;;  %3384 = vmatprep.subr.bf16.mxu1 %v7035_v22  ;;  %v7134_v21 = vld [vmem:[#allocation5 + $0x3ac] ss:$16 sps:$4 sm:$0xff]   ;;  %v7132_v22 = vld [vmem:[#allocation5 + $0x3a8] ss:$16 sps:$4 sm:$0xff]  }
 0x118   : > { %2651 = vmatmul.mubr.bf16.gmra.mrb[4].mxu0 %v7991_v23  ;;  %3230 = vmatmul.mubr.bf16.gmra.mrb[36].mxu1 %v7910_v47  ;;  %v7059_v47 = vld [vmem:[#allocation5 + $0x4a4] ss:$16 sps:$4 sm:$0xff]  }
 0x119   : > { %2660 = vmatprep.mubr.bf16.mxu0 %v7994_v24  ;;  %3239 = vmatprep.mubr.bf16.mxu1 %v7915_v54  ;;  %v7062_v54 = vld [vmem:[#allocation5 + $0x2ac] ss:$16 sps:$4 sm:$0xff]  }
 0x11a   : > { %2806 = vmatpush1.bf16.msra.mxu0 %v7030_v25  ;;  %3385 = vmatpush1.bf16.msra.mxu1 %v7033_v35  ;;  %v7140_v25 = vld [vmem:[#allocation5 + $0x5c4] ss:$16 sps:$4 sm:$0xff]   ;;  %v7143_v35 = vld [vmem:[#allocation5 + $0x3cc] ss:$16 sps:$4 sm:$0xff]  }
 0x11b   : > { %2807 = vmatprep.subr.bf16.mxu0 %v7041_v26  ;;  %3386 = vmatprep.subr.bf16.mxu1 %v7044_v28  ;;  %v8051_v26 = vld [vmem:[%s7881_s12 + $0x190] ss:$28 sps:$4 sm:$0xff]  }
 0x11c   : > { %v8054_v28 = vld [vmem:[%s7881_s12 + $0x1cc] ss:$28 sps:$4 sm:$0xff]  }
 0x11e   : > { %2808 = vmatpush1.bf16.msra.mxu0 %v7039_v42  ;;  %3387 = vmatpush1.bf16.msra.mxu1 %v7042_v29  ;;  %v7138_v42 = vld [vmem:[#allocation5 + $0x5c0] ss:$16 sps:$4 sm:$0xff]   ;;  %v7141_v29 = vld [vmem:[#allocation5 + $0x3c8] ss:$16 sps:$4 sm:$0xff]  }
 0x11f   : > { %2809 = vmatprep.subr.bf16.mxu0 %v7050_v30  ;;  %3388 = vmatprep.subr.bf16.mxu1 %v7053_v31  ;;  %v7152_v30 = vld [vmem:[#allocation5 + $0x3ec] ss:$16 sps:$4 sm:$0xff]   ;;  %v7150_v31 = vld [vmem:[#allocation5 + $0x3e8] ss:$16 sps:$4 sm:$0xff]  }
 0x120   : > { %2661 = vmatmul.mubr.bf16.gmra.mrb[8].mxu0 %v8001_v33  ;;  %3240 = vmatmul.mubr.bf16.gmra.mrb[40].mxu1 %v7920_v59  ;;  %v7077_v59 = vld [vmem:[#allocation5 + $0x4e4] ss:$16 sps:$4 sm:$0xff]  }
 0x121   : > { %2670 = vmatprep.mubr.bf16.mxu0 %v8004_v34  ;;  %3249 = vmatprep.mubr.bf16.mxu1 %v7925_v2  ;;  %v7080_v2 = vld [vmem:[#allocation5 + $0x2ec] ss:$16 sps:$4 sm:$0xff]  }
 0x122   : > { %2810 = vmatpush1.bf16.msra.mxu0 %v7048_v36  ;;  %3389 = vmatpush1.bf16.msra.mxu1 %v7051_v37  ;;  %v7425_v36 = vld [vmem:[%s7881_s12 + $0x1c4] ss:$28 sps:$4 sm:$0xff]  }
 0x123   : > { %2811 = vmatprep.subr.bf16.mxu0 %v7059_v47  ;;  %3390 = vmatprep.subr.bf16.mxu1 %v7062_v54  ;;  %v7158_v37 = vld [vmem:[#allocation5 + $0x604] ss:$16 sps:$4 sm:$0xff]   ;;  %v7161_v47 = vld [vmem:[#allocation5 + $0x40c] ss:$16 sps:$4 sm:$0xff]  }
 0x124   : > { %v8061_v54 = vld [vmem:[%s7881_s12 + $0x1c8] ss:$28 sps:$4 sm:$0xff]  }
 0x126   : > { %2812 = vmatpush1.bf16.msra.mxu0 %v7057_v38  ;;  %3391 = vmatpush1.bf16.msra.mxu1 %v7060_v39  ;;  %v7426_v38 = vld [vmem:[%s7881_s12 + $0x1c0] ss:$28 sps:$4 sm:$0xff]  }
 0x127   : > { %2813 = vmatprep.subr.bf16.mxu0 %v7068_v41  ;;  %3392 = vmatprep.subr.bf16.mxu1 %v7071_v43  ;;  %v7427_v39 = vld [vmem:[%s7881_s12 + $0x1fc] ss:$28 sps:$4 sm:$0xff]  }
 0x128   : > { %2671 = vmatmul.mubr.bf16.gmra.mrb[12].mxu0 %v8011_v44  ;;  %3250 = vmatmul.mubr.bf16.gmra.mrb[44].mxu1 %v7930_v7  ;;  %v7087_v7 = vld [vmem:[#allocation5 + $0x308] ss:$16 sps:$4 sm:$0xff]   ;;  %v8071_v41 = vld [vmem:[%s7881_s12 + $0x200] ss:$28 sps:$4 sm:$0xff]  }
 0x129   : > { %2680 = vmatprep.mubr.bf16.mxu0 %v8014_v45  ;;  %3259 = vmatprep.mubr.bf16.mxu1 %v7935_v15  ;;  %v7095_v15 = vld [vmem:[#allocation5 + $0x524] ss:$16 sps:$4 sm:$0xff]   ;;  %v8074_v43 = vld [vmem:[%s7881_s12 + $0x23c] ss:$28 sps:$4 sm:$0xff]  }
 0x12a   : > { %2814 = vmatpush1.bf16.msra.mxu0 %v7066_v48  ;;  %3393 = vmatpush1.bf16.msra.mxu1 %v7069_v49  ;;  %v7428_v48 = vld [vmem:[%s7881_s12 + $0x1f8] ss:$28 sps:$4 sm:$0xff]  }
 0x12b   : > { %2815 = vmatprep.subr.bf16.mxu0 %v7077_v59  ;;  %3394 = vmatprep.subr.bf16.mxu1 %v7080_v2  ;;  %v7429_v49 = vld [vmem:[%s7881_s12 + $0x234] ss:$28 sps:$4 sm:$0xff]  }
 0x12c   : > { %v8081_v59 = vld [vmem:[%s7881_s12 + $0x238] ss:$28 sps:$4 sm:$0xff]  }
 0x12d   : > { %v8084_v2 = vld [vmem:[%s7881_s12 + $0x274] ss:$28 sps:$4 sm:$0xff]  }
 0x12e   : > { %2816 = vmatpush1.bf16.msra.mxu0 %v7075_v50  ;;  %3395 = vmatpush1.bf16.msra.mxu1 %v7078_v51  ;;  %v7430_v50 = vld [vmem:[%s7881_s12 + $0x230] ss:$28 sps:$4 sm:$0xff]  }
 0x12f   : > { %2817 = vmatprep.subr.bf16.mxu0 %v7086_v52  ;;  %3396 = vmatprep.subr.bf16.mxu1 %v7089_v53  ;;  %v7431_v51 = vld [vmem:[%s7881_s12 + $0x26c] ss:$28 sps:$4 sm:$0xff]  }
 0x130   : > { %2681 = vmatmul.mubr.bf16.gmra.mrb[16].mxu0 %v8021_v56  ;;  %3260 = vmatmul.mubr.bf16.gmra.mrb[48].mxu1 %v7940_v20  ;;  %v7113_v20 = vld [vmem:[#allocation5 + $0x564] ss:$16 sps:$4 sm:$0xff]   ;;  %v8091_v52 = vld [vmem:[%s7881_s12 + $0x270] ss:$28 sps:$4 sm:$0xff]  }
 0x131   : > { %2690 = vmatprep.mubr.bf16.mxu0 %v8024_v57  ;;  %3269 = vmatprep.mubr.bf16.mxu1 %v7945_v27  ;;  %v7116_v27 = vld [vmem:[#allocation5 + $0x36c] ss:$16 sps:$4 sm:$0xff]  }
 0x132   : > { %2818 = vmatpush1.bf16.msra.mxu0 %v7084_v58  ;;  %3397 = vmatpush1.bf16.msra.mxu1 %v7087_v7  ;;  %v8094_v53 = vld [vmem:[%s7881_s12 + $0x2ac] ss:$28 sps:$4 sm:$0xff]   ;;  %v7433_v7 = vld [vmem:[%s7881_s12 + $0x2a4] ss:$28 sps:$4 sm:$0xff]  }
 0x133   : > { %2819 = vmatprep.subr.bf16.mxu0 %v7095_v15  ;;  %3398 = vmatprep.subr.bf16.mxu1 %v7098_v60  ;;  %v7432_v58 = vld [vmem:[%s7881_s12 + $0x268] ss:$28 sps:$4 sm:$0xff]  }
 0x134   : > { %v8101_v15 = vld [vmem:[%s7881_s12 + $0x2a8] ss:$28 sps:$4 sm:$0xff]  }
 0x135   : > { %v8104_v60 = vld [vmem:[%s7881_s12 + $0x2e4] ss:$28 sps:$4 sm:$0xff]  }
 0x136   : > { %2820 = vmatpush1.bf16.msra.mxu0 %v7093_v61  ;;  %3399 = vmatpush1.bf16.msra.mxu1 %v7096_v0  ;;  %v7434_v61 = vld [vmem:[%s7881_s12 + $0x2a0] ss:$28 sps:$4 sm:$0xff]  }
 0x137   : > { %2821 = vmatprep.subr.bf16.mxu0 %v7104_v3  ;;  %3400 = vmatprep.subr.bf16.mxu1 %v7107_v4  ;;  %v7435_v0 = vld [vmem:[%s7881_s12 + $0x2dc] ss:$28 sps:$4 sm:$0xff]  }
 0x138   : > { %2691 = vmatmul.mubr.bf16.gmra.mrb[20].mxu0 %v8031_v63  ;;  %3270 = vmatmul.mubr.bf16.gmra.mrb[52].mxu1 %v7950_v32  ;;  %v7131_v32 = vld [vmem:[#allocation5 + $0x5a4] ss:$16 sps:$4 sm:$0xff]   ;;  %v8111_v3 = vld [vmem:[%s7881_s12 + $0x2e0] ss:$28 sps:$4 sm:$0xff]  }
 0x139   : > { %2700 = vmatprep.mubr.bf16.mxu0 %v8034_v1  ;;  %3279 = vmatprep.mubr.bf16.mxu1 %v7955_v40  ;;  %v7129_v40 = vld [vmem:[#allocation5 + $0x5a0] ss:$16 sps:$4 sm:$0xff]   ;;  %v8114_v4 = vld [vmem:[%s7881_s12 + $0x31c] ss:$28 sps:$4 sm:$0xff]  }
 0x13a   : > { %2822 = vmatpush1.bf16.msra.mxu0 %v7102_v6  ;;  %3401 = vmatpush1.bf16.msra.mxu1 %v7105_v8  ;;  %v7436_v6 = vld [vmem:[%s7881_s12 + $0x2d8] ss:$28 sps:$4 sm:$0xff]  }
 0x13b   : > { %2823 = vmatprep.subr.bf16.mxu0 %v7113_v20  ;;  %3402 = vmatprep.subr.bf16.mxu1 %v7116_v27  ;;  %v7437_v8 = vld [vmem:[%s7881_s12 + $0x314] ss:$28 sps:$4 sm:$0xff]  }
 0x13c   : > { %v8121_v20 = vld [vmem:[%s7881_s12 + $0x318] ss:$28 sps:$4 sm:$0xff]  }
 0x13d   : > { %v8124_v27 = vld [vmem:[%s7881_s12 + $0x354] ss:$28 sps:$4 sm:$0xff]  }
 0x13e   : > { %2824 = vmatpush1.bf16.msra.mxu0 %v7111_v9  ;;  %3403 = vmatpush1.bf16.msra.mxu1 %v7114_v10  ;;  %v7438_v9 = vld [vmem:[%s7881_s12 + $0x310] ss:$28 sps:$4 sm:$0xff]  }
 0x13f   : > { %2825 = vmatprep.subr.bf16.mxu0 %v7122_v12  ;;  %3404 = vmatprep.subr.bf16.mxu1 %v7125_v14  ;;  %v7439_v10 = vld [vmem:[%s7881_s12 + $0x34c] ss:$28 sps:$4 sm:$0xff]   ;;  %v8134_v14 = vld [vmem:[%s7881_s12 + $0x14] ss:$28 sps:$4 sm:$0xff]  }
 0x140   : > { %2701 = vmatmul.mubr.bf16.gmra.mrb[24].mxu0 %v8041_v17  ;;  %3280 = vmatmul.mubr.bf16.gmra.mrb[56].mxu1 %v7960_v46  ;;  %v7149_v46 = vld [vmem:[#allocation5 + $0x5e4] ss:$16 sps:$4 sm:$0xff]   ;;  %v8131_v12 = vld [vmem:[%s7881_s12 + $0x350] ss:$28 sps:$4 sm:$0xff]  }
 0x141   : > { %2710 = vmatprep.mubr.bf16.mxu0 %v8044_v18  ;;  %3289 = vmatprep.mubr.bf16.mxu1 %v7965_v55  ;;  %v7147_v55 = vld [vmem:[#allocation5 + $0x5e0] ss:$16 sps:$4 sm:$0xff]  }
 0x142   : > { %2826 = vmatpush1.bf16.msra.mxu0 %v7120_v19  ;;  %3405 = vmatpush1.bf16.msra.mxu1 %v7123_v13  ;;  %v7440_v19 = vld [vmem:[%s7881_s12 + $0x348] ss:$28 sps:$4 sm:$0xff]   ;;  %v8141_v13 = vld [vmem:[%s7881_s12 + $0x10] ss:$28 sps:$4 sm:$0xff]  }
 0x143   : > { %2827 = vmatprep.subr.bf16.mxu0 %v7131_v32  ;;  %3406 = vmatprep.subr.bf16.mxu1 %v7134_v21  ;;  %v7156_v32 = vld [vmem:[#allocation5 + $0x600] ss:$16 sps:$4 sm:$0xff]   ;;  %v7159_v21 = vld [vmem:[#allocation5 + $0x408] ss:$16 sps:$4 sm:$0xff]  }
 0x146   : > { %2828 = vmatpush1.bf16.msra.mxu0 %v7129_v40  ;;  %3407 = vmatpush1.bf16.msra.mxu1 %v7132_v22  ;;  %v8144_v40 = vld [vmem:[%s7881_s12 + $0x4c] ss:$28 sps:$4 sm:$0xff]  }
 0x147   : > { %2829 = vmatprep.subr.bf16.mxu0 %v7140_v25  ;;  %3408 = vmatprep.subr.bf16.mxu1 %v7143_v35  ;;  %v7167_v22 = vld [vmem:[#allocation5 + $0x42c] ss:$16 sps:$4 sm:$0xff]   ;;  %v7173_v25 = vld [vmem:[#allocation5 + $0x624] ss:$16 sps:$4 sm:$0xff]   ;;  %v7165_v35 = vld [vmem:[#allocation5 + $0x428] ss:$16 sps:$4 sm:$0xff]  }
 0x148   : > { %2711 = vmatmul.mubr.bf16.gmra.mrb[28].mxu0 %v8051_v26  ;;  %3290 = vmatmul.mubr.bf16.gmra.mrb[60].mxu1 %v7971_v62  ;;  %v8064_v62 = vld [vmem:[%s7881_s12 + $0x204] ss:$28 sps:$4 sm:$0xff]  }
 0x149   : > { %2720 = vmatprep.mubr.bf16.mxu0 %v8054_v28  ;;  %3299 = vmatprep.mubr.bf16.mxu1 %v7425_v36  ;;  %v7203_v36 = vld [vmem:[#allocation5 + $0x664] ss:$16 sps:$4 sm:$0xff]  }
 0x14a   : > { %2830 = vmatpush1.bf16.msra.mxu0 %v7138_v42  ;;  %3409 = vmatpush1.bf16.msra.mxu1 %v7141_v29  ;;  %v7171_v42 = vld [vmem:[#allocation5 + $0x620] ss:$16 sps:$4 sm:$0xff]   ;;  %v7188_v29 = vld [vmem:[#allocation5 + $0x644] ss:$16 sps:$4 sm:$0xff]  }
 0x14b   : > { %2831 = vmatprep.subr.bf16.mxu0 %v7149_v46  ;;  %3410 = vmatprep.subr.bf16.mxu1 %v7152_v30  ;;  %v8151_v46 = vld [vmem:[%s7881_s12 + $0x48] ss:$28 sps:$4 sm:$0xff]  }
 0x14c   : > { %v8154_v30 = vld [vmem:[%s7881_s12 + $0x84] ss:$28 sps:$4 sm:$0xff]  }
 0x14e   : > { %2832 = vmatpush1.bf16.msra.mxu0 %v7147_v55  ;;  %3411 = vmatpush1.bf16.msra.mxu1 %v7150_v31  ;;  %v7174_v55 = vld [vmem:[#allocation5 + $0x448] ss:$16 sps:$4 sm:$0xff]   ;;  %v7182_v31 = vld [vmem:[#allocation5 + $0x46c] ss:$16 sps:$4 sm:$0xff]  }
 0x14f   : > { %2994 = vmatprep.subr.bf16.mxu0 %v7158_v37  ;;  %3573 = vmatprep.subr.bf16.mxu1 %v7161_v47  ;;  %v7201_v37 = vld [vmem:[#allocation5 + $0x660] ss:$16 sps:$4 sm:$0xff]   ;;  %v7191_v47 = vld [vmem:[#allocation5 + $0x48c] ss:$16 sps:$4 sm:$0xff]  }
 0x150   : > { %2721 = vmatmul.mubr.bf16.gmra.mrb[32].mxu0 %v8061_v54  ;;  %3300 = vmatmul.mubr.bf16.gmra.mrb[64].mxu1 %v7426_v38  ;;  %v7218_v38 = vld [vmem:[#allocation5 + $0x684] ss:$16 sps:$4 sm:$0xff]  }
 0x151   : > { %2730 = vmatprep.mubr.bf16.mxu0 %v8064_v62  ;;  %3309 = vmatprep.mubr.bf16.mxu1 %v7427_v39  ;;  %v8161_v39 = vld [vmem:[%s7881_s12 + $0x80] ss:$28 sps:$4 sm:$0xff]  }
 0x158   : > { %2731 = vmatmul.mubr.bf16.gmra.mrb[36].mxu0 %v8071_v41  ;;  %3310 = vmatmul.mubr.bf16.gmra.mrb[68].mxu1 %v7428_v48  ;;  %v8164_v48 = vld [vmem:[%s7881_s12 + $0xbc] ss:$28 sps:$4 sm:$0xff]  }
 0x159   : > { %2740 = vmatprep.mubr.bf16.mxu0 %v8074_v43  ;;  %3319 = vmatprep.mubr.bf16.mxu1 %v7429_v49  ;;  %v7189_v49 = vld [vmem:[#allocation5 + $0x488] ss:$16 sps:$4 sm:$0xff]  }
 0x160   : > { %2741 = vmatmul.mubr.bf16.gmra.mrb[40].mxu0 %v8081_v59  ;;  %3320 = vmatmul.mubr.bf16.gmra.mrb[72].mxu1 %v7430_v50  ;;  %v7197_v50 = vld [vmem:[#allocation5 + $0x4ac] ss:$16 sps:$4 sm:$0xff]  }
 0x161   : > { %2750 = vmatprep.mubr.bf16.mxu0 %v8084_v2  ;;  %3329 = vmatprep.mubr.bf16.mxu1 %v7431_v51  ;;  %v7195_v51 = vld [vmem:[#allocation5 + $0x4a8] ss:$16 sps:$4 sm:$0xff]  }
 0x168   : > { %2751 = vmatmul.mubr.bf16.gmra.mrb[44].mxu0 %v8091_v52  ;;  %3330 = vmatmul.mubr.bf16.gmra.mrb[76].mxu1 %v7432_v58  ;;  %v7231_v58 = vld [vmem:[#allocation5 + $0x6a0] ss:$16 sps:$4 sm:$0xff]  }
 0x169   : > { %2760 = vmatprep.mubr.bf16.mxu0 %v8094_v53  ;;  %3339 = vmatprep.mubr.bf16.mxu1 %v7433_v7 }
 0x170   : > { %2761 = vmatmul.mubr.bf16.gmra.mrb[48].mxu0 %v8101_v15  ;;  %3340 = vmatmul.mubr.bf16.gmra.mrb[80].mxu1 %v7434_v61  ;;  %v7206_v61 = vld [vmem:[#allocation5 + $0x4cc] ss:$16 sps:$4 sm:$0xff]  }
 0x171   : > { %2770 = vmatprep.mubr.bf16.mxu0 %v8104_v60  ;;  %3349 = vmatprep.mubr.bf16.mxu1 %v7435_v0  ;;  %v7248_v0 = vld [vmem:[#allocation5 + $0x6c4] ss:$16 sps:$4 sm:$0xff]  }
 0x178   : > { %2771 = vmatmul.mubr.bf16.gmra.mrb[52].mxu0 %v8111_v3  ;;  %3350 = vmatmul.mubr.bf16.gmra.mrb[84].mxu1 %v7436_v6 }
 0x179   : > { %2780 = vmatprep.mubr.bf16.mxu0 %v8114_v4  ;;  %3359 = vmatprep.mubr.bf16.mxu1 %v7437_v8  ;;  %v8175_v8 = vld [vmem:[%s7881_s12 + $0xb8] ss:$28 sps:$4 sm:$0xff]  }
 0x180   : > { %2781 = vmatmul.mubr.bf16.gmra.mrb[56].mxu0 %v8121_v20  ;;  %3360 = vmatmul.mubr.bf16.gmra.mrb[88].mxu1 %v7438_v9 }
 0x181   : > { %2790 = vmatprep.mubr.bf16.mxu0 %v8124_v27  ;;  %3369 = vmatprep.mubr.bf16.mxu1 %v7439_v10 }
 0x188   : > { %2791 = vmatmul.mubr.bf16.gmra.mrb[60].mxu0 %v8131_v12  ;;  %3370 = vmatmul.mubr.bf16.gmra.mrb[92].mxu1 %v7440_v19  ;;  %v7246_v19 = vld [vmem:[#allocation5 + $0x6c0] ss:$16 sps:$4 sm:$0xff]  }
 0x189   : > { %2833 = vmatprep.mubr.bf16.mxu0 %v8134_v14  ;;  %3412 = vmatprep.mubr.bf16.mxu1 %v7975_v5  ;;  %v7176_v5 = vld [vmem:[#allocation5 + $0x44c] ss:$16 sps:$4 sm:$0xff]  }
 0x190   : > { %2834 = vmatmul.mubr.bf16.vlgmr.msra.gmra.mrb[0].mxu0 %v8141_v13  ;;  %3413 = vmatmul.mubr.bf16.vlgmr.msra.gmra.mrb[32].mxu1 %v7981_v11  ;;  %v7186_v11 = vld [vmem:[#allocation5 + $0x640] ss:$16 sps:$4 sm:$0xff]  }
 0x191   : > { %2995 = vmatpush1.bf16.msra.mxu0 %v7156_v32  ;;  %3574 = vmatpush1.bf16.msra.mxu1 %v7159_v21  ;;  %v7212_v32 = vld [vmem:[#allocation5 + $0x4ec] ss:$16 sps:$4 sm:$0xff]   ;;  %v7263_v21 = vld [vmem:[#allocation5 + $0x6e4] ss:$16 sps:$4 sm:$0xff]  }
 0x192   : > { %2843 = vmatprep.mubr.bf16.mxu0 %v8144_v40  ;;  %3422 = vmatprep.mubr.bf16.mxu1 %v7984_v16  ;;  %v7180_v16 = vld [vmem:[#allocation5 + $0x468] ss:$16 sps:$4 sm:$0xff]  }
 0x193   : > { %3575 = vmatprep.subr.bf16.mxu1 %v7167_v22  ;;  %2996 = vmatprep.subr.bf16.mxu0 %v7173_v25  ;;  %v7210_v22 = vld [vmem:[#allocation5 + $0x4e8] ss:$16 sps:$4 sm:$0xff]   ;;  %v7261_v25 = vld [vmem:[#allocation5 + $0x6e0] ss:$16 sps:$4 sm:$0xff]  }
 0x195   : > { %3576 = vmatpush1.bf16.msra.mxu1 %v7165_v35  ;;  %2997 = vmatpush1.bf16.msra.mxu0 %v7171_v42  ;;  %v7221_v42 = vld [vmem:[#allocation5 + $0x50c] ss:$16 sps:$4 sm:$0xff]  }
 0x196   : > { %3577 = vmatprep.subr.bf16.mxu1 %v7176_v5  ;;  %2998 = vmatprep.subr.bf16.mxu0 %v7188_v29  ;;  %v8193_v29 = vld [vmem:[%s7881_s12 + $0xf0] ss:$28 sps:$4 sm:$0xff]  }
 0x198   : > { %2844 = vmatmul.mubr.bf16.gmra.mrb[4].mxu0 %v8151_v46  ;;  %3423 = vmatmul.mubr.bf16.gmra.mrb[36].mxu1 %v7991_v23  ;;  %v7216_v23 = vld [vmem:[#allocation5 + $0x680] ss:$16 sps:$4 sm:$0xff]  }
 0x199   : > { %2853 = vmatprep.mubr.bf16.mxu0 %v8154_v30  ;;  %3432 = vmatprep.mubr.bf16.mxu1 %v7994_v24  ;;  %v7233_v24 = vld [vmem:[#allocation5 + $0x6a4] ss:$16 sps:$4 sm:$0xff]  }
 0x19a   : > { %3578 = vmatpush1.bf16.msra.mxu1 %v7174_v55  ;;  %2999 = vmatpush1.bf16.msra.mxu0 %v7186_v11 }
 0x19b   : > { %3579 = vmatprep.subr.bf16.mxu1 %v7182_v31  ;;  %3000 = vmatprep.subr.bf16.mxu0 %v7203_v36  ;;  %v7227_v31 = vld [vmem:[#allocation5 + $0x52c] ss:$16 sps:$4 sm:$0xff]   ;;  %v7225_v36 = vld [vmem:[#allocation5 + $0x528] ss:$16 sps:$4 sm:$0xff]  }
 0x19e   : > { %3580 = vmatpush1.bf16.msra.mxu1 %v7180_v16  ;;  %3001 = vmatpush1.bf16.msra.mxu0 %v7201_v37  ;;  %v7236_v37 = vld [vmem:[#allocation5 + $0x54c] ss:$16 sps:$4 sm:$0xff]  }
 0x19f   : > { %3581 = vmatprep.subr.bf16.mxu1 %v7191_v47  ;;  %3002 = vmatprep.subr.bf16.mxu0 %v7218_v38  ;;  %v8211_v38 = vld [vmem:[%s7881_s12 + $0x128] ss:$28 sps:$4 sm:$0xff]  }
 0x1a0   : > { %2854 = vmatmul.mubr.bf16.gmra.mrb[8].mxu0 %v8161_v39  ;;  %3433 = vmatmul.mubr.bf16.gmra.mrb[40].mxu1 %v8001_v33  ;;  %v8180_v33 = vld [vmem:[%s7881_s12 + $0xf4] ss:$28 sps:$4 sm:$0xff]  }
 0x1a1   : > { %2863 = vmatprep.mubr.bf16.mxu0 %v8164_v48  ;;  %3442 = vmatprep.mubr.bf16.mxu1 %v8004_v34  ;;  %v7204_v34 = vld [vmem:[#allocation5 + $0x4c8] ss:$16 sps:$4 sm:$0xff]  }
 0x1a2   : > { %3582 = vmatpush1.bf16.msra.mxu1 %v7189_v49  ;;  %3003 = vmatpush1.bf16.msra.mxu0 %v7216_v23  ;;  %v8216_v23 = vld [vmem:[%s7881_s12 + $0x164] ss:$28 sps:$4 sm:$0xff]  }
 0x1a3   : > { %v8170_v7 = vpop.f32.mrb[0].mxu1  ;;  %3583 = vmatprep.subr.bf16.mxu1 %v7197_v50  ;;  %3004 = vmatprep.subr.bf16.mxu0 %v7233_v24  ;;  %v7242_v50 = vld [vmem:[#allocation5 + $0x56c] ss:$16 sps:$4 sm:$0xff]   ;;  %v7240_v24 = vld [vmem:[#allocation5 + $0x568] ss:$16 sps:$4 sm:$0xff]  }
 0x1a4   : > { %v8172_v6 = vpop.f32.mrb[1].mxu1 }
 0x1a5   : > { %v8177_v9 = vpop.f32.mrb[2].mxu1 }
 0x1a6   : > { %v8182_v10 = vpop.f32.mrb[3].mxu1  ;;  %3584 = vmatpush1.bf16.msra.mxu1 %v7195_v51  ;;  %3005 = vmatpush1.bf16.msra.mxu0 %v7231_v58  ;;  %v7251_v58 = vld [vmem:[#allocation5 + $0x58c] ss:$16 sps:$4 sm:$0xff]  }
 0x1a7   : > { %3585 = vmatprep.subr.bf16.mxu1 %v7206_v61  ;;  %3006 = vmatprep.subr.bf16.mxu0 %v7248_v0  ;;  %v8229_v0 = vld [vmem:[%s7881_s12 + $0x160] ss:$28 sps:$4 sm:$0xff]  }
 0x1a8   : > { %2864 = vmatmul.mubr.bf16.gmra.mrb[12].mxu0 %v8175_v8  ;;  %3443 = vmatmul.mubr.bf16.gmra.mrb[44].mxu1 %v8011_v44  ;;  %v8198_v44 = vld [vmem:[%s7881_s12 + $0x12c] ss:$28 sps:$4 sm:$0xff]  }
 0x1a9   : > { %2873 = vmatprep.mubr.bf16.mxu0 %v8180_v33  ;;  %3452 = vmatprep.mubr.bf16.mxu1 %v8014_v45  ;;  %v7219_v45 = vld [vmem:[#allocation5 + $0x508] ss:$16 sps:$4 sm:$0xff]  }
 0x1aa   : > { %3586 = vmatpush1.bf16.msra.mxu1 %v7204_v34  ;;  %3007 = vmatpush1.bf16.msra.mxu0 %v7246_v19  ;;  %v8234_v19 = vld [vmem:[%s7881_s12 + $0x19c] ss:$28 sps:$4 sm:$0xff]  }
 0x1ab   : > { %v8188_v35 = vpop.f32.mrb[4].mxu1  ;;  %3587 = vmatprep.subr.bf16.mxu1 %v7212_v32  ;;  %3008 = vmatprep.subr.bf16.mxu0 %v7263_v21  ;;  %v7257_v32 = vld [vmem:[#allocation5 + $0x5ac] ss:$16 sps:$4 sm:$0xff]   ;;  %v7255_v21 = vld [vmem:[#allocation5 + $0x5a8] ss:$16 sps:$4 sm:$0xff]  }
 0x1ac   : > { %v8190_v5 = vpop.f32.mrb[5].mxu1 }
 0x1ad   : > { %v8195_v55 = vpop.f32.mrb[6].mxu1 }
 0x1ae   : > { %v8200_v11 = vpop.f32.mrb[7].mxu1  ;;  %3588 = vmatpush1.bf16.msra.mxu1 %v7210_v22  ;;  %3009 = vmatpush1.bf16.msra.mxu0 %v7261_v25  ;;  %v7266_v25 = vld [vmem:[#allocation5 + $0x5cc] ss:$16 sps:$4 sm:$0xff]  }
 0x1af   : > { %3589 = vmatprep.subr.bf16.mxu1 %v7221_v42 }
 0x1b0   : > { %2874 = vmatmul.mubr.bf16.gmra.mrb[16].mxu0 %v8193_v29  ;;  %3453 = vmatmul.mubr.bf16.gmra.mrb[48].mxu1 %v8021_v56 }
 0x1b1   : > { %2883 = vmatprep.mubr.bf16.mxu0 %v8198_v44  ;;  %3462 = vmatprep.mubr.bf16.mxu1 %v8024_v57  ;;  %v7234_v57 = vld [vmem:[#allocation5 + $0x548] ss:$16 sps:$4 sm:$0xff]  }
 0x1b2   : > { %3590 = vmatpush1.bf16.msra.mxu1 %v7219_v45  ;;  %v8247_v45 = vld [vmem:[%s7881_s12 + $0x198] ss:$28 sps:$4 sm:$0xff]  }
 0x1b3   : > { %v8206_v16 = vpop.f32.mrb[8].mxu1  ;;  %3591 = vmatprep.subr.bf16.mxu1 %v7227_v31 }
 0x1b4   : > { %v8208_v47 = vpop.f32.mrb[9].mxu1 }
 0x1b5   : > { %v8213_v49 = vpop.f32.mrb[10].mxu1 }
 0x1b6   : > { %v8218_v56 = vpop.f32.mrb[11].mxu1  ;;  %3592 = vmatpush1.bf16.msra.mxu1 %v7225_v36  ;;  %v8252_v36 = vld [vmem:[%s7881_s12 + $0x1d4] ss:$28 sps:$4 sm:$0xff]  }
 0x1b7   : > { %3593 = vmatprep.subr.bf16.mxu1 %v7236_v37  ;;  %v7272_v37 = vld [vmem:[#allocation5 + $0x5ec] ss:$16 sps:$4 sm:$0xff]  }
 0x1b8   : > { %2884 = vmatmul.mubr.bf16.gmra.mrb[20].mxu0 %v8211_v38  ;;  %3463 = vmatmul.mubr.bf16.gmra.mrb[52].mxu1 %v8031_v63 }
 0x1b9   : > { %2893 = vmatprep.mubr.bf16.mxu0 %v8216_v23  ;;  %3472 = vmatprep.mubr.bf16.mxu1 %v8034_v1  ;;  %v7249_v1 = vld [vmem:[#allocation5 + $0x588] ss:$16 sps:$4 sm:$0xff]  }
 0x1ba   : > { %3594 = vmatpush1.bf16.msra.mxu1 %v7234_v57  ;;  %v7270_v57 = vld [vmem:[#allocation5 + $0x5e8] ss:$16 sps:$4 sm:$0xff]  }
 0x1bb   : > { %v8224_v51 = vpop.f32.mrb[12].mxu1  ;;  %3595 = vmatprep.subr.bf16.mxu1 %v7242_v50 }
 0x1bc   : > { %v8226_v61 = vpop.f32.mrb[13].mxu1 }
 0x1bd   : > { %v8231_v34 = vpop.f32.mrb[14].mxu1 }
 0x1be   : > { %v8236_v63 = vpop.f32.mrb[15].mxu1  ;;  %3596 = vmatpush1.bf16.msra.mxu1 %v7240_v24  ;;  %v7276_v24 = vld [vmem:[#allocation5 + $0x60c] ss:$16 sps:$4 sm:$0xff]  }
 0x1bf   : > { %3597 = vmatprep.subr.bf16.mxu1 %v7251_v58 }
 0x1c0   : > { %2894 = vmatmul.mubr.bf16.gmra.mrb[24].mxu0 %v8229_v0  ;;  %3473 = vmatmul.mubr.bf16.gmra.mrb[56].mxu1 %v8041_v17 }
 0x1c1   : > { %2903 = vmatprep.mubr.bf16.mxu0 %v8234_v19  ;;  %3482 = vmatprep.mubr.bf16.mxu1 %v8044_v18  ;;  %v7264_v18 = vld [vmem:[#allocation5 + $0x5c8] ss:$16 sps:$4 sm:$0xff]  }
 0x1c2   : > { %3598 = vmatpush1.bf16.msra.mxu1 %v7249_v1  ;;  %v8265_v1 = vld [vmem:[%s7881_s12 + $0x1d0] ss:$28 sps:$4 sm:$0xff]  }
 0x1c3   : > { %v8242_v22 = vpop.f32.mrb[16].mxu1  ;;  %3599 = vmatprep.subr.bf16.mxu1 %v7257_v32 }
 0x1c4   : > { %v8244_v42 = vpop.f32.mrb[17].mxu1 }
 0x1c5   : > { %v8249_v31 = vpop.f32.mrb[18].mxu1 }
 0x1c6   : > { %v8254_v17 = vpop.f32.mrb[19].mxu1  ;;  %3600 = vmatpush1.bf16.msra.mxu1 %v7255_v21  ;;  %v8270_v21 = vld [vmem:[%s7881_s12 + $0x20c] ss:$28 sps:$4 sm:$0xff]  }
 0x1c7   : > { %3601 = vmatprep.subr.bf16.mxu1 %v7266_v25 }
 0x1c8   : > { %2904 = vmatmul.mubr.bf16.gmra.mrb[28].mxu0 %v8247_v45  ;;  %3483 = vmatmul.mubr.bf16.gmra.mrb[60].mxu1 %v8051_v26 }
 0x1c9   : > { %2913 = vmatprep.mubr.bf16.mxu0 %v8252_v36  ;;  %3492 = vmatprep.mubr.bf16.mxu1 %v8054_v28 }
 0x1ca   : > { %3602 = vmatpush1.bf16.msra.mxu1 %v7264_v18  ;;  %v8283_v18 = vld [vmem:[%s7881_s12 + $0x208] ss:$28 sps:$4 sm:$0xff]  }
 0x1cb   : > { %v8260_v50 = vpop.f32.mrb[20].mxu1  ;;  %3603 = vmatprep.subr.bf16.mxu1 %v7272_v37 }
 0x1cc   : > { %v8262_v58 = vpop.f32.mrb[21].mxu1 }
 0x1cd   : > { %8909 = vst [vmem:[#allocation15_spill] sm:$0xff] %v8262_v58  ;;  %v8267_v32 = vpop.f32.mrb[22].mxu1  ;;  %v7316_v58 = vld [vmem:[#allocation7 + $0x24] ss:$8 sps:$4 sm:$0xff]  }
 0x1ce   : > { %8910 = vst [vmem:[#allocation16_spill] sm:$0xff] %v8267_v32  ;;  %v8272_v26 = vpop.f32.mrb[23].mxu1  ;;  %3604 = vmatpush1.bf16.msra.mxu1 %v7270_v57  ;;  %v8288_v57 = vld [vmem:[%s7881_s12 + $0x244] ss:$28 sps:$4 sm:$0xff]   ;;  %v7284_v32 = vld [vmem:[#allocation5 + $0x648] ss:$16 sps:$4 sm:$0xff]  }
 0x1cf   : > { %8911 = vst [vmem:[#allocation17_spill] sm:$0xff] %v8272_v26  ;;  %3766 = vmatprep.subr.bf16.mxu1 %v7276_v24  ;;  %v8369_v26 = vld [vmem:[%s7881_s12 + $0x50] ss:$28 sps:$4 sm:$0xff]  }
 0x1d0   : > { %2914 = vmatmul.mubr.bf16.gmra.mrb[32].mxu0 %v8265_v1  ;;  %3493 = vmatmul.mubr.bf16.gmra.mrb[64].mxu1 %v8061_v54 }
 0x1d1   : > { %2923 = vmatprep.mubr.bf16.mxu0 %v8270_v21  ;;  %3502 = vmatprep.mubr.bf16.mxu1 %v8064_v62 }
 0x1d3   : > { %v8278_v28 = vpop.f32.mrb[24].mxu1 }
 0x1d4   : > { %8912 = vst [vmem:[#allocation18_spill] sm:$0xff] %v8278_v28  ;;  %v8280_v25 = vpop.f32.mrb[25].mxu1 }
 0x1d5   : > { %8913 = vst [vmem:[#allocation19_spill] sm:$0xff] %v8280_v25  ;;  %v8285_v37 = vpop.f32.mrb[26].mxu1  ;;  %v8301_v25 = vld [vmem:[%s7881_s12 + $0x240] ss:$28 sps:$4 sm:$0xff]  }
 0x1d6   : > { %8914 = vst [vmem:[#allocation20_spill] sm:$0xff] %v8285_v37  ;;  %v8290_v24 = vpop.f32.mrb[27].mxu1 }
 0x1d7   : > { %8915 = vst [vmem:[#allocation21_spill] sm:$0xff] %v8290_v24  ;;  %v8306_v24 = vld [vmem:[%s7881_s12 + $0x27c] ss:$28 sps:$4 sm:$0xff]  }
 0x1d8   : > { %2924 = vmatmul.mubr.bf16.gmra.mrb[36].mxu0 %v8283_v18  ;;  %3503 = vmatmul.mubr.bf16.gmra.mrb[68].mxu1 %v8071_v41  ;;  %v8315_v41 = vld [vmem:[%s7881_s12 + $0x278] ss:$28 sps:$4 sm:$0xff]  }
 0x1d9   : > { %2933 = vmatprep.mubr.bf16.mxu0 %v8288_v57  ;;  %3512 = vmatprep.mubr.bf16.mxu1 %v8074_v43  ;;  %v8318_v43 = vld [vmem:[%s7881_s12 + $0x2b4] ss:$28 sps:$4 sm:$0xff]  }
 0x1db   : > { %v8296_v54 = vpop.f32.mrb[28].mxu1 }
 0x1dc   : > { %8916 = vst [vmem:[#allocation22_spill] sm:$0xff] %v8296_v54  ;;  %v8298_v62 = vpop.f32.mrb[29].mxu1  ;;  %v7286_v54 = vld [vmem:[#allocation5 + $0x64c] ss:$16 sps:$4 sm:$0xff]  }
 0x1dd   : > { %8917 = vst [vmem:[#allocation23_spill] sm:$0xff] %v8298_v62  ;;  %v8303_v37 = vpop.f32.mrb[30].mxu1  ;;  %v7303_v62 = vld [vmem:[#allocation7] ss:$8 sps:$4 sm:$0xff]  }
 0x1de   : > { %8918 = vst [vmem:[#allocation24_spill] sm:$0xff] %v8303_v37  ;;  %v8308_v28 = vpop.f32.mrb[31].mxu1  ;;  %v7305_v37 = vld [vmem:[#allocation7 + $0x4] ss:$8 sps:$4 sm:$0xff]  }
 0x1df   : > { %8919 = vst [vmem:[#allocation25_spill] sm:$0xff] %v8308_v28  ;;  %4547 = vmatprep.subr.bf16.mxu0 %v7305_v37  ;;  %v8338_v28 = vld [vmem:[%s7881_s12 + $0x324] ss:$28 sps:$4 sm:$0xff]   ;;  %v7274_v37 = vld [vmem:[#allocation5 + $0x608] ss:$16 sps:$4 sm:$0xff]  }
 0x1e0   : > { %2934 = vmatmul.mubr.bf16.gmra.mrb[40].mxu0 %v8301_v25  ;;  %3513 = vmatmul.mubr.bf16.gmra.mrb[72].mxu1 %v8081_v59  ;;  %v8325_v59 = vld [vmem:[%s7881_s12 + $0x2b0] ss:$28 sps:$4 sm:$0xff]  }
 0x1e1   : > { %2943 = vmatprep.mubr.bf16.mxu0 %v8306_v24  ;;  %3522 = vmatprep.mubr.bf16.mxu1 %v8084_v2  ;;  %v8328_v2 = vld [vmem:[%s7881_s12 + $0x2ec] ss:$28 sps:$4 sm:$0xff]  }
 0x1e8   : > { %2944 = vmatmul.mubr.bf16.gmra.mrb[44].mxu0 %v8315_v41  ;;  %3523 = vmatmul.mubr.bf16.gmra.mrb[76].mxu1 %v8091_v52  ;;  %v8335_v52 = vld [vmem:[%s7881_s12 + $0x2e8] ss:$28 sps:$4 sm:$0xff]  }
 0x1e9   : > { %2953 = vmatprep.mubr.bf16.mxu0 %v8318_v43  ;;  %3532 = vmatprep.mubr.bf16.mxu1 %v8094_v53  ;;  %v8345_v53 = vld [vmem:[%s7881_s12 + $0x320] ss:$28 sps:$4 sm:$0xff]  }
 0x1f0   : > { %2954 = vmatmul.mubr.bf16.gmra.mrb[48].mxu0 %v8325_v59  ;;  %3533 = vmatmul.mubr.bf16.gmra.mrb[80].mxu1 %v8101_v15  ;;  %v8348_v15 = vld [vmem:[%s7881_s12 + $0x35c] ss:$28 sps:$4 sm:$0xff]  }
 0x1f1   : > { %2963 = vmatprep.mubr.bf16.mxu0 %v8328_v2  ;;  %3542 = vmatprep.mubr.bf16.mxu1 %v8104_v60  ;;  %v8355_v60 = vld [vmem:[%s7881_s12 + $0x358] ss:$28 sps:$4 sm:$0xff]  }
 0x1f8   : > { %2964 = vmatmul.mubr.bf16.gmra.mrb[52].mxu0 %v8335_v52  ;;  %3543 = vmatmul.mubr.bf16.gmra.mrb[84].mxu1 %v8111_v3  ;;  %v8891_v3 = vmov 0  }
 0x1f9   : > { %2973 = vmatprep.mubr.bf16.mxu0 %v8338_v28  ;;  %3552 = vmatprep.mubr.bf16.mxu1 %v8114_v4  ;;  %v8362_v4 = vld [vmem:[%s7881_s12 + $0x18] ss:$28 sps:$4 sm:$0xff]  }
 0x200   : > { %2974 = vmatmul.mubr.bf16.gmra.mrb[56].mxu0 %v8345_v53  ;;  %3553 = vmatmul.mubr.bf16.gmra.mrb[88].mxu1 %v8121_v20  ;;  %v7281_v20 = vld [vmem:[#allocation5 + $0x62c] ss:$16 sps:$4 sm:$0xff]  }
 0x201   : > { %2983 = vmatprep.mubr.bf16.mxu0 %v8348_v15  ;;  %3562 = vmatprep.mubr.bf16.mxu1 %v8124_v27  ;;  %v7312_v27 = vld [vmem:[#allocation7 + $0x14] ss:$8 sps:$4 sm:$0xff]  }
 0x208   : > { %2984 = vmatmul.mubr.bf16.gmra.mrb[60].mxu0 %v8355_v60  ;;  %3563 = vmatmul.mubr.bf16.gmra.mrb[92].mxu1 %v8131_v12  ;;  %v7279_v12 = vld [vmem:[#allocation5 + $0x628] ss:$16 sps:$4 sm:$0xff]  }
 0x209   : > { %3026 = vmatprep.mubr.bf16.mxu0 %v8891_v3  ;;  %3605 = vmatprep.mubr.bf16.mxu1 %v8134_v14  ;;  %v7310_v14 = vld [vmem:[#allocation7 + $0x10] ss:$8 sps:$4 sm:$0xff]  }
 0x210   : > { %3027 = vmatmul.mubr.bf16.vlgmr.msra.gmra.mrb[0].mxu0 %v8362_v4  ;;  %3606 = vmatmul.mubr.bf16.vlgmr.msra.gmra.mrb[32].mxu1 %v8141_v13  ;;  %v7291_v13 = vld [vmem:[#allocation5 + $0x66c] ss:$16 sps:$4 sm:$0xff]  }
 0x211   : > { %3767 = vmatpush1.bf16.msra.mxu1 %v7274_v37  ;;  %3036 = vmatprep.mubr.bf16.mxu0 %v8891_v3  ;;  %v7314_v37 = vld [vmem:[#allocation7 + $0x20] ss:$8 sps:$4 sm:$0xff]  }
 0x212   : > { %3615 = vmatprep.mubr.bf16.mxu1 %v8144_v40  ;;  %3768 = vmatprep.subr.bf16.mxu1 %v7281_v20  ;;  %v7323_v40 = vld [vmem:[#allocation7 + $0x34] ss:$8 sps:$4 sm:$0xff]  }
 0x213   : > { %4548 = vmatpush1.bf16.msra.mxu0 %v7303_v62  ;;  %v7289_v62 = vld [vmem:[#allocation5 + $0x668] ss:$16 sps:$4 sm:$0xff]   ;;  %v7296_v20 = vld [vmem:[#allocation5 + $0x68c] ss:$16 sps:$4 sm:$0xff]  }
 0x214   : > { %4549 = vmatprep.subr.bf16.mxu0 %v7312_v27  ;;  %v8376_v27 = vld [vmem:[%s7881_s12 + $0x88] ss:$28 sps:$4 sm:$0xff]  }
 0x215   : > { %3769 = vmatpush1.bf16.msra.mxu1 %v7279_v12  ;;  %v7294_v12 = vld [vmem:[#allocation5 + $0x688] ss:$16 sps:$4 sm:$0xff]  }
 0x216   : > { %3770 = vmatprep.subr.bf16.mxu1 %v7286_v54  ;;  %v7321_v54 = vld [vmem:[#allocation7 + $0x30] ss:$8 sps:$4 sm:$0xff]  }
 0x217   : > { %4550 = vmatpush1.bf16.msra.mxu0 %v7310_v14  ;;  %v7327_v14 = vld [vmem:[#allocation7 + $0x44] ss:$8 sps:$4 sm:$0xff]  }
 0x218   : > { %3037 = vmatmul.mubr.bf16.gmra.mrb[4].mxu0 %v8369_v26  ;;  %3616 = vmatmul.mubr.bf16.gmra.mrb[36].mxu1 %v8151_v46  ;;  %v7301_v46 = vld [vmem:[#allocation5 + $0x6ac] ss:$16 sps:$4 sm:$0xff]  }
 0x219   : > { %3046 = vmatprep.mubr.bf16.mxu0 %v8891_v3  ;;  %3625 = vmatprep.mubr.bf16.mxu1 %v8154_v30  ;;  %v7325_v3 = vld [vmem:[#allocation7 + $0x40] ss:$8 sps:$4 sm:$0xff]   ;;  %v7330_v30 = vld [vmem:[#allocation7 + $0x54] ss:$8 sps:$4 sm:$0xff]  }
 0x21a   : > { %3771 = vmatpush1.bf16.msra.mxu1 %v7284_v32  ;;  %4551 = vmatprep.subr.bf16.mxu0 %v7316_v58  ;;  %v8920_v58 = vmov 0   ;;  %v7299_v32 = vld [vmem:[#allocation5 + $0x6a8] ss:$16 sps:$4 sm:$0xff]  }
 0x21b   : > { %3772 = vmatprep.subr.bf16.mxu1 %v7291_v13  ;;  %4552 = vmatpush1.bf16.msra.mxu0 %v7314_v37  ;;  %v7309_v13 = vld [vmem:[#allocation5 + $0x6cc] ss:$16 sps:$4 sm:$0xff]   ;;  %v7328_v37 = vld [vmem:[#allocation7 + $0x50] ss:$8 sps:$4 sm:$0xff]  }
 0x21c   : > { %4553 = vmatprep.subr.bf16.mxu0 %v7323_v40  ;;  %v8383_v40 = vld [vmem:[%s7881_s12 + $0xc0] ss:$28 sps:$4 sm:$0xff]  }
 0x21e   : > { %3773 = vmatpush1.bf16.msra.mxu1 %v7289_v62  ;;  %v7307_v62 = vld [vmem:[#allocation5 + $0x6c8] ss:$16 sps:$4 sm:$0xff]  }
 0x21f   : > { %3774 = vmatprep.subr.bf16.mxu1 %v7296_v20  ;;  %4554 = vmatpush1.bf16.msra.mxu0 %v7321_v54  ;;  %v7333_v20 = vld [vmem:[#allocation7 + $0x64] ss:$8 sps:$4 sm:$0xff]   ;;  %v7331_v54 = vld [vmem:[#allocation7 + $0x60] ss:$8 sps:$4 sm:$0xff]  }
 0x220   : > { %3047 = vmatmul.mubr.bf16.gmra.mrb[8].mxu0 %v8376_v27  ;;  %3626 = vmatmul.mubr.bf16.gmra.mrb[40].mxu1 %v8161_v39  ;;  %v7320_v39 = vld [vmem:[#allocation5 + $0x6ec] ss:$16 sps:$4 sm:$0xff]  }
 0x221   : > { %3056 = vmatprep.mubr.bf16.mxu0 %v8920_v58  ;;  %3635 = vmatprep.mubr.bf16.mxu1 %v8164_v48  ;;  %v7336_v48 = vld [vmem:[#allocation7 + $0x74] ss:$8 sps:$4 sm:$0xff]  }
 0x222   : > { %3775 = vmatpush1.bf16.msra.mxu1 %v7294_v12  ;;  %4555 = vmatprep.subr.bf16.mxu0 %v7327_v14  ;;  %v7334_v12 = vld [vmem:[#allocation7 + $0x70] ss:$8 sps:$4 sm:$0xff]  }
 0x223   : > { %3776 = vmatprep.subr.bf16.mxu1 %v7301_v46  ;;  %4556 = vmatpush1.bf16.msra.mxu0 %v7325_v3  ;;  %v7318_v3 = vld [vmem:[#allocation5 + $0x6e8] ss:$16 sps:$4 sm:$0xff]   ;;  %v7339_v46 = vld [vmem:[#allocation7 + $0x84] ss:$8 sps:$4 sm:$0xff]  }
 0x224   : > { %4557 = vmatprep.subr.bf16.mxu0 %v7330_v30  ;;  %v8390_v14 = vld [vmem:[%s7881_s12 + $0xf8] ss:$28 sps:$4 sm:$0xff]   ;;  %v7337_v30 = vld [vmem:[#allocation7 + $0x80] ss:$8 sps:$4 sm:$0xff]  }
 0x226   : > { %3777 = vmatpush1.bf16.msra.mxu1 %v7299_v32  ;;  %v8397_v32 = vld [vmem:[%s7881_s12 + $0x130] ss:$28 sps:$4 sm:$0xff]  }
 0x227   : > { %3778 = vmatprep.subr.bf16.mxu1 %v7309_v13  ;;  %4558 = vmatpush1.bf16.msra.mxu0 %v7328_v37  ;;  %v7343_v13 = vld [vmem:[#allocation7 + $0xa0] ss:$8 sps:$4 sm:$0xff]   ;;  %v7346_v37 = vld [vmem:[#allocation7 + $0xb0] ss:$8 sps:$4 sm:$0xff]  }
 0x228   : > { %3057 = vmatmul.mubr.bf16.gmra.mrb[12].mxu0 %v8383_v40  ;;  %3636 = vmatmul.mubr.bf16.gmra.mrb[44].mxu1 %v8175_v8  ;;  %v7342_v8 = vld [vmem:[#allocation7 + $0x94] ss:$8 sps:$4 sm:$0xff]  }
 0x229   : > { %3066 = vmatprep.mubr.bf16.mxu0 %v8920_v58  ;;  %3645 = vmatprep.mubr.bf16.mxu1 %v8180_v33  ;;  %v7340_v33 = vld [vmem:[#allocation7 + $0x90] ss:$8 sps:$4 sm:$0xff]  }
 0x22a   : > { %3779 = vmatpush1.bf16.msra.mxu1 %v7307_v62  ;;  %4559 = vmatprep.subr.bf16.mxu0 %v7333_v20  ;;  %v7348_v62 = vld [vmem:[#allocation7 + $0xb4] ss:$8 sps:$4 sm:$0xff]   ;;  %v7351_v20 = vld [vmem:[#allocation7 + $0xc4] ss:$8 sps:$4 sm:$0xff]  }
 0x22b   : > { %3780 = vmatprep.subr.bf16.mxu1 %v7320_v39  ;;  %4560 = vmatpush1.bf16.msra.mxu0 %v7331_v54  ;;  %v7354_v39 = vld [vmem:[#allocation7 + $0xd4] ss:$8 sps:$4 sm:$0xff]   ;;  %v7357_v54 = vld [vmem:[#allocation7 + $0xe4] ss:$8 sps:$4 sm:$0xff]  }
 0x22c   : > { %4561 = vmatprep.subr.bf16.mxu0 %v7336_v48 }
 0x22e   : > { %3781 = vmatpush1.bf16.msra.mxu1 %v7318_v3 }
 0x22f   : > { %4562 = vmatpush1.bf16.msra.mxu0 %v7334_v12 }
 0x230   : > { %3067 = vmatmul.mubr.bf16.gmra.mrb[16].mxu0 %v8390_v14  ;;  %3646 = vmatmul.mubr.bf16.gmra.mrb[48].mxu1 %v8193_v29  ;;  %v7345_v29 = vld [vmem:[#allocation7 + $0xa4] ss:$8 sps:$4 sm:$0xff]  }
 0x231   : > { %3076 = vmatprep.mubr.bf16.mxu0 %v8920_v58  ;;  %3655 = vmatprep.mubr.bf16.mxu1 %v8198_v44  ;;  %v8404_v44 = vld [vmem:[%s7881_s12 + $0x168] ss:$28 sps:$4 sm:$0xff]  }
 0x232   : > { %4563 = vmatprep.subr.bf16.mxu0 %v7339_v46 }
 0x233   : > { %4564 = vmatpush1.bf16.msra.mxu0 %v7337_v30 }
 0x234   : > { %4565 = vmatprep.subr.bf16.mxu0 %v7342_v8 }
 0x237   : > { %4566 = vmatpush1.bf16.msra.mxu0 %v7340_v33 }
 0x238   : > { %3077 = vmatmul.mubr.bf16.gmra.mrb[20].mxu0 %v8397_v32  ;;  %3656 = vmatmul.mubr.bf16.gmra.mrb[52].mxu1 %v8211_v38  ;;  %v8411_v38 = vld [vmem:[%s7881_s12 + $0x1a0] ss:$28 sps:$4 sm:$0xff]  }
 0x239   : > { %3086 = vmatprep.mubr.bf16.mxu0 %v8920_v58  ;;  %3665 = vmatprep.mubr.bf16.mxu1 %v8216_v23  ;;  %v7349_v23 = vld [vmem:[#allocation7 + $0xc0] ss:$8 sps:$4 sm:$0xff]  }
 0x23a   : > { %4567 = vmatprep.subr.bf16.mxu0 %v7345_v29 }
 0x23b   : > { %4568 = vmatpush1.bf16.msra.mxu0 %v7343_v13 }
 0x23c   : > { %4569 = vmatprep.subr.bf16.mxu0 %v7348_v62 }
 0x23f   : > { %4570 = vmatpush1.bf16.msra.mxu0 %v7346_v37  ;;  %v7361_v37 = vld [vmem:[#allocation7 + $0x100] ss:$8 sps:$4 sm:$0xff]  }
 0x240   : > { %3087 = vmatmul.mubr.bf16.gmra.mrb[24].mxu0 %v8404_v44  ;;  %3666 = vmatmul.mubr.bf16.gmra.mrb[56].mxu1 %v8229_v0  ;;  %v8418_v0 = vld [vmem:[%s7881_s12 + $0x1d8] ss:$28 sps:$4 sm:$0xff]  }
 0x241   : > { %3096 = vmatprep.mubr.bf16.mxu0 %v8920_v58  ;;  %3675 = vmatprep.mubr.bf16.mxu1 %v8234_v19  ;;  %v7352_v19 = vld [vmem:[#allocation7 + $0xd0] ss:$8 sps:$4 sm:$0xff]  }
 0x242   : > { %4571 = vmatprep.subr.bf16.mxu0 %v7351_v20 }
 0x243   : > { %4572 = vmatpush1.bf16.msra.mxu0 %v7349_v23  ;;  %v7366_v23 = vld [vmem:[#allocation7 + $0x114] ss:$8 sps:$4 sm:$0xff]  }
 0x244   : > { %4573 = vmatprep.subr.bf16.mxu0 %v7354_v39 }
 0x247   : > { %4574 = vmatpush1.bf16.msra.mxu0 %v7352_v19 }
 0x248   : > { %3097 = vmatmul.mubr.bf16.gmra.mrb[28].mxu0 %v8411_v38  ;;  %3676 = vmatmul.mubr.bf16.gmra.mrb[60].mxu1 %v8247_v45  ;;  %v7297_v45 = vld [vmem:[%s7881_s12 + $0x210] ss:$28 sps:$4 sm:$0xff]  }
 0x249   : > { %3106 = vmatprep.mubr.bf16.mxu0 %v8920_v58  ;;  %3685 = vmatprep.mubr.bf16.mxu1 %v8252_v36  ;;  %v7355_v36 = vld [vmem:[#allocation7 + $0xe0] ss:$8 sps:$4 sm:$0xff]  }
 0x24a   : > { %4575 = vmatprep.subr.bf16.mxu0 %v7357_v54 }
 0x24b   : > { %4576 = vmatpush1.bf16.msra.mxu0 %v7355_v36  ;;  %v7364_v36 = vld [vmem:[#allocation7 + $0x110] ss:$8 sps:$4 sm:$0xff]  }
 0x250   : > { %3107 = vmatmul.mubr.bf16.gmra.mrb[32].mxu0 %v8418_v0  ;;  %3686 = vmatmul.mubr.bf16.gmra.mrb[64].mxu1 %v8265_v1  ;;  %v7298_v1 = vld [vmem:[%s7881_s12 + $0x248] ss:$28 sps:$4 sm:$0xff]  }
 0x251   : > { %3116 = vmatprep.mubr.bf16.mxu0 %v8920_v58  ;;  %3695 = vmatprep.mubr.bf16.mxu1 %v8270_v21  ;;  %v8433_v21 = vld [vmem:[%s7881_s12 + $0x280] ss:$28 sps:$4 sm:$0xff]  }
 0x258   : > { %3117 = vmatmul.mubr.bf16.gmra.mrb[36].mxu0 %v7297_v45  ;;  %3696 = vmatmul.mubr.bf16.gmra.mrb[68].mxu1 %v8283_v18  ;;  %v7360_v18 = vld [vmem:[#allocation7 + $0xf4] ss:$8 sps:$4 sm:$0xff]  }
 0x259   : > { %3126 = vmatprep.mubr.bf16.mxu0 %v8920_v58  ;;  %3705 = vmatprep.mubr.bf16.mxu1 %v8288_v57  ;;  %v7358_v57 = vld [vmem:[#allocation7 + $0xf0] ss:$8 sps:$4 sm:$0xff]  }
 0x25a   : > { %4577 = vmatprep.subr.bf16.mxu0 %v7360_v18 }
 0x25b   : > { %4578 = vmatpush1.bf16.msra.mxu0 %v7358_v57 }
 0x260   : > { %3127 = vmatmul.mubr.bf16.gmra.mrb[40].mxu0 %v7298_v1  ;;  %3706 = vmatmul.mubr.bf16.gmra.mrb[72].mxu1 %v8301_v25  ;;  %v8440_v25 = vld [vmem:[%s7881_s12 + $0x2b8] ss:$28 sps:$4 sm:$0xff]  }
 0x261   : > { %3136 = vmatprep.mubr.bf16.mxu0 %v8920_v58  ;;  %3715 = vmatprep.mubr.bf16.mxu1 %v8306_v24  ;;  %v7363_v24 = vld [vmem:[#allocation7 + $0x104] ss:$8 sps:$4 sm:$0xff]  }
 0x262   : > { %4740 = vmatprep.subr.bf16.mxu0 %v7363_v24 }
 0x268   : > { %3137 = vmatmul.mubr.bf16.gmra.mrb[44].mxu0 %v8433_v21  ;;  %3716 = vmatmul.mubr.bf16.gmra.mrb[76].mxu1 %v8315_v41  ;;  %v8447_v41 = vld [vmem:[%s7881_s12 + $0x2f0] ss:$28 sps:$4 sm:$0xff]  }
 0x269   : > { %3146 = vmatprep.mubr.bf16.mxu0 %v8920_v58  ;;  %3725 = vmatprep.mubr.bf16.mxu1 %v8318_v43  ;;  %v8454_v43 = vld [vmem:[%s7881_s12 + $0x328] ss:$28 sps:$4 sm:$0xff]  }
 0x270   : > { %3147 = vmatmul.mubr.bf16.gmra.mrb[48].mxu0 %v8440_v25  ;;  %3726 = vmatmul.mubr.bf16.gmra.mrb[80].mxu1 %v8325_v59  ;;  %v8461_v59 = vld [vmem:[%s7881_s12 + $0x360] ss:$28 sps:$4 sm:$0xff]   ;;  %s5390_s12 = scalar_lea.sflag [#allocation4], %s7877_s21 }
 0x271   : > { %3156 = vmatprep.mubr.bf16.mxu0 %v8920_v58  ;;  %3735 = vmatprep.mubr.bf16.mxu1 %v8328_v2 }
 0x278   : > { %3157 = vmatmul.mubr.bf16.gmra.mrb[52].mxu0 %v8447_v41  ;;  %3736 = vmatmul.mubr.bf16.gmra.mrb[84].mxu1 %v8335_v52  ;;  %v8491_v52 = vld [vmem:[%s8882_s2] sm:$0xf] }
 0x279   : > { %3166 = vmatprep.mubr.bf16.mxu0 %v8920_v58  ;;  %3745 = vmatprep.mubr.bf16.mxu1 %v8338_v28 }
 0x280   : > { %3167 = vmatmul.mubr.bf16.gmra.mrb[56].mxu0 %v8454_v43  ;;  %3746 = vmatmul.mubr.bf16.gmra.mrb[88].mxu1 %v8345_v53 }
 0x281   : > { %3176 = vmatprep.mubr.bf16.mxu0 %v8920_v58  ;;  %3755 = vmatprep.mubr.bf16.mxu1 %v8348_v15 }
 0x288   : > { %3177 = vmatmul.mubr.bf16.gmra.mrb[60].mxu0 %v8461_v59  ;;  %3756 = vmatmul.mubr.bf16.gmra.mrb[92].mxu1 %v8355_v60 }
 0x289   : > { %3798 = vmatprep.mubr.bf16.mxu1 %v8920_v58 }
 0x290   : > { %3799 = vmatmul.mubr.bf16.vlgmr.msra.gmra.mrb[32].mxu1 %v8362_v4 }
 0x291   : > { %3808 = vmatprep.mubr.bf16.mxu1 %v8920_v58 }
 0x298   : > { %3809 = vmatmul.mubr.bf16.gmra.mrb[36].mxu1 %v8369_v26  ;;  %v699_v26 = vlaneseq }
 0x299   : > { %3818 = vmatprep.mubr.bf16.mxu1 %v8920_v58 }
 0x29a   : > { %v8485_v28 = vshrl.u32 %v699_v26, 7 }
 0x29c   : > { %v701_v2 = vsub.s32 0, %v8485_v28  ;;  %v705_v53 = vsub.s32 1, %v8485_v28 }
 0x29e   : > { %v8498_v15 = vrot.slane %v8491_v52, %v701_v2  ;;  %v8503_v60 = vrot.slane %v8491_v52, %v705_v53 }
 0x2a0   : > { %3819 = vmatmul.mubr.bf16.gmra.mrb[40].mxu1 %v8376_v27 }
 0x2a1   : > { %3828 = vmatprep.mubr.bf16.mxu1 %v8920_v58 }
 0x2a8   : > { %3829 = vmatmul.mubr.bf16.gmra.mrb[44].mxu1 %v8383_v40 }
 0x2a9   : > { %3838 = vmatprep.mubr.bf16.mxu1 %v8920_v58 }
 0x2b0   : > { %3839 = vmatmul.mubr.bf16.gmra.mrb[48].mxu1 %v8390_v14 }
 0x2b1   : > { %3848 = vmatprep.mubr.bf16.mxu1 %v8920_v58 }
 0x2b8   : > { %3849 = vmatmul.mubr.bf16.gmra.mrb[52].mxu1 %v8397_v32 }
 0x2b9   : > { %3858 = vmatprep.mubr.bf16.mxu1 %v8920_v58 }
 0x2c0   : > { %3859 = vmatmul.mubr.bf16.gmra.mrb[56].mxu1 %v8404_v44 }
 0x2c1   : > { %3868 = vmatprep.mubr.bf16.mxu1 %v8920_v58 }
 0x2c8   : > { %3869 = vmatmul.mubr.bf16.gmra.mrb[60].mxu1 %v8411_v38 }
 0x2c9   : > { %3878 = vmatprep.mubr.bf16.mxu1 %v8920_v58 }
 0x2d0   : > { %3879 = vmatmul.mubr.bf16.gmra.mrb[64].mxu1 %v8418_v0 }
 0x2d1   : > { %3888 = vmatprep.mubr.bf16.mxu1 %v8920_v58 }
 0x2d8   : > { %3889 = vmatmul.mubr.bf16.gmra.mrb[68].mxu1 %v7297_v45 }
 0x2d9   : > { %3898 = vmatprep.mubr.bf16.mxu1 %v8920_v58 }
 0x2e0   : > { %3899 = vmatmul.mubr.bf16.gmra.mrb[72].mxu1 %v7298_v1 }
 0x2e1   : > { %3908 = vmatprep.mubr.bf16.mxu1 %v8920_v58 }
 0x2e3   : > { %v3028_v4 = vpop.f32.mrb[0].mxu0 }
 0x2e4   : > { %v6086_v27 = vadd.f32 %v3028_v4, %v8498_v15  ;;  %v3030_v40 = vpop.f32.mrb[1].mxu0 }
 0x2e5   : > { %v6087_v48 = vadd.f32 %v3030_v40, %v8503_v60  ;;  %v3032_v3 = vpop.f32.mrb[2].mxu0 }
 0x2e6   : > { %v6088_v12 = vadd.f32 %v3032_v3, %v8498_v15  ;;  %v3034_v14 = vpop.f32.mrb[3].mxu0  ;;  %v3959_v30 = vmax.f32 %v6086_v27, 0.0  ;;  %v7367_v27 = vld [vmem:[#allocation7 + $0x120] ss:$8 sps:$4 sm:$0xff]   ;;  %v7372_v3 = vld [vmem:[#allocation7 + $0x134] ss:$8 sps:$4 sm:$0xff]  }
 0x2e7   : > { %v6089_v46 = vadd.f32 %v3034_v14, %v8503_v60  ;;  %v3960_v33 = vmax.f32 %v6087_v48, 0.0 }
 0x2e8   : > { %v3963_v8 = vmax.f32 %v6088_v12, 0.0  ;;  %3909 = vmatmul.mubr.bf16.gmra.mrb[76].mxu1 %v8433_v21  ;;  %v7369_v21 = vld [vmem:[#allocation7 + $0x124] ss:$8 sps:$4 sm:$0xff]  }
 0x2e9   : > { %v3964_v32 = vmax.f32 %v6089_v46, 0.0  ;;  %3918 = vmatprep.mubr.bf16.mxu1 %v8920_v58 }
 0x2ea   : > { %v4087_v13 = vpack.c.bf16 %v3963_v8, %v3959_v30  ;;  %v7370_v8 = vld [vmem:[#allocation7 + $0x130] ss:$8 sps:$4 sm:$0xff]  }
 0x2eb   : > { %v4088_v29 = vpack.c.bf16 %v3964_v32, %v3960_v33  ;;  %v3038_v44 = vpop.f32.mrb[4].mxu0 }
 0x2ec   : > { %v6090_v62 = vadd.f32 %v3038_v44, %v8498_v15  ;;  %v3040_v38 = vpop.f32.mrb[5].mxu0 }
 0x2ed   : > { %v6091_v20 = vadd.f32 %v3040_v38, %v8503_v60  ;;  %v3042_v0 = vpop.f32.mrb[6].mxu0  ;;  %4579 = vmatprep.mubr.bf16.mxu0 %v4088_v29 }
 0x2ee   : > { %v6092_v19 = vadd.f32 %v3042_v0, %v8498_v15  ;;  %v3044_v39 = vpop.f32.mrb[7].mxu0  ;;  %4580 = vmatmul.mubr.bf16.vlgmr.msra.gmra.mrb[64].mxu0 %v4087_v13  ;;  %v3967_v54 = vmax.f32 %v6090_v62, 0.0  ;;  %v7375_v13 = vld [vmem:[#allocation7 + $0x144] ss:$8 sps:$4 sm:$0xff]  }
 0x2ef   : > { %v6093_v45 = vadd.f32 %v3044_v39, %v8503_v60  ;;  %4741 = vmatpush1.bf16.msra.mxu0 %v7361_v37  ;;  %v3968_v18 = vmax.f32 %v6091_v20, 0.0 }
 0x2f0   : > { %v3971_v1 = vmax.f32 %v6092_v19, 0.0  ;;  %3919 = vmatmul.mubr.bf16.gmra.mrb[80].mxu1 %v8440_v25  ;;  %4742 = vmatprep.subr.bf16.mxu0 %v7366_v23  ;;  %v7373_v23 = vld [vmem:[#allocation7 + $0x140] ss:$8 sps:$4 sm:$0xff]   ;;  %v7378_v19 = vld [vmem:[#allocation7 + $0x154] ss:$8 sps:$4 sm:$0xff]  }
 0x2f1   : > { %v3972_v57 = vmax.f32 %v6093_v45, 0.0  ;;  %3928 = vmatprep.mubr.bf16.mxu1 %v8920_v58 }
 0x2f2   : > { %v4091_v24 = vpack.c.bf16 %v3971_v1, %v3967_v54  ;;  %v7376_v1 = vld [vmem:[#allocation7 + $0x150] ss:$8 sps:$4 sm:$0xff]  }
 0x2f3   : > { %v4092_v26 = vpack.c.bf16 %v3972_v57, %v3968_v18  ;;  %v3048_v4 = vpop.f32.mrb[8].mxu0  ;;  %4743 = vmatpush1.bf16.msra.mxu0 %v7364_v36  ;;  %v7381_v57 = vld [vmem:[#allocation7 + $0x164] ss:$8 sps:$4 sm:$0xff]  }
 0x2f4   : > { %v6094_v40 = vadd.f32 %v3048_v4, %v8498_v15  ;;  %v3050_v48 = vpop.f32.mrb[9].mxu0  ;;  %4744 = vmatprep.subr.bf16.mxu0 %v7369_v21 }
 0x2f5   : > { %v6095_v12 = vadd.f32 %v3050_v48, %v8503_v60  ;;  %v3052_v14 = vpop.f32.mrb[10].mxu0  ;;  %4589 = vmatprep.mubr.bf16.mxu0 %v4092_v26  ;;  %v7379_v48 = vld [vmem:[#allocation7 + $0x160] ss:$8 sps:$4 sm:$0xff]  }
 0x2f6   : > { %v6096_v25 = vadd.f32 %v3052_v14, %v8498_v15  ;;  %v3054_v46 = vpop.f32.mrb[11].mxu0  ;;  %4590 = vmatmul.mubr.bf16.gmra.mrb[68].mxu0 %v4091_v24  ;;  %v3975_v33 = vmax.f32 %v6094_v40, 0.0  ;;  %v7384_v14 = vld [vmem:[#allocation7 + $0x174] ss:$8 sps:$4 sm:$0xff]  }
 0x2f7   : > { %v6097_v30 = vadd.f32 %v3054_v46, %v8503_v60  ;;  %4745 = vmatpush1.bf16.msra.mxu0 %v7367_v27  ;;  %v3976_v29 = vmax.f32 %v6095_v12, 0.0 }
 0x2f8   : > { %v3979_v32 = vmax.f32 %v6096_v25, 0.0  ;;  %3929 = vmatmul.mubr.bf16.gmra.mrb[84].mxu1 %v8447_v41  ;;  %4746 = vmatprep.subr.bf16.mxu0 %v7372_v3 }
 0x2f9   : > { %v3980_v44 = vmax.f32 %v6097_v30, 0.0  ;;  %3938 = vmatprep.mubr.bf16.mxu1 %v8920_v58 }
 0x2fa   : > { %v4095_v37 = vpack.c.bf16 %v3979_v32, %v3975_v33 }
 0x2fb   : > { %v4096_v62 = vpack.c.bf16 %v3980_v44, %v3976_v29  ;;  %v3058_v38 = vpop.f32.mrb[12].mxu0  ;;  %4747 = vmatpush1.bf16.msra.mxu0 %v7370_v8  ;;  %v7382_v8 = vld [vmem:[#allocation7 + $0x170] ss:$8 sps:$4 sm:$0xff]  }
 0x2fc   : > { %v6098_v20 = vadd.f32 %v3058_v38, %v8498_v15  ;;  %v3060_v0 = vpop.f32.mrb[13].mxu0  ;;  %4748 = vmatprep.subr.bf16.mxu0 %v7375_v13  ;;  %v7387_v13 = vld [vmem:[#allocation7 + $0x184] ss:$8 sps:$4 sm:$0xff]  }
 0x2fd   : > { %v6099_v39 = vadd.f32 %v3060_v0, %v8503_v60  ;;  %v3062_v45 = vpop.f32.mrb[14].mxu0  ;;  %4599 = vmatprep.mubr.bf16.mxu0 %v4096_v62 }
 0x2fe   : > { %v6100_v41 = vadd.f32 %v3062_v45, %v8498_v15  ;;  %v3064_v36 = vpop.f32.mrb[15].mxu0  ;;  %4600 = vmatmul.mubr.bf16.gmra.mrb[72].mxu0 %v4095_v37  ;;  %v3983_v21 = vmax.f32 %v6098_v20, 0.0 }
 0x2ff   : > { %v6101_v54 = vadd.f32 %v3064_v36, %v8503_v60  ;;  %4749 = vmatpush1.bf16.msra.mxu0 %v7373_v23  ;;  %v3984_v24 = vmax.f32 %v6099_v39, 0.0  ;;  %v7385_v23 = vld [vmem:[#allocation7 + $0x180] ss:$8 sps:$4 sm:$0xff]  }
 0x300   : > { %v3987_v18 = vmax.f32 %v6100_v41, 0.0  ;;  %3939 = vmatmul.mubr.bf16.gmra.mrb[88].mxu1 %v8454_v43  ;;  %4750 = vmatprep.subr.bf16.mxu0 %v7378_v19  ;;  %v7390_v19 = vld [vmem:[#allocation7 + $0x194] ss:$8 sps:$4 sm:$0xff]  }
 0x301   : > { %v3988_v26 = vmax.f32 %v6101_v54, 0.0  ;;  %3948 = vmatprep.mubr.bf16.mxu1 %v8920_v58  ;;  %v7388_v54 = vld [vmem:[#allocation7 + $0x190] ss:$8 sps:$4 sm:$0xff]  }
 0x302   : > { %v4099_v4 = vpack.c.bf16 %v3987_v18, %v3983_v21  ;;  %v7393_v18 = vld [vmem:[#allocation7 + $0x1a4] ss:$8 sps:$4 sm:$0xff]  }
 0x303   : > { %v4100_v27 = vpack.c.bf16 %v3988_v26, %v3984_v24  ;;  %v3068_v40 = vpop.f32.mrb[16].mxu0  ;;  %4751 = vmatpush1.bf16.msra.mxu0 %v7376_v1 }
 0x304   : > { %v6102_v3 = vadd.f32 %v3068_v40, %v8498_v15  ;;  %v3070_v12 = vpop.f32.mrb[17].mxu0  ;;  %4752 = vmatprep.subr.bf16.mxu0 %v7381_v57  ;;  %v7391_v40 = vld [vmem:[#allocation7 + $0x1a0] ss:$8 sps:$4 sm:$0xff]  }
 0x305   : > { %v6103_v25 = vadd.f32 %v3070_v12, %v8503_v60  ;;  %v3072_v46 = vpop.f32.mrb[18].mxu0  ;;  %4609 = vmatprep.mubr.bf16.mxu0 %v4100_v27  ;;  %v7396_v12 = vld [vmem:[#allocation7 + $0x1b4] ss:$8 sps:$4 sm:$0xff]  }
 0x306   : > { %v6104_v43 = vadd.f32 %v3072_v46, %v8498_v15  ;;  %v3074_v30 = vpop.f32.mrb[19].mxu0  ;;  %4610 = vmatmul.mubr.bf16.gmra.mrb[76].mxu0 %v4099_v4  ;;  %v3991_v33 = vmax.f32 %v6102_v3, 0.0 }
 0x307   : > { %v6105_v58 = vadd.f32 %v3074_v30, %v8503_v60  ;;  %4753 = vmatpush1.bf16.msra.mxu0 %v7379_v48  ;;  %v3992_v29 = vmax.f32 %v6103_v25, 0.0 }
 0x308   : > { %v3995_v32 = vmax.f32 %v6104_v43, 0.0  ;;  %3949 = vmatmul.mubr.bf16.gmra.mrb[92].mxu1 %v8461_v59  ;;  %4754 = vmatprep.subr.bf16.mxu0 %v7384_v14 }
 0x309   : > { %v3996_v44 = vmax.f32 %v6105_v58, 0.0  ;;  %v7394_v58 = vld [vmem:[#allocation7 + $0x1b0] ss:$8 sps:$4 sm:$0xff]  }
 0x30a   : > { %v4103_v37 = vpack.c.bf16 %v3995_v32, %v3991_v33  ;;  %v7399_v32 = vld [vmem:[#allocation7 + $0x1c4] ss:$8 sps:$4 sm:$0xff]  }
 0x30b   : > { %v4104_v62 = vpack.c.bf16 %v3996_v44, %v3992_v29  ;;  %v3078_v38 = vpop.f32.mrb[20].mxu0  ;;  %4755 = vmatpush1.bf16.msra.mxu0 %v7382_v8 }
 0x30c   : > { %v6106_v20 = vadd.f32 %v3078_v38, %v8498_v15  ;;  %v3080_v0 = vpop.f32.mrb[21].mxu0  ;;  %4756 = vmatprep.subr.bf16.mxu0 %v7387_v13  ;;  %v7397_v38 = vld [vmem:[#allocation7 + $0x1c0] ss:$8 sps:$4 sm:$0xff]  }
 0x30d   : > { %v6107_v39 = vadd.f32 %v3080_v0, %v8503_v60  ;;  %v3082_v45 = vpop.f32.mrb[22].mxu0  ;;  %4619 = vmatprep.mubr.bf16.mxu0 %v4104_v62  ;;  %v7402_v0 = vld [vmem:[#allocation7 + $0x1d4] ss:$8 sps:$4 sm:$0xff]  }
 0x30e   : > { %v6108_v59 = vadd.f32 %v3082_v45, %v8498_v15  ;;  %v3084_v41 = vpop.f32.mrb[23].mxu0  ;;  %4620 = vmatmul.mubr.bf16.gmra.mrb[80].mxu0 %v4103_v37  ;;  %v3999_v1 = vmax.f32 %v6106_v20, 0.0 }
 0x30f   : > { %v6109_v36 = vadd.f32 %v3084_v41, %v8503_v60  ;;  %4757 = vmatpush1.bf16.msra.mxu0 %v7385_v23  ;;  %v4000_v57 = vmax.f32 %v6107_v39, 0.0 }
 0x310   : > { %v4003_v21 = vmax.f32 %v6108_v59, 0.0  ;;  %4758 = vmatprep.subr.bf16.mxu0 %v7390_v19 }
 0x311   : > { %v4004_v24 = vmax.f32 %v6109_v36, 0.0  ;;  %v7400_v36 = vld [vmem:[#allocation7 + $0x1d0] ss:$8 sps:$4 sm:$0xff]  }
 0x312   : > { %v4107_v26 = vpack.c.bf16 %v4003_v21, %v3999_v1  ;;  %v7405_v21 = vld [vmem:[#allocation7 + $0x1e4] ss:$8 sps:$4 sm:$0xff]  }
 0x313   : > { %v4108_v4 = vpack.c.bf16 %v4004_v24, %v4000_v57  ;;  %v3088_v27 = vpop.f32.mrb[24].mxu0  ;;  %4759 = vmatpush1.bf16.msra.mxu0 %v7388_v54  ;;  %v2530_v24 = vadd.f32 %v8170_v7, %v8498_v15 }
 0x314   : > { %v6110_v48 = vadd.f32 %v3088_v27, %v8498_v15  ;;  %v3090_v3 = vpop.f32.mrb[25].mxu0  ;;  %4760 = vmatprep.subr.bf16.mxu0 %v7393_v18 }
 0x315   : > { %v6111_v14 = vadd.f32 %v3090_v3, %v8503_v60  ;;  %v3092_v25 = vpop.f32.mrb[26].mxu0  ;;  %4629 = vmatprep.mubr.bf16.mxu0 %v4108_v4  ;;  %v2532_v4 = vadd.f32 %v8172_v6, %v8503_v60  ;;  %v2534_v3 = vadd.f32 %v8177_v9, %v8498_v15 }
 0x316   : > { %v6112_v46 = vadd.f32 %v3092_v25, %v8498_v15  ;;  %v3094_v43 = vpop.f32.mrb[27].mxu0  ;;  %4630 = vmatmul.mubr.bf16.gmra.mrb[84].mxu0 %v4107_v26  ;;  %v4007_v8 = vmax.f32 %v6110_v48, 0.0  ;;  %v7403_v48 = vld [vmem:[#allocation7 + $0x1e0] ss:$8 sps:$4 sm:$0xff]   ;;  %v7408_v25 = vld [vmem:[#allocation7 + $0x1f4] ss:$8 sps:$4 sm:$0xff]  }
 0x317   : > { %v6113_v30 = vadd.f32 %v3094_v43, %v8503_v60  ;;  %4761 = vmatpush1.bf16.msra.mxu0 %v7391_v40  ;;  %v4008_v13 = vmax.f32 %v6111_v14, 0.0 }
 0x318   : > { %v4011_v33 = vmax.f32 %v6112_v46, 0.0  ;;  %4762 = vmatprep.subr.bf16.mxu0 %v7396_v12  ;;  %v2536_v46 = vadd.f32 %v8182_v10, %v8503_v60  ;;  %v2542_v10 = vadd.f32 %v8190_v5, %v8503_v60 }
 0x319   : > { %v4012_v29 = vmax.f32 %v6113_v30, 0.0 }
 0x31a   : > { %v4111_v44 = vpack.c.bf16 %v4011_v33, %v4007_v8  ;;  %v7406_v8 = vld [vmem:[#allocation7 + $0x1f0] ss:$8 sps:$4 sm:$0xff]  }
 0x31b   : > { %v4112_v37 = vpack.c.bf16 %v4012_v29, %v4008_v13  ;;  %v3098_v62 = vpop.f32.mrb[28].mxu0  ;;  %4763 = vmatpush1.bf16.msra.mxu0 %v7394_v58  ;;  %v2540_v29 = vadd.f32 %v8188_v35, %v8498_v15 }
 0x31c   : > { %v6114_v23 = vadd.f32 %v3098_v62, %v8498_v15  ;;  %v3100_v20 = vpop.f32.mrb[29].mxu0  ;;  %4764 = vmatprep.subr.bf16.mxu0 %v7399_v32 }
 0x31d   : > { %v6115_v19 = vadd.f32 %v3100_v20, %v8503_v60  ;;  %v3102_v39 = vpop.f32.mrb[30].mxu0  ;;  %4639 = vmatprep.mubr.bf16.mxu0 %v4112_v37 }
 0x31e   : > { %v6116_v45 = vadd.f32 %v3102_v39, %v8498_v15  ;;  %v3104_v59 = vpop.f32.mrb[31].mxu0  ;;  %4640 = vmatmul.mubr.bf16.gmra.mrb[88].mxu0 %v4111_v44  ;;  %v4015_v54 = vmax.f32 %v6114_v23, 0.0 }
 0x31f   : > { %v6117_v41 = vadd.f32 %v3104_v59, %v8503_v60  ;;  %4765 = vmatpush1.bf16.msra.mxu0 %v7397_v38  ;;  %v4016_v18 = vmax.f32 %v6115_v19, 0.0  ;;  %v2544_v38 = vadd.f32 %v8195_v55, %v8498_v15 }
 0x320   : > { %v4019_v1 = vmax.f32 %v6116_v45, 0.0  ;;  %4766 = vmatprep.subr.bf16.mxu0 %v7402_v0  ;;  %v2546_v0 = vadd.f32 %v8200_v11, %v8503_v60 }
 0x321   : > { %v4020_v57 = vmax.f32 %v6117_v41, 0.0 }
 0x322   : > { %v4115_v26 = vpack.c.bf16 %v4019_v1, %v4015_v54  ;;  %v2550_v1 = vadd.f32 %v8206_v16, %v8498_v15 }
 0x323   : > { %v4116_v27 = vpack.c.bf16 %v4020_v57, %v4016_v18  ;;  %v3108_v40 = vpop.f32.mrb[32].mxu0  ;;  %4767 = vmatpush1.bf16.msra.mxu0 %v7400_v36  ;;  %v2554_v57 = vadd.f32 %v8213_v49, %v8498_v15 }
 0x324   : > { %v6119_v12 = vadd.f32 %v3108_v40, %v2530_v24  ;;  %v3110_v14 = vpop.f32.mrb[33].mxu0  ;;  %4768 = vmatprep.subr.bf16.mxu0 %v7405_v21  ;;  %v2552_v21 = vadd.f32 %v8208_v47, %v8503_v60 }
 0x325   : > { %v6121_v43 = vadd.f32 %v3110_v14, %v2532_v4  ;;  %v3112_v7 = vpop.f32.mrb[34].mxu0  ;;  %4649 = vmatprep.mubr.bf16.mxu0 %v4116_v27  ;;  %v2556_v4 = vadd.f32 %v8218_v56, %v8503_v60 }
 0x326   : > { %v6123_v30 = vadd.f32 %v3112_v7, %v2534_v3  ;;  %v3114_v58 = vpop.f32.mrb[35].mxu0  ;;  %4650 = vmatmul.mubr.bf16.gmra.mrb[92].mxu0 %v4115_v26  ;;  %v4023_v33 = vmax.f32 %v6119_v12, 0.0 }
 0x327   : > { %v6125_v6 = vadd.f32 %v3114_v58, %v2536_v46  ;;  %4769 = vmatpush1.bf16.msra.mxu0 %v7403_v48  ;;  %v4024_v9 = vmax.f32 %v6121_v43, 0.0  ;;  %v2560_v46 = vadd.f32 %v8224_v51, %v8498_v15  ;;  %v2562_v43 = vadd.f32 %v8226_v61, %v8503_v60 }
 0x328   : > { %v4027_v32 = vmax.f32 %v6123_v30, 0.0  ;;  %4770 = vmatprep.subr.bf16.mxu0 %v7408_v25  ;;  %v2564_v30 = vadd.f32 %v8231_v34, %v8498_v15 }
 0x329   : > { %v4028_v13 = vmax.f32 %v6125_v6, 0.0 }
 0x32a   : > { %v4119_v44 = vpack.c.bf16 %v4027_v32, %v4023_v33 }
 0x32b   : > { %v4120_v37 = vpack.c.bf16 %v4028_v13, %v4024_v9  ;;  %v3118_v62 = vpop.f32.mrb[36].mxu0  ;;  %4771 = vmatpush1.bf16.msra.mxu0 %v7406_v8  ;;  %v2566_v8 = vadd.f32 %v8236_v63, %v8503_v60 }
 0x32c   : > { %v6127_v23 = vadd.f32 %v3118_v62, %v2540_v29  ;;  %v3120_v20 = vpop.f32.mrb[37].mxu0  ;;  %v2572_v62 = vadd.f32 %v8244_v42, %v8503_v60 }
 0x32d   : > { %v6129_v19 = vadd.f32 %v3120_v20, %v2542_v10  ;;  %v3122_v39 = vpop.f32.mrb[38].mxu0  ;;  %4659 = vmatprep.mubr.bf16.mxu0 %v4120_v37  ;;  %v2570_v37 = vadd.f32 %v8242_v22, %v8498_v15 }
 0x32e   : > { %v6131_v45 = vadd.f32 %v3122_v39, %v2544_v38  ;;  %v3124_v35 = vpop.f32.mrb[39].mxu0  ;;  %4660 = vmatmul.mubr.bf16.gmra.mrb[96].mxu0 %v4119_v44  ;;  %v4031_v41 = vmax.f32 %v6127_v23, 0.0  ;;  %v2574_v23 = vadd.f32 %v8249_v31, %v8498_v15 }
 0x32f   : > { %v6133_v59 = vadd.f32 %v3124_v35, %v2546_v0  ;;  %v4032_v36 = vmax.f32 %v6129_v19, 0.0  ;;  %v2576_v19 = vadd.f32 %v8254_v17, %v8503_v60 }
 0x330   : > { %v4035_v5 = vmax.f32 %v6131_v45, 0.0 }
 0x331   : > { %v4036_v54 = vmax.f32 %v6133_v59, 0.0 }
 0x332   : > { %v4123_v55 = vpack.c.bf16 %v4035_v5, %v4031_v41 }
 0x333   : > { %v4124_v18 = vpack.c.bf16 %v4036_v54, %v4032_v36  ;;  %v3128_v11 = vpop.f32.mrb[40].mxu0  ;;  %v2580_v54 = vadd.f32 %v8260_v50, %v8498_v15 }
 0x334   : > { %v6135_v24 = vadd.f32 %v3128_v11, %v2550_v1  ;;  %v3130_v26 = vpop.f32.mrb[41].mxu0  ;;  %v8921_v1 = vld [vmem:[#allocation15_spill] sm:$0xff] }
 0x335   : > { %v6137_v27 = vadd.f32 %v3130_v26, %v2552_v21  ;;  %v3132_v40 = vpop.f32.mrb[42].mxu0  ;;  %4669 = vmatprep.mubr.bf16.mxu0 %v4124_v18  ;;  %v8922_v18 = vld [vmem:[#allocation16_spill] sm:$0xff]  ;;  %v8923_v26 = vld [vmem:[#allocation17_spill] sm:$0xff] }
 0x336   : > { %v6139_v48 = vadd.f32 %v3132_v40, %v2554_v57  ;;  %v3134_v3 = vpop.f32.mrb[43].mxu0  ;;  %4670 = vmatmul.mubr.bf16.gmra.mrb[100].mxu0 %v4123_v55  ;;  %v4039_v12 = vmax.f32 %v6135_v24, 0.0  ;;  %v2582_v55 = vadd.f32 %v8921_v1, %v8503_v60  ;;  %v2584_v11 = vadd.f32 %v8922_v18, %v8498_v15 }
 0x337   : > { %v6141_v16 = vadd.f32 %v3134_v3, %v2556_v4  ;;  %v4040_v47 = vmax.f32 %v6137_v27, 0.0  ;;  %v2586_v4 = vadd.f32 %v8923_v26, %v8503_v60 }
 0x338   : > { %v4043_v14 = vmax.f32 %v6139_v48, 0.0 }
 0x339   : > { %v4044_v25 = vmax.f32 %v6141_v16, 0.0  ;;  %v7409_v16 = vld [vmem:[#allocation8 + $0x40] sm:$0xff]  }
 0x33a   : > { %v4127_v49 = vpack.c.bf16 %v4043_v14, %v4039_v12  ;;  %5942 = vmatprep.subr.bf16.mxu1 %v7409_v16 }
 0x33b   : > { %v4128_v7 = vpack.c.bf16 %v4044_v25, %v4040_v47  ;;  %v3138_v56 = vpop.f32.mrb[44].mxu0 }
 0x33c   : > { %v6143_v58 = vadd.f32 %v3138_v56, %v2560_v46  ;;  %v3140_v6 = vpop.f32.mrb[45].mxu0  ;;  %v8924_v46 = vld [vmem:[#allocation18_spill] sm:$0xff]  ;;  %v8925_v56 = vld [vmem:[#allocation19_spill] sm:$0xff] }
 0x33d   : > { %v6145_v33 = vadd.f32 %v3140_v6, %v2562_v43  ;;  %v3142_v32 = vpop.f32.mrb[46].mxu0  ;;  %4679 = vmatprep.mubr.bf16.mxu0 %v4128_v7  ;;  %v7410_v7 = vld [vmem:[#allocation8] sm:$0xff]  }
 0x33e   : > { %v6147_v9 = vadd.f32 %v3142_v32, %v2564_v30  ;;  %v3144_v13 = vpop.f32.mrb[47].mxu0  ;;  %4680 = vmatmul.mubr.bf16.gmra.mrb[104].mxu0 %v4127_v49  ;;  %v4047_v29 = vmax.f32 %v6143_v58, 0.0  ;;  %v2590_v49 = vadd.f32 %v8924_v46, %v8498_v15  ;;  %v2592_v30 = vadd.f32 %v8925_v56, %v8503_v60  ;;  %5943 = vmatpush3.bf16.msra.mxu1 %v7410_v7  ;;  %v7413_v46 = vld [vmem:[#allocation8 + $0x50] sm:$0xff]  }
 0x33f   : > { %v6149_v51 = vadd.f32 %v3144_v13, %v2566_v8  ;;  %v4048_v61 = vmax.f32 %v6145_v33, 0.0  ;;  %v8926_v8 = vld [vmem:[#allocation20_spill] sm:$0xff]  ;;  %v8927_v13 = vld [vmem:[#allocation21_spill] sm:$0xff] }
 0x340   : > { %v4051_v44 = vmax.f32 %v6147_v9, 0.0  ;;  %v2594_v33 = vadd.f32 %v8926_v8, %v8498_v15 }
 0x341   : > { %v4052_v10 = vmax.f32 %v6149_v51, 0.0  ;;  %v2596_v51 = vadd.f32 %v8927_v13, %v8503_v60 }
 0x342   : > { %v4131_v34 = vpack.c.bf16 %v4051_v44, %v4047_v29 }
 0x343   : > { %v4132_v38 = vpack.c.bf16 %v4052_v10, %v4048_v61  ;;  %v3148_v63 = vpop.f32.mrb[48].mxu0 }
 0x344   : > { %v6151_v20 = vadd.f32 %v3148_v63, %v2570_v37  ;;  %v3150_v0 = vpop.f32.mrb[49].mxu0 }
 0x345   : > { %v6153_v39 = vadd.f32 %v3150_v0, %v2572_v62  ;;  %v3152_v45 = vpop.f32.mrb[50].mxu0  ;;  %4689 = vmatprep.mubr.bf16.mxu0 %v4132_v38 }
 0x346   : > { %v6155_v35 = vadd.f32 %v3152_v45, %v2574_v23  ;;  %v3154_v59 = vpop.f32.mrb[51].mxu0  ;;  %4690 = vmatmul.mubr.bf16.gmra.mrb[108].mxu0 %v4131_v34  ;;  %v4055_v41 = vmax.f32 %v6151_v20, 0.0  ;;  %v8928_v23 = vld [vmem:[#allocation22_spill] sm:$0xff] }
 0x347   : > { %v6157_v22 = vadd.f32 %v3154_v59, %v2576_v19  ;;  %v4056_v42 = vmax.f32 %v6153_v39, 0.0  ;;  %v2600_v20 = vadd.f32 %v8928_v23, %v8498_v15  ;;  %v8929_v19 = vld [vmem:[#allocation23_spill] sm:$0xff]  ;;  %v8930_v59 = vld [vmem:[#allocation24_spill] sm:$0xff] }
 0x348   : > { %v4059_v5 = vmax.f32 %v6155_v35, 0.0  ;;  %v2602_v39 = vadd.f32 %v8929_v19, %v8503_v60 }
 0x349   : > { %v4060_v36 = vmax.f32 %v6157_v22, 0.0  ;;  %v2604_v22 = vadd.f32 %v8930_v59, %v8498_v15 }
 0x34a   : > { %v4135_v31 = vpack.c.bf16 %v4059_v5, %v4055_v41 }
 0x34b   : > { %v4136_v21 = vpack.c.bf16 %v4060_v36, %v4056_v42  ;;  %v3158_v17 = vpop.f32.mrb[52].mxu0  ;;  %v709_v42 = vsub.s32 2, %v8485_v28  ;;  %v8931_v36 = vld [vmem:[#allocation25_spill] sm:$0xff] }
 0x34c   : > { %v6159_v57 = vadd.f32 %v3158_v17, %v2580_v54  ;;  %v3160_v24 = vpop.f32.mrb[53].mxu0  ;;  %v2606_v54 = vadd.f32 %v8931_v36, %v8503_v60 }
 0x34d   : > { %v6161_v27 = vadd.f32 %v3160_v24, %v2582_v55  ;;  %v3162_v40 = vpop.f32.mrb[54].mxu0  ;;  %4699 = vmatprep.mubr.bf16.mxu0 %v4136_v21  ;;  %v713_v55 = vsub.s32 3, %v8485_v28  ;;  %v8613_v15 = vrot.slane %v8491_v52, %v709_v42  ;;  %v7422_v42 = vld [vmem:[#allocation8 + $0x30] sm:$0xff]  }
 0x34e   : > { %v6163_v48 = vadd.f32 %v3162_v40, %v2584_v11  ;;  %v3164_v3 = vpop.f32.mrb[55].mxu0  ;;  %4700 = vmatmul.mubr.bf16.gmra.mrb[112].mxu0 %v4135_v31  ;;  %v4063_v12 = vmax.f32 %v6159_v57, 0.0  ;;  %v7411_v11 = vld [vmem:[#allocation8 + $0x48] sm:$0xff]  }
 0x34f   : > { %v6165_v50 = vadd.f32 %v3164_v3, %v2586_v4  ;;  %v4064_v47 = vmax.f32 %v6161_v27, 0.0  ;;  %v8616_v27 = vrot.slane %v8491_v52, %v713_v55  ;;  %5944 = vmatprep.subr.bf16.mxu1 %v7411_v11  ;;  %v7412_v40 = vld [vmem:[#allocation8 + $0x8] sm:$0xff]   ;;  %v7414_v52 = vld [vmem:[#allocation8 + $0x10] sm:$0xff]   ;;  %v7424_v11 = vld [vmem:[#allocation8 + $0x38] sm:$0xff]  }
 0x350   : > { %v4067_v14 = vmax.f32 %v6163_v48, 0.0  ;;  %5945 = vmatpush3.bf16.msra.mxu1 %v7412_v40 }
 0x351   : > { %v4068_v25 = vmax.f32 %v6165_v50, 0.0  ;;  %5946 = vmatprep.subr.bf16.mxu1 %v7413_v46 }
 0x352   : > { %v4139_v43 = vpack.c.bf16 %v4067_v14, %v4063_v12 }
 0x353   : > { %v4140_v58 = vpack.c.bf16 %v4068_v25, %v4064_v47  ;;  %v3168_v6 = vpop.f32.mrb[56].mxu0 }
 0x354   : > { %v6167_v32 = vadd.f32 %v3168_v6, %v2590_v49  ;;  %v3170_v9 = vpop.f32.mrb[57].mxu0  ;;  %v7415_v49 = vld [vmem:[#allocation8 + $0x58] sm:$0xff]   ;;  %5947 = vmatpush3.bf16.msra.mxu1 %v7414_v52 }
 0x355   : > { %v6169_v29 = vadd.f32 %v3170_v9, %v2592_v30  ;;  %v3172_v44 = vpop.f32.mrb[58].mxu0  ;;  %4709 = vmatprep.mubr.bf16.mxu0 %v4140_v58  ;;  %v7416_v6 = vld [vmem:[#allocation8 + $0x18] sm:$0xff]   ;;  %5948 = vmatprep.subr.bf16.mxu1 %v7415_v49 }
 0x356   : > { %v6171_v61 = vadd.f32 %v3172_v44, %v2594_v33  ;;  %v3174_v10 = vpop.f32.mrb[59].mxu0  ;;  %4710 = vmatmul.mubr.bf16.gmra.mrb[116].mxu0 %v4139_v43  ;;  %v4071_v34 = vmax.f32 %v6167_v32, 0.0  ;;  %v7417_v33 = vld [vmem:[#allocation8 + $0x60] sm:$0xff]  }
 0x357   : > { %v6173_v37 = vadd.f32 %v3174_v10, %v2596_v51  ;;  %v4072_v38 = vmax.f32 %v6169_v29, 0.0 }
 0x358   : > { %v4075_v62 = vmax.f32 %v6171_v61, 0.0  ;;  %5949 = vmatpush3.bf16.msra.mxu1 %v7416_v6  ;;  %v7418_v61 = vld [vmem:[#allocation8 + $0x20] sm:$0xff]  }
 0x359   : > { %v4076_v63 = vmax.f32 %v6173_v37, 0.0  ;;  %5950 = vmatprep.subr.bf16.mxu1 %v7417_v33 }
 0x35a   : > { %v4143_v0 = vpack.c.bf16 %v4075_v62, %v4071_v34  ;;  %v7419_v34 = vld [vmem:[#allocation8 + $0x68] sm:$0xff]  }
 0x35b   : > { %v4144_v45 = vpack.c.bf16 %v4076_v63, %v4072_v38  ;;  %v3178_v35 = vpop.f32.mrb[60].mxu0 }
 0x35c   : > { %v6175_v41 = vadd.f32 %v3178_v35, %v2600_v20  ;;  %v3180_v5 = vpop.f32.mrb[61].mxu0  ;;  %5951 = vmatpush3.bf16.msra.mxu1 %v7418_v61 }
 0x35d   : > { %v6177_v31 = vadd.f32 %v3180_v5, %v2602_v39  ;;  %v3182_v1 = vpop.f32.mrb[62].mxu0  ;;  %4719 = vmatprep.mubr.bf16.mxu0 %v4144_v45  ;;  %5952 = vmatprep.subr.bf16.mxu1 %v7419_v34  ;;  %v7421_v39 = vld [vmem:[#allocation8 + $0x70] sm:$0xff]  }
 0x35e   : > { %v6179_v21 = vadd.f32 %v3182_v1, %v2604_v22  ;;  %v3184_v17 = vpop.f32.mrb[63].mxu0  ;;  %4720 = vmatmul.mubr.bf16.gmra.mrb[120].mxu0 %v4143_v0  ;;  %v4079_v57 = vmax.f32 %v6175_v41, 0.0  ;;  %v7420_v0 = vld [vmem:[#allocation8 + $0x28] sm:$0xff]  }
 0x35f   : > { %v6181_v18 = vadd.f32 %v3184_v17, %v2606_v54  ;;  %v4080_v26 = vmax.f32 %v6177_v31, 0.0  ;;  %v7423_v31 = vld [vmem:[#allocation8 + $0x78] sm:$0xff]  }
 0x360   : > { %v4083_v24 = vmax.f32 %v6179_v21, 0.0  ;;  %5953 = vmatpush3.bf16.msra.mxu1 %v7420_v0 }
 0x361   : > { %v4084_v4 = vmax.f32 %v6181_v18, 0.0  ;;  %5954 = vmatprep.subr.bf16.mxu1 %v7421_v39 }
 0x362   : > { %v4147_v60 = vpack.c.bf16 %v4083_v24, %v4079_v57 }
 0x363   : > { %v4148_v48 = vpack.c.bf16 %v4084_v4, %v4080_v26  ;;  %v3800_v3 = vpop.f32.mrb[32].mxu1 }
 0x364   : > { %v6182_v50 = vadd.f32 %v3800_v3, %v8613_v15  ;;  %v3802_v16 = vpop.f32.mrb[33].mxu1  ;;  %5955 = vmatpush3.bf16.msra.mxu1 %v7422_v42 }
 0x365   : > { %v6183_v12 = vadd.f32 %v3802_v16, %v8616_v27  ;;  %v3804_v14 = vpop.f32.mrb[34].mxu1  ;;  %4729 = vmatprep.mubr.bf16.mxu0 %v4148_v48  ;;  %5956 = vmatprep.subr.bf16.mxu1 %v7423_v31 }
 0x366   : > { %v6184_v47 = vadd.f32 %v3804_v14, %v8613_v15  ;;  %v3806_v25 = vpop.f32.mrb[35].mxu1  ;;  %4730 = vmatmul.mubr.bf16.gmra.mrb[124].mxu0 %v4147_v60  ;;  %v3961_v7 = vmax.f32 %v6182_v50, 0.0 }
 0x367   : > { %v6185_v43 = vadd.f32 %v3806_v25, %v8616_v27  ;;  %v3962_v30 = vmax.f32 %v6183_v12, 0.0 }
 0x368   : > { %v3965_v56 = vmax.f32 %v6184_v47, 0.0  ;;  %5957 = vmatpush3.bf16.msra.mxu1 %v7424_v11 }
 0x369   : > { %v3966_v58 = vmax.f32 %v6185_v43, 0.0 }
 0x36a   : > { %v4089_v8 = vpack.c.bf16 %v3965_v56, %v3961_v7 }
 0x36b   : > { %v4090_v32 = vpack.c.bf16 %v3966_v58, %v3962_v30  ;;  %v3810_v9 = vpop.f32.mrb[36].mxu1 }
 0x36c   : > { %v6186_v13 = vadd.f32 %v3810_v9, %v8613_v15  ;;  %v3812_v51 = vpop.f32.mrb[37].mxu1 }
 0x36d   : > { %v6187_v29 = vadd.f32 %v3812_v51, %v8616_v27  ;;  %v3814_v44 = vpop.f32.mrb[38].mxu1  ;;  %4772 = vmatprep.mubr.bf16.mxu0 %v4090_v32 }
 0x36e   : > { %v6188_v10 = vadd.f32 %v3814_v44, %v8613_v15  ;;  %v3816_v37 = vpop.f32.mrb[39].mxu1  ;;  %4773 = vmatmul.mubr.bf16.vlgmr.msra.gmra.mrb[64].mxu0 %v4089_v8  ;;  %v3969_v38 = vmax.f32 %v6186_v13, 0.0 }
 0x36f   : > { %v6189_v62 = vadd.f32 %v3816_v37, %v8616_v27  ;;  %v3970_v23 = vmax.f32 %v6187_v29, 0.0 }
 0x370   : > { %v3973_v63 = vmax.f32 %v6188_v10, 0.0 }
 0x371   : > { %v3974_v20 = vmax.f32 %v6189_v62, 0.0 }
 0x372   : > { %v4093_v19 = vpack.c.bf16 %v3973_v63, %v3969_v38 }
 0x373   : > { %v4094_v45 = vpack.c.bf16 %v3974_v20, %v3970_v23  ;;  %v3820_v35 = vpop.f32.mrb[40].mxu1 }
 0x374   : > { %v6190_v59 = vadd.f32 %v3820_v35, %v8613_v15  ;;  %v3822_v22 = vpop.f32.mrb[41].mxu1 }
 0x375   : > { %v6191_v41 = vadd.f32 %v3822_v22, %v8616_v27  ;;  %v3824_v5 = vpop.f32.mrb[42].mxu1  ;;  %4782 = vmatprep.mubr.bf16.mxu0 %v4094_v45 }
 0x376   : > { %v6192_v36 = vadd.f32 %v3824_v5, %v8613_v15  ;;  %v3826_v54 = vpop.f32.mrb[43].mxu1  ;;  %4783 = vmatmul.mubr.bf16.gmra.mrb[68].mxu0 %v4093_v19  ;;  %v3977_v55 = vmax.f32 %v6190_v59, 0.0 }
 0x377   : > { %v6193_v1 = vadd.f32 %v3826_v54, %v8616_v27  ;;  %v3978_v17 = vmax.f32 %v6191_v41, 0.0 }
 0x378   : > { %v3981_v21 = vmax.f32 %v6192_v36, 0.0 }
 0x379   : > { %v3982_v18 = vmax.f32 %v6193_v1, 0.0 }
 0x37a   : > { %v4097_v57 = vpack.c.bf16 %v3981_v21, %v3977_v55 }
 0x37b   : > { %v4098_v24 = vpack.c.bf16 %v3982_v18, %v3978_v17  ;;  %v3830_v26 = vpop.f32.mrb[44].mxu1 }
 0x37c   : > { %v6194_v4 = vadd.f32 %v3830_v26, %v8613_v15  ;;  %v3832_v60 = vpop.f32.mrb[45].mxu1 }
 0x37d   : > { %v6195_v40 = vadd.f32 %v3832_v60, %v8616_v27  ;;  %v3834_v48 = vpop.f32.mrb[46].mxu1  ;;  %4792 = vmatprep.mubr.bf16.mxu0 %v4098_v24 }
 0x37e   : > { %v6196_v3 = vadd.f32 %v3834_v48, %v8613_v15  ;;  %v3836_v50 = vpop.f32.mrb[47].mxu1  ;;  %4793 = vmatmul.mubr.bf16.gmra.mrb[72].mxu0 %v4097_v57  ;;  %v3985_v12 = vmax.f32 %v6194_v4, 0.0 }
 0x37f   : > { %v6197_v16 = vadd.f32 %v3836_v50, %v8616_v27  ;;  %v3986_v47 = vmax.f32 %v6195_v40, 0.0 }
 0x380   : > { %v3989_v14 = vmax.f32 %v6196_v3, 0.0 }
 0x381   : > { %v3990_v25 = vmax.f32 %v6197_v16, 0.0 }
 0x382   : > { %v4101_v46 = vpack.c.bf16 %v3989_v14, %v3985_v12 }
 0x383   : > { %v4102_v52 = vpack.c.bf16 %v3990_v25, %v3986_v47  ;;  %v3840_v49 = vpop.f32.mrb[48].mxu1 }
 0x384   : > { %v6198_v43 = vadd.f32 %v3840_v49, %v8613_v15  ;;  %v3842_v7 = vpop.f32.mrb[49].mxu1 }
 0x385   : > { %v6199_v56 = vadd.f32 %v3842_v7, %v8616_v27  ;;  %v3844_v30 = vpop.f32.mrb[50].mxu1  ;;  %4802 = vmatprep.mubr.bf16.mxu0 %v4102_v52 }
 0x386   : > { %v6200_v58 = vadd.f32 %v3844_v30, %v8613_v15  ;;  %v3846_v6 = vpop.f32.mrb[51].mxu1  ;;  %4803 = vmatmul.mubr.bf16.gmra.mrb[76].mxu0 %v4101_v46  ;;  %v3993_v33 = vmax.f32 %v6198_v43, 0.0 }
 0x387   : > { %v6201_v8 = vadd.f32 %v3846_v6, %v8616_v27  ;;  %v3994_v9 = vmax.f32 %v6199_v56, 0.0 }
 0x388   : > { %v3997_v32 = vmax.f32 %v6200_v58, 0.0 }
 0x389   : > { %v3998_v13 = vmax.f32 %v6201_v8, 0.0 }
 0x38a   : > { %v4105_v51 = vpack.c.bf16 %v3997_v32, %v3993_v33 }
 0x38b   : > { %v4106_v29 = vpack.c.bf16 %v3998_v13, %v3994_v9  ;;  %v3850_v44 = vpop.f32.mrb[52].mxu1 }
 0x38c   : > { %v6202_v61 = vadd.f32 %v3850_v44, %v8613_v15  ;;  %v3852_v10 = vpop.f32.mrb[53].mxu1 }
 0x38d   : > { %v6203_v37 = vadd.f32 %v3852_v10, %v8616_v27  ;;  %v3854_v34 = vpop.f32.mrb[54].mxu1  ;;  %4812 = vmatprep.mubr.bf16.mxu0 %v4106_v29 }
 0x38e   : > { %v6204_v62 = vadd.f32 %v3854_v34, %v8613_v15  ;;  %v3856_v38 = vpop.f32.mrb[55].mxu1  ;;  %4813 = vmatmul.mubr.bf16.gmra.mrb[80].mxu0 %v4105_v51  ;;  %v4001_v23 = vmax.f32 %v6202_v61, 0.0 }
 0x38f   : > { %v6205_v63 = vadd.f32 %v3856_v38, %v8616_v27  ;;  %v4002_v0 = vmax.f32 %v6203_v37, 0.0 }
 0x390   : > { %v4005_v20 = vmax.f32 %v6204_v62, 0.0 }
 0x391   : > { %v4006_v19 = vmax.f32 %v6205_v63, 0.0 }
 0x392   : > { %v4109_v39 = vpack.c.bf16 %v4005_v20, %v4001_v23 }
 0x393   : > { %v4110_v45 = vpack.c.bf16 %v4006_v19, %v4002_v0  ;;  %v3860_v35 = vpop.f32.mrb[56].mxu1 }
 0x394   : > { %v6206_v59 = vadd.f32 %v3860_v35, %v8613_v15  ;;  %v3862_v22 = vpop.f32.mrb[57].mxu1 }
 0x395   : > { %v6207_v41 = vadd.f32 %v3862_v22, %v8616_v27  ;;  %v3864_v5 = vpop.f32.mrb[58].mxu1  ;;  %4822 = vmatprep.mubr.bf16.mxu0 %v4110_v45 }
 0x396   : > { %v6208_v42 = vadd.f32 %v3864_v5, %v8613_v15  ;;  %v3866_v36 = vpop.f32.mrb[59].mxu1  ;;  %4823 = vmatmul.mubr.bf16.gmra.mrb[84].mxu0 %v4109_v39  ;;  %v4009_v31 = vmax.f32 %v6206_v59, 0.0 }
 0x397   : > { %v6209_v54 = vadd.f32 %v3866_v36, %v8616_v27  ;;  %v4010_v55 = vmax.f32 %v6207_v41, 0.0 }
 0x398   : > { %v4013_v1 = vmax.f32 %v6208_v42, 0.0 }
 0x399   : > { %v4014_v21 = vmax.f32 %v6209_v54, 0.0 }
 0x39a   : > { %v4113_v17 = vpack.c.bf16 %v4013_v1, %v4009_v31 }
 0x39b   : > { %v4114_v18 = vpack.c.bf16 %v4014_v21, %v4010_v55  ;;  %v3870_v11 = vpop.f32.mrb[60].mxu1 }
 0x39c   : > { %v6210_v57 = vadd.f32 %v3870_v11, %v8613_v15  ;;  %v3872_v24 = vpop.f32.mrb[61].mxu1 }
 0x39d   : > { %v6211_v26 = vadd.f32 %v3872_v24, %v8616_v27  ;;  %v3874_v4 = vpop.f32.mrb[62].mxu1  ;;  %4832 = vmatprep.mubr.bf16.mxu0 %v4114_v18 }
 0x39e   : > { %v6212_v60 = vadd.f32 %v3874_v4, %v8613_v15  ;;  %v3876_v40 = vpop.f32.mrb[63].mxu1  ;;  %4833 = vmatmul.mubr.bf16.gmra.mrb[88].mxu0 %v4113_v17  ;;  %v4017_v3 = vmax.f32 %v6210_v57, 0.0 }
 0x39f   : > { %v6213_v48 = vadd.f32 %v3876_v40, %v8616_v27  ;;  %v4018_v16 = vmax.f32 %v6211_v26, 0.0 }
 0x3a0   : > { %v4021_v50 = vmax.f32 %v6212_v60, 0.0 }
 0x3a1   : > { %v4022_v12 = vmax.f32 %v6213_v48, 0.0 }
 0x3a2   : > { %v4117_v14 = vpack.c.bf16 %v4021_v50, %v4017_v3 }
 0x3a3   : > { %v4118_v47 = vpack.c.bf16 %v4022_v12, %v4018_v16  ;;  %v3880_v25 = vpop.f32.mrb[64].mxu1 }
 0x3a4   : > { %v6214_v46 = vadd.f32 %v3880_v25, %v8613_v15  ;;  %v3882_v52 = vpop.f32.mrb[65].mxu1 }
 0x3a5   : > { %v6215_v49 = vadd.f32 %v3882_v52, %v8616_v27  ;;  %v3884_v43 = vpop.f32.mrb[66].mxu1  ;;  %4842 = vmatprep.mubr.bf16.mxu0 %v4118_v47 }
 0x3a6   : > { %v6216_v7 = vadd.f32 %v3884_v43, %v8613_v15  ;;  %v3886_v56 = vpop.f32.mrb[67].mxu1  ;;  %4843 = vmatmul.mubr.bf16.gmra.mrb[92].mxu0 %v4117_v14  ;;  %v4025_v58 = vmax.f32 %v6214_v46, 0.0 }
 0x3a7   : > { %v6217_v30 = vadd.f32 %v3886_v56, %v8616_v27  ;;  %v4026_v8 = vmax.f32 %v6215_v49, 0.0 }
 0x3a8   : > { %v4029_v6 = vmax.f32 %v6216_v7, 0.0 }
 0x3a9   : > { %v4030_v33 = vmax.f32 %v6217_v30, 0.0 }
 0x3aa   : > { %v4121_v32 = vpack.c.bf16 %v4029_v6, %v4025_v58 }
 0x3ab   : > { %v4122_v9 = vpack.c.bf16 %v4030_v33, %v4026_v8  ;;  %v3890_v13 = vpop.f32.mrb[68].mxu1 }
 0x3ac   : > { %v6218_v51 = vadd.f32 %v3890_v13, %v8613_v15  ;;  %v3892_v29 = vpop.f32.mrb[69].mxu1 }
 0x3ad   : > { %v6219_v44 = vadd.f32 %v3892_v29, %v8616_v27  ;;  %v3894_v61 = vpop.f32.mrb[70].mxu1  ;;  %4852 = vmatprep.mubr.bf16.mxu0 %v4122_v9 }
 0x3ae   : > { %v6220_v10 = vadd.f32 %v3894_v61, %v8613_v15  ;;  %v3896_v37 = vpop.f32.mrb[71].mxu1  ;;  %4853 = vmatmul.mubr.bf16.gmra.mrb[96].mxu0 %v4121_v32  ;;  %v4033_v62 = vmax.f32 %v6218_v51, 0.0 }
 0x3af   : > { %v6221_v34 = vadd.f32 %v3896_v37, %v8616_v27  ;;  %v4034_v63 = vmax.f32 %v6219_v44, 0.0 }
 0x3b0   : > { %v4037_v38 = vmax.f32 %v6220_v10, 0.0 }
 0x3b1   : > { %v4038_v23 = vmax.f32 %v6221_v34, 0.0 }
 0x3b2   : > { %v4125_v20 = vpack.c.bf16 %v4037_v38, %v4033_v62 }
 0x3b3   : > { %v4126_v0 = vpack.c.bf16 %v4038_v23, %v4034_v63  ;;  %v3900_v19 = vpop.f32.mrb[72].mxu1 }
 0x3b4   : > { %v6222_v39 = vadd.f32 %v3900_v19, %v8613_v15  ;;  %v3902_v45 = vpop.f32.mrb[73].mxu1 }
 0x3b5   : > { %v6223_v35 = vadd.f32 %v3902_v45, %v8616_v27  ;;  %v3904_v59 = vpop.f32.mrb[74].mxu1  ;;  %4862 = vmatprep.mubr.bf16.mxu0 %v4126_v0 }
 0x3b6   : > { %v6224_v22 = vadd.f32 %v3904_v59, %v8613_v15  ;;  %v3906_v41 = vpop.f32.mrb[75].mxu1  ;;  %4863 = vmatmul.mubr.bf16.gmra.mrb[100].mxu0 %v4125_v20  ;;  %v4041_v42 = vmax.f32 %v6222_v39, 0.0 }
 0x3b7   : > { %v6225_v5 = vadd.f32 %v3906_v41, %v8616_v27  ;;  %v4042_v54 = vmax.f32 %v6223_v35, 0.0 }
 0x3b8   : > { %v4045_v36 = vmax.f32 %v6224_v22, 0.0 }
 0x3b9   : > { %v4046_v31 = vmax.f32 %v6225_v5, 0.0 }
 0x3ba   : > { %v4129_v1 = vpack.c.bf16 %v4045_v36, %v4041_v42 }
 0x3bb   : > { %v4130_v55 = vpack.c.bf16 %v4046_v31, %v4042_v54  ;;  %v3910_v21 = vpop.f32.mrb[76].mxu1 }
 0x3bc   : > { %v6226_v17 = vadd.f32 %v3910_v21, %v8613_v15  ;;  %v3912_v18 = vpop.f32.mrb[77].mxu1 }
 0x3bd   : > { %v6227_v11 = vadd.f32 %v3912_v18, %v8616_v27  ;;  %v3914_v57 = vpop.f32.mrb[78].mxu1  ;;  %4872 = vmatprep.mubr.bf16.mxu0 %v4130_v55 }
 0x3be   : > { %v6228_v24 = vadd.f32 %v3914_v57, %v8613_v15  ;;  %v3916_v26 = vpop.f32.mrb[79].mxu1  ;;  %4873 = vmatmul.mubr.bf16.gmra.mrb[104].mxu0 %v4129_v1  ;;  %v4049_v60 = vmax.f32 %v6226_v17, 0.0 }
 0x3bf   : > { %v6229_v4 = vadd.f32 %v3916_v26, %v8616_v27  ;;  %v4050_v48 = vmax.f32 %v6227_v11, 0.0 }
 0x3c0   : > { %v4053_v40 = vmax.f32 %v6228_v24, 0.0 }
 0x3c1   : > { %v4054_v3 = vmax.f32 %v6229_v4, 0.0 }
 0x3c2   : > { %v4133_v50 = vpack.c.bf16 %v4053_v40, %v4049_v60 }
 0x3c3   : > { %v4134_v16 = vpack.c.bf16 %v4054_v3, %v4050_v48  ;;  %v3920_v12 = vpop.f32.mrb[80].mxu1  ;;  %v4215_v3 = vld [vmem:[%s8884_s4] sm:$0x3] }
 0x3c4   : > { %v6230_v14 = vadd.f32 %v3920_v12, %v8613_v15  ;;  %v3922_v47 = vpop.f32.mrb[81].mxu1 }
 0x3c5   : > { %v6231_v25 = vadd.f32 %v3922_v47, %v8616_v27  ;;  %v3924_v46 = vpop.f32.mrb[82].mxu1  ;;  %4882 = vmatprep.mubr.bf16.mxu0 %v4134_v16 }
 0x3c6   : > { %v6232_v52 = vadd.f32 %v3924_v46, %v8613_v15  ;;  %v3926_v49 = vpop.f32.mrb[83].mxu1  ;;  %4883 = vmatmul.mubr.bf16.gmra.mrb[108].mxu0 %v4133_v50  ;;  %v4057_v7 = vmax.f32 %v6230_v14, 0.0  ;;  %v8687_v50 = vrot.slane %v4215_v3, %v701_v2 }
 0x3c7   : > { %v6233_v43 = vadd.f32 %v3926_v49, %v8616_v27  ;;  %v4058_v30 = vmax.f32 %v6231_v25, 0.0 }
 0x3c8   : > { %v4061_v56 = vmax.f32 %v6232_v52, 0.0 }
 0x3c9   : > { %v4062_v58 = vmax.f32 %v6233_v43, 0.0 }
 0x3ca   : > { %v4137_v6 = vpack.c.bf16 %v4061_v56, %v4057_v7 }
 0x3cb   : > { %v4138_v8 = vpack.c.bf16 %v4062_v58, %v4058_v30  ;;  %v3930_v33 = vpop.f32.mrb[84].mxu1 }
 0x3cc   : > { %v6234_v32 = vadd.f32 %v3930_v33, %v8613_v15  ;;  %v3932_v9 = vpop.f32.mrb[85].mxu1 }
 0x3cd   : > { %v6235_v13 = vadd.f32 %v3932_v9, %v8616_v27  ;;  %v3934_v51 = vpop.f32.mrb[86].mxu1  ;;  %4892 = vmatprep.mubr.bf16.mxu0 %v4138_v8 }
 0x3ce   : > { %v6236_v29 = vadd.f32 %v3934_v51, %v8613_v15  ;;  %v3936_v44 = vpop.f32.mrb[87].mxu1  ;;  %4893 = vmatmul.mubr.bf16.gmra.mrb[112].mxu0 %v4137_v6  ;;  %v4065_v10 = vmax.f32 %v6234_v32, 0.0 }
 0x3cf   : > { %v6237_v61 = vadd.f32 %v3936_v44, %v8616_v27  ;;  %v4066_v34 = vmax.f32 %v6235_v13, 0.0 }
 0x3d0   : > { %v4069_v37 = vmax.f32 %v6236_v29, 0.0 }
 0x3d1   : > { %v4070_v62 = vmax.f32 %v6237_v61, 0.0 }
 0x3d2   : > { %v4141_v38 = vpack.c.bf16 %v4069_v37, %v4065_v10 }
 0x3d3   : > { %v4142_v63 = vpack.c.bf16 %v4070_v62, %v4066_v34  ;;  %v3940_v23 = vpop.f32.mrb[88].mxu1 }
 0x3d4   : > { %v6238_v20 = vadd.f32 %v3940_v23, %v8613_v15  ;;  %v3942_v0 = vpop.f32.mrb[89].mxu1 }
 0x3d5   : > { %v6239_v19 = vadd.f32 %v3942_v0, %v8616_v27  ;;  %v3944_v39 = vpop.f32.mrb[90].mxu1  ;;  %4902 = vmatprep.mubr.bf16.mxu0 %v4142_v63 }
 0x3d6   : > { %v6240_v45 = vadd.f32 %v3944_v39, %v8613_v15  ;;  %v3946_v35 = vpop.f32.mrb[91].mxu1  ;;  %4903 = vmatmul.mubr.bf16.gmra.mrb[116].mxu0 %v4141_v38  ;;  %v4073_v22 = vmax.f32 %v6238_v20, 0.0 }
 0x3d7   : > { %v6241_v59 = vadd.f32 %v3946_v35, %v8616_v27  ;;  %v4074_v5 = vmax.f32 %v6239_v19, 0.0 }
 0x3d8   : > { %v4077_v41 = vmax.f32 %v6240_v45, 0.0 }
 0x3d9   : > { %v4078_v42 = vmax.f32 %v6241_v59, 0.0 }
 0x3da   : > { %v4145_v36 = vpack.c.bf16 %v4077_v41, %v4073_v22 }
 0x3db   : > { %v4146_v54 = vpack.c.bf16 %v4078_v42, %v4074_v5  ;;  %v3950_v31 = vpop.f32.mrb[92].mxu1 }
 0x3dc   : > { %v6242_v1 = vadd.f32 %v3950_v31, %v8613_v15  ;;  %v3952_v55 = vpop.f32.mrb[93].mxu1 }
 0x3dd   : > { %v6243_v21 = vadd.f32 %v3952_v55, %v8616_v27  ;;  %v3954_v17 = vpop.f32.mrb[94].mxu1  ;;  %4912 = vmatprep.mubr.bf16.mxu0 %v4146_v54 }
 0x3de   : > { %v6244_v18 = vadd.f32 %v3954_v17, %v8613_v15  ;;  %v3956_v11 = vpop.f32.mrb[95].mxu1  ;;  %4913 = vmatmul.mubr.bf16.gmra.mrb[120].mxu0 %v4145_v36  ;;  %v4081_v24 = vmax.f32 %v6242_v1, 0.0  ;;  %v8691_v15 = vrot.slane %v4215_v3, %v705_v53 }
 0x3df   : > { %v6245_v57 = vadd.f32 %v3956_v11, %v8616_v27  ;;  %v4082_v4 = vmax.f32 %v6243_v21, 0.0 }
 0x3e0   : > { %v4085_v26 = vmax.f32 %v6244_v18, 0.0 }
 0x3e1   : > { %v4086_v60 = vmax.f32 %v6245_v57, 0.0 }
 0x3e2   : > { %v4149_v40 = vpack.c.bf16 %v4085_v26, %v4081_v24 }
 0x3e3   : > { %v4150_v48 = vpack.c.bf16 %v4086_v60, %v4082_v4 }
 0x3e5   : > { %4922 = vmatprep.mubr.bf16.mxu0 %v4150_v48 }
 0x3e6   : > { %4923 = vmatmul.mubr.bf16.gmra.mrb[124].mxu0 %v4149_v40 }
 0x441   : > { %v4774_v27 = vpop.f32.mrb[64].mxu0 }
 0x442   : > { %v6246_v16 = vadd.f32 %v4774_v27, %v8687_v50  ;;  %v4776_v12 = vpop.f32.mrb[65].mxu0 }
 0x443   : > { %v6247_v14 = vadd.f32 %v4776_v12, %v8691_v15  ;;  %v4778_v47 = vpop.f32.mrb[66].mxu0 }
 0x444   : > { %v6248_v25 = vadd.f32 %v4778_v47, %v8687_v50  ;;  %v4780_v46 = vpop.f32.mrb[67].mxu0  ;;  %v4933_v49 = vmax.f32 %v6246_v16, 0.0 }
 0x445   : > { %v6249_v52 = vadd.f32 %v4780_v46, %v8691_v15  ;;  %v4934_v2 = vmax.f32 %v6247_v14, 0.0 }
 0x446   : > { %v4935_v43 = vmax.f32 %v6248_v25, 0.0 }
 0x447   : > { %v4936_v7 = vmax.f32 %v6249_v52, 0.0 }
 0x448   : > { %v4997_v56 = vpack.c.bf16 %v4935_v43, %v4933_v49 }
 0x449   : > { %v4998_v28 = vpack.c.bf16 %v4936_v7, %v4934_v2  ;;  %v4784_v53 = vpop.f32.mrb[68].mxu0 }
 0x44a   : > { %v6250_v30 = vadd.f32 %v4784_v53, %v8687_v50  ;;  %v4786_v58 = vpop.f32.mrb[69].mxu0 }
 0x44b   : > { %v6251_v6 = vadd.f32 %v4786_v58, %v8691_v15  ;;  %v4788_v8 = vpop.f32.mrb[70].mxu0  ;;  %5196 = vmatprep.mubr.bf16.mxu1 %v4998_v28 }
 0x44c   : > { %v6252_v33 = vadd.f32 %v4788_v8, %v8687_v50  ;;  %v4790_v32 = vpop.f32.mrb[71].mxu0  ;;  %5197 = vmatmul.mubr.bf16.vlgmr.msra.gmra.mrb[96].mxu1 %v4997_v56  ;;  %v4937_v13 = vmax.f32 %v6250_v30, 0.0 }
 0x44d   : > { %v6253_v9 = vadd.f32 %v4790_v32, %v8691_v15  ;;  %v4938_v29 = vmax.f32 %v6251_v6, 0.0 }
 0x44e   : > { %v4939_v51 = vmax.f32 %v6252_v33, 0.0 }
 0x44f   : > { %v4940_v44 = vmax.f32 %v6253_v9, 0.0 }
 0x450   : > { %v4999_v61 = vpack.c.bf16 %v4939_v51, %v4937_v13 }
 0x451   : > { %v5000_v10 = vpack.c.bf16 %v4940_v44, %v4938_v29  ;;  %v4794_v37 = vpop.f32.mrb[72].mxu0 }
 0x452   : > { %v6254_v34 = vadd.f32 %v4794_v37, %v8687_v50  ;;  %v4796_v62 = vpop.f32.mrb[73].mxu0 }
 0x453   : > { %v6255_v38 = vadd.f32 %v4796_v62, %v8691_v15  ;;  %v4798_v63 = vpop.f32.mrb[74].mxu0  ;;  %5204 = vmatprep.mubr.bf16.mxu1 %v5000_v10 }
 0x454   : > { %v6256_v23 = vadd.f32 %v4798_v63, %v8687_v50  ;;  %v4800_v20 = vpop.f32.mrb[75].mxu0  ;;  %5205 = vmatmul.mubr.bf16.gmra.mrb[100].mxu1 %v4999_v61  ;;  %v4941_v19 = vmax.f32 %v6254_v34, 0.0 }
 0x455   : > { %v6257_v0 = vadd.f32 %v4800_v20, %v8691_v15  ;;  %v4942_v45 = vmax.f32 %v6255_v38, 0.0 }
 0x456   : > { %v4943_v39 = vmax.f32 %v6256_v23, 0.0 }
 0x457   : > { %v4944_v35 = vmax.f32 %v6257_v0, 0.0 }
 0x458   : > { %v5001_v59 = vpack.c.bf16 %v4943_v39, %v4941_v19 }
 0x459   : > { %v5002_v22 = vpack.c.bf16 %v4944_v35, %v4942_v45  ;;  %v4804_v41 = vpop.f32.mrb[76].mxu0 }
 0x45a   : > { %v6258_v5 = vadd.f32 %v4804_v41, %v8687_v50  ;;  %v4806_v42 = vpop.f32.mrb[77].mxu0 }
 0x45b   : > { %v6259_v36 = vadd.f32 %v4806_v42, %v8691_v15  ;;  %v4808_v54 = vpop.f32.mrb[78].mxu0  ;;  %5212 = vmatprep.mubr.bf16.mxu1 %v5002_v22 }
 0x45c   : > { %v6260_v31 = vadd.f32 %v4808_v54, %v8687_v50  ;;  %v4810_v1 = vpop.f32.mrb[79].mxu0  ;;  %5213 = vmatmul.mubr.bf16.gmra.mrb[104].mxu1 %v5001_v59  ;;  %v4945_v21 = vmax.f32 %v6258_v5, 0.0 }
 0x45d   : > { %v6261_v55 = vadd.f32 %v4810_v1, %v8691_v15  ;;  %v4946_v18 = vmax.f32 %v6259_v36, 0.0 }
 0x45e   : > { %v4947_v17 = vmax.f32 %v6260_v31, 0.0 }
 0x45f   : > { %v4948_v11 = vmax.f32 %v6261_v55, 0.0 }
 0x460   : > { %v5003_v57 = vpack.c.bf16 %v4947_v17, %v4945_v21 }
 0x461   : > { %v5004_v24 = vpack.c.bf16 %v4948_v11, %v4946_v18  ;;  %v4814_v26 = vpop.f32.mrb[80].mxu0 }
 0x462   : > { %v6262_v4 = vadd.f32 %v4814_v26, %v8687_v50  ;;  %v4816_v60 = vpop.f32.mrb[81].mxu0 }
 0x463   : > { %v6263_v40 = vadd.f32 %v4816_v60, %v8691_v15  ;;  %v4818_v48 = vpop.f32.mrb[82].mxu0  ;;  %5220 = vmatprep.mubr.bf16.mxu1 %v5004_v24 }
 0x464   : > { %v6264_v3 = vadd.f32 %v4818_v48, %v8687_v50  ;;  %v4820_v27 = vpop.f32.mrb[83].mxu0  ;;  %5221 = vmatmul.mubr.bf16.gmra.mrb[108].mxu1 %v5003_v57  ;;  %v4949_v12 = vmax.f32 %v6262_v4, 0.0 }
 0x465   : > { %v6265_v16 = vadd.f32 %v4820_v27, %v8691_v15  ;;  %v4950_v47 = vmax.f32 %v6263_v40, 0.0 }
 0x466   : > { %v4951_v14 = vmax.f32 %v6264_v3, 0.0 }
 0x467   : > { %v4952_v25 = vmax.f32 %v6265_v16, 0.0 }
 0x468   : > { %v5005_v46 = vpack.c.bf16 %v4951_v14, %v4949_v12 }
 0x469   : > { %v5006_v52 = vpack.c.bf16 %v4952_v25, %v4950_v47  ;;  %v4824_v49 = vpop.f32.mrb[84].mxu0 }
 0x46a   : > { %v6266_v43 = vadd.f32 %v4824_v49, %v8687_v50  ;;  %v4826_v2 = vpop.f32.mrb[85].mxu0 }
 0x46b   : > { %v6267_v7 = vadd.f32 %v4826_v2, %v8691_v15  ;;  %v4828_v56 = vpop.f32.mrb[86].mxu0  ;;  %5228 = vmatprep.mubr.bf16.mxu1 %v5006_v52 }
 0x46c   : > { %v6268_v28 = vadd.f32 %v4828_v56, %v8687_v50  ;;  %v4830_v53 = vpop.f32.mrb[87].mxu0  ;;  %5229 = vmatmul.mubr.bf16.gmra.mrb[112].mxu1 %v5005_v46  ;;  %v4953_v58 = vmax.f32 %v6266_v43, 0.0 }
 0x46d   : > { %v6269_v30 = vadd.f32 %v4830_v53, %v8691_v15  ;;  %v4954_v8 = vmax.f32 %v6267_v7, 0.0 }
 0x46e   : > { %v4955_v6 = vmax.f32 %v6268_v28, 0.0 }
 0x46f   : > { %v4956_v33 = vmax.f32 %v6269_v30, 0.0 }
 0x470   : > { %v5007_v32 = vpack.c.bf16 %v4955_v6, %v4953_v58 }
 0x471   : > { %v5008_v9 = vpack.c.bf16 %v4956_v33, %v4954_v8  ;;  %v4834_v13 = vpop.f32.mrb[88].mxu0 }
 0x472   : > { %v6270_v51 = vadd.f32 %v4834_v13, %v8687_v50  ;;  %v4836_v29 = vpop.f32.mrb[89].mxu0 }
 0x473   : > { %v6271_v44 = vadd.f32 %v4836_v29, %v8691_v15  ;;  %v4838_v61 = vpop.f32.mrb[90].mxu0  ;;  %5236 = vmatprep.mubr.bf16.mxu1 %v5008_v9 }
 0x474   : > { %v6272_v10 = vadd.f32 %v4838_v61, %v8687_v50  ;;  %v4840_v37 = vpop.f32.mrb[91].mxu0  ;;  %5237 = vmatmul.mubr.bf16.gmra.mrb[116].mxu1 %v5007_v32  ;;  %v4957_v62 = vmax.f32 %v6270_v51, 0.0 }
 0x475   : > { %v6273_v34 = vadd.f32 %v4840_v37, %v8691_v15  ;;  %v4958_v63 = vmax.f32 %v6271_v44, 0.0 }
 0x476   : > { %v4959_v38 = vmax.f32 %v6272_v10, 0.0 }
 0x477   : > { %v4960_v23 = vmax.f32 %v6273_v34, 0.0 }
 0x478   : > { %v5009_v20 = vpack.c.bf16 %v4959_v38, %v4957_v62 }
 0x479   : > { %v5010_v0 = vpack.c.bf16 %v4960_v23, %v4958_v63  ;;  %v4844_v19 = vpop.f32.mrb[92].mxu0 }
 0x47a   : > { %v6274_v39 = vadd.f32 %v4844_v19, %v8687_v50  ;;  %v4846_v45 = vpop.f32.mrb[93].mxu0 }
 0x47b   : > { %v6275_v35 = vadd.f32 %v4846_v45, %v8691_v15  ;;  %v4848_v59 = vpop.f32.mrb[94].mxu0  ;;  %5244 = vmatprep.mubr.bf16.mxu1 %v5010_v0 }
 0x47c   : > { %v6276_v22 = vadd.f32 %v4848_v59, %v8687_v50  ;;  %v4850_v41 = vpop.f32.mrb[95].mxu0  ;;  %5245 = vmatmul.mubr.bf16.gmra.mrb[120].mxu1 %v5009_v20  ;;  %v4961_v42 = vmax.f32 %v6274_v39, 0.0 }
 0x47d   : > { %v6277_v5 = vadd.f32 %v4850_v41, %v8691_v15  ;;  %v4962_v54 = vmax.f32 %v6275_v35, 0.0 }
 0x47e   : > { %v4963_v36 = vmax.f32 %v6276_v22, 0.0 }
 0x47f   : > { %v4964_v31 = vmax.f32 %v6277_v5, 0.0 }
 0x480   : > { %v5011_v1 = vpack.c.bf16 %v4963_v36, %v4961_v42 }
 0x481   : > { %v5012_v55 = vpack.c.bf16 %v4964_v31, %v4962_v54  ;;  %v4854_v21 = vpop.f32.mrb[96].mxu0 }
 0x482   : > { %v6278_v17 = vadd.f32 %v4854_v21, %v8687_v50  ;;  %v4856_v18 = vpop.f32.mrb[97].mxu0 }
 0x483   : > { %v6279_v11 = vadd.f32 %v4856_v18, %v8691_v15  ;;  %v4858_v57 = vpop.f32.mrb[98].mxu0  ;;  %5252 = vmatprep.mubr.bf16.mxu1 %v5012_v55 }
 0x484   : > { %v6280_v24 = vadd.f32 %v4858_v57, %v8687_v50  ;;  %v4860_v26 = vpop.f32.mrb[99].mxu0  ;;  %5253 = vmatmul.mubr.bf16.gmra.mrb[124].mxu1 %v5011_v1  ;;  %v4965_v60 = vmax.f32 %v6278_v17, 0.0 }
 0x485   : > { %v6281_v4 = vadd.f32 %v4860_v26, %v8691_v15  ;;  %v4966_v48 = vmax.f32 %v6279_v11, 0.0 }
 0x486   : > { %v4967_v40 = vmax.f32 %v6280_v24, 0.0 }
 0x487   : > { %v4968_v3 = vmax.f32 %v6281_v4, 0.0 }
 0x488   : > { %v5013_v27 = vpack.c.bf16 %v4967_v40, %v4965_v60 }
 0x489   : > { %v5014_v16 = vpack.c.bf16 %v4968_v3, %v4966_v48  ;;  %v4864_v12 = vpop.f32.mrb[100].mxu0 }
 0x48a   : > { %v6282_v14 = vadd.f32 %v4864_v12, %v8687_v50  ;;  %v4866_v47 = vpop.f32.mrb[101].mxu0 }
 0x48b   : > { %v6283_v25 = vadd.f32 %v4866_v47, %v8691_v15  ;;  %v4868_v46 = vpop.f32.mrb[102].mxu0  ;;  %5260 = vmatprep.mubr.bf16.mxu1 %v5014_v16 }
 0x48c   : > { %v6284_v52 = vadd.f32 %v4868_v46, %v8687_v50  ;;  %v4870_v49 = vpop.f32.mrb[103].mxu0  ;;  %5261 = vmatmul.mubr.bf16.gmra.mrb[128].mxu1 %v5013_v27  ;;  %v4969_v2 = vmax.f32 %v6282_v14, 0.0 }
 0x48d   : > { %v6285_v43 = vadd.f32 %v4870_v49, %v8691_v15  ;;  %v4970_v56 = vmax.f32 %v6283_v25, 0.0 }
 0x48e   : > { %v4971_v7 = vmax.f32 %v6284_v52, 0.0 }
 0x48f   : > { %v4972_v28 = vmax.f32 %v6285_v43, 0.0 }
 0x490   : > { %v5015_v53 = vpack.c.bf16 %v4971_v7, %v4969_v2 }
 0x491   : > { %v5016_v30 = vpack.c.bf16 %v4972_v28, %v4970_v56  ;;  %v4874_v58 = vpop.f32.mrb[104].mxu0 }
 0x492   : > { %v6286_v6 = vadd.f32 %v4874_v58, %v8687_v50  ;;  %v4876_v8 = vpop.f32.mrb[105].mxu0 }
 0x493   : > { %v6287_v33 = vadd.f32 %v4876_v8, %v8691_v15  ;;  %v4878_v32 = vpop.f32.mrb[106].mxu0  ;;  %5268 = vmatprep.mubr.bf16.mxu1 %v5016_v30 }
 0x494   : > { %v6288_v9 = vadd.f32 %v4878_v32, %v8687_v50  ;;  %v4880_v13 = vpop.f32.mrb[107].mxu0  ;;  %5269 = vmatmul.mubr.bf16.gmra.mrb[132].mxu1 %v5015_v53  ;;  %v4973_v29 = vmax.f32 %v6286_v6, 0.0 }
 0x495   : > { %v6289_v51 = vadd.f32 %v4880_v13, %v8691_v15  ;;  %v4974_v61 = vmax.f32 %v6287_v33, 0.0 }
 0x496   : > { %v4975_v44 = vmax.f32 %v6288_v9, 0.0 }
 0x497   : > { %v4976_v10 = vmax.f32 %v6289_v51, 0.0 }
 0x498   : > { %v5017_v37 = vpack.c.bf16 %v4975_v44, %v4973_v29 }
 0x499   : > { %v5018_v34 = vpack.c.bf16 %v4976_v10, %v4974_v61  ;;  %v4884_v62 = vpop.f32.mrb[108].mxu0 }
 0x49a   : > { %v6290_v38 = vadd.f32 %v4884_v62, %v8687_v50  ;;  %v4886_v63 = vpop.f32.mrb[109].mxu0 }
 0x49b   : > { %v6291_v23 = vadd.f32 %v4886_v63, %v8691_v15  ;;  %v4888_v20 = vpop.f32.mrb[110].mxu0  ;;  %5276 = vmatprep.mubr.bf16.mxu1 %v5018_v34 }
 0x49c   : > { %v6292_v0 = vadd.f32 %v4888_v20, %v8687_v50  ;;  %v4890_v19 = vpop.f32.mrb[111].mxu0  ;;  %5277 = vmatmul.mubr.bf16.gmra.mrb[136].mxu1 %v5017_v37  ;;  %v4977_v45 = vmax.f32 %v6290_v38, 0.0 }
 0x49d   : > { %v6293_v39 = vadd.f32 %v4890_v19, %v8691_v15  ;;  %v4978_v59 = vmax.f32 %v6291_v23, 0.0 }
 0x49e   : > { %v4979_v35 = vmax.f32 %v6292_v0, 0.0 }
 0x49f   : > { %v4980_v22 = vmax.f32 %v6293_v39, 0.0 }
 0x4a0   : > { %v5019_v41 = vpack.c.bf16 %v4979_v35, %v4977_v45  ;;  %v8760_v35 = vld [vmem:[%s8886_s6] ss:$0 sm:$0xff] }
 0x4a1   : > { %v5020_v5 = vpack.c.bf16 %v4980_v22, %v4978_v59  ;;  %v4894_v42 = vpop.f32.mrb[112].mxu0 }
 0x4a2   : > { %v6294_v36 = vadd.f32 %v4894_v42, %v8687_v50  ;;  %v4896_v54 = vpop.f32.mrb[113].mxu0 }
 0x4a3   : > { %v6295_v31 = vadd.f32 %v4896_v54, %v8691_v15  ;;  %v4898_v1 = vpop.f32.mrb[114].mxu0  ;;  %5284 = vmatprep.mubr.bf16.mxu1 %v5020_v5 }
 0x4a4   : > { %v6296_v55 = vadd.f32 %v4898_v1, %v8687_v50  ;;  %v4900_v21 = vpop.f32.mrb[115].mxu0  ;;  %5285 = vmatmul.mubr.bf16.gmra.mrb[140].mxu1 %v5019_v41  ;;  %v4981_v18 = vmax.f32 %v6294_v36, 0.0 }
 0x4a5   : > { %v6297_v17 = vadd.f32 %v4900_v21, %v8691_v15  ;;  %v4982_v57 = vmax.f32 %v6295_v31, 0.0 }
 0x4a6   : > { %v4983_v11 = vmax.f32 %v6296_v55, 0.0 }
 0x4a7   : > { %v4984_v24 = vmax.f32 %v6297_v17, 0.0 }
 0x4a8   : > { %v5021_v26 = vpack.c.bf16 %v4983_v11, %v4981_v18 }
 0x4a9   : > { %v5022_v4 = vpack.c.bf16 %v4984_v24, %v4982_v57  ;;  %v4904_v60 = vpop.f32.mrb[116].mxu0 }
 0x4aa   : > { %v6298_v40 = vadd.f32 %v4904_v60, %v8687_v50  ;;  %v4906_v48 = vpop.f32.mrb[117].mxu0 }
 0x4ab   : > { %v6299_v3 = vadd.f32 %v4906_v48, %v8691_v15  ;;  %v4908_v27 = vpop.f32.mrb[118].mxu0  ;;  %5292 = vmatprep.mubr.bf16.mxu1 %v5022_v4 }
 0x4ac   : > { %v6300_v16 = vadd.f32 %v4908_v27, %v8687_v50  ;;  %v4910_v12 = vpop.f32.mrb[119].mxu0  ;;  %5293 = vmatmul.mubr.bf16.gmra.mrb[144].mxu1 %v5021_v26  ;;  %v4985_v47 = vmax.f32 %v6298_v40, 0.0 }
 0x4ad   : > { %v6301_v14 = vadd.f32 %v4910_v12, %v8691_v15  ;;  %v4986_v46 = vmax.f32 %v6299_v3, 0.0 }
 0x4ae   : > { %v4987_v25 = vmax.f32 %v6300_v16, 0.0 }
 0x4af   : > { %v4988_v52 = vmax.f32 %v6301_v14, 0.0 }
 0x4b0   : > { %v5023_v49 = vpack.c.bf16 %v4987_v25, %v4985_v47 }
 0x4b1   : > { %v5024_v43 = vpack.c.bf16 %v4988_v52, %v4986_v46  ;;  %v4914_v2 = vpop.f32.mrb[120].mxu0 }
 0x4b2   : > { %v6302_v7 = vadd.f32 %v4914_v2, %v8687_v50  ;;  %v4916_v56 = vpop.f32.mrb[121].mxu0 }
 0x4b3   : > { %v6303_v28 = vadd.f32 %v4916_v56, %v8691_v15  ;;  %v4918_v53 = vpop.f32.mrb[122].mxu0  ;;  %5300 = vmatprep.mubr.bf16.mxu1 %v5024_v43 }
 0x4b4   : > { %v6304_v30 = vadd.f32 %v4918_v53, %v8687_v50  ;;  %v4920_v58 = vpop.f32.mrb[123].mxu0  ;;  %5301 = vmatmul.mubr.bf16.gmra.mrb[148].mxu1 %v5023_v49  ;;  %v4989_v8 = vmax.f32 %v6302_v7, 0.0 }
 0x4b5   : > { %v6305_v6 = vadd.f32 %v4920_v58, %v8691_v15  ;;  %v4990_v32 = vmax.f32 %v6303_v28, 0.0 }
 0x4b6   : > { %v4991_v33 = vmax.f32 %v6304_v30, 0.0 }
 0x4b7   : > { %v4992_v9 = vmax.f32 %v6305_v6, 0.0 }
 0x4b8   : > { %v5025_v13 = vpack.c.bf16 %v4991_v33, %v4989_v8 }
 0x4b9   : > { %v5026_v51 = vpack.c.bf16 %v4992_v9, %v4990_v32  ;;  %v4924_v29 = vpop.f32.mrb[124].mxu0 }
 0x4ba   : > { %v6306_v44 = vadd.f32 %v4924_v29, %v8687_v50  ;;  %v4926_v61 = vpop.f32.mrb[125].mxu0 }
 0x4bb   : > { %v6307_v10 = vadd.f32 %v4926_v61, %v8691_v15  ;;  %v4928_v37 = vpop.f32.mrb[126].mxu0  ;;  %5308 = vmatprep.mubr.bf16.mxu1 %v5026_v51 }
 0x4bc   : > { %v6308_v34 = vadd.f32 %v4928_v37, %v8687_v50  ;;  %v4930_v62 = vpop.f32.mrb[127].mxu0  ;;  %5309 = vmatmul.mubr.bf16.gmra.mrb[152].mxu1 %v5025_v13  ;;  %v4993_v63 = vmax.f32 %v6306_v44, 0.0 }
 0x4bd   : > { %v6309_v38 = vadd.f32 %v4930_v62, %v8691_v15  ;;  %v4994_v20 = vmax.f32 %v6307_v10, 0.0 }
 0x4be   : > { %v4995_v23 = vmax.f32 %v6308_v34, 0.0 }
 0x4bf   : > { %v4996_v0 = vmax.f32 %v6309_v38, 0.0 }
 0x4c0   : > { %v5027_v19 = vpack.c.bf16 %v4995_v23, %v4993_v63 }
 0x4c1   : > { %v5028_v39 = vpack.c.bf16 %v4996_v0, %v4994_v20 }
 0x4c3   : > { %5316 = vmatprep.mubr.bf16.mxu1 %v5028_v39 }
 0x4c4   : > { %5317 = vmatmul.mubr.bf16.gmra.mrb[156].mxu1 %v5027_v19 }
 0x51f   : > { %v5958_v45 = vpop.f32.mrb[96].mxu1 }
 0x520   : > { %v5959_v59 = vpop.f32.mrb[97].mxu1 }
 0x521   : > { %v5960_v50 = vadd.f32 %v5959_v59, %v5958_v45  ;;  %v5961_v22 = vpop.f32.mrb[98].mxu1 }
 0x522   : > { %v5962_v41 = vpop.f32.mrb[99].mxu1 }
 0x523   : > { %v5199_v15 = vadd.f32 %v5960_v50, %v8760_v35  ;;  %v5963_v5 = vadd.f32 %v5962_v41, %v5961_v22 }
 0x525   : > { %v5325_v42 = vmax.f32 %v5199_v15, 0.0  ;;  %v5202_v36 = vadd.f32 %v5963_v5, %v8760_v35 }
 0x527   : > { %5357 = vst [vmem:[%s8765_s29] sm:$0xff] %v5325_v42  ;;  %v5326_v54 = vmax.f32 %v5202_v36, 0.0  ;;  %v5964_v31 = vpop.f32.mrb[100].mxu1 }
 0x528   : > { %v5965_v1 = vpop.f32.mrb[101].mxu1 }
 0x529   : > { %5358 = vst [vmem:[%s8765_s29 + $0x8] sm:$0xff] %v5326_v54  ;;  %v5966_v55 = vadd.f32 %v5965_v1, %v5964_v31  ;;  %v5967_v21 = vpop.f32.mrb[102].mxu1 }
 0x52a   : > { %v5968_v17 = vpop.f32.mrb[103].mxu1 }
 0x52b   : > { %v5207_v18 = vadd.f32 %v5966_v55, %v8760_v35  ;;  %v5969_v11 = vadd.f32 %v5968_v17, %v5967_v21 }
 0x52d   : > { %v5327_v57 = vmax.f32 %v5207_v18, 0.0  ;;  %v5210_v24 = vadd.f32 %v5969_v11, %v8760_v35 }
 0x52f   : > { %5359 = vst [vmem:[%s8765_s29 + $0x10] sm:$0xff] %v5327_v57  ;;  %v5328_v26 = vmax.f32 %v5210_v24, 0.0  ;;  %v5970_v4 = vpop.f32.mrb[104].mxu1 }
 0x530   : > { %v5971_v60 = vpop.f32.mrb[105].mxu1 }
 0x531   : > { %5360 = vst [vmem:[%s8765_s29 + $0x18] sm:$0xff] %v5328_v26  ;;  %v5972_v40 = vadd.f32 %v5971_v60, %v5970_v4  ;;  %v5973_v48 = vpop.f32.mrb[106].mxu1 }
 0x532   : > { %v5974_v3 = vpop.f32.mrb[107].mxu1 }
 0x533   : > { %v5215_v27 = vadd.f32 %v5972_v40, %v8760_v35  ;;  %v5975_v16 = vadd.f32 %v5974_v3, %v5973_v48 }
 0x535   : > { %v5329_v12 = vmax.f32 %v5215_v27, 0.0  ;;  %v5218_v14 = vadd.f32 %v5975_v16, %v8760_v35 }
 0x537   : > { %5361 = vst [vmem:[%s8765_s29 + $0x20] sm:$0xff] %v5329_v12  ;;  %v5330_v47 = vmax.f32 %v5218_v14, 0.0  ;;  %v5976_v25 = vpop.f32.mrb[108].mxu1 }
 0x538   : > { %v5977_v46 = vpop.f32.mrb[109].mxu1 }
 0x539   : > { %5362 = vst [vmem:[%s8765_s29 + $0x28] sm:$0xff] %v5330_v47  ;;  %v5978_v52 = vadd.f32 %v5977_v46, %v5976_v25  ;;  %v5979_v49 = vpop.f32.mrb[110].mxu1 }
 0x53a   : > { %v5980_v43 = vpop.f32.mrb[111].mxu1 }
 0x53b   : > { %v5223_v2 = vadd.f32 %v5978_v52, %v8760_v35  ;;  %v5981_v7 = vadd.f32 %v5980_v43, %v5979_v49 }
 0x53d   : > { %v5331_v56 = vmax.f32 %v5223_v2, 0.0  ;;  %v5226_v28 = vadd.f32 %v5981_v7, %v8760_v35 }
 0x53f   : > { %5363 = vst [vmem:[%s8765_s29 + $0x30] sm:$0xff] %v5331_v56  ;;  %v5332_v53 = vmax.f32 %v5226_v28, 0.0  ;;  %v5982_v30 = vpop.f32.mrb[112].mxu1 }
 0x540   : > { %v5983_v58 = vpop.f32.mrb[113].mxu1 }
 0x541   : > { %5364 = vst [vmem:[%s8765_s29 + $0x38] sm:$0xff] %v5332_v53  ;;  %v5984_v6 = vadd.f32 %v5983_v58, %v5982_v30  ;;  %v5985_v8 = vpop.f32.mrb[114].mxu1 }
 0x542   : > { %v5986_v33 = vpop.f32.mrb[115].mxu1 }
 0x543   : > { %v5231_v32 = vadd.f32 %v5984_v6, %v8760_v35  ;;  %v5987_v9 = vadd.f32 %v5986_v33, %v5985_v8 }
 0x545   : > { %v5333_v13 = vmax.f32 %v5231_v32, 0.0  ;;  %v5234_v51 = vadd.f32 %v5987_v9, %v8760_v35 }
 0x547   : > { %5365 = vst [vmem:[%s8765_s29 + $0x40] sm:$0xff] %v5333_v13  ;;  %v5334_v29 = vmax.f32 %v5234_v51, 0.0  ;;  %v5988_v44 = vpop.f32.mrb[116].mxu1 }
 0x548   : > { %v5989_v61 = vpop.f32.mrb[117].mxu1 }
 0x549   : > { %5366 = vst [vmem:[%s8765_s29 + $0x48] sm:$0xff] %v5334_v29  ;;  %v5990_v10 = vadd.f32 %v5989_v61, %v5988_v44  ;;  %v5991_v37 = vpop.f32.mrb[118].mxu1 }
 0x54a   : > { %v5992_v34 = vpop.f32.mrb[119].mxu1 }
 0x54b   : > { %v5239_v62 = vadd.f32 %v5990_v10, %v8760_v35  ;;  %v5993_v38 = vadd.f32 %v5992_v34, %v5991_v37 }
 0x54d   : > { %v5335_v63 = vmax.f32 %v5239_v62, 0.0  ;;  %v5242_v23 = vadd.f32 %v5993_v38, %v8760_v35 }
 0x54f   : > { %5367 = vst [vmem:[%s8765_s29 + $0x50] sm:$0xff] %v5335_v63  ;;  %v5336_v20 = vmax.f32 %v5242_v23, 0.0  ;;  %v5994_v0 = vpop.f32.mrb[120].mxu1 }
 0x550   : > { %v5995_v19 = vpop.f32.mrb[121].mxu1 }
 0x551   : > { %5368 = vst [vmem:[%s8765_s29 + $0x58] sm:$0xff] %v5336_v20  ;;  %v5996_v39 = vadd.f32 %v5995_v19, %v5994_v0  ;;  %v5997_v45 = vpop.f32.mrb[122].mxu1 }
 0x552   : > { %v5998_v59 = vpop.f32.mrb[123].mxu1 }
 0x553   : > { %v5247_v50 = vadd.f32 %v5996_v39, %v8760_v35  ;;  %v5999_v22 = vadd.f32 %v5998_v59, %v5997_v45 }
 0x555   : > { %v5337_v41 = vmax.f32 %v5247_v50, 0.0  ;;  %v5250_v15 = vadd.f32 %v5999_v22, %v8760_v35 }
 0x557   : > { %5369 = vst [vmem:[%s8765_s29 + $0x60] sm:$0xff] %v5337_v41  ;;  %v5338_v5 = vmax.f32 %v5250_v15, 0.0  ;;  %v6000_v42 = vpop.f32.mrb[124].mxu1 }
 0x558   : > { %v6001_v36 = vpop.f32.mrb[125].mxu1 }
 0x559   : > { %5370 = vst [vmem:[%s8765_s29 + $0x68] sm:$0xff] %v5338_v5  ;;  %v6002_v54 = vadd.f32 %v6001_v36, %v6000_v42  ;;  %v6003_v31 = vpop.f32.mrb[126].mxu1 }
 0x55a   : > { %v6004_v1 = vpop.f32.mrb[127].mxu1 }
 0x55b   : > { %v5255_v55 = vadd.f32 %v6002_v54, %v8760_v35  ;;  %v6005_v21 = vadd.f32 %v6004_v1, %v6003_v31 }
 0x55d   : > { %v5339_v17 = vmax.f32 %v5255_v55, 0.0  ;;  %v5258_v18 = vadd.f32 %v6005_v21, %v8760_v35 }
 0x55f   : > { %5371 = vst [vmem:[%s8765_s29 + $0x70] sm:$0xff] %v5339_v17  ;;  %v5340_v11 = vmax.f32 %v5258_v18, 0.0  ;;  %v6006_v57 = vpop.f32.mrb[128].mxu1 }
 0x560   : > { %v6007_v24 = vpop.f32.mrb[129].mxu1 }
 0x561   : > { %5372 = vst [vmem:[%s8765_s29 + $0x78] sm:$0xff] %v5340_v11  ;;  %v6008_v26 = vadd.f32 %v6007_v24, %v6006_v57  ;;  %v6009_v4 = vpop.f32.mrb[130].mxu1 }
 0x562   : > { %v6010_v60 = vpop.f32.mrb[131].mxu1 }
 0x563   : > { %v5263_v40 = vadd.f32 %v6008_v26, %v8760_v35  ;;  %v6011_v48 = vadd.f32 %v6010_v60, %v6009_v4 }
 0x565   : > { %v5341_v3 = vmax.f32 %v5263_v40, 0.0  ;;  %v5266_v27 = vadd.f32 %v6011_v48, %v8760_v35 }
 0x567   : > { %5373 = vst [vmem:[%s8765_s29 + $0x80] sm:$0xff] %v5341_v3  ;;  %v5342_v16 = vmax.f32 %v5266_v27, 0.0  ;;  %v6012_v12 = vpop.f32.mrb[132].mxu1 }
 0x568   : > { %v6013_v14 = vpop.f32.mrb[133].mxu1 }
 0x569   : > { %5374 = vst [vmem:[%s8765_s29 + $0x88] sm:$0xff] %v5342_v16  ;;  %v6014_v47 = vadd.f32 %v6013_v14, %v6012_v12  ;;  %v6015_v25 = vpop.f32.mrb[134].mxu1 }
 0x56a   : > { %v6016_v46 = vpop.f32.mrb[135].mxu1 }
 0x56b   : > { %v5271_v52 = vadd.f32 %v6014_v47, %v8760_v35  ;;  %v6017_v49 = vadd.f32 %v6016_v46, %v6015_v25 }
 0x56d   : > { %v5343_v43 = vmax.f32 %v5271_v52, 0.0  ;;  %v5274_v2 = vadd.f32 %v6017_v49, %v8760_v35 }
 0x56f   : > { %5375 = vst [vmem:[%s8765_s29 + $0x90] sm:$0xff] %v5343_v43  ;;  %v5344_v7 = vmax.f32 %v5274_v2, 0.0  ;;  %v6018_v56 = vpop.f32.mrb[136].mxu1 }
 0x570   : > { %v6019_v28 = vpop.f32.mrb[137].mxu1 }
 0x571   : > { %5376 = vst [vmem:[%s8765_s29 + $0x98] sm:$0xff] %v5344_v7  ;;  %v6020_v53 = vadd.f32 %v6019_v28, %v6018_v56  ;;  %v6021_v30 = vpop.f32.mrb[138].mxu1 }
 0x572   : > { %v6022_v58 = vpop.f32.mrb[139].mxu1 }
 0x573   : > { %v5279_v6 = vadd.f32 %v6020_v53, %v8760_v35  ;;  %v6023_v8 = vadd.f32 %v6022_v58, %v6021_v30 }
 0x575   : > { %v5345_v33 = vmax.f32 %v5279_v6, 0.0  ;;  %v5282_v32 = vadd.f32 %v6023_v8, %v8760_v35 }
 0x577   : > { %5377 = vst [vmem:[%s8765_s29 + $0xa0] sm:$0xff] %v5345_v33  ;;  %v5346_v9 = vmax.f32 %v5282_v32, 0.0  ;;  %v6024_v13 = vpop.f32.mrb[140].mxu1 }
 0x578   : > { %v6025_v51 = vpop.f32.mrb[141].mxu1 }
 0x579   : > { %5378 = vst [vmem:[%s8765_s29 + $0xa8] sm:$0xff] %v5346_v9  ;;  %v6026_v29 = vadd.f32 %v6025_v51, %v6024_v13  ;;  %v6027_v44 = vpop.f32.mrb[142].mxu1 }
 0x57a   : > { %v6028_v61 = vpop.f32.mrb[143].mxu1 }
 0x57b   : > { %v5287_v10 = vadd.f32 %v6026_v29, %v8760_v35  ;;  %v6029_v37 = vadd.f32 %v6028_v61, %v6027_v44 }
 0x57d   : > { %v5347_v34 = vmax.f32 %v5287_v10, 0.0  ;;  %v5290_v62 = vadd.f32 %v6029_v37, %v8760_v35 }
 0x57f   : > { %5379 = vst [vmem:[%s8765_s29 + $0xb0] sm:$0xff] %v5347_v34  ;;  %v5348_v38 = vmax.f32 %v5290_v62, 0.0  ;;  %v6030_v63 = vpop.f32.mrb[144].mxu1 }
 0x580   : > { %v6031_v23 = vpop.f32.mrb[145].mxu1 }
 0x581   : > { %5380 = vst [vmem:[%s8765_s29 + $0xb8] sm:$0xff] %v5348_v38  ;;  %v6032_v20 = vadd.f32 %v6031_v23, %v6030_v63  ;;  %v6033_v0 = vpop.f32.mrb[146].mxu1 }
 0x582   : > { %v6034_v19 = vpop.f32.mrb[147].mxu1 }
 0x583   : > { %v5295_v39 = vadd.f32 %v6032_v20, %v8760_v35  ;;  %v6035_v45 = vadd.f32 %v6034_v19, %v6033_v0 }
 0x585   : > { %v5349_v59 = vmax.f32 %v5295_v39, 0.0  ;;  %v5298_v50 = vadd.f32 %v6035_v45, %v8760_v35 }
 0x587   : > { %5381 = vst [vmem:[%s8765_s29 + $0xc0] sm:$0xff] %v5349_v59  ;;  %v5350_v22 = vmax.f32 %v5298_v50, 0.0  ;;  %v6036_v41 = vpop.f32.mrb[148].mxu1 }
 0x588   : > { %v6037_v15 = vpop.f32.mrb[149].mxu1 }
 0x589   : > { %5382 = vst [vmem:[%s8765_s29 + $0xc8] sm:$0xff] %v5350_v22  ;;  %v6038_v5 = vadd.f32 %v6037_v15, %v6036_v41  ;;  %v6039_v42 = vpop.f32.mrb[150].mxu1 }
 0x58a   : > { %v6040_v36 = vpop.f32.mrb[151].mxu1 }
 0x58b   : > { %v5303_v54 = vadd.f32 %v6038_v5, %v8760_v35  ;;  %v6041_v31 = vadd.f32 %v6040_v36, %v6039_v42 }
 0x58d   : > { %v5351_v1 = vmax.f32 %v5303_v54, 0.0  ;;  %v5306_v55 = vadd.f32 %v6041_v31, %v8760_v35 }
 0x58f   : > { %5383 = vst [vmem:[%s8765_s29 + $0xd0] sm:$0xff] %v5351_v1  ;;  %v5352_v21 = vmax.f32 %v5306_v55, 0.0  ;;  %v6042_v17 = vpop.f32.mrb[152].mxu1 }
 0x590   : > { %v6043_v18 = vpop.f32.mrb[153].mxu1 }
 0x591   : > { %5384 = vst [vmem:[%s8765_s29 + $0xd8] sm:$0xff] %v5352_v21  ;;  %v6044_v11 = vadd.f32 %v6043_v18, %v6042_v17  ;;  %v6045_v57 = vpop.f32.mrb[154].mxu1 }
 0x592   : > { %v6046_v24 = vpop.f32.mrb[155].mxu1 }
 0x593   : > { %v5311_v26 = vadd.f32 %v6044_v11, %v8760_v35  ;;  %v6047_v4 = vadd.f32 %v6046_v24, %v6045_v57 }
 0x595   : > { %v5353_v60 = vmax.f32 %v5311_v26, 0.0  ;;  %v5314_v40 = vadd.f32 %v6047_v4, %v8760_v35 }
 0x597   : > { %5385 = vst [vmem:[%s8765_s29 + $0xe0] sm:$0xff] %v5353_v60  ;;  %v5354_v48 = vmax.f32 %v5314_v40, 0.0  ;;  %v6048_v3 = vpop.f32.mrb[156].mxu1 }
 0x598   : > { %v6049_v27 = vpop.f32.mrb[157].mxu1 }
 0x599   : > { %5386 = vst [vmem:[%s8765_s29 + $0xe8] sm:$0xff] %v5354_v48  ;;  %v6050_v16 = vadd.f32 %v6049_v27, %v6048_v3  ;;  %v6051_v12 = vpop.f32.mrb[158].mxu1 }
 0x59a   : > { %v6052_v14 = vpop.f32.mrb[159].mxu1 }
 0x59b   : > { %v5319_v47 = vadd.f32 %v6050_v16, %v8760_v35  ;;  %v6053_v25 = vadd.f32 %v6052_v14, %v6051_v12 }
 0x59d   : > { %v5355_v46 = vmax.f32 %v5319_v47, 0.0  ;;  %v5322_v52 = vadd.f32 %v6053_v25, %v8760_v35 }
 0x59f   : > { %5387 = vst [vmem:[%s8765_s29 + $0xf0] sm:$0xff] %v5355_v46  ;;  %v5356_v49 = vmax.f32 %v5322_v52, 0.0 }
 0x5a1   : > { %5388 = vst [vmem:[%s8765_s29 + $0xf8] sm:$0xff] %v5356_v49 }
 0x5a2   : > { %7568 = shalt.err (!%p7565_p4)
}
 0x5a3   : > { %s7569_s14 = scalar_lea.hbm %s8832_s23, 4096  ;;  %s7573_s17 = scalar_lea.hbm %s8887_s7, 8192 }
 0x5a4   : > { %p7570_p9 = scmp.ne.s32.totalorder %s8832_s23, %s7569_s14  ;;  %p7574_p8 = scmp.lt.u32.totalorder %s8832_s23, %s8887_s7 }
 0x5a5   : > { %p7575_p13 = scmp.lt.u32.totalorder %s7573_s17, %s7569_s14  ;;  %p7577_p10 = scmp.lt.u32.totalorder %s7569_s14, %s8832_s23 }
 0x5a6   : > { %p7571_p0 = pnand %p7570_p9, %p7829_p5 }
 0x5a7   : > { %p7576_p6 = por %p7575_p13, %p7574_p8 }
 0x5a8   : > { %p7572_p11 = pneg %p7571_p0 }
 0x5a9   : > { %p7578_p3 = por %p7577_p10, %p7576_p6 }
 0x5ab   : > { %p7579_p7 = pnand %p7578_p3, %p7572_p11 }
 0x5ad   : > { %7582 = shalt.err (!%p7579_p7)
}
 0x5ae   : > { %s7645_s16 = smov 128   ;;  %s7646_s22 = smov 8  }
 0x5af   : > { %6743 = dma.vmem_to_hbm [thread:$0]  (%p7829_p5), %s8834_s10, 4096, %s8832_s23, %s5390_s12, %s7645_s16, %s7645_s16, %s7646_s22  }
 0x5b0 PF: > { %s5418_s30 = sand.u32 1, %s7617_s24   ;;  %p8932_p12 = scmp.ne.s32.totalorder %s8895_s8, 0 }
 0x5b1   : > { %p8933_p2 = scmp.ge.s32.totalorder %s7629_s27, 2  ;;  %s5419_s28 = scalar_lea.sflag [#allocation4], %s5418_s30 }
 0x5b3   : > { %p6760_p1 = pnand %p8933_p2, %p8932_p12 }
 0x5b5   : > { %7612 = dma.done.wait (!%p6760_p1), %s5419_s28, 4096  }
 0x5b6   : > { %7614 = vsyncadd (!%p6760_p1), %s5419_s28, 4294963200  ;;  %p22_p4 = scmp.ge.s32.totalorder %s7815_s13, 4   ;;  %s8934_s24 = smov %s7621_s25 }
 0x5b7   : > { %s8935_s25 = smov %s7625_s26  ;;  %s8936_s26 = smov %s7825_s18 }
 0x5b8   : > { %s8937_s27 = smov %s7815_s13  ;;  %24 = sbr.rel (!%p22_p4) target bundleno = 9 (0x9), region = 105 }
 0x5bf   :  { %5424 = vsyncpa [#allocation3], 1 }
 0x5c0   :  { %5426 = vsyncpa [#allocation3 + $0x1], 1 }
 0x5c1   :  { %5427 = vsyncpa [#allocation6], 1 }
 0x5c2   :  { %5428 = vsyncpa [#allocation9], 1 }
 0x5c3   :  { %5429 = vsyncpa [#allocation4], 1 }
 0x5c4   :  { %5431 = vsyncpa [#allocation4 + $0x1], 1 }

// kernel: tpu_custom_call.1
= control target key start
LH: loop header
LB: loop body
LE: loop exit
PB: predicated region body
PF: predicated region fallthrough
CT: control target
= control target key end

     0   :  { %s8880_s0 = inlined_call_operand.hbm [shape: bf16[512,896], index: 0, kind: input, shape index: {}]   ;;  %s8881_s1 = inlined_call_operand.hbm [shape: bf16[896,512], index: 1, kind: input, shape index: {}]   ;;  %s8882_s2 = inlined_call_operand.vmem [shape: f32[1,512], index: 2, kind: input, shape index: {}]   ;;  %s8883_s3 = inlined_call_operand.hbm [shape: bf16[512,256], index: 3, kind: input, shape index: {}]   ;;  %s8884_s4 = inlined_call_operand.vmem [shape: f32[1,256], index: 4, kind: input, shape index: {}]   ;;  %s8885_s5 = inlined_call_operand.hbm [shape: bf16[256,128], index: 5, kind: input, shape index: {}]   ;;  %s8886_s6 = inlined_call_operand.vmem [shape: f32[1,128], index: 6, kind: input, shape index: {}]   ;;  %s8887_s7 = inlined_call_operand.hbm [shape: f32[512,128], index: 7, kind: output, shape index: {}]  }
   0x1   :  { %8893 = sst [smem:[#allocation26_spill]] %s8881_s1 }
   0x2   :  { %12 = vsyncpa [#allocation3], 0 }
   0x3   :  { %14 = vsyncpa [#allocation3 + $0x1], 0 }
   0x4   :  { %15 = vsyncpa [#allocation6], 0 }
   0x5   :  { %16 = vsyncpa [#allocation9], 0 }
   0x6   :  { %17 = vsyncpa [#allocation4], 0 }
   0x7   :  { %19 = vsyncpa [#allocation4 + $0x1], 0  ;;  %s7687_s24 = smov 0   ;;  %s7689_s25 = smov 0  }
   0x8   :  { %s7691_s26 = smov 0   ;;  %s7693_s27 = smov 0  }
   0x9 LB: > { %s7708_s28 = sadd.s32 4294967295, %s7629_s27   ;;  %s5505_s29 = sadd.s32 4294967294, %s7629_s27   ;;  %s7629_s27 = sphi %s7693_s27, %s8937_s27   ;;  %s7625_s26 = sphi %s7691_s26, %s8936_s26   ;;  %s7621_s25 = sphi %s7689_s25, %s8935_s25   ;;  %s7617_s24 = sphi %s7687_s24, %s8934_s24  }
   0xa   : > { %p45_p0 = scmp.ne.s32.totalorder %s7621_s25, %s7617_s24  ;;  %p8888_p1 = scmp.eq.s32.totalorder %s7708_s28, 0 }
   0xb   : > { %p201_p3 = scmp.eq.s32.totalorder %s5505_s29, 1  ;;  %p5506_p5 = scmp.ge.s32.totalorder %s7629_s27, 1 }
   0xc   : > { %p7717_p4 = por %p8888_p1, %p45_p0  ;;  %p208_p7 = scmp.lt.s32.totalorder %s7629_s27, 3 }
   0xd   : > { %p7722_p6 = por %p201_p3, %p45_p0  ;;  %s7631_s10 = smov [#allocation5]  }
   0xe   : > { %s8894_s30 = scalar_select %p7717_p4, 1, 0 }
   0xf   : > { %s8895_s8 = scalar_select %p7722_p6, 1, 0 }
  0x10   : > { %p7727_p8 = pnand %p5506_p5, %p208_p7  ;;  %s220_s11 = sshll.u32 %s7631_s10, 4  ;;  %s7731_s11 = int_to_ptr.vmem [resolvable:$true] %s220_s11 }
  0x11   : > { %s7632_s13 = smov [#allocation7]   ;;  %s8898_s1 = sld [smem:[#allocation26_spill]] }
  0x12   : > { %s8896_s9 = scalar_select %p7727_p8, 1, 0 }
  0x13   : > { %p6745_p9 = pneg %p7727_p8  ;;  %s236_s14 = sshll.u32 %s7632_s13, 4  ;;  %s7742_s14 = int_to_ptr.vmem [resolvable:$true] %s236_s14 }
  0x15   : > { %p7738_p11 = pnand %p6745_p9, %p8888_p1 }
  0x17   : > { %s7441_s17 = scalar_lea.hbm %s8898_s1, 28672  ;;  %p7752_p13 = pneg %p7738_p11 }
  0x18   : > { %p7442_p12 = scmp.ne.s32.totalorder %s8898_s1, %s7441_s17  ;;  %p7448_p5 = scmp.lt.u32.totalorder %s7441_s17, %s8898_s1 }
  0x1a   : > { %p7444_p0 = pnand %p7752_p13, %p7442_p12 }
  0x1c   : > { %p7445_p3 = pneg %p7444_p0 }
  0x1e   : > { %p7450_p7 = pnand %p7448_p5, %p7445_p3 }
  0x20   : > { %7453 = shalt.err (!%p7450_p7)
}
  0x21   : > { %s7454_s23 = scalar_lea.vmem %s7731_s11, 28672  ;;  %p7462_p2 = scmp.lt.s32.totalorder %s7731_s11, %s7731_s11 }
  0x22   : > { %p7455_p9 = scmp.ne.s32.totalorder %s7731_s11, %s7454_s23  ;;  %p7463_p6 = scmp.lt.s32.totalorder %s7454_s23, %s7454_s23 }
  0x24   : > { %p7457_p10 = pnand %p7455_p9, %p7752_p13  ;;  %p7464_p12 = por %p7463_p6, %p7462_p2 }
  0x26   : > { %p7458_p1 = pneg %p7457_p10 }
  0x28   : > { %p7465_p0 = pnand %p7464_p12, %p7458_p1 }
  0x2a   : > { %7468 = shalt.err (!%p7465_p0)
}
  0x2b   : > { %s7633_s29 = smov 256   ;;  %s7634_s10 = smov 16  }
  0x2c   : > { %6748 = dma.hbm_to_vmem [thread:$0]  (!%p7738_p11), %s8898_s1, 28672, %s7731_s11, [#allocation6], %s7633_s29, %s7633_s29, %s7634_s10  }
  0x2d   : > { %s7469_s18 = scalar_lea.hbm %s8883_s3, 8192 }
  0x2e   : > { %p7470_p2 = scmp.ne.s32.totalorder %s8883_s3, %s7469_s18  ;;  %p7476_p10 = scmp.lt.u32.totalorder %s7469_s18, %s8883_s3 }
  0x30   : > { %p7472_p1 = pnand %p7470_p2, %p7752_p13 }
  0x32   : > { %p7473_p6 = pneg %p7472_p1 }
  0x34   : > { %p7478_p3 = pnand %p7476_p10, %p7473_p6 }
  0x36   : > { %7481 = shalt.err (!%p7478_p3)
}
  0x37   : > { %s7482_s11 = scalar_lea.vmem %s7742_s14, 8192  ;;  %p7490_p12 = scmp.lt.s32.totalorder %s7742_s14, %s7742_s14 }
  0x38   : > { %p7483_p5 = scmp.ne.s32.totalorder %s7742_s14, %s7482_s11  ;;  %p7491_p0 = scmp.lt.s32.totalorder %s7482_s11, %s7482_s11 }
  0x3a   : > { %p7485_p7 = pnand %p7483_p5, %p7752_p13  ;;  %p7492_p2 = por %p7491_p0, %p7490_p12 }
  0x3c   : > { %p7486_p9 = pneg %p7485_p7 }
  0x3e   : > { %p7493_p1 = pnand %p7492_p2, %p7486_p9 }
  0x40   : > { %7496 = shalt.err (!%p7493_p1)
}
  0x41   : > { %s7635_s29 = smov 128   ;;  %s7636_s10 = smov 8  }
  0x42   : > { %6751 = dma.hbm_to_vmem [thread:$0]  (!%p7738_p11), %s8883_s3, 8192, %s7742_s14, [#allocation6], %s7635_s29, %s7635_s29, %s7636_s10  }
  0x43   : > { %s7637_s16 = smov [#allocation8]   ;;  %s7497_s21 = scalar_lea.hbm %s8885_s5, 2048 }
  0x44   : > { %s252_s17 = sshll.u32 %s7637_s16, 4  ;;  %p7498_p6 = scmp.ne.s32.totalorder %s8885_s5, %s7497_s21  ;;  %s253_s17 = int_to_ptr.vmem [resolvable:$true] %s252_s17 }
  0x45   : > { %p7504_p5 = scmp.lt.u32.totalorder %s7497_s21, %s8885_s5 }
  0x46   : > { %p7500_p10 = pnand %p7498_p6, %p7752_p13 }
  0x48   : > { %p7501_p3 = pneg %p7500_p10 }
  0x4a   : > { %p7506_p7 = pnand %p7504_p5, %p7501_p3 }
  0x4c   : > { %7509 = shalt.err (!%p7506_p7)
}
  0x4d   : > { %s7510_s14 = scalar_lea.vmem %s253_s17, 2048  ;;  %p7518_p2 = scmp.lt.s32.totalorder %s253_s17, %s253_s17 }
  0x4e   : > { %p7511_p9 = scmp.ne.s32.totalorder %s253_s17, %s7510_s14  ;;  %p7519_p1 = scmp.lt.s32.totalorder %s7510_s14, %s7510_s14 }
  0x50   : > { %p7513_p12 = pnand %p7511_p9, %p7752_p13  ;;  %p7520_p4 = por %p7519_p1, %p7518_p2 }
  0x52   : > { %p7514_p0 = pneg %p7513_p12 }
  0x54   : > { %p7521_p8 = pnand %p7520_p4, %p7514_p0 }
  0x56   : > { %7524 = shalt.err (!%p7521_p8)
}
  0x57   : > { %s7638_s29 = smov 64   ;;  %s7639_s1 = smov 4  }
  0x58   : > { %6754 = dma.hbm_to_vmem [thread:$0]  (!%p7738_p11), %s8885_s5, 2048, %s253_s17, [#allocation9], %s7638_s29, %s7638_s29, %s7639_s1  }
  0x59   : > { %s7815_s13 = sadd.s32 1, %s7629_s27   ;;  %s32_s16 = sadd.s32 1, %s7625_s26 }
  0x5a   : > { %s29_s15 = ssub.s32 %s7629_s27, %s7815_s13  ;;  %p39_p8 = scmp.ne.s32.totalorder %s7625_s26, %s7621_s25 }
  0x5b   : > { %p30_p4 = scmp.eq.s32.totalorder %s29_s15, 0  ;;  %p40_p13 = scmp.eq.s32.totalorder %s7629_s27, 0 }
  0x5c   : > { %p6766_p6 = scmp.lt.s32.totalorder %s7629_s27, 2  ;;  %p8900_p3 = scmp.eq.s32.totalorder %s7708_s28, 1 }
  0x5d   : > { %s7825_s18 = scalar_select %p30_p4, %s7625_s26, %s32_s16  }
  0x5e   : > { %p41_p10 = por %p40_p13, %p39_p8  ;;  %p7829_p5 = por %p8900_p3, %p39_p8 }
  0x5f   : > { %s269_s12 = sand.u32 1, %s7625_s26   ;;  %s6727_s21 = smul.u32 14336, %s7629_s27 }
  0x60   : > { %s6726_s17 = smul.u32 896, %s269_s12  ;;  %p7840_p11 = pnand %p6766_p6, %p41_p10 }
  0x61   : > { %s7838_s11 = scalar_lea.hbm %s8880_s0, %s6727_s21  ;;  %s7846_s20 = scalar_lea.sflag [#allocation3], %s269_s12 }
  0x62   : > { %s273_s29 = scalar_lea.vmem [#allocation2], %s6726_s17  ;;  %s7525_s10 = scalar_lea.hbm %s7838_s11, 14336 }
  0x63   : > { %s281_s1 = sshll.u32 %s273_s29, 4  ;;  %p7526_p7 = scmp.ne.s32.totalorder %s7838_s11, %s7525_s10  ;;  %s7844_s1 = int_to_ptr.vmem [resolvable:$true] %s281_s1 }
  0x64   : > { %p7527_p9 = pneg %p7840_p11  ;;  %s7530_s21 = scalar_lea.hbm %s8880_s0, 28672 }
  0x65   : > { %p7531_p2 = scmp.lt.u32.totalorder %s7838_s11, %s8880_s0  ;;  %p7532_p1 = scmp.lt.u32.totalorder %s7530_s21, %s7525_s10 }
  0x66   : > { %p7528_p12 = pnand %p7527_p9, %p7526_p7  ;;  %p7534_p8 = scmp.lt.u32.totalorder %s7525_s10, %s7838_s11 }
  0x67   : > { %p7533_p4 = por %p7532_p1, %p7531_p2 }
  0x68   : > { %p7529_p0 = pneg %p7528_p12 }
  0x69   : > { %p7535_p13 = por %p7534_p8, %p7533_p4 }
  0x6b   : > { %p7536_p6 = pnand %p7535_p13, %p7529_p0 }
  0x6d   : > { %7539 = shalt.err (!%p7536_p6)
}
  0x6e   : > { %s7540_s12 = scalar_lea.vmem %s7844_s1, 14336  ;;  %s7640_s17 = smov [#allocation2]  }
  0x6f   : > { %p7541_p10 = scmp.ne.s32.totalorder %s7844_s1, %s7540_s12  ;;  %s7545_s29 = sshll.u32 %s7640_s17, 4  ;;  %s7546_s29 = int_to_ptr.vmem [resolvable:$false] %s7545_s29 }
  0x70   : > { %s7547_s15 = scalar_lea.vmem %s7546_s29, 28672  ;;  %p7548_p12 = scmp.lt.s32.totalorder %s7844_s1, %s7546_s29 }
  0x71   : > { %p7543_p3 = pnand %p7541_p10, %p7527_p9  ;;  %p7549_p2 = scmp.lt.s32.totalorder %s7547_s15, %s7540_s12 }
  0x73   : > { %p7544_p7 = pneg %p7543_p3  ;;  %p7550_p1 = por %p7549_p2, %p7548_p12 }
  0x75   : > { %p7551_p4 = pnand %p7550_p1, %p7544_p7 }
  0x77   : > { %7554 = shalt.err (!%p7551_p4)
}
  0x78   : > { %s7641_s10 = smov 448   ;;  %s7642_s16 = smov 28  }
  0x79   : > { %6758 = dma.hbm_to_vmem [thread:$0]  (!%p7840_p11), %s7838_s11, 14336, %s7844_s1, %s7846_s20, %s7641_s10, %s7641_s10, %s7642_s16  }
  0x7a   : > { %p8903_p9 = scmp.ne.s32.totalorder %s8896_s9, 0 }
  0x7c   : > { %293 = sbr.rel (%p8903_p9) target bundleno = 1456 (0x5b0), region = 48 }
  0x83   : > { %s7877_s21 = sand.u32 1, %s7621_s25   ;;  %p8904_p0 = scmp.ne.s32.totalorder %s8894_s30, 0 }
  0x84   : > { %s6728_s22 = smul.u32 896, %s7877_s21  ;;  %s296_s23 = scalar_lea.sflag [#allocation3], %s7877_s21 }
  0x86   : > { %s7881_s12 = scalar_lea.vmem [#allocation2], %s6728_s22 }
  0x87   : > { %7600 = dma.done.wait (%p8904_p0), %s296_s23, 14336  }
  0x88   : > { %7602 = vsyncadd (%p8904_p0), %s296_s23, 4294952960  ;;  %p8905_p11 = scmp.eq.s32.totalorder %s7708_s28, 0 }
  0x8a   : > { %7604 = dma.done.wait (%p8905_p11), [#allocation6], 36864   ;;  %p8906_p8 = pmov %p8905_p11 }
  0x8c   : > { %7606 = vsyncadd (%p8906_p8), [#allocation6], 4294930432  ;;  %p8907_p13 = pmov %p8906_p8 }
  0x8d   : > { %p8908_p6 = pmov %p8906_p8 }
  0x8e   : > { %7608 = dma.done.wait (%p8907_p13), [#allocation9], 2048  }
  0x8f   : > { %7610 = vsyncadd (%p8908_p6), [#allocation9], 4294965248  ;;  %v6817_v0 = vld [vmem:[#allocation5 + $0x4] ss:$16 sps:$4 sm:$0xff]   ;;  %v6819_v1 = vld [vmem:[#allocation5] ss:$16 sps:$4 sm:$0xff]  }
  0x90   : > { %2415 = vmatprep.subr.bf16.mxu0 %v6817_v0  ;;  %6054 = vmatprep.subr.bf16.mxu1 %v6817_v0  ;;  %v6820_v2 = vld [vmem:[#allocation5 + $0x24] ss:$16 sps:$4 sm:$0xff]   ;;  %v6822_v3 = vld [vmem:[#allocation5 + $0x20] ss:$16 sps:$4 sm:$0xff]   ;;  %v6876_v36 = vld [vmem:[#allocation5 + $0xc] ss:$16 sps:$4 sm:$0xff]  }
  0x91   : > { %2416 = vmatpush1.bf16.msra.mxu0 %v6819_v1  ;;  %6070 = vmatpush1.bf16.msra.mxu1 %v6819_v1  ;;  %v6823_v4 = vld [vmem:[#allocation5 + $0x44] ss:$16 sps:$4 sm:$0xff]   ;;  %v6825_v5 = vld [vmem:[#allocation5 + $0x40] ss:$16 sps:$4 sm:$0xff]   ;;  %v6874_v39 = vld [vmem:[#allocation5 + $0x8] ss:$16 sps:$4 sm:$0xff]  }
  0x92   : > { %2417 = vmatprep.subr.bf16.mxu0 %v6820_v2  ;;  %6055 = vmatprep.subr.bf16.mxu1 %v6820_v2  ;;  %v6826_v6 = vld [vmem:[#allocation5 + $0x64] ss:$16 sps:$4 sm:$0xff]   ;;  %v6828_v7 = vld [vmem:[#allocation5 + $0x60] ss:$16 sps:$4 sm:$0xff]   ;;  %v6882_v41 = vld [vmem:[#allocation5 + $0x2c] ss:$16 sps:$4 sm:$0xff]  }
  0x93   : > { %v6829_v8 = vld [vmem:[#allocation5 + $0x84] ss:$16 sps:$4 sm:$0xff]   ;;  %v6831_v9 = vld [vmem:[#allocation5 + $0x80] ss:$16 sps:$4 sm:$0xff]   ;;  %v7905_v42 = vld [vmem:[%s7881_s12 + $0x3c] ss:$28 sps:$4 sm:$0xff]  }
  0x94   : > { %v6832_v10 = vld [vmem:[#allocation5 + $0xa4] ss:$16 sps:$4 sm:$0xff]   ;;  %v6834_v11 = vld [vmem:[#allocation5 + $0xa0] ss:$16 sps:$4 sm:$0xff]   ;;  %v6885_v43 = vld [vmem:[%s7881_s12 + $0x1fc] ss:$28 sps:$4 sm:$0xff]  }
  0x95   : > { %2418 = vmatpush1.bf16.msra.mxu0 %v6822_v3  ;;  %6071 = vmatpush1.bf16.msra.mxu1 %v6822_v3  ;;  %v6835_v12 = vld [vmem:[#allocation5 + $0xc4] ss:$16 sps:$4 sm:$0xff]   ;;  %v6837_v14 = vld [vmem:[#allocation5 + $0xc0] ss:$16 sps:$4 sm:$0xff]   ;;  %v6880_v45 = vld [vmem:[#allocation5 + $0x28] ss:$16 sps:$4 sm:$0xff]  }
  0x96   : > { %2419 = vmatprep.subr.bf16.mxu0 %v6823_v4  ;;  %6056 = vmatprep.subr.bf16.mxu1 %v6823_v4  ;;  %v7896_v13 = vld [vmem:[%s7881_s12 + $0x4] ss:$28 sps:$4 sm:$0xff]   ;;  %v7910_v47 = vld [vmem:[%s7881_s12 + $0x38] ss:$28 sps:$4 sm:$0xff]   ;;  %v6894_v48 = vld [vmem:[#allocation5 + $0x4c] ss:$16 sps:$4 sm:$0xff]  }
  0x97   : > { %v6870_v15 = vld [vmem:[%s7881_s12 + $0x1c4] ss:$28 sps:$4 sm:$0xff]   ;;  %2447 = vmatprep.mubr.bf16.mxu0 %v7896_v13  ;;  %v6888_v49 = vld [vmem:[%s7881_s12 + $0x1f8] ss:$28 sps:$4 sm:$0xff]   ;;  %v6900_v53 = vld [vmem:[#allocation5 + $0x6c] ss:$16 sps:$4 sm:$0xff]  }
  0x98   : > { %v6838_v16 = vld [vmem:[#allocation5 + $0xe4] ss:$16 sps:$4 sm:$0xff]   ;;  %2527 = vmatprep.mubr.bf16.mxu1 %v6870_v15  ;;  %v6840_v17 = vld [vmem:[#allocation5 + $0xe0] ss:$16 sps:$4 sm:$0xff]   ;;  %v6892_v51 = vld [vmem:[#allocation5 + $0x48] ss:$16 sps:$4 sm:$0xff]  }
  0x99   : > { %2420 = vmatpush1.bf16.msra.mxu0 %v6825_v5  ;;  %6072 = vmatpush1.bf16.msra.mxu1 %v6825_v5  ;;  %v6841_v18 = vld [vmem:[#allocation5 + $0x104] ss:$16 sps:$4 sm:$0xff]   ;;  %v6843_v19 = vld [vmem:[#allocation5 + $0x100] ss:$16 sps:$4 sm:$0xff]   ;;  %v6898_v57 = vld [vmem:[#allocation5 + $0x68] ss:$16 sps:$4 sm:$0xff]  }
  0x9a   : > { %2421 = vmatprep.subr.bf16.mxu0 %v6826_v6  ;;  %6057 = vmatprep.subr.bf16.mxu1 %v6826_v6  ;;  %v6844_v20 = vld [vmem:[#allocation5 + $0x124] ss:$16 sps:$4 sm:$0xff]   ;;  %v6846_v21 = vld [vmem:[#allocation5 + $0x120] ss:$16 sps:$4 sm:$0xff]   ;;  %v6912_v60 = vld [vmem:[#allocation5 + $0x8c] ss:$16 sps:$4 sm:$0xff]  }
  0x9b   : > { %v6847_v22 = vld [vmem:[#allocation5 + $0x144] ss:$16 sps:$4 sm:$0xff]   ;;  %v6849_v23 = vld [vmem:[#allocation5 + $0x140] ss:$16 sps:$4 sm:$0xff]   ;;  %v6910_v63 = vld [vmem:[#allocation5 + $0x88] ss:$16 sps:$4 sm:$0xff]  }
  0x9c   : > { %v6850_v24 = vld [vmem:[#allocation5 + $0x164] ss:$16 sps:$4 sm:$0xff]   ;;  %v6852_v25 = vld [vmem:[#allocation5 + $0x160] ss:$16 sps:$4 sm:$0xff]   ;;  %v6918_v1 = vld [vmem:[#allocation5 + $0xac] ss:$16 sps:$4 sm:$0xff]  }
  0x9d   : > { %2422 = vmatpush1.bf16.msra.mxu0 %v6828_v7  ;;  %6073 = vmatpush1.bf16.msra.mxu1 %v6828_v7  ;;  %v6853_v26 = vld [vmem:[#allocation5 + $0x184] ss:$16 sps:$4 sm:$0xff]   ;;  %v6855_v27 = vld [vmem:[#allocation5 + $0x180] ss:$16 sps:$4 sm:$0xff]   ;;  %v7925_v2 = vld [vmem:[%s7881_s12 + $0xac] ss:$28 sps:$4 sm:$0xff]  }
  0x9e   : > { %2423 = vmatprep.subr.bf16.mxu0 %v6829_v8  ;;  %6058 = vmatprep.subr.bf16.mxu1 %v6829_v8  ;;  %v6856_v28 = vld [vmem:[#allocation5 + $0x1a4] ss:$16 sps:$4 sm:$0xff]   ;;  %v6858_v29 = vld [vmem:[#allocation5 + $0x1a0] ss:$16 sps:$4 sm:$0xff]   ;;  %v6921_v3 = vld [vmem:[%s7881_s12 + $0x26c] ss:$28 sps:$4 sm:$0xff]  }
  0x9f   : > { %v6859_v30 = vld [vmem:[#allocation5 + $0x1c4] ss:$16 sps:$4 sm:$0xff]   ;;  %v6861_v31 = vld [vmem:[#allocation5 + $0x1c0] ss:$16 sps:$4 sm:$0xff]   ;;  %v6916_v5 = vld [vmem:[#allocation5 + $0xa8] ss:$16 sps:$4 sm:$0xff]  }
  0xa0   : > { %v6862_v32 = vld [vmem:[#allocation5 + $0x1e4] ss:$16 sps:$4 sm:$0xff]   ;;  %v6864_v33 = vld [vmem:[#allocation5 + $0x1e0] ss:$16 sps:$4 sm:$0xff]   ;;  %v6930_v8 = vld [vmem:[#allocation5 + $0xcc] ss:$16 sps:$4 sm:$0xff]  }
  0xa1   : > { %2424 = vmatpush1.bf16.msra.mxu0 %v6831_v9  ;;  %6074 = vmatpush1.bf16.msra.mxu1 %v6831_v9  ;;  %v6873_v34 = vld [vmem:[#allocation5 + $0x204] ss:$16 sps:$4 sm:$0xff]   ;;  %v7901_v35 = vld [vmem:[%s7881_s12] ss:$28 sps:$4 sm:$0xff]   ;;  %v7920_v59 = vld [vmem:[%s7881_s12 + $0x70] ss:$28 sps:$4 sm:$0xff]  }
  0xa2   : > { %2425 = vmatprep.subr.bf16.mxu0 %v6832_v10  ;;  %6059 = vmatprep.subr.bf16.mxu1 %v6832_v10  ;;  %v6868_v37 = vld [vmem:[%s7881_s12 + $0x1c0] ss:$28 sps:$4 sm:$0xff]   ;;  %v6879_v40 = vld [vmem:[#allocation5 + $0x224] ss:$16 sps:$4 sm:$0xff]   ;;  %v6906_v61 = vld [vmem:[%s7881_s12 + $0x230] ss:$28 sps:$4 sm:$0xff]  }
  0xa3   : > { %v6871_v38 = vld [vmem:[#allocation5 + $0x200] ss:$16 sps:$4 sm:$0xff]   ;;  %v6891_v46 = vld [vmem:[#allocation5 + $0x244] ss:$16 sps:$4 sm:$0xff]   ;;  %s5518_s17 = sshll.u32 %s7877_s21, 8  ;;  %s5941_s15 = sshll.u32 %s7708_s28, 12 }
  0xa4   : > { %v6877_v44 = vld [vmem:[#allocation5 + $0x220] ss:$16 sps:$4 sm:$0xff]   ;;  %v6897_v52 = vld [vmem:[#allocation5 + $0x264] ss:$16 sps:$4 sm:$0xff]   ;;  %s8765_s29 = scalar_lea.vmem [#allocation10], %s5518_s17  ;;  %s8832_s23 = scalar_lea.hbm %s8887_s7, %s5941_s15 }
  0xa5   : > { %2426 = vmatpush1.bf16.msra.mxu0 %v6834_v11  ;;  %6075 = vmatpush1.bf16.msra.mxu1 %v6834_v11  ;;  %v6889_v50 = vld [vmem:[#allocation5 + $0x240] ss:$16 sps:$4 sm:$0xff]   ;;  %v6909_v58 = vld [vmem:[#allocation5 + $0x284] ss:$16 sps:$4 sm:$0xff]   ;;  %v6928_v11 = vld [vmem:[#allocation5 + $0xc8] ss:$16 sps:$4 sm:$0xff]  }
  0xa6   : > { %2427 = vmatprep.subr.bf16.mxu0 %v6835_v12  ;;  %6060 = vmatprep.subr.bf16.mxu1 %v6835_v12  ;;  %v7915_v54 = vld [vmem:[%s7881_s12 + $0x74] ss:$28 sps:$4 sm:$0xff]   ;;  %v7930_v7 = vld [vmem:[%s7881_s12 + $0xa8] ss:$28 sps:$4 sm:$0xff]   ;;  %s5403_s10 = sshll.u32 %s8765_s29, 4  ;;  %s7644_s28 = smov [#allocation10]   ;;  %s8834_s10 = int_to_ptr.vmem [resolvable:$true] %s5403_s10 }
  0xa7   : > { %v6903_v55 = vld [vmem:[%s7881_s12 + $0x234] ss:$28 sps:$4 sm:$0xff]   ;;  %v6924_v9 = vld [vmem:[%s7881_s12 + $0x268] ss:$28 sps:$4 sm:$0xff]   ;;  %s7555_s30 = scalar_lea.vmem %s8834_s10, 4096  ;;  %s7559_s9 = sshll.u32 %s7644_s28, 4  ;;  %s7560_s9 = int_to_ptr.vmem [resolvable:$false] %s7559_s9 }
  0xa8   : > { %v6895_v56 = vld [vmem:[#allocation5 + $0x260] ss:$16 sps:$4 sm:$0xff]   ;;  %v6915_v0 = vld [vmem:[#allocation5 + $0x2a4] ss:$16 sps:$4 sm:$0xff]   ;;  %p7556_p10 = scmp.ne.s32.totalorder %s8834_s10, %s7555_s30  ;;  %s7561_s11 = scalar_lea.vmem %s7560_s9, 8192 }
  0xa9   : > { %2428 = vmatpush1.bf16.msra.mxu0 %v6837_v14  ;;  %6076 = vmatpush1.bf16.msra.mxu1 %v6837_v14  ;;  %v6907_v62 = vld [vmem:[#allocation5 + $0x280] ss:$16 sps:$4 sm:$0xff]   ;;  %v6927_v6 = vld [vmem:[#allocation5 + $0x2c4] ss:$16 sps:$4 sm:$0xff]   ;;  %v6936_v14 = vld [vmem:[#allocation5 + $0xec] ss:$16 sps:$4 sm:$0xff]   ;;  %p7562_p12 = scmp.lt.s32.totalorder %s8834_s10, %s7560_s9  ;;  %p7563_p2 = scmp.lt.s32.totalorder %s7561_s11, %s7555_s30 }
  0xaa   : > { %2429 = vmatprep.subr.bf16.mxu0 %v6838_v16  ;;  %6061 = vmatprep.subr.bf16.mxu1 %v6838_v16  ;;  %v6913_v4 = vld [vmem:[#allocation5 + $0x2a0] ss:$16 sps:$4 sm:$0xff]   ;;  %v6933_v12 = vld [vmem:[#allocation5 + $0x2e4] ss:$16 sps:$4 sm:$0xff]   ;;  %p7557_p3 = pnand %p7556_p10, %p7829_p5 }
  0xab   : > { %v6925_v10 = vld [vmem:[#allocation5 + $0x2c0] ss:$16 sps:$4 sm:$0xff]   ;;  %p7564_p1 = por %p7563_p2, %p7562_p12 }
  0xac   : > { %v7935_v15 = vld [vmem:[%s7881_s12 + $0xe4] ss:$28 sps:$4 sm:$0xff]   ;;  %p7558_p7 = pneg %p7557_p3 }
  0xad   : > { %2430 = vmatpush1.bf16.msra.mxu0 %v6840_v17  ;;  %6077 = vmatpush1.bf16.msra.mxu1 %v6840_v17  ;;  %v6939_v16 = vld [vmem:[%s7881_s12 + $0x2a4] ss:$28 sps:$4 sm:$0xff]  }
  0xae   : > { %2431 = vmatprep.subr.bf16.mxu0 %v6841_v18  ;;  %6062 = vmatprep.subr.bf16.mxu1 %v6841_v18  ;;  %v6931_v17 = vld [vmem:[#allocation5 + $0x2e0] ss:$16 sps:$4 sm:$0xff]   ;;  %v6934_v18 = vld [vmem:[#allocation5 + $0xe8] ss:$16 sps:$4 sm:$0xff]   ;;  %p7565_p4 = pnand %p7564_p1, %p7558_p7 }
  0xb1   : > { %2432 = vmatpush1.bf16.msra.mxu0 %v6843_v19  ;;  %6078 = vmatpush1.bf16.msra.mxu1 %v6843_v19  ;;  %v6945_v19 = vld [vmem:[#allocation5 + $0x304] ss:$16 sps:$4 sm:$0xff]  }
  0xb2   : > { %2433 = vmatprep.subr.bf16.mxu0 %v6844_v20  ;;  %6063 = vmatprep.subr.bf16.mxu1 %v6844_v20  ;;  %v7940_v20 = vld [vmem:[%s7881_s12 + $0xe0] ss:$28 sps:$4 sm:$0xff]  }
  0xb5   : > { %2434 = vmatpush1.bf16.msra.mxu0 %v6846_v21  ;;  %6079 = vmatpush1.bf16.msra.mxu1 %v6846_v21  ;;  %v6948_v21 = vld [vmem:[#allocation5 + $0x10c] ss:$16 sps:$4 sm:$0xff]  }
  0xb6   : > { %2435 = vmatprep.subr.bf16.mxu0 %v6847_v22  ;;  %6064 = vmatprep.subr.bf16.mxu1 %v6847_v22  ;;  %v6942_v22 = vld [vmem:[%s7881_s12 + $0x2a0] ss:$28 sps:$4 sm:$0xff]  }
  0xb9   : > { %2436 = vmatpush1.bf16.msra.mxu0 %v6849_v23  ;;  %6080 = vmatpush1.bf16.msra.mxu1 %v6849_v23  ;;  %v6943_v23 = vld [vmem:[#allocation5 + $0x300] ss:$16 sps:$4 sm:$0xff]  }
  0xba   : > { %2437 = vmatprep.subr.bf16.mxu0 %v6850_v24  ;;  %6065 = vmatprep.subr.bf16.mxu1 %v6850_v24  ;;  %v6946_v24 = vld [vmem:[#allocation5 + $0x108] ss:$16 sps:$4 sm:$0xff]  }
  0xbd   : > { %2438 = vmatpush1.bf16.msra.mxu0 %v6852_v25  ;;  %6081 = vmatpush1.bf16.msra.mxu1 %v6852_v25  ;;  %v6951_v25 = vld [vmem:[#allocation5 + $0x324] ss:$16 sps:$4 sm:$0xff]  }
  0xbe   : > { %2439 = vmatprep.subr.bf16.mxu0 %v6853_v26  ;;  %6066 = vmatprep.subr.bf16.mxu1 %v6853_v26  ;;  %v6954_v26 = vld [vmem:[#allocation5 + $0x12c] ss:$16 sps:$4 sm:$0xff]  }
  0xc1   : > { %2440 = vmatpush1.bf16.msra.mxu0 %v6855_v27  ;;  %6082 = vmatpush1.bf16.msra.mxu1 %v6855_v27  ;;  %v7945_v27 = vld [vmem:[%s7881_s12 + $0x11c] ss:$28 sps:$4 sm:$0xff]  }
  0xc2   : > { %2441 = vmatprep.subr.bf16.mxu0 %v6856_v28  ;;  %6067 = vmatprep.subr.bf16.mxu1 %v6856_v28  ;;  %v6957_v28 = vld [vmem:[%s7881_s12 + $0x2dc] ss:$28 sps:$4 sm:$0xff]  }
  0xc5   : > { %2442 = vmatpush1.bf16.msra.mxu0 %v6858_v29  ;;  %6083 = vmatpush1.bf16.msra.mxu1 %v6858_v29  ;;  %v6949_v29 = vld [vmem:[#allocation5 + $0x320] ss:$16 sps:$4 sm:$0xff]  }
  0xc6   : > { %2443 = vmatprep.subr.bf16.mxu0 %v6859_v30  ;;  %6068 = vmatprep.subr.bf16.mxu1 %v6859_v30  ;;  %v6952_v30 = vld [vmem:[#allocation5 + $0x128] ss:$16 sps:$4 sm:$0xff]  }
  0xc9   : > { %2444 = vmatpush1.bf16.msra.mxu0 %v6861_v31  ;;  %6084 = vmatpush1.bf16.msra.mxu1 %v6861_v31  ;;  %v6963_v31 = vld [vmem:[#allocation5 + $0x344] ss:$16 sps:$4 sm:$0xff]  }
  0xca   : > { %2445 = vmatprep.subr.bf16.mxu0 %v6862_v32  ;;  %6069 = vmatprep.subr.bf16.mxu1 %v6862_v32  ;;  %v7950_v32 = vld [vmem:[%s7881_s12 + $0x118] ss:$28 sps:$4 sm:$0xff]  }
  0xcd   : > { %2446 = vmatpush1.bf16.msra.mxu0 %v6864_v33  ;;  %6085 = vmatpush1.bf16.msra.mxu1 %v6864_v33  ;;  %v6966_v33 = vld [vmem:[#allocation5 + $0x14c] ss:$16 sps:$4 sm:$0xff]  }
  0xce   : > { %2608 = vmatprep.subr.bf16.mxu0 %v6873_v34  ;;  %3187 = vmatprep.subr.bf16.mxu1 %v6876_v36  ;;  %v6960_v34 = vld [vmem:[%s7881_s12 + $0x2d8] ss:$28 sps:$4 sm:$0xff]   ;;  %v6961_v36 = vld [vmem:[#allocation5 + $0x340] ss:$16 sps:$4 sm:$0xff]  }
  0xd0   : > { %2448 = vmatmul.mubr.bf16.vlgmr.msra.gmra.mrb[0].mxu0 %v7901_v35  ;;  %2528 = vmatmul.mubr.bf16.vlgmr.msra.gmra.mrb[0].mxu1 %v6868_v37  ;;  %v6964_v37 = vld [vmem:[#allocation5 + $0x148] ss:$16 sps:$4 sm:$0xff]  }
  0xd1   : > { %2609 = vmatpush1.bf16.msra.mxu0 %v6871_v38  ;;  %3188 = vmatpush1.bf16.msra.mxu1 %v6874_v39  ;;  %v6969_v38 = vld [vmem:[#allocation5 + $0x364] ss:$16 sps:$4 sm:$0xff]   ;;  %v6972_v39 = vld [vmem:[#allocation5 + $0x16c] ss:$16 sps:$4 sm:$0xff]  }
  0xd2   : > { %2610 = vmatprep.subr.bf16.mxu0 %v6879_v40  ;;  %3189 = vmatprep.subr.bf16.mxu1 %v6882_v41  ;;  %v7955_v40 = vld [vmem:[%s7881_s12 + $0x154] ss:$28 sps:$4 sm:$0xff]  }
  0xd3   : > { %2457 = vmatprep.mubr.bf16.mxu0 %v7905_v42  ;;  %2537 = vmatprep.mubr.bf16.mxu1 %v6885_v43  ;;  %v6975_v41 = vld [vmem:[%s7881_s12 + $0x314] ss:$28 sps:$4 sm:$0xff]  }
  0xd4   : > { %v6967_v43 = vld [vmem:[#allocation5 + $0x360] ss:$16 sps:$4 sm:$0xff]  }
  0xd5   : > { %2611 = vmatpush1.bf16.msra.mxu0 %v6877_v44  ;;  %3190 = vmatpush1.bf16.msra.mxu1 %v6880_v45  ;;  %v6970_v44 = vld [vmem:[#allocation5 + $0x168] ss:$16 sps:$4 sm:$0xff]   ;;  %v6981_v45 = vld [vmem:[#allocation5 + $0x384] ss:$16 sps:$4 sm:$0xff]  }
  0xd6   : > { %2612 = vmatprep.subr.bf16.mxu0 %v6891_v46  ;;  %3191 = vmatprep.subr.bf16.mxu1 %v6894_v48  ;;  %v7960_v46 = vld [vmem:[%s7881_s12 + $0x150] ss:$28 sps:$4 sm:$0xff]  }
  0xd7   : > { %v6984_v48 = vld [vmem:[#allocation5 + $0x18c] ss:$16 sps:$4 sm:$0xff]  }
  0xd8   : > { %2458 = vmatmul.mubr.bf16.gmra.mrb[4].mxu0 %v7910_v47  ;;  %2538 = vmatmul.mubr.bf16.gmra.mrb[4].mxu1 %v6888_v49  ;;  %v6978_v49 = vld [vmem:[%s7881_s12 + $0x310] ss:$28 sps:$4 sm:$0xff]  }
  0xd9   : > { %2613 = vmatpush1.bf16.msra.mxu0 %v6889_v50  ;;  %3192 = vmatpush1.bf16.msra.mxu1 %v6892_v51  ;;  %v6979_v50 = vld [vmem:[#allocation5 + $0x380] ss:$16 sps:$4 sm:$0xff]   ;;  %v6982_v51 = vld [vmem:[#allocation5 + $0x188] ss:$16 sps:$4 sm:$0xff]  }
  0xda   : > { %2614 = vmatprep.subr.bf16.mxu0 %v6897_v52  ;;  %3193 = vmatprep.subr.bf16.mxu1 %v6900_v53  ;;  %v6987_v52 = vld [vmem:[#allocation5 + $0x3a4] ss:$16 sps:$4 sm:$0xff]   ;;  %v6990_v53 = vld [vmem:[#allocation5 + $0x1ac] ss:$16 sps:$4 sm:$0xff]  }
  0xdb   : > { %2467 = vmatprep.mubr.bf16.mxu0 %v7915_v54  ;;  %2547 = vmatprep.mubr.bf16.mxu1 %v6903_v55  ;;  %v7965_v55 = vld [vmem:[%s7881_s12 + $0x18c] ss:$28 sps:$4 sm:$0xff]  }
  0xdd   : > { %2615 = vmatpush1.bf16.msra.mxu0 %v6895_v56  ;;  %3194 = vmatpush1.bf16.msra.mxu1 %v6898_v57  ;;  %v6993_v56 = vld [vmem:[%s7881_s12 + $0x34c] ss:$28 sps:$4 sm:$0xff]   ;;  %v6985_v57 = vld [vmem:[#allocation5 + $0x3a0] ss:$16 sps:$4 sm:$0xff]  }
  0xde   : > { %2616 = vmatprep.subr.bf16.mxu0 %v6909_v58  ;;  %3195 = vmatprep.subr.bf16.mxu1 %v6912_v60  ;;  %v6988_v58 = vld [vmem:[#allocation5 + $0x1a8] ss:$16 sps:$4 sm:$0xff]   ;;  %v6999_v60 = vld [vmem:[#allocation5 + $0x3c4] ss:$16 sps:$4 sm:$0xff]  }
  0xe0   : > { %2468 = vmatmul.mubr.bf16.gmra.mrb[8].mxu0 %v7920_v59  ;;  %2548 = vmatmul.mubr.bf16.gmra.mrb[8].mxu1 %v6906_v61  ;;  %v7002_v61 = vld [vmem:[#allocation5 + $0x1cc] ss:$16 sps:$4 sm:$0xff]  }
  0xe1   : > { %2617 = vmatpush1.bf16.msra.mxu0 %v6907_v62  ;;  %3196 = vmatpush1.bf16.msra.mxu1 %v6910_v63  ;;  %v7971_v62 = vld [vmem:[%s7881_s12 + $0x188] ss:$28 sps:$4 sm:$0xff]  }
  0xe2   : > { %2618 = vmatprep.subr.bf16.mxu0 %v6915_v0  ;;  %3197 = vmatprep.subr.bf16.mxu1 %v6918_v1  ;;  %v6996_v63 = vld [vmem:[%s7881_s12 + $0x348] ss:$28 sps:$4 sm:$0xff]   ;;  %v6997_v0 = vld [vmem:[#allocation5 + $0x3c0] ss:$16 sps:$4 sm:$0xff]  }
  0xe3   : > { %2477 = vmatprep.mubr.bf16.mxu0 %v7925_v2  ;;  %2557 = vmatprep.mubr.bf16.mxu1 %v6921_v3  ;;  %v7000_v1 = vld [vmem:[#allocation5 + $0x1c8] ss:$16 sps:$4 sm:$0xff]   ;;  %v7005_v3 = vld [vmem:[#allocation5 + $0x3e4] ss:$16 sps:$4 sm:$0xff]  }
  0xe5   : > { %2619 = vmatpush1.bf16.msra.mxu0 %v6913_v4  ;;  %3198 = vmatpush1.bf16.msra.mxu1 %v6916_v5  ;;  %v7008_v4 = vld [vmem:[#allocation5 + $0x1ec] ss:$16 sps:$4 sm:$0xff]  }
  0xe6   : > { %2620 = vmatprep.subr.bf16.mxu0 %v6927_v6  ;;  %3199 = vmatprep.subr.bf16.mxu1 %v6930_v8  ;;  %v7975_v5 = vld [vmem:[%s7881_s12 + $0xc] ss:$28 sps:$4 sm:$0xff]   ;;  %v7003_v6 = vld [vmem:[#allocation5 + $0x3e0] ss:$16 sps:$4 sm:$0xff]  }
  0xe7   : > { %v7006_v8 = vld [vmem:[#allocation5 + $0x1e8] ss:$16 sps:$4 sm:$0xff]  }
  0xe8   : > { %2478 = vmatmul.mubr.bf16.gmra.mrb[12].mxu0 %v7930_v7  ;;  %2558 = vmatmul.mubr.bf16.gmra.mrb[12].mxu1 %v6924_v9  ;;  %v7014_v9 = vld [vmem:[#allocation5 + $0x404] ss:$16 sps:$4 sm:$0xff]  }
  0xe9   : > { %2621 = vmatpush1.bf16.msra.mxu0 %v6925_v10  ;;  %3200 = vmatpush1.bf16.msra.mxu1 %v6928_v11  ;;  %v7017_v10 = vld [vmem:[#allocation5 + $0x20c] ss:$16 sps:$4 sm:$0xff]   ;;  %v7981_v11 = vld [vmem:[%s7881_s12 + $0x8] ss:$28 sps:$4 sm:$0xff]  }
  0xea   : > { %2622 = vmatprep.subr.bf16.mxu0 %v6933_v12  ;;  %3201 = vmatprep.subr.bf16.mxu1 %v6936_v14  ;;  %v7012_v12 = vld [vmem:[#allocation5 + $0x400] ss:$16 sps:$4 sm:$0xff]   ;;  %v7015_v14 = vld [vmem:[#allocation5 + $0x208] ss:$16 sps:$4 sm:$0xff]  }
  0xeb   : > { %2487 = vmatprep.mubr.bf16.mxu0 %v7935_v15  ;;  %2567 = vmatprep.mubr.bf16.mxu1 %v6939_v16  ;;  %v7984_v16 = vld [vmem:[%s7881_s12 + $0x44] ss:$28 sps:$4 sm:$0xff]  }
  0xed   : > { %2623 = vmatpush1.bf16.msra.mxu0 %v6931_v17  ;;  %3202 = vmatpush1.bf16.msra.mxu1 %v6934_v18  ;;  %v7023_v17 = vld [vmem:[#allocation5 + $0x424] ss:$16 sps:$4 sm:$0xff]   ;;  %v7026_v18 = vld [vmem:[#allocation5 + $0x22c] ss:$16 sps:$4 sm:$0xff]  }
  0xee   : > { %2624 = vmatprep.subr.bf16.mxu0 %v6945_v19  ;;  %3203 = vmatprep.subr.bf16.mxu1 %v6948_v21  ;;  %v7021_v19 = vld [vmem:[#allocation5 + $0x420] ss:$16 sps:$4 sm:$0xff]   ;;  %v7032_v21 = vld [vmem:[#allocation5 + $0x444] ss:$16 sps:$4 sm:$0xff]  }
  0xf0   : > { %2488 = vmatmul.mubr.bf16.gmra.mrb[16].mxu0 %v7940_v20  ;;  %2568 = vmatmul.mubr.bf16.gmra.mrb[16].mxu1 %v6942_v22  ;;  %v7035_v22 = vld [vmem:[#allocation5 + $0x24c] ss:$16 sps:$4 sm:$0xff]  }
  0xf1   : > { %2625 = vmatpush1.bf16.msra.mxu0 %v6943_v23  ;;  %3204 = vmatpush1.bf16.msra.mxu1 %v6946_v24  ;;  %v7991_v23 = vld [vmem:[%s7881_s12 + $0x40] ss:$28 sps:$4 sm:$0xff]  }
  0xf2   : > { %2626 = vmatprep.subr.bf16.mxu0 %v6951_v25  ;;  %3205 = vmatprep.subr.bf16.mxu1 %v6954_v26  ;;  %v7994_v24 = vld [vmem:[%s7881_s12 + $0x7c] ss:$28 sps:$4 sm:$0xff]   ;;  %v7030_v25 = vld [vmem:[#allocation5 + $0x440] ss:$16 sps:$4 sm:$0xff]   ;;  %v7041_v26 = vld [vmem:[#allocation5 + $0x464] ss:$16 sps:$4 sm:$0xff]  }
  0xf3   : > { %2497 = vmatprep.mubr.bf16.mxu0 %v7945_v27  ;;  %2577 = vmatprep.mubr.bf16.mxu1 %v6957_v28  ;;  %v7044_v28 = vld [vmem:[#allocation5 + $0x26c] ss:$16 sps:$4 sm:$0xff]  }
  0xf5   : > { %2627 = vmatpush1.bf16.msra.mxu0 %v6949_v29  ;;  %3206 = vmatpush1.bf16.msra.mxu1 %v6952_v30  ;;  %v7042_v29 = vld [vmem:[#allocation5 + $0x268] ss:$16 sps:$4 sm:$0xff]   ;;  %v7050_v30 = vld [vmem:[#allocation5 + $0x484] ss:$16 sps:$4 sm:$0xff]  }
  0xf6   : > { %2628 = vmatprep.subr.bf16.mxu0 %v6963_v31  ;;  %3207 = vmatprep.subr.bf16.mxu1 %v6966_v33  ;;  %v7053_v31 = vld [vmem:[#allocation5 + $0x28c] ss:$16 sps:$4 sm:$0xff]   ;;  %v8001_v33 = vld [vmem:[%s7881_s12 + $0x78] ss:$28 sps:$4 sm:$0xff]  }
  0xf8   : > { %2498 = vmatmul.mubr.bf16.gmra.mrb[20].mxu0 %v7950_v32  ;;  %2578 = vmatmul.mubr.bf16.gmra.mrb[20].mxu1 %v6960_v34  ;;  %v8004_v34 = vld [vmem:[%s7881_s12 + $0xb4] ss:$28 sps:$4 sm:$0xff]  }
  0xf9   : > { %2629 = vmatpush1.bf16.msra.mxu0 %v6961_v36  ;;  %3208 = vmatpush1.bf16.msra.mxu1 %v6964_v37  ;;  %v7048_v36 = vld [vmem:[#allocation5 + $0x480] ss:$16 sps:$4 sm:$0xff]   ;;  %v7051_v37 = vld [vmem:[#allocation5 + $0x288] ss:$16 sps:$4 sm:$0xff]  }
  0xfa   : > { %2630 = vmatprep.subr.bf16.mxu0 %v6969_v38  ;;  %3209 = vmatprep.subr.bf16.mxu1 %v6972_v39  ;;  %v7057_v38 = vld [vmem:[#allocation5 + $0x4a0] ss:$16 sps:$4 sm:$0xff]   ;;  %v7060_v39 = vld [vmem:[#allocation5 + $0x2a8] ss:$16 sps:$4 sm:$0xff]  }
  0xfb   : > { %2507 = vmatprep.mubr.bf16.mxu0 %v7955_v40  ;;  %2587 = vmatprep.mubr.bf16.mxu1 %v6975_v41  ;;  %v7068_v41 = vld [vmem:[#allocation5 + $0x4c4] ss:$16 sps:$4 sm:$0xff]  }
  0xfd   : > { %2631 = vmatpush1.bf16.msra.mxu0 %v6967_v43  ;;  %3210 = vmatpush1.bf16.msra.mxu1 %v6970_v44  ;;  %v7071_v43 = vld [vmem:[#allocation5 + $0x2cc] ss:$16 sps:$4 sm:$0xff]  }
  0xfe   : > { %2632 = vmatprep.subr.bf16.mxu0 %v6981_v45  ;;  %3211 = vmatprep.subr.bf16.mxu1 %v6984_v48  ;;  %v8011_v44 = vld [vmem:[%s7881_s12 + $0xb0] ss:$28 sps:$4 sm:$0xff]  }
  0xff   : > { %v8014_v45 = vld [vmem:[%s7881_s12 + $0xec] ss:$28 sps:$4 sm:$0xff]   ;;  %v7066_v48 = vld [vmem:[#allocation5 + $0x4c0] ss:$16 sps:$4 sm:$0xff]  }
 0x100   : > { %2508 = vmatmul.mubr.bf16.gmra.mrb[24].mxu0 %v7960_v46  ;;  %2588 = vmatmul.mubr.bf16.gmra.mrb[24].mxu1 %v6978_v49  ;;  %v7069_v49 = vld [vmem:[#allocation5 + $0x2c8] ss:$16 sps:$4 sm:$0xff]  }
 0x101   : > { %2633 = vmatpush1.bf16.msra.mxu0 %v6979_v50  ;;  %3212 = vmatpush1.bf16.msra.mxu1 %v6982_v51  ;;  %v7075_v50 = vld [vmem:[#allocation5 + $0x4e0] ss:$16 sps:$4 sm:$0xff]   ;;  %v7078_v51 = vld [vmem:[#allocation5 + $0x2e8] ss:$16 sps:$4 sm:$0xff]  }
 0x102   : > { %2634 = vmatprep.subr.bf16.mxu0 %v6987_v52  ;;  %3213 = vmatprep.subr.bf16.mxu1 %v6990_v53  ;;  %v7086_v52 = vld [vmem:[#allocation5 + $0x504] ss:$16 sps:$4 sm:$0xff]   ;;  %v7089_v53 = vld [vmem:[#allocation5 + $0x30c] ss:$16 sps:$4 sm:$0xff]  }
 0x103   : > { %2517 = vmatprep.mubr.bf16.mxu0 %v7965_v55  ;;  %2597 = vmatprep.mubr.bf16.mxu1 %v6993_v56  ;;  %v8021_v56 = vld [vmem:[%s7881_s12 + $0xe8] ss:$28 sps:$4 sm:$0xff]  }
 0x105   : > { %2635 = vmatpush1.bf16.msra.mxu0 %v6985_v57  ;;  %3214 = vmatpush1.bf16.msra.mxu1 %v6988_v58  ;;  %v8024_v57 = vld [vmem:[%s7881_s12 + $0x124] ss:$28 sps:$4 sm:$0xff]  }
 0x106   : > { %2636 = vmatprep.subr.bf16.mxu0 %v6999_v60  ;;  %3215 = vmatprep.subr.bf16.mxu1 %v7002_v61  ;;  %v7084_v58 = vld [vmem:[#allocation5 + $0x500] ss:$16 sps:$4 sm:$0xff]   ;;  %v7098_v60 = vld [vmem:[#allocation5 + $0x32c] ss:$16 sps:$4 sm:$0xff]  }
 0x107   : > { %v7093_v61 = vld [vmem:[#allocation5 + $0x520] ss:$16 sps:$4 sm:$0xff]  }
 0x108   : > { %2518 = vmatmul.mubr.bf16.gmra.mrb[28].mxu0 %v7971_v62  ;;  %2598 = vmatmul.mubr.bf16.gmra.mrb[28].mxu1 %v6996_v63  ;;  %v8031_v63 = vld [vmem:[%s7881_s12 + $0x120] ss:$28 sps:$4 sm:$0xff]  }
 0x109   : > { %2637 = vmatpush1.bf16.msra.mxu0 %v6997_v0  ;;  %3216 = vmatpush1.bf16.msra.mxu1 %v7000_v1  ;;  %v7096_v0 = vld [vmem:[#allocation5 + $0x328] ss:$16 sps:$4 sm:$0xff]  }
 0x10a   : > { %2638 = vmatprep.subr.bf16.mxu0 %v7005_v3  ;;  %3217 = vmatprep.subr.bf16.mxu1 %v7008_v4  ;;  %v8034_v1 = vld [vmem:[%s7881_s12 + $0x15c] ss:$28 sps:$4 sm:$0xff]   ;;  %v7104_v3 = vld [vmem:[#allocation5 + $0x544] ss:$16 sps:$4 sm:$0xff]  }
 0x10b   : > { %2640 = vmatprep.mubr.bf16.mxu0 %v7975_v5  ;;  %3219 = vmatprep.mubr.bf16.mxu1 %v7896_v13  ;;  %v7024_v13 = vld [vmem:[#allocation5 + $0x228] ss:$16 sps:$4 sm:$0xff]   ;;  %v7107_v4 = vld [vmem:[#allocation5 + $0x34c] ss:$16 sps:$4 sm:$0xff]  }
 0x10d   : > { %2639 = vmatpush1.bf16.msra.mxu0 %v7003_v6  ;;  %3218 = vmatpush1.bf16.msra.mxu1 %v7006_v8  ;;  %v7102_v6 = vld [vmem:[#allocation5 + $0x540] ss:$16 sps:$4 sm:$0xff]   ;;  %v7105_v8 = vld [vmem:[#allocation5 + $0x348] ss:$16 sps:$4 sm:$0xff]  }
 0x10e   : > { %2801 = vmatprep.subr.bf16.mxu0 %v7014_v9  ;;  %3380 = vmatprep.subr.bf16.mxu1 %v7017_v10  ;;  %v7111_v9 = vld [vmem:[#allocation5 + $0x560] ss:$16 sps:$4 sm:$0xff]   ;;  %v7114_v10 = vld [vmem:[#allocation5 + $0x368] ss:$16 sps:$4 sm:$0xff]  }
 0x110   : > { %2641 = vmatmul.mubr.bf16.vlgmr.msra.gmra.mrb[0].mxu0 %v7981_v11  ;;  %3220 = vmatmul.mubr.bf16.vlgmr.msra.gmra.mrb[32].mxu1 %v7901_v35  ;;  %v7033_v35 = vld [vmem:[#allocation5 + $0x248] ss:$16 sps:$4 sm:$0xff]  }
 0x111   : > { %2802 = vmatpush1.bf16.msra.mxu0 %v7012_v12  ;;  %3381 = vmatpush1.bf16.msra.mxu1 %v7015_v14  ;;  %v7122_v12 = vld [vmem:[#allocation5 + $0x584] ss:$16 sps:$4 sm:$0xff]   ;;  %v7125_v14 = vld [vmem:[#allocation5 + $0x38c] ss:$16 sps:$4 sm:$0xff]  }
 0x112   : > { %2650 = vmatprep.mubr.bf16.mxu0 %v7984_v16  ;;  %3229 = vmatprep.mubr.bf16.mxu1 %v7905_v42  ;;  %v7039_v42 = vld [vmem:[#allocation5 + $0x460] ss:$16 sps:$4 sm:$0xff]  }
 0x113   : > { %2803 = vmatprep.subr.bf16.mxu0 %v7023_v17  ;;  %3382 = vmatprep.subr.bf16.mxu1 %v7026_v18  ;;  %v8041_v17 = vld [vmem:[%s7881_s12 + $0x158] ss:$28 sps:$4 sm:$0xff]  }
 0x114   : > { %v8044_v18 = vld [vmem:[%s7881_s12 + $0x194] ss:$28 sps:$4 sm:$0xff]  }
 0x115   : > { %2804 = vmatpush1.bf16.msra.mxu0 %v7021_v19  ;;  %3383 = vmatpush1.bf16.msra.mxu1 %v7024_v13  ;;  %v7120_v19 = vld [vmem:[#allocation5 + $0x580] ss:$16 sps:$4 sm:$0xff]   ;;  %v7123_v13 = vld [vmem:[#allocation5 + $0x388] ss:$16 sps:$4 sm:$0xff]  }
 0x116   : > { %2805 = vmatprep.subr.bf16.mxu0 %v7032_v21  ;;  %3384 = vmatprep.subr.bf16.mxu1 %v7035_v22  ;;  %v7134_v21 = vld [vmem:[#allocation5 + $0x3ac] ss:$16 sps:$4 sm:$0xff]   ;;  %v7132_v22 = vld [vmem:[#allocation5 + $0x3a8] ss:$16 sps:$4 sm:$0xff]  }
 0x118   : > { %2651 = vmatmul.mubr.bf16.gmra.mrb[4].mxu0 %v7991_v23  ;;  %3230 = vmatmul.mubr.bf16.gmra.mrb[36].mxu1 %v7910_v47  ;;  %v7059_v47 = vld [vmem:[#allocation5 + $0x4a4] ss:$16 sps:$4 sm:$0xff]  }
 0x119   : > { %2660 = vmatprep.mubr.bf16.mxu0 %v7994_v24  ;;  %3239 = vmatprep.mubr.bf16.mxu1 %v7915_v54  ;;  %v7062_v54 = vld [vmem:[#allocation5 + $0x2ac] ss:$16 sps:$4 sm:$0xff]  }
 0x11a   : > { %2806 = vmatpush1.bf16.msra.mxu0 %v7030_v25  ;;  %3385 = vmatpush1.bf16.msra.mxu1 %v7033_v35  ;;  %v7140_v25 = vld [vmem:[#allocation5 + $0x5c4] ss:$16 sps:$4 sm:$0xff]   ;;  %v7143_v35 = vld [vmem:[#allocation5 + $0x3cc] ss:$16 sps:$4 sm:$0xff]  }
 0x11b   : > { %2807 = vmatprep.subr.bf16.mxu0 %v7041_v26  ;;  %3386 = vmatprep.subr.bf16.mxu1 %v7044_v28  ;;  %v8051_v26 = vld [vmem:[%s7881_s12 + $0x190] ss:$28 sps:$4 sm:$0xff]  }
 0x11c   : > { %v8054_v28 = vld [vmem:[%s7881_s12 + $0x1cc] ss:$28 sps:$4 sm:$0xff]  }
 0x11e   : > { %2808 = vmatpush1.bf16.msra.mxu0 %v7039_v42  ;;  %3387 = vmatpush1.bf16.msra.mxu1 %v7042_v29  ;;  %v7138_v42 = vld [vmem:[#allocation5 + $0x5c0] ss:$16 sps:$4 sm:$0xff]   ;;  %v7141_v29 = vld [vmem:[#allocation5 + $0x3c8] ss:$16 sps:$4 sm:$0xff]  }
 0x11f   : > { %2809 = vmatprep.subr.bf16.mxu0 %v7050_v30  ;;  %3388 = vmatprep.subr.bf16.mxu1 %v7053_v31  ;;  %v7152_v30 = vld [vmem:[#allocation5 + $0x3ec] ss:$16 sps:$4 sm:$0xff]   ;;  %v7150_v31 = vld [vmem:[#allocation5 + $0x3e8] ss:$16 sps:$4 sm:$0xff]  }
 0x120   : > { %2661 = vmatmul.mubr.bf16.gmra.mrb[8].mxu0 %v8001_v33  ;;  %3240 = vmatmul.mubr.bf16.gmra.mrb[40].mxu1 %v7920_v59  ;;  %v7077_v59 = vld [vmem:[#allocation5 + $0x4e4] ss:$16 sps:$4 sm:$0xff]  }
 0x121   : > { %2670 = vmatprep.mubr.bf16.mxu0 %v8004_v34  ;;  %3249 = vmatprep.mubr.bf16.mxu1 %v7925_v2  ;;  %v7080_v2 = vld [vmem:[#allocation5 + $0x2ec] ss:$16 sps:$4 sm:$0xff]  }
 0x122   : > { %2810 = vmatpush1.bf16.msra.mxu0 %v7048_v36  ;;  %3389 = vmatpush1.bf16.msra.mxu1 %v7051_v37  ;;  %v7425_v36 = vld [vmem:[%s7881_s12 + $0x1c4] ss:$28 sps:$4 sm:$0xff]  }
 0x123   : > { %2811 = vmatprep.subr.bf16.mxu0 %v7059_v47  ;;  %3390 = vmatprep.subr.bf16.mxu1 %v7062_v54  ;;  %v7158_v37 = vld [vmem:[#allocation5 + $0x604] ss:$16 sps:$4 sm:$0xff]   ;;  %v7161_v47 = vld [vmem:[#allocation5 + $0x40c] ss:$16 sps:$4 sm:$0xff]  }
 0x124   : > { %v8061_v54 = vld [vmem:[%s7881_s12 + $0x1c8] ss:$28 sps:$4 sm:$0xff]  }
 0x126   : > { %2812 = vmatpush1.bf16.msra.mxu0 %v7057_v38  ;;  %3391 = vmatpush1.bf16.msra.mxu1 %v7060_v39  ;;  %v7426_v38 = vld [vmem:[%s7881_s12 + $0x1c0] ss:$28 sps:$4 sm:$0xff]  }
 0x127   : > { %2813 = vmatprep.subr.bf16.mxu0 %v7068_v41  ;;  %3392 = vmatprep.subr.bf16.mxu1 %v7071_v43  ;;  %v7427_v39 = vld [vmem:[%s7881_s12 + $0x1fc] ss:$28 sps:$4 sm:$0xff]  }
 0x128   : > { %2671 = vmatmul.mubr.bf16.gmra.mrb[12].mxu0 %v8011_v44  ;;  %3250 = vmatmul.mubr.bf16.gmra.mrb[44].mxu1 %v7930_v7  ;;  %v7087_v7 = vld [vmem:[#allocation5 + $0x308] ss:$16 sps:$4 sm:$0xff]   ;;  %v8071_v41 = vld [vmem:[%s7881_s12 + $0x200] ss:$28 sps:$4 sm:$0xff]  }
 0x129   : > { %2680 = vmatprep.mubr.bf16.mxu0 %v8014_v45  ;;  %3259 = vmatprep.mubr.bf16.mxu1 %v7935_v15  ;;  %v7095_v15 = vld [vmem:[#allocation5 + $0x524] ss:$16 sps:$4 sm:$0xff]   ;;  %v8074_v43 = vld [vmem:[%s7881_s12 + $0x23c] ss:$28 sps:$4 sm:$0xff]  }
 0x12a   : > { %2814 = vmatpush1.bf16.msra.mxu0 %v7066_v48  ;;  %3393 = vmatpush1.bf16.msra.mxu1 %v7069_v49  ;;  %v7428_v48 = vld [vmem:[%s7881_s12 + $0x1f8] ss:$28 sps:$4 sm:$0xff]  }
 0x12b   : > { %2815 = vmatprep.subr.bf16.mxu0 %v7077_v59  ;;  %3394 = vmatprep.subr.bf16.mxu1 %v7080_v2  ;;  %v7429_v49 = vld [vmem:[%s7881_s12 + $0x234] ss:$28 sps:$4 sm:$0xff]  }
 0x12c   : > { %v8081_v59 = vld [vmem:[%s7881_s12 + $0x238] ss:$28 sps:$4 sm:$0xff]  }
 0x12d   : > { %v8084_v2 = vld [vmem:[%s7881_s12 + $0x274] ss:$28 sps:$4 sm:$0xff]  }
 0x12e   : > { %2816 = vmatpush1.bf16.msra.mxu0 %v7075_v50  ;;  %3395 = vmatpush1.bf16.msra.mxu1 %v7078_v51  ;;  %v7430_v50 = vld [vmem:[%s7881_s12 + $0x230] ss:$28 sps:$4 sm:$0xff]  }
 0x12f   : > { %2817 = vmatprep.subr.bf16.mxu0 %v7086_v52  ;;  %3396 = vmatprep.subr.bf16.mxu1 %v7089_v53  ;;  %v7431_v51 = vld [vmem:[%s7881_s12 + $0x26c] ss:$28 sps:$4 sm:$0xff]  }
 0x130   : > { %2681 = vmatmul.mubr.bf16.gmra.mrb[16].mxu0 %v8021_v56  ;;  %3260 = vmatmul.mubr.bf16.gmra.mrb[48].mxu1 %v7940_v20  ;;  %v7113_v20 = vld [vmem:[#allocation5 + $0x564] ss:$16 sps:$4 sm:$0xff]   ;;  %v8091_v52 = vld [vmem:[%s7881_s12 + $0x270] ss:$28 sps:$4 sm:$0xff]  }
 0x131   : > { %2690 = vmatprep.mubr.bf16.mxu0 %v8024_v57  ;;  %3269 = vmatprep.mubr.bf16.mxu1 %v7945_v27  ;;  %v7116_v27 = vld [vmem:[#allocation5 + $0x36c] ss:$16 sps:$4 sm:$0xff]  }
 0x132   : > { %2818 = vmatpush1.bf16.msra.mxu0 %v7084_v58  ;;  %3397 = vmatpush1.bf16.msra.mxu1 %v7087_v7  ;;  %v8094_v53 = vld [vmem:[%s7881_s12 + $0x2ac] ss:$28 sps:$4 sm:$0xff]   ;;  %v7433_v7 = vld [vmem:[%s7881_s12 + $0x2a4] ss:$28 sps:$4 sm:$0xff]  }
 0x133   : > { %2819 = vmatprep.subr.bf16.mxu0 %v7095_v15  ;;  %3398 = vmatprep.subr.bf16.mxu1 %v7098_v60  ;;  %v7432_v58 = vld [vmem:[%s7881_s12 + $0x268] ss:$28 sps:$4 sm:$0xff]  }
 0x134   : > { %v8101_v15 = vld [vmem:[%s7881_s12 + $0x2a8] ss:$28 sps:$4 sm:$0xff]  }
 0x135   : > { %v8104_v60 = vld [vmem:[%s7881_s12 + $0x2e4] ss:$28 sps:$4 sm:$0xff]  }
 0x136   : > { %2820 = vmatpush1.bf16.msra.mxu0 %v7093_v61  ;;  %3399 = vmatpush1.bf16.msra.mxu1 %v7096_v0  ;;  %v7434_v61 = vld [vmem:[%s7881_s12 + $0x2a0] ss:$28 sps:$4 sm:$0xff]  }
 0x137   : > { %2821 = vmatprep.subr.bf16.mxu0 %v7104_v3  ;;  %3400 = vmatprep.subr.bf16.mxu1 %v7107_v4  ;;  %v7435_v0 = vld [vmem:[%s7881_s12 + $0x2dc] ss:$28 sps:$4 sm:$0xff]  }
 0x138   : > { %2691 = vmatmul.mubr.bf16.gmra.mrb[20].mxu0 %v8031_v63  ;;  %3270 = vmatmul.mubr.bf16.gmra.mrb[52].mxu1 %v7950_v32  ;;  %v7131_v32 = vld [vmem:[#allocation5 + $0x5a4] ss:$16 sps:$4 sm:$0xff]   ;;  %v8111_v3 = vld [vmem:[%s7881_s12 + $0x2e0] ss:$28 sps:$4 sm:$0xff]  }
 0x139   : > { %2700 = vmatprep.mubr.bf16.mxu0 %v8034_v1  ;;  %3279 = vmatprep.mubr.bf16.mxu1 %v7955_v40  ;;  %v7129_v40 = vld [vmem:[#allocation5 + $0x5a0] ss:$16 sps:$4 sm:$0xff]   ;;  %v8114_v4 = vld [vmem:[%s7881_s12 + $0x31c] ss:$28 sps:$4 sm:$0xff]  }
 0x13a   : > { %2822 = vmatpush1.bf16.msra.mxu0 %v7102_v6  ;;  %3401 = vmatpush1.bf16.msra.mxu1 %v7105_v8  ;;  %v7436_v6 = vld [vmem:[%s7881_s12 + $0x2d8] ss:$28 sps:$4 sm:$0xff]  }
 0x13b   : > { %2823 = vmatprep.subr.bf16.mxu0 %v7113_v20  ;;  %3402 = vmatprep.subr.bf16.mxu1 %v7116_v27  ;;  %v7437_v8 = vld [vmem:[%s7881_s12 + $0x314] ss:$28 sps:$4 sm:$0xff]  }
 0x13c   : > { %v8121_v20 = vld [vmem:[%s7881_s12 + $0x318] ss:$28 sps:$4 sm:$0xff]  }
 0x13d   : > { %v8124_v27 = vld [vmem:[%s7881_s12 + $0x354] ss:$28 sps:$4 sm:$0xff]  }
 0x13e   : > { %2824 = vmatpush1.bf16.msra.mxu0 %v7111_v9  ;;  %3403 = vmatpush1.bf16.msra.mxu1 %v7114_v10  ;;  %v7438_v9 = vld [vmem:[%s7881_s12 + $0x310] ss:$28 sps:$4 sm:$0xff]  }
 0x13f   : > { %2825 = vmatprep.subr.bf16.mxu0 %v7122_v12  ;;  %3404 = vmatprep.subr.bf16.mxu1 %v7125_v14  ;;  %v7439_v10 = vld [vmem:[%s7881_s12 + $0x34c] ss:$28 sps:$4 sm:$0xff]   ;;  %v8134_v14 = vld [vmem:[%s7881_s12 + $0x14] ss:$28 sps:$4 sm:$0xff]  }
 0x140   : > { %2701 = vmatmul.mubr.bf16.gmra.mrb[24].mxu0 %v8041_v17  ;;  %3280 = vmatmul.mubr.bf16.gmra.mrb[56].mxu1 %v7960_v46  ;;  %v7149_v46 = vld [vmem:[#allocation5 + $0x5e4] ss:$16 sps:$4 sm:$0xff]   ;;  %v8131_v12 = vld [vmem:[%s7881_s12 + $0x350] ss:$28 sps:$4 sm:$0xff]  }
 0x141   : > { %2710 = vmatprep.mubr.bf16.mxu0 %v8044_v18  ;;  %3289 = vmatprep.mubr.bf16.mxu1 %v7965_v55  ;;  %v7147_v55 = vld [vmem:[#allocation5 + $0x5e0] ss:$16 sps:$4 sm:$0xff]  }
 0x142   : > { %2826 = vmatpush1.bf16.msra.mxu0 %v7120_v19  ;;  %3405 = vmatpush1.bf16.msra.mxu1 %v7123_v13  ;;  %v7440_v19 = vld [vmem:[%s7881_s12 + $0x348] ss:$28 sps:$4 sm:$0xff]   ;;  %v8141_v13 = vld [vmem:[%s7881_s12 + $0x10] ss:$28 sps:$4 sm:$0xff]  }
 0x143   : > { %2827 = vmatprep.subr.bf16.mxu0 %v7131_v32  ;;  %3406 = vmatprep.subr.bf16.mxu1 %v7134_v21  ;;  %v7156_v32 = vld [vmem:[#allocation5 + $0x600] ss:$16 sps:$4 sm:$0xff]   ;;  %v7159_v21 = vld [vmem:[#allocation5 + $0x408] ss:$16 sps:$4 sm:$0xff]  }
 0x146   : > { %2828 = vmatpush1.bf16.msra.mxu0 %v7129_v40  ;;  %3407 = vmatpush1.bf16.msra.mxu1 %v7132_v22  ;;  %v8144_v40 = vld [vmem:[%s7881_s12 + $0x4c] ss:$28 sps:$4 sm:$0xff]  }
 0x147   : > { %2829 = vmatprep.subr.bf16.mxu0 %v7140_v25  ;;  %3408 = vmatprep.subr.bf16.mxu1 %v7143_v35  ;;  %v7167_v22 = vld [vmem:[#allocation5 + $0x42c] ss:$16 sps:$4 sm:$0xff]   ;;  %v7173_v25 = vld [vmem:[#allocation5 + $0x624] ss:$16 sps:$4 sm:$0xff]   ;;  %v7165_v35 = vld [vmem:[#allocation5 + $0x428] ss:$16 sps:$4 sm:$0xff]  }
 0x148   : > { %2711 = vmatmul.mubr.bf16.gmra.mrb[28].mxu0 %v8051_v26  ;;  %3290 = vmatmul.mubr.bf16.gmra.mrb[60].mxu1 %v7971_v62  ;;  %v8064_v62 = vld [vmem:[%s7881_s12 + $0x204] ss:$28 sps:$4 sm:$0xff]  }
 0x149   : > { %2720 = vmatprep.mubr.bf16.mxu0 %v8054_v28  ;;  %3299 = vmatprep.mubr.bf16.mxu1 %v7425_v36  ;;  %v7203_v36 = vld [vmem:[#allocation5 + $0x664] ss:$16 sps:$4 sm:$0xff]  }
 0x14a   : > { %2830 = vmatpush1.bf16.msra.mxu0 %v7138_v42  ;;  %3409 = vmatpush1.bf16.msra.mxu1 %v7141_v29  ;;  %v7171_v42 = vld [vmem:[#allocation5 + $0x620] ss:$16 sps:$4 sm:$0xff]   ;;  %v7188_v29 = vld [vmem:[#allocation5 + $0x644] ss:$16 sps:$4 sm:$0xff]  }
 0x14b   : > { %2831 = vmatprep.subr.bf16.mxu0 %v7149_v46  ;;  %3410 = vmatprep.subr.bf16.mxu1 %v7152_v30  ;;  %v8151_v46 = vld [vmem:[%s7881_s12 + $0x48] ss:$28 sps:$4 sm:$0xff]  }
 0x14c   : > { %v8154_v30 = vld [vmem:[%s7881_s12 + $0x84] ss:$28 sps:$4 sm:$0xff]  }
 0x14e   : > { %2832 = vmatpush1.bf16.msra.mxu0 %v7147_v55  ;;  %3411 = vmatpush1.bf16.msra.mxu1 %v7150_v31  ;;  %v7174_v55 = vld [vmem:[#allocation5 + $0x448] ss:$16 sps:$4 sm:$0xff]   ;;  %v7182_v31 = vld [vmem:[#allocation5 + $0x46c] ss:$16 sps:$4 sm:$0xff]  }
 0x14f   : > { %2994 = vmatprep.subr.bf16.mxu0 %v7158_v37  ;;  %3573 = vmatprep.subr.bf16.mxu1 %v7161_v47  ;;  %v7201_v37 = vld [vmem:[#allocation5 + $0x660] ss:$16 sps:$4 sm:$0xff]   ;;  %v7191_v47 = vld [vmem:[#allocation5 + $0x48c] ss:$16 sps:$4 sm:$0xff]  }
 0x150   : > { %2721 = vmatmul.mubr.bf16.gmra.mrb[32].mxu0 %v8061_v54  ;;  %3300 = vmatmul.mubr.bf16.gmra.mrb[64].mxu1 %v7426_v38  ;;  %v7218_v38 = vld [vmem:[#allocation5 + $0x684] ss:$16 sps:$4 sm:$0xff]  }
 0x151   : > { %2730 = vmatprep.mubr.bf16.mxu0 %v8064_v62  ;;  %3309 = vmatprep.mubr.bf16.mxu1 %v7427_v39  ;;  %v8161_v39 = vld [vmem:[%s7881_s12 + $0x80] ss:$28 sps:$4 sm:$0xff]  }
 0x158   : > { %2731 = vmatmul.mubr.bf16.gmra.mrb[36].mxu0 %v8071_v41  ;;  %3310 = vmatmul.mubr.bf16.gmra.mrb[68].mxu1 %v7428_v48  ;;  %v8164_v48 = vld [vmem:[%s7881_s12 + $0xbc] ss:$28 sps:$4 sm:$0xff]  }
 0x159   : > { %2740 = vmatprep.mubr.bf16.mxu0 %v8074_v43  ;;  %3319 = vmatprep.mubr.bf16.mxu1 %v7429_v49  ;;  %v7189_v49 = vld [vmem:[#allocation5 + $0x488] ss:$16 sps:$4 sm:$0xff]  }
 0x160   : > { %2741 = vmatmul.mubr.bf16.gmra.mrb[40].mxu0 %v8081_v59  ;;  %3320 = vmatmul.mubr.bf16.gmra.mrb[72].mxu1 %v7430_v50  ;;  %v7197_v50 = vld [vmem:[#allocation5 + $0x4ac] ss:$16 sps:$4 sm:$0xff]  }
 0x161   : > { %2750 = vmatprep.mubr.bf16.mxu0 %v8084_v2  ;;  %3329 = vmatprep.mubr.bf16.mxu1 %v7431_v51  ;;  %v7195_v51 = vld [vmem:[#allocation5 + $0x4a8] ss:$16 sps:$4 sm:$0xff]  }
 0x168   : > { %2751 = vmatmul.mubr.bf16.gmra.mrb[44].mxu0 %v8091_v52  ;;  %3330 = vmatmul.mubr.bf16.gmra.mrb[76].mxu1 %v7432_v58  ;;  %v7231_v58 = vld [vmem:[#allocation5 + $0x6a0] ss:$16 sps:$4 sm:$0xff]  }
 0x169   : > { %2760 = vmatprep.mubr.bf16.mxu0 %v8094_v53  ;;  %3339 = vmatprep.mubr.bf16.mxu1 %v7433_v7 }
 0x170   : > { %2761 = vmatmul.mubr.bf16.gmra.mrb[48].mxu0 %v8101_v15  ;;  %3340 = vmatmul.mubr.bf16.gmra.mrb[80].mxu1 %v7434_v61  ;;  %v7206_v61 = vld [vmem:[#allocation5 + $0x4cc] ss:$16 sps:$4 sm:$0xff]  }
 0x171   : > { %2770 = vmatprep.mubr.bf16.mxu0 %v8104_v60  ;;  %3349 = vmatprep.mubr.bf16.mxu1 %v7435_v0  ;;  %v7248_v0 = vld [vmem:[#allocation5 + $0x6c4] ss:$16 sps:$4 sm:$0xff]  }
 0x178   : > { %2771 = vmatmul.mubr.bf16.gmra.mrb[52].mxu0 %v8111_v3  ;;  %3350 = vmatmul.mubr.bf16.gmra.mrb[84].mxu1 %v7436_v6 }
 0x179   : > { %2780 = vmatprep.mubr.bf16.mxu0 %v8114_v4  ;;  %3359 = vmatprep.mubr.bf16.mxu1 %v7437_v8  ;;  %v8175_v8 = vld [vmem:[%s7881_s12 + $0xb8] ss:$28 sps:$4 sm:$0xff]  }
 0x180   : > { %2781 = vmatmul.mubr.bf16.gmra.mrb[56].mxu0 %v8121_v20  ;;  %3360 = vmatmul.mubr.bf16.gmra.mrb[88].mxu1 %v7438_v9 }
 0x181   : > { %2790 = vmatprep.mubr.bf16.mxu0 %v8124_v27  ;;  %3369 = vmatprep.mubr.bf16.mxu1 %v7439_v10 }
 0x188   : > { %2791 = vmatmul.mubr.bf16.gmra.mrb[60].mxu0 %v8131_v12  ;;  %3370 = vmatmul.mubr.bf16.gmra.mrb[92].mxu1 %v7440_v19  ;;  %v7246_v19 = vld [vmem:[#allocation5 + $0x6c0] ss:$16 sps:$4 sm:$0xff]  }
 0x189   : > { %2833 = vmatprep.mubr.bf16.mxu0 %v8134_v14  ;;  %3412 = vmatprep.mubr.bf16.mxu1 %v7975_v5  ;;  %v7176_v5 = vld [vmem:[#allocation5 + $0x44c] ss:$16 sps:$4 sm:$0xff]  }
 0x190   : > { %2834 = vmatmul.mubr.bf16.vlgmr.msra.gmra.mrb[0].mxu0 %v8141_v13  ;;  %3413 = vmatmul.mubr.bf16.vlgmr.msra.gmra.mrb[32].mxu1 %v7981_v11  ;;  %v7186_v11 = vld [vmem:[#allocation5 + $0x640] ss:$16 sps:$4 sm:$0xff]  }
 0x191   : > { %2995 = vmatpush1.bf16.msra.mxu0 %v7156_v32  ;;  %3574 = vmatpush1.bf16.msra.mxu1 %v7159_v21  ;;  %v7212_v32 = vld [vmem:[#allocation5 + $0x4ec] ss:$16 sps:$4 sm:$0xff]   ;;  %v7263_v21 = vld [vmem:[#allocation5 + $0x6e4] ss:$16 sps:$4 sm:$0xff]  }
 0x192   : > { %2843 = vmatprep.mubr.bf16.mxu0 %v8144_v40  ;;  %3422 = vmatprep.mubr.bf16.mxu1 %v7984_v16  ;;  %v7180_v16 = vld [vmem:[#allocation5 + $0x468] ss:$16 sps:$4 sm:$0xff]  }
 0x193   : > { %3575 = vmatprep.subr.bf16.mxu1 %v7167_v22  ;;  %2996 = vmatprep.subr.bf16.mxu0 %v7173_v25  ;;  %v7210_v22 = vld [vmem:[#allocation5 + $0x4e8] ss:$16 sps:$4 sm:$0xff]   ;;  %v7261_v25 = vld [vmem:[#allocation5 + $0x6e0] ss:$16 sps:$4 sm:$0xff]  }
 0x195   : > { %3576 = vmatpush1.bf16.msra.mxu1 %v7165_v35  ;;  %2997 = vmatpush1.bf16.msra.mxu0 %v7171_v42  ;;  %v7221_v42 = vld [vmem:[#allocation5 + $0x50c] ss:$16 sps:$4 sm:$0xff]  }
 0x196   : > { %3577 = vmatprep.subr.bf16.mxu1 %v7176_v5  ;;  %2998 = vmatprep.subr.bf16.mxu0 %v7188_v29  ;;  %v8193_v29 = vld [vmem:[%s7881_s12 + $0xf0] ss:$28 sps:$4 sm:$0xff]  }
 0x198   : > { %2844 = vmatmul.mubr.bf16.gmra.mrb[4].mxu0 %v8151_v46  ;;  %3423 = vmatmul.mubr.bf16.gmra.mrb[36].mxu1 %v7991_v23  ;;  %v7216_v23 = vld [vmem:[#allocation5 + $0x680] ss:$16 sps:$4 sm:$0xff]  }
 0x199   : > { %2853 = vmatprep.mubr.bf16.mxu0 %v8154_v30  ;;  %3432 = vmatprep.mubr.bf16.mxu1 %v7994_v24  ;;  %v7233_v24 = vld [vmem:[#allocation5 + $0x6a4] ss:$16 sps:$4 sm:$0xff]  }
 0x19a   : > { %3578 = vmatpush1.bf16.msra.mxu1 %v7174_v55  ;;  %2999 = vmatpush1.bf16.msra.mxu0 %v7186_v11 }
 0x19b   : > { %3579 = vmatprep.subr.bf16.mxu1 %v7182_v31  ;;  %3000 = vmatprep.subr.bf16.mxu0 %v7203_v36  ;;  %v7227_v31 = vld [vmem:[#allocation5 + $0x52c] ss:$16 sps:$4 sm:$0xff]   ;;  %v7225_v36 = vld [vmem:[#allocation5 + $0x528] ss:$16 sps:$4 sm:$0xff]  }
 0x19e   : > { %3580 = vmatpush1.bf16.msra.mxu1 %v7180_v16  ;;  %3001 = vmatpush1.bf16.msra.mxu0 %v7201_v37  ;;  %v7236_v37 = vld [vmem:[#allocation5 + $0x54c] ss:$16 sps:$4 sm:$0xff]  }
 0x19f   : > { %3581 = vmatprep.subr.bf16.mxu1 %v7191_v47  ;;  %3002 = vmatprep.subr.bf16.mxu0 %v7218_v38  ;;  %v8211_v38 = vld [vmem:[%s7881_s12 + $0x128] ss:$28 sps:$4 sm:$0xff]  }
 0x1a0   : > { %2854 = vmatmul.mubr.bf16.gmra.mrb[8].mxu0 %v8161_v39  ;;  %3433 = vmatmul.mubr.bf16.gmra.mrb[40].mxu1 %v8001_v33  ;;  %v8180_v33 = vld [vmem:[%s7881_s12 + $0xf4] ss:$28 sps:$4 sm:$0xff]  }
 0x1a1   : > { %2863 = vmatprep.mubr.bf16.mxu0 %v8164_v48  ;;  %3442 = vmatprep.mubr.bf16.mxu1 %v8004_v34  ;;  %v7204_v34 = vld [vmem:[#allocation5 + $0x4c8] ss:$16 sps:$4 sm:$0xff]  }
 0x1a2   : > { %3582 = vmatpush1.bf16.msra.mxu1 %v7189_v49  ;;  %3003 = vmatpush1.bf16.msra.mxu0 %v7216_v23  ;;  %v8216_v23 = vld [vmem:[%s7881_s12 + $0x164] ss:$28 sps:$4 sm:$0xff]  }
 0x1a3   : > { %v8170_v7 = vpop.f32.mrb[0].mxu1  ;;  %3583 = vmatprep.subr.bf16.mxu1 %v7197_v50  ;;  %3004 = vmatprep.subr.bf16.mxu0 %v7233_v24  ;;  %v7242_v50 = vld [vmem:[#allocation5 + $0x56c] ss:$16 sps:$4 sm:$0xff]   ;;  %v7240_v24 = vld [vmem:[#allocation5 + $0x568] ss:$16 sps:$4 sm:$0xff]  }
 0x1a4   : > { %v8172_v6 = vpop.f32.mrb[1].mxu1 }
 0x1a5   : > { %v8177_v9 = vpop.f32.mrb[2].mxu1 }
 0x1a6   : > { %v8182_v10 = vpop.f32.mrb[3].mxu1  ;;  %3584 = vmatpush1.bf16.msra.mxu1 %v7195_v51  ;;  %3005 = vmatpush1.bf16.msra.mxu0 %v7231_v58  ;;  %v7251_v58 = vld [vmem:[#allocation5 + $0x58c] ss:$16 sps:$4 sm:$0xff]  }
 0x1a7   : > { %3585 = vmatprep.subr.bf16.mxu1 %v7206_v61  ;;  %3006 = vmatprep.subr.bf16.mxu0 %v7248_v0  ;;  %v8229_v0 = vld [vmem:[%s7881_s12 + $0x160] ss:$28 sps:$4 sm:$0xff]  }
 0x1a8   : > { %2864 = vmatmul.mubr.bf16.gmra.mrb[12].mxu0 %v8175_v8  ;;  %3443 = vmatmul.mubr.bf16.gmra.mrb[44].mxu1 %v8011_v44  ;;  %v8198_v44 = vld [vmem:[%s7881_s12 + $0x12c] ss:$28 sps:$4 sm:$0xff]  }
 0x1a9   : > { %2873 = vmatprep.mubr.bf16.mxu0 %v8180_v33  ;;  %3452 = vmatprep.mubr.bf16.mxu1 %v8014_v45  ;;  %v7219_v45 = vld [vmem:[#allocation5 + $0x508] ss:$16 sps:$4 sm:$0xff]  }
 0x1aa   : > { %3586 = vmatpush1.bf16.msra.mxu1 %v7204_v34  ;;  %3007 = vmatpush1.bf16.msra.mxu0 %v7246_v19  ;;  %v8234_v19 = vld [vmem:[%s7881_s12 + $0x19c] ss:$28 sps:$4 sm:$0xff]  }
 0x1ab   : > { %v8188_v35 = vpop.f32.mrb[4].mxu1  ;;  %3587 = vmatprep.subr.bf16.mxu1 %v7212_v32  ;;  %3008 = vmatprep.subr.bf16.mxu0 %v7263_v21  ;;  %v7257_v32 = vld [vmem:[#allocation5 + $0x5ac] ss:$16 sps:$4 sm:$0xff]   ;;  %v7255_v21 = vld [vmem:[#allocation5 + $0x5a8] ss:$16 sps:$4 sm:$0xff]  }
 0x1ac   : > { %v8190_v5 = vpop.f32.mrb[5].mxu1 }
 0x1ad   : > { %v8195_v55 = vpop.f32.mrb[6].mxu1 }
 0x1ae   : > { %v8200_v11 = vpop.f32.mrb[7].mxu1  ;;  %3588 = vmatpush1.bf16.msra.mxu1 %v7210_v22  ;;  %3009 = vmatpush1.bf16.msra.mxu0 %v7261_v25  ;;  %v7266_v25 = vld [vmem:[#allocation5 + $0x5cc] ss:$16 sps:$4 sm:$0xff]  }
 0x1af   : > { %3589 = vmatprep.subr.bf16.mxu1 %v7221_v42 }
 0x1b0   : > { %2874 = vmatmul.mubr.bf16.gmra.mrb[16].mxu0 %v8193_v29  ;;  %3453 = vmatmul.mubr.bf16.gmra.mrb[48].mxu1 %v8021_v56 }
 0x1b1   : > { %2883 = vmatprep.mubr.bf16.mxu0 %v8198_v44  ;;  %3462 = vmatprep.mubr.bf16.mxu1 %v8024_v57  ;;  %v7234_v57 = vld [vmem:[#allocation5 + $0x548] ss:$16 sps:$4 sm:$0xff]  }
 0x1b2   : > { %3590 = vmatpush1.bf16.msra.mxu1 %v7219_v45  ;;  %v8247_v45 = vld [vmem:[%s7881_s12 + $0x198] ss:$28 sps:$4 sm:$0xff]  }
 0x1b3   : > { %v8206_v16 = vpop.f32.mrb[8].mxu1  ;;  %3591 = vmatprep.subr.bf16.mxu1 %v7227_v31 }
 0x1b4   : > { %v8208_v47 = vpop.f32.mrb[9].mxu1 }
 0x1b5   : > { %v8213_v49 = vpop.f32.mrb[10].mxu1 }
 0x1b6   : > { %v8218_v56 = vpop.f32.mrb[11].mxu1  ;;  %3592 = vmatpush1.bf16.msra.mxu1 %v7225_v36  ;;  %v8252_v36 = vld [vmem:[%s7881_s12 + $0x1d4] ss:$28 sps:$4 sm:$0xff]  }
 0x1b7   : > { %3593 = vmatprep.subr.bf16.mxu1 %v7236_v37  ;;  %v7272_v37 = vld [vmem:[#allocation5 + $0x5ec] ss:$16 sps:$4 sm:$0xff]  }
 0x1b8   : > { %2884 = vmatmul.mubr.bf16.gmra.mrb[20].mxu0 %v8211_v38  ;;  %3463 = vmatmul.mubr.bf16.gmra.mrb[52].mxu1 %v8031_v63 }
 0x1b9   : > { %2893 = vmatprep.mubr.bf16.mxu0 %v8216_v23  ;;  %3472 = vmatprep.mubr.bf16.mxu1 %v8034_v1  ;;  %v7249_v1 = vld [vmem:[#allocation5 + $0x588] ss:$16 sps:$4 sm:$0xff]  }
 0x1ba   : > { %3594 = vmatpush1.bf16.msra.mxu1 %v7234_v57  ;;  %v7270_v57 = vld [vmem:[#allocation5 + $0x5e8] ss:$16 sps:$4 sm:$0xff]  }
 0x1bb   : > { %v8224_v51 = vpop.f32.mrb[12].mxu1  ;;  %3595 = vmatprep.subr.bf16.mxu1 %v7242_v50 }
 0x1bc   : > { %v8226_v61 = vpop.f32.mrb[13].mxu1 }
 0x1bd   : > { %v8231_v34 = vpop.f32.mrb[14].mxu1 }
 0x1be   : > { %v8236_v63 = vpop.f32.mrb[15].mxu1  ;;  %3596 = vmatpush1.bf16.msra.mxu1 %v7240_v24  ;;  %v7276_v24 = vld [vmem:[#allocation5 + $0x60c] ss:$16 sps:$4 sm:$0xff]  }
 0x1bf   : > { %3597 = vmatprep.subr.bf16.mxu1 %v7251_v58 }
 0x1c0   : > { %2894 = vmatmul.mubr.bf16.gmra.mrb[24].mxu0 %v8229_v0  ;;  %3473 = vmatmul.mubr.bf16.gmra.mrb[56].mxu1 %v8041_v17 }
 0x1c1   : > { %2903 = vmatprep.mubr.bf16.mxu0 %v8234_v19  ;;  %3482 = vmatprep.mubr.bf16.mxu1 %v8044_v18  ;;  %v7264_v18 = vld [vmem:[#allocation5 + $0x5c8] ss:$16 sps:$4 sm:$0xff]  }
 0x1c2   : > { %3598 = vmatpush1.bf16.msra.mxu1 %v7249_v1  ;;  %v8265_v1 = vld [vmem:[%s7881_s12 + $0x1d0] ss:$28 sps:$4 sm:$0xff]  }
 0x1c3   : > { %v8242_v22 = vpop.f32.mrb[16].mxu1  ;;  %3599 = vmatprep.subr.bf16.mxu1 %v7257_v32 }
 0x1c4   : > { %v8244_v42 = vpop.f32.mrb[17].mxu1 }
 0x1c5   : > { %v8249_v31 = vpop.f32.mrb[18].mxu1 }
 0x1c6   : > { %v8254_v17 = vpop.f32.mrb[19].mxu1  ;;  %3600 = vmatpush1.bf16.msra.mxu1 %v7255_v21  ;;  %v8270_v21 = vld [vmem:[%s7881_s12 + $0x20c] ss:$28 sps:$4 sm:$0xff]  }
 0x1c7   : > { %3601 = vmatprep.subr.bf16.mxu1 %v7266_v25 }
 0x1c8   : > { %2904 = vmatmul.mubr.bf16.gmra.mrb[28].mxu0 %v8247_v45  ;;  %3483 = vmatmul.mubr.bf16.gmra.mrb[60].mxu1 %v8051_v26 }
 0x1c9   : > { %2913 = vmatprep.mubr.bf16.mxu0 %v8252_v36  ;;  %3492 = vmatprep.mubr.bf16.mxu1 %v8054_v28 }
 0x1ca   : > { %3602 = vmatpush1.bf16.msra.mxu1 %v7264_v18  ;;  %v8283_v18 = vld [vmem:[%s7881_s12 + $0x208] ss:$28 sps:$4 sm:$0xff]  }
 0x1cb   : > { %v8260_v50 = vpop.f32.mrb[20].mxu1  ;;  %3603 = vmatprep.subr.bf16.mxu1 %v7272_v37 }
 0x1cc   : > { %v8262_v58 = vpop.f32.mrb[21].mxu1 }
 0x1cd   : > { %8909 = vst [vmem:[#allocation15_spill] sm:$0xff] %v8262_v58  ;;  %v8267_v32 = vpop.f32.mrb[22].mxu1  ;;  %v7316_v58 = vld [vmem:[#allocation7 + $0x24] ss:$8 sps:$4 sm:$0xff]  }
 0x1ce   : > { %8910 = vst [vmem:[#allocation16_spill] sm:$0xff] %v8267_v32  ;;  %v8272_v26 = vpop.f32.mrb[23].mxu1  ;;  %3604 = vmatpush1.bf16.msra.mxu1 %v7270_v57  ;;  %v8288_v57 = vld [vmem:[%s7881_s12 + $0x244] ss:$28 sps:$4 sm:$0xff]   ;;  %v7284_v32 = vld [vmem:[#allocation5 + $0x648] ss:$16 sps:$4 sm:$0xff]  }
 0x1cf   : > { %8911 = vst [vmem:[#allocation17_spill] sm:$0xff] %v8272_v26  ;;  %3766 = vmatprep.subr.bf16.mxu1 %v7276_v24  ;;  %v8369_v26 = vld [vmem:[%s7881_s12 + $0x50] ss:$28 sps:$4 sm:$0xff]  }
 0x1d0   : > { %2914 = vmatmul.mubr.bf16.gmra.mrb[32].mxu0 %v8265_v1  ;;  %3493 = vmatmul.mubr.bf16.gmra.mrb[64].mxu1 %v8061_v54 }
 0x1d1   : > { %2923 = vmatprep.mubr.bf16.mxu0 %v8270_v21  ;;  %3502 = vmatprep.mubr.bf16.mxu1 %v8064_v62 }
 0x1d3   : > { %v8278_v28 = vpop.f32.mrb[24].mxu1 }
 0x1d4   : > { %8912 = vst [vmem:[#allocation18_spill] sm:$0xff] %v8278_v28  ;;  %v8280_v25 = vpop.f32.mrb[25].mxu1 }
 0x1d5   : > { %8913 = vst [vmem:[#allocation19_spill] sm:$0xff] %v8280_v25  ;;  %v8285_v37 = vpop.f32.mrb[26].mxu1  ;;  %v8301_v25 = vld [vmem:[%s7881_s12 + $0x240] ss:$28 sps:$4 sm:$0xff]  }
 0x1d6   : > { %8914 = vst [vmem:[#allocation20_spill] sm:$0xff] %v8285_v37  ;;  %v8290_v24 = vpop.f32.mrb[27].mxu1 }
 0x1d7   : > { %8915 = vst [vmem:[#allocation21_spill] sm:$0xff] %v8290_v24  ;;  %v8306_v24 = vld [vmem:[%s7881_s12 + $0x27c] ss:$28 sps:$4 sm:$0xff]  }
 0x1d8   : > { %2924 = vmatmul.mubr.bf16.gmra.mrb[36].mxu0 %v8283_v18  ;;  %3503 = vmatmul.mubr.bf16.gmra.mrb[68].mxu1 %v8071_v41  ;;  %v8315_v41 = vld [vmem:[%s7881_s12 + $0x278] ss:$28 sps:$4 sm:$0xff]  }
 0x1d9   : > { %2933 = vmatprep.mubr.bf16.mxu0 %v8288_v57  ;;  %3512 = vmatprep.mubr.bf16.mxu1 %v8074_v43  ;;  %v8318_v43 = vld [vmem:[%s7881_s12 + $0x2b4] ss:$28 sps:$4 sm:$0xff]  }
 0x1db   : > { %v8296_v54 = vpop.f32.mrb[28].mxu1 }
 0x1dc   : > { %8916 = vst [vmem:[#allocation22_spill] sm:$0xff] %v8296_v54  ;;  %v8298_v62 = vpop.f32.mrb[29].mxu1  ;;  %v7286_v54 = vld [vmem:[#allocation5 + $0x64c] ss:$16 sps:$4 sm:$0xff]  }
 0x1dd   : > { %8917 = vst [vmem:[#allocation23_spill] sm:$0xff] %v8298_v62  ;;  %v8303_v37 = vpop.f32.mrb[30].mxu1  ;;  %v7303_v62 = vld [vmem:[#allocation7] ss:$8 sps:$4 sm:$0xff]  }
 0x1de   : > { %8918 = vst [vmem:[#allocation24_spill] sm:$0xff] %v8303_v37  ;;  %v8308_v28 = vpop.f32.mrb[31].mxu1  ;;  %v7305_v37 = vld [vmem:[#allocation7 + $0x4] ss:$8 sps:$4 sm:$0xff]  }
 0x1df   : > { %8919 = vst [vmem:[#allocation25_spill] sm:$0xff] %v8308_v28  ;;  %4547 = vmatprep.subr.bf16.mxu0 %v7305_v37  ;;  %v8338_v28 = vld [vmem:[%s7881_s12 + $0x324] ss:$28 sps:$4 sm:$0xff]   ;;  %v7274_v37 = vld [vmem:[#allocation5 + $0x608] ss:$16 sps:$4 sm:$0xff]  }
 0x1e0   : > { %2934 = vmatmul.mubr.bf16.gmra.mrb[40].mxu0 %v8301_v25  ;;  %3513 = vmatmul.mubr.bf16.gmra.mrb[72].mxu1 %v8081_v59  ;;  %v8325_v59 = vld [vmem:[%s7881_s12 + $0x2b0] ss:$28 sps:$4 sm:$0xff]  }
 0x1e1   : > { %2943 = vmatprep.mubr.bf16.mxu0 %v8306_v24  ;;  %3522 = vmatprep.mubr.bf16.mxu1 %v8084_v2  ;;  %v8328_v2 = vld [vmem:[%s7881_s12 + $0x2ec] ss:$28 sps:$4 sm:$0xff]  }
 0x1e8   : > { %2944 = vmatmul.mubr.bf16.gmra.mrb[44].mxu0 %v8315_v41  ;;  %3523 = vmatmul.mubr.bf16.gmra.mrb[76].mxu1 %v8091_v52  ;;  %v8335_v52 = vld [vmem:[%s7881_s12 + $0x2e8] ss:$28 sps:$4 sm:$0xff]  }
 0x1e9   : > { %2953 = vmatprep.mubr.bf16.mxu0 %v8318_v43  ;;  %3532 = vmatprep.mubr.bf16.mxu1 %v8094_v53  ;;  %v8345_v53 = vld [vmem:[%s7881_s12 + $0x320] ss:$28 sps:$4 sm:$0xff]  }
 0x1f0   : > { %2954 = vmatmul.mubr.bf16.gmra.mrb[48].mxu0 %v8325_v59  ;;  %3533 = vmatmul.mubr.bf16.gmra.mrb[80].mxu1 %v8101_v15  ;;  %v8348_v15 = vld [vmem:[%s7881_s12 + $0x35c] ss:$28 sps:$4 sm:$0xff]  }
 0x1f1   : > { %2963 = vmatprep.mubr.bf16.mxu0 %v8328_v2  ;;  %3542 = vmatprep.mubr.bf16.mxu1 %v8104_v60  ;;  %v8355_v60 = vld [vmem:[%s7881_s12 + $0x358] ss:$28 sps:$4 sm:$0xff]  }
 0x1f8   : > { %2964 = vmatmul.mubr.bf16.gmra.mrb[52].mxu0 %v8335_v52  ;;  %3543 = vmatmul.mubr.bf16.gmra.mrb[84].mxu1 %v8111_v3  ;;  %v8891_v3 = vmov 0  }
 0x1f9   : > { %2973 = vmatprep.mubr.bf16.mxu0 %v8338_v28  ;;  %3552 = vmatprep.mubr.bf16.mxu1 %v8114_v4  ;;  %v8362_v4 = vld [vmem:[%s7881_s12 + $0x18] ss:$28 sps:$4 sm:$0xff]  }
 0x200   : > { %2974 = vmatmul.mubr.bf16.gmra.mrb[56].mxu0 %v8345_v53  ;;  %3553 = vmatmul.mubr.bf16.gmra.mrb[88].mxu1 %v8121_v20  ;;  %v7281_v20 = vld [vmem:[#allocation5 + $0x62c] ss:$16 sps:$4 sm:$0xff]  }
 0x201   : > { %2983 = vmatprep.mubr.bf16.mxu0 %v8348_v15  ;;  %3562 = vmatprep.mubr.bf16.mxu1 %v8124_v27  ;;  %v7312_v27 = vld [vmem:[#allocation7 + $0x14] ss:$8 sps:$4 sm:$0xff]  }
 0x208   : > { %2984 = vmatmul.mubr.bf16.gmra.mrb[60].mxu0 %v8355_v60  ;;  %3563 = vmatmul.mubr.bf16.gmra.mrb[92].mxu1 %v8131_v12  ;;  %v7279_v12 = vld [vmem:[#allocation5 + $0x628] ss:$16 sps:$4 sm:$0xff]  }
 0x209   : > { %3026 = vmatprep.mubr.bf16.mxu0 %v8891_v3  ;;  %3605 = vmatprep.mubr.bf16.mxu1 %v8134_v14  ;;  %v7310_v14 = vld [vmem:[#allocation7 + $0x10] ss:$8 sps:$4 sm:$0xff]  }
 0x210   : > { %3027 = vmatmul.mubr.bf16.vlgmr.msra.gmra.mrb[0].mxu0 %v8362_v4  ;;  %3606 = vmatmul.mubr.bf16.vlgmr.msra.gmra.mrb[32].mxu1 %v8141_v13  ;;  %v7291_v13 = vld [vmem:[#allocation5 + $0x66c] ss:$16 sps:$4 sm:$0xff]  }
 0x211   : > { %3767 = vmatpush1.bf16.msra.mxu1 %v7274_v37  ;;  %3036 = vmatprep.mubr.bf16.mxu0 %v8891_v3  ;;  %v7314_v37 = vld [vmem:[#allocation7 + $0x20] ss:$8 sps:$4 sm:$0xff]  }
 0x212   : > { %3615 = vmatprep.mubr.bf16.mxu1 %v8144_v40  ;;  %3768 = vmatprep.subr.bf16.mxu1 %v7281_v20  ;;  %v7323_v40 = vld [vmem:[#allocation7 + $0x34] ss:$8 sps:$4 sm:$0xff]  }
 0x213   : > { %4548 = vmatpush1.bf16.msra.mxu0 %v7303_v62  ;;  %v7289_v62 = vld [vmem:[#allocation5 + $0x668] ss:$16 sps:$4 sm:$0xff]   ;;  %v7296_v20 = vld [vmem:[#allocation5 + $0x68c] ss:$16 sps:$4 sm:$0xff]  }
 0x214   : > { %4549 = vmatprep.subr.bf16.mxu0 %v7312_v27  ;;  %v8376_v27 = vld [vmem:[%s7881_s12 + $0x88] ss:$28 sps:$4 sm:$0xff]  }
 0x215   : > { %3769 = vmatpush1.bf16.msra.mxu1 %v7279_v12  ;;  %v7294_v12 = vld [vmem:[#allocation5 + $0x688] ss:$16 sps:$4 sm:$0xff]  }
 0x216   : > { %3770 = vmatprep.subr.bf16.mxu1 %v7286_v54  ;;  %v7321_v54 = vld [vmem:[#allocation7 + $0x30] ss:$8 sps:$4 sm:$0xff]  }
 0x217   : > { %4550 = vmatpush1.bf16.msra.mxu0 %v7310_v14  ;;  %v7327_v14 = vld [vmem:[#allocation7 + $0x44] ss:$8 sps:$4 sm:$0xff]  }
 0x218   : > { %3037 = vmatmul.mubr.bf16.gmra.mrb[4].mxu0 %v8369_v26  ;;  %3616 = vmatmul.mubr.bf16.gmra.mrb[36].mxu1 %v8151_v46  ;;  %v7301_v46 = vld [vmem:[#allocation5 + $0x6ac] ss:$16 sps:$4 sm:$0xff]  }
 0x219   : > { %3046 = vmatprep.mubr.bf16.mxu0 %v8891_v3  ;;  %3625 = vmatprep.mubr.bf16.mxu1 %v8154_v30  ;;  %v7325_v3 = vld [vmem:[#allocation7 + $0x40] ss:$8 sps:$4 sm:$0xff]   ;;  %v7330_v30 = vld [vmem:[#allocation7 + $0x54] ss:$8 sps:$4 sm:$0xff]  }
 0x21a   : > { %3771 = vmatpush1.bf16.msra.mxu1 %v7284_v32  ;;  %4551 = vmatprep.subr.bf16.mxu0 %v7316_v58  ;;  %v8920_v58 = vmov 0   ;;  %v7299_v32 = vld [vmem:[#allocation5 + $0x6a8] ss:$16 sps:$4 sm:$0xff]  }
 0x21b   : > { %3772 = vmatprep.subr.bf16.mxu1 %v7291_v13  ;;  %4552 = vmatpush1.bf16.msra.mxu0 %v7314_v37  ;;  %v7309_v13 = vld [vmem:[#allocation5 + $0x6cc] ss:$16 sps:$4 sm:$0xff]   ;;  %v7328_v37 = vld [vmem:[#allocation7 + $0x50] ss:$8 sps:$4 sm:$0xff]  }
 0x21c   : > { %4553 = vmatprep.subr.bf16.mxu0 %v7323_v40  ;;  %v8383_v40 = vld [vmem:[%s7881_s12 + $0xc0] ss:$28 sps:$4 sm:$0xff]  }
 0x21e   : > { %3773 = vmatpush1.bf16.msra.mxu1 %v7289_v62  ;;  %v7307_v62 = vld [vmem:[#allocation5 + $0x6c8] ss:$16 sps:$4 sm:$0xff]  }
 0x21f   : > { %3774 = vmatprep.subr.bf16.mxu1 %v7296_v20  ;;  %4554 = vmatpush1.bf16.msra.mxu0 %v7321_v54  ;;  %v7333_v20 = vld [vmem:[#allocation7 + $0x64] ss:$8 sps:$4 sm:$0xff]   ;;  %v7331_v54 = vld [vmem:[#allocation7 + $0x60] ss:$8 sps:$4 sm:$0xff]  }
 0x220   : > { %3047 = vmatmul.mubr.bf16.gmra.mrb[8].mxu0 %v8376_v27  ;;  %3626 = vmatmul.mubr.bf16.gmra.mrb[40].mxu1 %v8161_v39  ;;  %v7320_v39 = vld [vmem:[#allocation5 + $0x6ec] ss:$16 sps:$4 sm:$0xff]  }
 0x221   : > { %3056 = vmatprep.mubr.bf16.mxu0 %v8920_v58  ;;  %3635 = vmatprep.mubr.bf16.mxu1 %v8164_v48  ;;  %v7336_v48 = vld [vmem:[#allocation7 + $0x74] ss:$8 sps:$4 sm:$0xff]  }
 0x222   : > { %3775 = vmatpush1.bf16.msra.mxu1 %v7294_v12  ;;  %4555 = vmatprep.subr.bf16.mxu0 %v7327_v14  ;;  %v7334_v12 = vld [vmem:[#allocation7 + $0x70] ss:$8 sps:$4 sm:$0xff]  }
 0x223   : > { %3776 = vmatprep.subr.bf16.mxu1 %v7301_v46  ;;  %4556 = vmatpush1.bf16.msra.mxu0 %v7325_v3  ;;  %v7318_v3 = vld [vmem:[#allocation5 + $0x6e8] ss:$16 sps:$4 sm:$0xff]   ;;  %v7339_v46 = vld [vmem:[#allocation7 + $0x84] ss:$8 sps:$4 sm:$0xff]  }
 0x224   : > { %4557 = vmatprep.subr.bf16.mxu0 %v7330_v30  ;;  %v8390_v14 = vld [vmem:[%s7881_s12 + $0xf8] ss:$28 sps:$4 sm:$0xff]   ;;  %v7337_v30 = vld [vmem:[#allocation7 + $0x80] ss:$8 sps:$4 sm:$0xff]  }
 0x226   : > { %3777 = vmatpush1.bf16.msra.mxu1 %v7299_v32  ;;  %v8397_v32 = vld [vmem:[%s7881_s12 + $0x130] ss:$28 sps:$4 sm:$0xff]  }
 0x227   : > { %3778 = vmatprep.subr.bf16.mxu1 %v7309_v13  ;;  %4558 = vmatpush1.bf16.msra.mxu0 %v7328_v37  ;;  %v7343_v13 = vld [vmem:[#allocation7 + $0xa0] ss:$8 sps:$4 sm:$0xff]   ;;  %v7346_v37 = vld [vmem:[#allocation7 + $0xb0] ss:$8 sps:$4 sm:$0xff]  }
 0x228   : > { %3057 = vmatmul.mubr.bf16.gmra.mrb[12].mxu0 %v8383_v40  ;;  %3636 = vmatmul.mubr.bf16.gmra.mrb[44].mxu1 %v8175_v8  ;;  %v7342_v8 = vld [vmem:[#allocation7 + $0x94] ss:$8 sps:$4 sm:$0xff]  }
 0x229   : > { %3066 = vmatprep.mubr.bf16.mxu0 %v8920_v58  ;;  %3645 = vmatprep.mubr.bf16.mxu1 %v8180_v33  ;;  %v7340_v33 = vld [vmem:[#allocation7 + $0x90] ss:$8 sps:$4 sm:$0xff]  }
 0x22a   : > { %3779 = vmatpush1.bf16.msra.mxu1 %v7307_v62  ;;  %4559 = vmatprep.subr.bf16.mxu0 %v7333_v20  ;;  %v7348_v62 = vld [vmem:[#allocation7 + $0xb4] ss:$8 sps:$4 sm:$0xff]   ;;  %v7351_v20 = vld [vmem:[#allocation7 + $0xc4] ss:$8 sps:$4 sm:$0xff]  }
 0x22b   : > { %3780 = vmatprep.subr.bf16.mxu1 %v7320_v39  ;;  %4560 = vmatpush1.bf16.msra.mxu0 %v7331_v54  ;;  %v7354_v39 = vld [vmem:[#allocation7 + $0xd4] ss:$8 sps:$4 sm:$0xff]   ;;  %v7357_v54 = vld [vmem:[#allocation7 + $0xe4] ss:$8 sps:$4 sm:$0xff]  }
 0x22c   : > { %4561 = vmatprep.subr.bf16.mxu0 %v7336_v48 }
 0x22e   : > { %3781 = vmatpush1.bf16.msra.mxu1 %v7318_v3 }
 0x22f   : > { %4562 = vmatpush1.bf16.msra.mxu0 %v7334_v12 }
 0x230   : > { %3067 = vmatmul.mubr.bf16.gmra.mrb[16].mxu0 %v8390_v14  ;;  %3646 = vmatmul.mubr.bf16.gmra.mrb[48].mxu1 %v8193_v29  ;;  %v7345_v29 = vld [vmem:[#allocation7 + $0xa4] ss:$8 sps:$4 sm:$0xff]  }
 0x231   : > { %3076 = vmatprep.mubr.bf16.mxu0 %v8920_v58  ;;  %3655 = vmatprep.mubr.bf16.mxu1 %v8198_v44  ;;  %v8404_v44 = vld [vmem:[%s7881_s12 + $0x168] ss:$28 sps:$4 sm:$0xff]  }
 0x232   : > { %4563 = vmatprep.subr.bf16.mxu0 %v7339_v46 }
 0x233   : > { %4564 = vmatpush1.bf16.msra.mxu0 %v7337_v30 }
 0x234   : > { %4565 = vmatprep.subr.bf16.mxu0 %v7342_v8 }
 0x237   : > { %4566 = vmatpush1.bf16.msra.mxu0 %v7340_v33 }
 0x238   : > { %3077 = vmatmul.mubr.bf16.gmra.mrb[20].mxu0 %v8397_v32  ;;  %3656 = vmatmul.mubr.bf16.gmra.mrb[52].mxu1 %v8211_v38  ;;  %v8411_v38 = vld [vmem:[%s7881_s12 + $0x1a0] ss:$28 sps:$4 sm:$0xff]  }
 0x239   : > { %3086 = vmatprep.mubr.bf16.mxu0 %v8920_v58  ;;  %3665 = vmatprep.mubr.bf16.mxu1 %v8216_v23  ;;  %v7349_v23 = vld [vmem:[#allocation7 + $0xc0] ss:$8 sps:$4 sm:$0xff]  }
 0x23a   : > { %4567 = vmatprep.subr.bf16.mxu0 %v7345_v29 }
 0x23b   : > { %4568 = vmatpush1.bf16.msra.mxu0 %v7343_v13 }
 0x23c   : > { %4569 = vmatprep.subr.bf16.mxu0 %v7348_v62 }
 0x23f   : > { %4570 = vmatpush1.bf16.msra.mxu0 %v7346_v37  ;;  %v7361_v37 = vld [vmem:[#allocation7 + $0x100] ss:$8 sps:$4 sm:$0xff]  }
 0x240   : > { %3087 = vmatmul.mubr.bf16.gmra.mrb[24].mxu0 %v8404_v44  ;;  %3666 = vmatmul.mubr.bf16.gmra.mrb[56].mxu1 %v8229_v0  ;;  %v8418_v0 = vld [vmem:[%s7881_s12 + $0x1d8] ss:$28 sps:$4 sm:$0xff]  }
 0x241   : > { %3096 = vmatprep.mubr.bf16.mxu0 %v8920_v58  ;;  %3675 = vmatprep.mubr.bf16.mxu1 %v8234_v19  ;;  %v7352_v19 = vld [vmem:[#allocation7 + $0xd0] ss:$8 sps:$4 sm:$0xff]  }
 0x242   : > { %4571 = vmatprep.subr.bf16.mxu0 %v7351_v20 }
 0x243   : > { %4572 = vmatpush1.bf16.msra.mxu0 %v7349_v23  ;;  %v7366_v23 = vld [vmem:[#allocation7 + $0x114] ss:$8 sps:$4 sm:$0xff]  }
 0x244   : > { %4573 = vmatprep.subr.bf16.mxu0 %v7354_v39 }
 0x247   : > { %4574 = vmatpush1.bf16.msra.mxu0 %v7352_v19 }
 0x248   : > { %3097 = vmatmul.mubr.bf16.gmra.mrb[28].mxu0 %v8411_v38  ;;  %3676 = vmatmul.mubr.bf16.gmra.mrb[60].mxu1 %v8247_v45  ;;  %v7297_v45 = vld [vmem:[%s7881_s12 + $0x210] ss:$28 sps:$4 sm:$0xff]  }
 0x249   : > { %3106 = vmatprep.mubr.bf16.mxu0 %v8920_v58  ;;  %3685 = vmatprep.mubr.bf16.mxu1 %v8252_v36  ;;  %v7355_v36 = vld [vmem:[#allocation7 + $0xe0] ss:$8 sps:$4 sm:$0xff]  }
 0x24a   : > { %4575 = vmatprep.subr.bf16.mxu0 %v7357_v54 }
 0x24b   : > { %4576 = vmatpush1.bf16.msra.mxu0 %v7355_v36  ;;  %v7364_v36 = vld [vmem:[#allocation7 + $0x110] ss:$8 sps:$4 sm:$0xff]  }
 0x250   : > { %3107 = vmatmul.mubr.bf16.gmra.mrb[32].mxu0 %v8418_v0  ;;  %3686 = vmatmul.mubr.bf16.gmra.mrb[64].mxu1 %v8265_v1  ;;  %v7298_v1 = vld [vmem:[%s7881_s12 + $0x248] ss:$28 sps:$4 sm:$0xff]  }
 0x251   : > { %3116 = vmatprep.mubr.bf16.mxu0 %v8920_v58  ;;  %3695 = vmatprep.mubr.bf16.mxu1 %v8270_v21  ;;  %v8433_v21 = vld [vmem:[%s7881_s12 + $0x280] ss:$28 sps:$4 sm:$0xff]  }
 0x258   : > { %3117 = vmatmul.mubr.bf16.gmra.mrb[36].mxu0 %v7297_v45  ;;  %3696 = vmatmul.mubr.bf16.gmra.mrb[68].mxu1 %v8283_v18  ;;  %v7360_v18 = vld [vmem:[#allocation7 + $0xf4] ss:$8 sps:$4 sm:$0xff]  }
 0x259   : > { %3126 = vmatprep.mubr.bf16.mxu0 %v8920_v58  ;;  %3705 = vmatprep.mubr.bf16.mxu1 %v8288_v57  ;;  %v7358_v57 = vld [vmem:[#allocation7 + $0xf0] ss:$8 sps:$4 sm:$0xff]  }
 0x25a   : > { %4577 = vmatprep.subr.bf16.mxu0 %v7360_v18 }
 0x25b   : > { %4578 = vmatpush1.bf16.msra.mxu0 %v7358_v57 }
 0x260   : > { %3127 = vmatmul.mubr.bf16.gmra.mrb[40].mxu0 %v7298_v1  ;;  %3706 = vmatmul.mubr.bf16.gmra.mrb[72].mxu1 %v8301_v25  ;;  %v8440_v25 = vld [vmem:[%s7881_s12 + $0x2b8] ss:$28 sps:$4 sm:$0xff]  }
 0x261   : > { %3136 = vmatprep.mubr.bf16.mxu0 %v8920_v58  ;;  %3715 = vmatprep.mubr.bf16.mxu1 %v8306_v24  ;;  %v7363_v24 = vld [vmem:[#allocation7 + $0x104] ss:$8 sps:$4 sm:$0xff]  }
 0x262   : > { %4740 = vmatprep.subr.bf16.mxu0 %v7363_v24 }
 0x268   : > { %3137 = vmatmul.mubr.bf16.gmra.mrb[44].mxu0 %v8433_v21  ;;  %3716 = vmatmul.mubr.bf16.gmra.mrb[76].mxu1 %v8315_v41  ;;  %v8447_v41 = vld [vmem:[%s7881_s12 + $0x2f0] ss:$28 sps:$4 sm:$0xff]  }
 0x269   : > { %3146 = vmatprep.mubr.bf16.mxu0 %v8920_v58  ;;  %3725 = vmatprep.mubr.bf16.mxu1 %v8318_v43  ;;  %v8454_v43 = vld [vmem:[%s7881_s12 + $0x328] ss:$28 sps:$4 sm:$0xff]  }
 0x270   : > { %3147 = vmatmul.mubr.bf16.gmra.mrb[48].mxu0 %v8440_v25  ;;  %3726 = vmatmul.mubr.bf16.gmra.mrb[80].mxu1 %v8325_v59  ;;  %v8461_v59 = vld [vmem:[%s7881_s12 + $0x360] ss:$28 sps:$4 sm:$0xff]   ;;  %s5390_s12 = scalar_lea.sflag [#allocation4], %s7877_s21 }
 0x271   : > { %3156 = vmatprep.mubr.bf16.mxu0 %v8920_v58  ;;  %3735 = vmatprep.mubr.bf16.mxu1 %v8328_v2 }
 0x278   : > { %3157 = vmatmul.mubr.bf16.gmra.mrb[52].mxu0 %v8447_v41  ;;  %3736 = vmatmul.mubr.bf16.gmra.mrb[84].mxu1 %v8335_v52  ;;  %v8491_v52 = vld [vmem:[%s8882_s2] sm:$0xf] }
 0x279   : > { %3166 = vmatprep.mubr.bf16.mxu0 %v8920_v58  ;;  %3745 = vmatprep.mubr.bf16.mxu1 %v8338_v28 }
 0x280   : > { %3167 = vmatmul.mubr.bf16.gmra.mrb[56].mxu0 %v8454_v43  ;;  %3746 = vmatmul.mubr.bf16.gmra.mrb[88].mxu1 %v8345_v53 }
 0x281   : > { %3176 = vmatprep.mubr.bf16.mxu0 %v8920_v58  ;;  %3755 = vmatprep.mubr.bf16.mxu1 %v8348_v15 }
 0x288   : > { %3177 = vmatmul.mubr.bf16.gmra.mrb[60].mxu0 %v8461_v59  ;;  %3756 = vmatmul.mubr.bf16.gmra.mrb[92].mxu1 %v8355_v60 }
 0x289   : > { %3798 = vmatprep.mubr.bf16.mxu1 %v8920_v58 }
 0x290   : > { %3799 = vmatmul.mubr.bf16.vlgmr.msra.gmra.mrb[32].mxu1 %v8362_v4 }
 0x291   : > { %3808 = vmatprep.mubr.bf16.mxu1 %v8920_v58 }
 0x298   : > { %3809 = vmatmul.mubr.bf16.gmra.mrb[36].mxu1 %v8369_v26  ;;  %v699_v26 = vlaneseq }
 0x299   : > { %3818 = vmatprep.mubr.bf16.mxu1 %v8920_v58 }
 0x29a   : > { %v8485_v28 = vshrl.u32 %v699_v26, 7 }
 0x29c   : > { %v701_v2 = vsub.s32 0, %v8485_v28  ;;  %v705_v53 = vsub.s32 1, %v8485_v28 }
 0x29e   : > { %v8498_v15 = vrot.slane %v8491_v52, %v701_v2  ;;  %v8503_v60 = vrot.slane %v8491_v52, %v705_v53 }
 0x2a0   : > { %3819 = vmatmul.mubr.bf16.gmra.mrb[40].mxu1 %v8376_v27 }
 0x2a1   : > { %3828 = vmatprep.mubr.bf16.mxu1 %v8920_v58 }
 0x2a8   : > { %3829 = vmatmul.mubr.bf16.gmra.mrb[44].mxu1 %v8383_v40 }
 0x2a9   : > { %3838 = vmatprep.mubr.bf16.mxu1 %v8920_v58 }
 0x2b0   : > { %3839 = vmatmul.mubr.bf16.gmra.mrb[48].mxu1 %v8390_v14 }
 0x2b1   : > { %3848 = vmatprep.mubr.bf16.mxu1 %v8920_v58 }
 0x2b8   : > { %3849 = vmatmul.mubr.bf16.gmra.mrb[52].mxu1 %v8397_v32 }
 0x2b9   : > { %3858 = vmatprep.mubr.bf16.mxu1 %v8920_v58 }
 0x2c0   : > { %3859 = vmatmul.mubr.bf16.gmra.mrb[56].mxu1 %v8404_v44 }
 0x2c1   : > { %3868 = vmatprep.mubr.bf16.mxu1 %v8920_v58 }
 0x2c8   : > { %3869 = vmatmul.mubr.bf16.gmra.mrb[60].mxu1 %v8411_v38 }
 0x2c9   : > { %3878 = vmatprep.mubr.bf16.mxu1 %v8920_v58 }
 0x2d0   : > { %3879 = vmatmul.mubr.bf16.gmra.mrb[64].mxu1 %v8418_v0 }
 0x2d1   : > { %3888 = vmatprep.mubr.bf16.mxu1 %v8920_v58 }
 0x2d8   : > { %3889 = vmatmul.mubr.bf16.gmra.mrb[68].mxu1 %v7297_v45 }
 0x2d9   : > { %3898 = vmatprep.mubr.bf16.mxu1 %v8920_v58 }
 0x2e0   : > { %3899 = vmatmul.mubr.bf16.gmra.mrb[72].mxu1 %v7298_v1 }
 0x2e1   : > { %3908 = vmatprep.mubr.bf16.mxu1 %v8920_v58 }
 0x2e3   : > { %v3028_v4 = vpop.f32.mrb[0].mxu0 }
 0x2e4   : > { %v6086_v27 = vadd.f32 %v3028_v4, %v8498_v15  ;;  %v3030_v40 = vpop.f32.mrb[1].mxu0 }
 0x2e5   : > { %v6087_v48 = vadd.f32 %v3030_v40, %v8503_v60  ;;  %v3032_v3 = vpop.f32.mrb[2].mxu0 }
 0x2e6   : > { %v6088_v12 = vadd.f32 %v3032_v3, %v8498_v15  ;;  %v3034_v14 = vpop.f32.mrb[3].mxu0  ;;  %v3959_v30 = vmax.f32 %v6086_v27, 0.0  ;;  %v7367_v27 = vld [vmem:[#allocation7 + $0x120] ss:$8 sps:$4 sm:$0xff]   ;;  %v7372_v3 = vld [vmem:[#allocation7 + $0x134] ss:$8 sps:$4 sm:$0xff]  }
 0x2e7   : > { %v6089_v46 = vadd.f32 %v3034_v14, %v8503_v60  ;;  %v3960_v33 = vmax.f32 %v6087_v48, 0.0 }
 0x2e8   : > { %v3963_v8 = vmax.f32 %v6088_v12, 0.0  ;;  %3909 = vmatmul.mubr.bf16.gmra.mrb[76].mxu1 %v8433_v21  ;;  %v7369_v21 = vld [vmem:[#allocation7 + $0x124] ss:$8 sps:$4 sm:$0xff]  }
 0x2e9   : > { %v3964_v32 = vmax.f32 %v6089_v46, 0.0  ;;  %3918 = vmatprep.mubr.bf16.mxu1 %v8920_v58 }
 0x2ea   : > { %v4087_v13 = vpack.c.bf16 %v3963_v8, %v3959_v30  ;;  %v7370_v8 = vld [vmem:[#allocation7 + $0x130] ss:$8 sps:$4 sm:$0xff]  }
 0x2eb   : > { %v4088_v29 = vpack.c.bf16 %v3964_v32, %v3960_v33  ;;  %v3038_v44 = vpop.f32.mrb[4].mxu0 }
 0x2ec   : > { %v6090_v62 = vadd.f32 %v3038_v44, %v8498_v15  ;;  %v3040_v38 = vpop.f32.mrb[5].mxu0 }
 0x2ed   : > { %v6091_v20 = vadd.f32 %v3040_v38, %v8503_v60  ;;  %v3042_v0 = vpop.f32.mrb[6].mxu0  ;;  %4579 = vmatprep.mubr.bf16.mxu0 %v4088_v29 }
 0x2ee   : > { %v6092_v19 = vadd.f32 %v3042_v0, %v8498_v15  ;;  %v3044_v39 = vpop.f32.mrb[7].mxu0  ;;  %4580 = vmatmul.mubr.bf16.vlgmr.msra.gmra.mrb[64].mxu0 %v4087_v13  ;;  %v3967_v54 = vmax.f32 %v6090_v62, 0.0  ;;  %v7375_v13 = vld [vmem:[#allocation7 + $0x144] ss:$8 sps:$4 sm:$0xff]  }
 0x2ef   : > { %v6093_v45 = vadd.f32 %v3044_v39, %v8503_v60  ;;  %4741 = vmatpush1.bf16.msra.mxu0 %v7361_v37  ;;  %v3968_v18 = vmax.f32 %v6091_v20, 0.0 }
 0x2f0   : > { %v3971_v1 = vmax.f32 %v6092_v19, 0.0  ;;  %3919 = vmatmul.mubr.bf16.gmra.mrb[80].mxu1 %v8440_v25  ;;  %4742 = vmatprep.subr.bf16.mxu0 %v7366_v23  ;;  %v7373_v23 = vld [vmem:[#allocation7 + $0x140] ss:$8 sps:$4 sm:$0xff]   ;;  %v7378_v19 = vld [vmem:[#allocation7 + $0x154] ss:$8 sps:$4 sm:$0xff]  }
 0x2f1   : > { %v3972_v57 = vmax.f32 %v6093_v45, 0.0  ;;  %3928 = vmatprep.mubr.bf16.mxu1 %v8920_v58 }
 0x2f2   : > { %v4091_v24 = vpack.c.bf16 %v3971_v1, %v3967_v54  ;;  %v7376_v1 = vld [vmem:[#allocation7 + $0x150] ss:$8 sps:$4 sm:$0xff]  }
 0x2f3   : > { %v4092_v26 = vpack.c.bf16 %v3972_v57, %v3968_v18  ;;  %v3048_v4 = vpop.f32.mrb[8].mxu0  ;;  %4743 = vmatpush1.bf16.msra.mxu0 %v7364_v36  ;;  %v7381_v57 = vld [vmem:[#allocation7 + $0x164] ss:$8 sps:$4 sm:$0xff]  }
 0x2f4   : > { %v6094_v40 = vadd.f32 %v3048_v4, %v8498_v15  ;;  %v3050_v48 = vpop.f32.mrb[9].mxu0  ;;  %4744 = vmatprep.subr.bf16.mxu0 %v7369_v21 }
 0x2f5   : > { %v6095_v12 = vadd.f32 %v3050_v48, %v8503_v60  ;;  %v3052_v14 = vpop.f32.mrb[10].mxu0  ;;  %4589 = vmatprep.mubr.bf16.mxu0 %v4092_v26  ;;  %v7379_v48 = vld [vmem:[#allocation7 + $0x160] ss:$8 sps:$4 sm:$0xff]  }
 0x2f6   : > { %v6096_v25 = vadd.f32 %v3052_v14, %v8498_v15  ;;  %v3054_v46 = vpop.f32.mrb[11].mxu0  ;;  %4590 = vmatmul.mubr.bf16.gmra.mrb[68].mxu0 %v4091_v24  ;;  %v3975_v33 = vmax.f32 %v6094_v40, 0.0  ;;  %v7384_v14 = vld [vmem:[#allocation7 + $0x174] ss:$8 sps:$4 sm:$0xff]  }
 0x2f7   : > { %v6097_v30 = vadd.f32 %v3054_v46, %v8503_v60  ;;  %4745 = vmatpush1.bf16.msra.mxu0 %v7367_v27  ;;  %v3976_v29 = vmax.f32 %v6095_v12, 0.0 }
 0x2f8   : > { %v3979_v32 = vmax.f32 %v6096_v25, 0.0  ;;  %3929 = vmatmul.mubr.bf16.gmra.mrb[84].mxu1 %v8447_v41  ;;  %4746 = vmatprep.subr.bf16.mxu0 %v7372_v3 }
 0x2f9   : > { %v3980_v44 = vmax.f32 %v6097_v30, 0.0  ;;  %3938 = vmatprep.mubr.bf16.mxu1 %v8920_v58 }
 0x2fa   : > { %v4095_v37 = vpack.c.bf16 %v3979_v32, %v3975_v33 }
 0x2fb   : > { %v4096_v62 = vpack.c.bf16 %v3980_v44, %v3976_v29  ;;  %v3058_v38 = vpop.f32.mrb[12].mxu0  ;;  %4747 = vmatpush1.bf16.msra.mxu0 %v7370_v8  ;;  %v7382_v8 = vld [vmem:[#allocation7 + $0x170] ss:$8 sps:$4 sm:$0xff]  }
 0x2fc   : > { %v6098_v20 = vadd.f32 %v3058_v38, %v8498_v15  ;;  %v3060_v0 = vpop.f32.mrb[13].mxu0  ;;  %4748 = vmatprep.subr.bf16.mxu0 %v7375_v13  ;;  %v7387_v13 = vld [vmem:[#allocation7 + $0x184] ss:$8 sps:$4 sm:$0xff]  }
 0x2fd   : > { %v6099_v39 = vadd.f32 %v3060_v0, %v8503_v60  ;;  %v3062_v45 = vpop.f32.mrb[14].mxu0  ;;  %4599 = vmatprep.mubr.bf16.mxu0 %v4096_v62 }
 0x2fe   : > { %v6100_v41 = vadd.f32 %v3062_v45, %v8498_v15  ;;  %v3064_v36 = vpop.f32.mrb[15].mxu0  ;;  %4600 = vmatmul.mubr.bf16.gmra.mrb[72].mxu0 %v4095_v37  ;;  %v3983_v21 = vmax.f32 %v6098_v20, 0.0 }
 0x2ff   : > { %v6101_v54 = vadd.f32 %v3064_v36, %v8503_v60  ;;  %4749 = vmatpush1.bf16.msra.mxu0 %v7373_v23  ;;  %v3984_v24 = vmax.f32 %v6099_v39, 0.0  ;;  %v7385_v23 = vld [vmem:[#allocation7 + $0x180] ss:$8 sps:$4 sm:$0xff]  }
 0x300   : > { %v3987_v18 = vmax.f32 %v6100_v41, 0.0  ;;  %3939 = vmatmul.mubr.bf16.gmra.mrb[88].mxu1 %v8454_v43  ;;  %4750 = vmatprep.subr.bf16.mxu0 %v7378_v19  ;;  %v7390_v19 = vld [vmem:[#allocation7 + $0x194] ss:$8 sps:$4 sm:$0xff]  }
 0x301   : > { %v3988_v26 = vmax.f32 %v6101_v54, 0.0  ;;  %3948 = vmatprep.mubr.bf16.mxu1 %v8920_v58  ;;  %v7388_v54 = vld [vmem:[#allocation7 + $0x190] ss:$8 sps:$4 sm:$0xff]  }
 0x302   : > { %v4099_v4 = vpack.c.bf16 %v3987_v18, %v3983_v21  ;;  %v7393_v18 = vld [vmem:[#allocation7 + $0x1a4] ss:$8 sps:$4 sm:$0xff]  }
 0x303   : > { %v4100_v27 = vpack.c.bf16 %v3988_v26, %v3984_v24  ;;  %v3068_v40 = vpop.f32.mrb[16].mxu0  ;;  %4751 = vmatpush1.bf16.msra.mxu0 %v7376_v1 }
 0x304   : > { %v6102_v3 = vadd.f32 %v3068_v40, %v8498_v15  ;;  %v3070_v12 = vpop.f32.mrb[17].mxu0  ;;  %4752 = vmatprep.subr.bf16.mxu0 %v7381_v57  ;;  %v7391_v40 = vld [vmem:[#allocation7 + $0x1a0] ss:$8 sps:$4 sm:$0xff]  }
 0x305   : > { %v6103_v25 = vadd.f32 %v3070_v12, %v8503_v60  ;;  %v3072_v46 = vpop.f32.mrb[18].mxu0  ;;  %4609 = vmatprep.mubr.bf16.mxu0 %v4100_v27  ;;  %v7396_v12 = vld [vmem:[#allocation7 + $0x1b4] ss:$8 sps:$4 sm:$0xff]  }
 0x306   : > { %v6104_v43 = vadd.f32 %v3072_v46, %v8498_v15  ;;  %v3074_v30 = vpop.f32.mrb[19].mxu0  ;;  %4610 = vmatmul.mubr.bf16.gmra.mrb[76].mxu0 %v4099_v4  ;;  %v3991_v33 = vmax.f32 %v6102_v3, 0.0 }
 0x307   : > { %v6105_v58 = vadd.f32 %v3074_v30, %v8503_v60  ;;  %4753 = vmatpush1.bf16.msra.mxu0 %v7379_v48  ;;  %v3992_v29 = vmax.f32 %v6103_v25, 0.0 }
 0x308   : > { %v3995_v32 = vmax.f32 %v6104_v43, 0.0  ;;  %3949 = vmatmul.mubr.bf16.gmra.mrb[92].mxu1 %v8461_v59  ;;  %4754 = vmatprep.subr.bf16.mxu0 %v7384_v14 }
 0x309   : > { %v3996_v44 = vmax.f32 %v6105_v58, 0.0  ;;  %v7394_v58 = vld [vmem:[#allocation7 + $0x1b0] ss:$8 sps:$4 sm:$0xff]  }
 0x30a   : > { %v4103_v37 = vpack.c.bf16 %v3995_v32, %v3991_v33  ;;  %v7399_v32 = vld [vmem:[#allocation7 + $0x1c4] ss:$8 sps:$4 sm:$0xff]  }
 0x30b   : > { %v4104_v62 = vpack.c.bf16 %v3996_v44, %v3992_v29  ;;  %v3078_v38 = vpop.f32.mrb[20].mxu0  ;;  %4755 = vmatpush1.bf16.msra.mxu0 %v7382_v8 }
 0x30c   : > { %v6106_v20 = vadd.f32 %v3078_v38, %v8498_v15  ;;  %v3080_v0 = vpop.f32.mrb[21].mxu0  ;;  %4756 = vmatprep.subr.bf16.mxu0 %v7387_v13  ;;  %v7397_v38 = vld [vmem:[#allocation7 + $0x1c0] ss:$8 sps:$4 sm:$0xff]  }
 0x30d   : > { %v6107_v39 = vadd.f32 %v3080_v0, %v8503_v60  ;;  %v3082_v45 = vpop.f32.mrb[22].mxu0  ;;  %4619 = vmatprep.mubr.bf16.mxu0 %v4104_v62  ;;  %v7402_v0 = vld [vmem:[#allocation7 + $0x1d4] ss:$8 sps:$4 sm:$0xff]  }
 0x30e   : > { %v6108_v59 = vadd.f32 %v3082_v45, %v8498_v15  ;;  %v3084_v41 = vpop.f32.mrb[23].mxu0  ;;  %4620 = vmatmul.mubr.bf16.gmra.mrb[80].mxu0 %v4103_v37  ;;  %v3999_v1 = vmax.f32 %v6106_v20, 0.0 }
 0x30f   : > { %v6109_v36 = vadd.f32 %v3084_v41, %v8503_v60  ;;  %4757 = vmatpush1.bf16.msra.mxu0 %v7385_v23  ;;  %v4000_v57 = vmax.f32 %v6107_v39, 0.0 }
 0x310   : > { %v4003_v21 = vmax.f32 %v6108_v59, 0.0  ;;  %4758 = vmatprep.subr.bf16.mxu0 %v7390_v19 }
 0x311   : > { %v4004_v24 = vmax.f32 %v6109_v36, 0.0  ;;  %v7400_v36 = vld [vmem:[#allocation7 + $0x1d0] ss:$8 sps:$4 sm:$0xff]  }
 0x312   : > { %v4107_v26 = vpack.c.bf16 %v4003_v21, %v3999_v1  ;;  %v7405_v21 = vld [vmem:[#allocation7 + $0x1e4] ss:$8 sps:$4 sm:$0xff]  }
 0x313   : > { %v4108_v4 = vpack.c.bf16 %v4004_v24, %v4000_v57  ;;  %v3088_v27 = vpop.f32.mrb[24].mxu0  ;;  %4759 = vmatpush1.bf16.msra.mxu0 %v7388_v54  ;;  %v2530_v24 = vadd.f32 %v8170_v7, %v8498_v15 }
 0x314   : > { %v6110_v48 = vadd.f32 %v3088_v27, %v8498_v15  ;;  %v3090_v3 = vpop.f32.mrb[25].mxu0  ;;  %4760 = vmatprep.subr.bf16.mxu0 %v7393_v18 }
 0x315   : > { %v6111_v14 = vadd.f32 %v3090_v3, %v8503_v60  ;;  %v3092_v25 = vpop.f32.mrb[26].mxu0  ;;  %4629 = vmatprep.mubr.bf16.mxu0 %v4108_v4  ;;  %v2532_v4 = vadd.f32 %v8172_v6, %v8503_v60  ;;  %v2534_v3 = vadd.f32 %v8177_v9, %v8498_v15 }
 0x316   : > { %v6112_v46 = vadd.f32 %v3092_v25, %v8498_v15  ;;  %v3094_v43 = vpop.f32.mrb[27].mxu0  ;;  %4630 = vmatmul.mubr.bf16.gmra.mrb[84].mxu0 %v4107_v26  ;;  %v4007_v8 = vmax.f32 %v6110_v48, 0.0  ;;  %v7403_v48 = vld [vmem:[#allocation7 + $0x1e0] ss:$8 sps:$4 sm:$0xff]   ;;  %v7408_v25 = vld [vmem:[#allocation7 + $0x1f4] ss:$8 sps:$4 sm:$0xff]  }
 0x317   : > { %v6113_v30 = vadd.f32 %v3094_v43, %v8503_v60  ;;  %4761 = vmatpush1.bf16.msra.mxu0 %v7391_v40  ;;  %v4008_v13 = vmax.f32 %v6111_v14, 0.0 }
 0x318   : > { %v4011_v33 = vmax.f32 %v6112_v46, 0.0  ;;  %4762 = vmatprep.subr.bf16.mxu0 %v7396_v12  ;;  %v2536_v46 = vadd.f32 %v8182_v10, %v8503_v60  ;;  %v2542_v10 = vadd.f32 %v8190_v5, %v8503_v60 }
 0x319   : > { %v4012_v29 = vmax.f32 %v6113_v30, 0.0 }
 0x31a   : > { %v4111_v44 = vpack.c.bf16 %v4011_v33, %v4007_v8  ;;  %v7406_v8 = vld [vmem:[#allocation7 + $0x1f0] ss:$8 sps:$4 sm:$0xff]  }
 0x31b   : > { %v4112_v37 = vpack.c.bf16 %v4012_v29, %v4008_v13  ;;  %v3098_v62 = vpop.f32.mrb[28].mxu0  ;;  %4763 = vmatpush1.bf16.msra.mxu0 %v7394_v58  ;;  %v2540_v29 = vadd.f32 %v8188_v35, %v8498_v15 }
 0x31c   : > { %v6114_v23 = vadd.f32 %v3098_v62, %v8498_v15  ;;  %v3100_v20 = vpop.f32.mrb[29].mxu0  ;;  %4764 = vmatprep.subr.bf16.mxu0 %v7399_v32 }
 0x31d   : > { %v6115_v19 = vadd.f32 %v3100_v20, %v8503_v60  ;;  %v3102_v39 = vpop.f32.mrb[30].mxu0  ;;  %4639 = vmatprep.mubr.bf16.mxu0 %v4112_v37 }
 0x31e   : > { %v6116_v45 = vadd.f32 %v3102_v39, %v8498_v15  ;;  %v3104_v59 = vpop.f32.mrb[31].mxu0  ;;  %4640 = vmatmul.mubr.bf16.gmra.mrb[88].mxu0 %v4111_v44  ;;  %v4015_v54 = vmax.f32 %v6114_v23, 0.0 }
 0x31f   : > { %v6117_v41 = vadd.f32 %v3104_v59, %v8503_v60  ;;  %4765 = vmatpush1.bf16.msra.mxu0 %v7397_v38  ;;  %v4016_v18 = vmax.f32 %v6115_v19, 0.0  ;;  %v2544_v38 = vadd.f32 %v8195_v55, %v8498_v15 }
 0x320   : > { %v4019_v1 = vmax.f32 %v6116_v45, 0.0  ;;  %4766 = vmatprep.subr.bf16.mxu0 %v7402_v0  ;;  %v2546_v0 = vadd.f32 %v8200_v11, %v8503_v60 }
 0x321   : > { %v4020_v57 = vmax.f32 %v6117_v41, 0.0 }
 0x322   : > { %v4115_v26 = vpack.c.bf16 %v4019_v1, %v4015_v54  ;;  %v2550_v1 = vadd.f32 %v8206_v16, %v8498_v15 }
 0x323   : > { %v4116_v27 = vpack.c.bf16 %v4020_v57, %v4016_v18  ;;  %v3108_v40 = vpop.f32.mrb[32].mxu0  ;;  %4767 = vmatpush1.bf16.msra.mxu0 %v7400_v36  ;;  %v2554_v57 = vadd.f32 %v8213_v49, %v8498_v15 }
 0x324   : > { %v6119_v12 = vadd.f32 %v3108_v40, %v2530_v24  ;;  %v3110_v14 = vpop.f32.mrb[33].mxu0  ;;  %4768 = vmatprep.subr.bf16.mxu0 %v7405_v21  ;;  %v2552_v21 = vadd.f32 %v8208_v47, %v8503_v60 }
 0x325   : > { %v6121_v43 = vadd.f32 %v3110_v14, %v2532_v4  ;;  %v3112_v7 = vpop.f32.mrb[34].mxu0  ;;  %4649 = vmatprep.mubr.bf16.mxu0 %v4116_v27  ;;  %v2556_v4 = vadd.f32 %v8218_v56, %v8503_v60 }
 0x326   : > { %v6123_v30 = vadd.f32 %v3112_v7, %v2534_v3  ;;  %v3114_v58 = vpop.f32.mrb[35].mxu0  ;;  %4650 = vmatmul.mubr.bf16.gmra.mrb[92].mxu0 %v4115_v26  ;;  %v4023_v33 = vmax.f32 %v6119_v12, 0.0 }
 0x327   : > { %v6125_v6 = vadd.f32 %v3114_v58, %v2536_v46  ;;  %4769 = vmatpush1.bf16.msra.mxu0 %v7403_v48  ;;  %v4024_v9 = vmax.f32 %v6121_v43, 0.0  ;;  %v2560_v46 = vadd.f32 %v8224_v51, %v8498_v15  ;;  %v2562_v43 = vadd.f32 %v8226_v61, %v8503_v60 }
 0x328   : > { %v4027_v32 = vmax.f32 %v6123_v30, 0.0  ;;  %4770 = vmatprep.subr.bf16.mxu0 %v7408_v25  ;;  %v2564_v30 = vadd.f32 %v8231_v34, %v8498_v15 }
 0x329   : > { %v4028_v13 = vmax.f32 %v6125_v6, 0.0 }
 0x32a   : > { %v4119_v44 = vpack.c.bf16 %v4027_v32, %v4023_v33 }
 0x32b   : > { %v4120_v37 = vpack.c.bf16 %v4028_v13, %v4024_v9  ;;  %v3118_v62 = vpop.f32.mrb[36].mxu0  ;;  %4771 = vmatpush1.bf16.msra.mxu0 %v7406_v8  ;;  %v2566_v8 = vadd.f32 %v8236_v63, %v8503_v60 }
 0x32c   : > { %v6127_v23 = vadd.f32 %v3118_v62, %v2540_v29  ;;  %v3120_v20 = vpop.f32.mrb[37].mxu0  ;;  %v2572_v62 = vadd.f32 %v8244_v42, %v8503_v60 }
 0x32d   : > { %v6129_v19 = vadd.f32 %v3120_v20, %v2542_v10  ;;  %v3122_v39 = vpop.f32.mrb[38].mxu0  ;;  %4659 = vmatprep.mubr.bf16.mxu0 %v4120_v37  ;;  %v2570_v37 = vadd.f32 %v8242_v22, %v8498_v15 }
 0x32e   : > { %v6131_v45 = vadd.f32 %v3122_v39, %v2544_v38  ;;  %v3124_v35 = vpop.f32.mrb[39].mxu0  ;;  %4660 = vmatmul.mubr.bf16.gmra.mrb[96].mxu0 %v4119_v44  ;;  %v4031_v41 = vmax.f32 %v6127_v23, 0.0  ;;  %v2574_v23 = vadd.f32 %v8249_v31, %v8498_v15 }
 0x32f   : > { %v6133_v59 = vadd.f32 %v3124_v35, %v2546_v0  ;;  %v4032_v36 = vmax.f32 %v6129_v19, 0.0  ;;  %v2576_v19 = vadd.f32 %v8254_v17, %v8503_v60 }
 0x330   : > { %v4035_v5 = vmax.f32 %v6131_v45, 0.0 }
 0x331   : > { %v4036_v54 = vmax.f32 %v6133_v59, 0.0 }
 0x332   : > { %v4123_v55 = vpack.c.bf16 %v4035_v5, %v4031_v41 }
 0x333   : > { %v4124_v18 = vpack.c.bf16 %v4036_v54, %v4032_v36  ;;  %v3128_v11 = vpop.f32.mrb[40].mxu0  ;;  %v2580_v54 = vadd.f32 %v8260_v50, %v8498_v15 }
 0x334   : > { %v6135_v24 = vadd.f32 %v3128_v11, %v2550_v1  ;;  %v3130_v26 = vpop.f32.mrb[41].mxu0  ;;  %v8921_v1 = vld [vmem:[#allocation15_spill] sm:$0xff] }
 0x335   : > { %v6137_v27 = vadd.f32 %v3130_v26, %v2552_v21  ;;  %v3132_v40 = vpop.f32.mrb[42].mxu0  ;;  %4669 = vmatprep.mubr.bf16.mxu0 %v4124_v18  ;;  %v8922_v18 = vld [vmem:[#allocation16_spill] sm:$0xff]  ;;  %v8923_v26 = vld [vmem:[#allocation17_spill] sm:$0xff] }
 0x336   : > { %v6139_v48 = vadd.f32 %v3132_v40, %v2554_v57  ;;  %v3134_v3 = vpop.f32.mrb[43].mxu0  ;;  %4670 = vmatmul.mubr.bf16.gmra.mrb[100].mxu0 %v4123_v55  ;;  %v4039_v12 = vmax.f32 %v6135_v24, 0.0  ;;  %v2582_v55 = vadd.f32 %v8921_v1, %v8503_v60  ;;  %v2584_v11 = vadd.f32 %v8922_v18, %v8498_v15 }
 0x337   : > { %v6141_v16 = vadd.f32 %v3134_v3, %v2556_v4  ;;  %v4040_v47 = vmax.f32 %v6137_v27, 0.0  ;;  %v2586_v4 = vadd.f32 %v8923_v26, %v8503_v60 }
 0x338   : > { %v4043_v14 = vmax.f32 %v6139_v48, 0.0 }
 0x339   : > { %v4044_v25 = vmax.f32 %v6141_v16, 0.0  ;;  %v7409_v16 = vld [vmem:[#allocation8 + $0x40] sm:$0xff]  }
 0x33a   : > { %v4127_v49 = vpack.c.bf16 %v4043_v14, %v4039_v12  ;;  %5942 = vmatprep.subr.bf16.mxu1 %v7409_v16 }
 0x33b   : > { %v4128_v7 = vpack.c.bf16 %v4044_v25, %v4040_v47  ;;  %v3138_v56 = vpop.f32.mrb[44].mxu0 }
 0x33c   : > { %v6143_v58 = vadd.f32 %v3138_v56, %v2560_v46  ;;  %v3140_v6 = vpop.f32.mrb[45].mxu0  ;;  %v8924_v46 = vld [vmem:[#allocation18_spill] sm:$0xff]  ;;  %v8925_v56 = vld [vmem:[#allocation19_spill] sm:$0xff] }
 0x33d   : > { %v6145_v33 = vadd.f32 %v3140_v6, %v2562_v43  ;;  %v3142_v32 = vpop.f32.mrb[46].mxu0  ;;  %4679 = vmatprep.mubr.bf16.mxu0 %v4128_v7  ;;  %v7410_v7 = vld [vmem:[#allocation8] sm:$0xff]  }
 0x33e   : > { %v6147_v9 = vadd.f32 %v3142_v32, %v2564_v30  ;;  %v3144_v13 = vpop.f32.mrb[47].mxu0  ;;  %4680 = vmatmul.mubr.bf16.gmra.mrb[104].mxu0 %v4127_v49  ;;  %v4047_v29 = vmax.f32 %v6143_v58, 0.0  ;;  %v2590_v49 = vadd.f32 %v8924_v46, %v8498_v15  ;;  %v2592_v30 = vadd.f32 %v8925_v56, %v8503_v60  ;;  %5943 = vmatpush3.bf16.msra.mxu1 %v7410_v7  ;;  %v7413_v46 = vld [vmem:[#allocation8 + $0x50] sm:$0xff]  }
 0x33f   : > { %v6149_v51 = vadd.f32 %v3144_v13, %v2566_v8  ;;  %v4048_v61 = vmax.f32 %v6145_v33, 0.0  ;;  %v8926_v8 = vld [vmem:[#allocation20_spill] sm:$0xff]  ;;  %v8927_v13 = vld [vmem:[#allocation21_spill] sm:$0xff] }
 0x340   : > { %v4051_v44 = vmax.f32 %v6147_v9, 0.0  ;;  %v2594_v33 = vadd.f32 %v8926_v8, %v8498_v15 }
 0x341   : > { %v4052_v10 = vmax.f32 %v6149_v51, 0.0  ;;  %v2596_v51 = vadd.f32 %v8927_v13, %v8503_v60 }
 0x342   : > { %v4131_v34 = vpack.c.bf16 %v4051_v44, %v4047_v29 }
 0x343   : > { %v4132_v38 = vpack.c.bf16 %v4052_v10, %v4048_v61  ;;  %v3148_v63 = vpop.f32.mrb[48].mxu0 }
 0x344   : > { %v6151_v20 = vadd.f32 %v3148_v63, %v2570_v37  ;;  %v3150_v0 = vpop.f32.mrb[49].mxu0 }
 0x345   : > { %v6153_v39 = vadd.f32 %v3150_v0, %v2572_v62  ;;  %v3152_v45 = vpop.f32.mrb[50].mxu0  ;;  %4689 = vmatprep.mubr.bf16.mxu0 %v4132_v38 }
 0x346   : > { %v6155_v35 = vadd.f32 %v3152_v45, %v2574_v23  ;;  %v3154_v59 = vpop.f32.mrb[51].mxu0  ;;  %4690 = vmatmul.mubr.bf16.gmra.mrb[108].mxu0 %v4131_v34  ;;  %v4055_v41 = vmax.f32 %v6151_v20, 0.0  ;;  %v8928_v23 = vld [vmem:[#allocation22_spill] sm:$0xff] }
 0x347   : > { %v6157_v22 = vadd.f32 %v3154_v59, %v2576_v19  ;;  %v4056_v42 = vmax.f32 %v6153_v39, 0.0  ;;  %v2600_v20 = vadd.f32 %v8928_v23, %v8498_v15  ;;  %v8929_v19 = vld [vmem:[#allocation23_spill] sm:$0xff]  ;;  %v8930_v59 = vld [vmem:[#allocation24_spill] sm:$0xff] }
 0x348   : > { %v4059_v5 = vmax.f32 %v6155_v35, 0.0  ;;  %v2602_v39 = vadd.f32 %v8929_v19, %v8503_v60 }
 0x349   : > { %v4060_v36 = vmax.f32 %v6157_v22, 0.0  ;;  %v2604_v22 = vadd.f32 %v8930_v59, %v8498_v15 }
 0x34a   : > { %v4135_v31 = vpack.c.bf16 %v4059_v5, %v4055_v41 }
 0x34b   : > { %v4136_v21 = vpack.c.bf16 %v4060_v36, %v4056_v42  ;;  %v3158_v17 = vpop.f32.mrb[52].mxu0  ;;  %v709_v42 = vsub.s32 2, %v8485_v28  ;;  %v8931_v36 = vld [vmem:[#allocation25_spill] sm:$0xff] }
 0x34c   : > { %v6159_v57 = vadd.f32 %v3158_v17, %v2580_v54  ;;  %v3160_v24 = vpop.f32.mrb[53].mxu0  ;;  %v2606_v54 = vadd.f32 %v8931_v36, %v8503_v60 }
 0x34d   : > { %v6161_v27 = vadd.f32 %v3160_v24, %v2582_v55  ;;  %v3162_v40 = vpop.f32.mrb[54].mxu0  ;;  %4699 = vmatprep.mubr.bf16.mxu0 %v4136_v21  ;;  %v713_v55 = vsub.s32 3, %v8485_v28  ;;  %v8613_v15 = vrot.slane %v8491_v52, %v709_v42  ;;  %v7422_v42 = vld [vmem:[#allocation8 + $0x30] sm:$0xff]  }
 0x34e   : > { %v6163_v48 = vadd.f32 %v3162_v40, %v2584_v11  ;;  %v3164_v3 = vpop.f32.mrb[55].mxu0  ;;  %4700 = vmatmul.mubr.bf16.gmra.mrb[112].mxu0 %v4135_v31  ;;  %v4063_v12 = vmax.f32 %v6159_v57, 0.0  ;;  %v7411_v11 = vld [vmem:[#allocation8 + $0x48] sm:$0xff]  }
 0x34f   : > { %v6165_v50 = vadd.f32 %v3164_v3, %v2586_v4  ;;  %v4064_v47 = vmax.f32 %v6161_v27, 0.0  ;;  %v8616_v27 = vrot.slane %v8491_v52, %v713_v55  ;;  %5944 = vmatprep.subr.bf16.mxu1 %v7411_v11  ;;  %v7412_v40 = vld [vmem:[#allocation8 + $0x8] sm:$0xff]   ;;  %v7414_v52 = vld [vmem:[#allocation8 + $0x10] sm:$0xff]   ;;  %v7424_v11 = vld [vmem:[#allocation8 + $0x38] sm:$0xff]  }
 0x350   : > { %v4067_v14 = vmax.f32 %v6163_v48, 0.0  ;;  %5945 = vmatpush3.bf16.msra.mxu1 %v7412_v40 }
 0x351   : > { %v4068_v25 = vmax.f32 %v6165_v50, 0.0  ;;  %5946 = vmatprep.subr.bf16.mxu1 %v7413_v46 }
 0x352   : > { %v4139_v43 = vpack.c.bf16 %v4067_v14, %v4063_v12 }
 0x353   : > { %v4140_v58 = vpack.c.bf16 %v4068_v25, %v4064_v47  ;;  %v3168_v6 = vpop.f32.mrb[56].mxu0 }
 0x354   : > { %v6167_v32 = vadd.f32 %v3168_v6, %v2590_v49  ;;  %v3170_v9 = vpop.f32.mrb[57].mxu0  ;;  %v7415_v49 = vld [vmem:[#allocation8 + $0x58] sm:$0xff]   ;;  %5947 = vmatpush3.bf16.msra.mxu1 %v7414_v52 }
 0x355   : > { %v6169_v29 = vadd.f32 %v3170_v9, %v2592_v30  ;;  %v3172_v44 = vpop.f32.mrb[58].mxu0  ;;  %4709 = vmatprep.mubr.bf16.mxu0 %v4140_v58  ;;  %v7416_v6 = vld [vmem:[#allocation8 + $0x18] sm:$0xff]   ;;  %5948 = vmatprep.subr.bf16.mxu1 %v7415_v49 }
 0x356   : > { %v6171_v61 = vadd.f32 %v3172_v44, %v2594_v33  ;;  %v3174_v10 = vpop.f32.mrb[59].mxu0  ;;  %4710 = vmatmul.mubr.bf16.gmra.mrb[116].mxu0 %v4139_v43  ;;  %v4071_v34 = vmax.f32 %v6167_v32, 0.0  ;;  %v7417_v33 = vld [vmem:[#allocation8 + $0x60] sm:$0xff]  }
 0x357   : > { %v6173_v37 = vadd.f32 %v3174_v10, %v2596_v51  ;;  %v4072_v38 = vmax.f32 %v6169_v29, 0.0 }
 0x358   : > { %v4075_v62 = vmax.f32 %v6171_v61, 0.0  ;;  %5949 = vmatpush3.bf16.msra.mxu1 %v7416_v6  ;;  %v7418_v61 = vld [vmem:[#allocation8 + $0x20] sm:$0xff]  }
 0x359   : > { %v4076_v63 = vmax.f32 %v6173_v37, 0.0  ;;  %5950 = vmatprep.subr.bf16.mxu1 %v7417_v33 }
 0x35a   : > { %v4143_v0 = vpack.c.bf16 %v4075_v62, %v4071_v34  ;;  %v7419_v34 = vld [vmem:[#allocation8 + $0x68] sm:$0xff]  }
 0x35b   : > { %v4144_v45 = vpack.c.bf16 %v4076_v63, %v4072_v38  ;;  %v3178_v35 = vpop.f32.mrb[60].mxu0 }
 0x35c   : > { %v6175_v41 = vadd.f32 %v3178_v35, %v2600_v20  ;;  %v3180_v5 = vpop.f32.mrb[61].mxu0  ;;  %5951 = vmatpush3.bf16.msra.mxu1 %v7418_v61 }
 0x35d   : > { %v6177_v31 = vadd.f32 %v3180_v5, %v2602_v39  ;;  %v3182_v1 = vpop.f32.mrb[62].mxu0  ;;  %4719 = vmatprep.mubr.bf16.mxu0 %v4144_v45  ;;  %5952 = vmatprep.subr.bf16.mxu1 %v7419_v34  ;;  %v7421_v39 = vld [vmem:[#allocation8 + $0x70] sm:$0xff]  }
 0x35e   : > { %v6179_v21 = vadd.f32 %v3182_v1, %v2604_v22  ;;  %v3184_v17 = vpop.f32.mrb[63].mxu0  ;;  %4720 = vmatmul.mubr.bf16.gmra.mrb[120].mxu0 %v4143_v0  ;;  %v4079_v57 = vmax.f32 %v6175_v41, 0.0  ;;  %v7420_v0 = vld [vmem:[#allocation8 + $0x28] sm:$0xff]  }
 0x35f   : > { %v6181_v18 = vadd.f32 %v3184_v17, %v2606_v54  ;;  %v4080_v26 = vmax.f32 %v6177_v31, 0.0  ;;  %v7423_v31 = vld [vmem:[#allocation8 + $0x78] sm:$0xff]  }
 0x360   : > { %v4083_v24 = vmax.f32 %v6179_v21, 0.0  ;;  %5953 = vmatpush3.bf16.msra.mxu1 %v7420_v0 }
 0x361   : > { %v4084_v4 = vmax.f32 %v6181_v18, 0.0  ;;  %5954 = vmatprep.subr.bf16.mxu1 %v7421_v39 }
 0x362   : > { %v4147_v60 = vpack.c.bf16 %v4083_v24, %v4079_v57 }
 0x363   : > { %v4148_v48 = vpack.c.bf16 %v4084_v4, %v4080_v26  ;;  %v3800_v3 = vpop.f32.mrb[32].mxu1 }
 0x364   : > { %v6182_v50 = vadd.f32 %v3800_v3, %v8613_v15  ;;  %v3802_v16 = vpop.f32.mrb[33].mxu1  ;;  %5955 = vmatpush3.bf16.msra.mxu1 %v7422_v42 }
 0x365   : > { %v6183_v12 = vadd.f32 %v3802_v16, %v8616_v27  ;;  %v3804_v14 = vpop.f32.mrb[34].mxu1  ;;  %4729 = vmatprep.mubr.bf16.mxu0 %v4148_v48  ;;  %5956 = vmatprep.subr.bf16.mxu1 %v7423_v31 }
 0x366   : > { %v6184_v47 = vadd.f32 %v3804_v14, %v8613_v15  ;;  %v3806_v25 = vpop.f32.mrb[35].mxu1  ;;  %4730 = vmatmul.mubr.bf16.gmra.mrb[124].mxu0 %v4147_v60  ;;  %v3961_v7 = vmax.f32 %v6182_v50, 0.0 }
 0x367   : > { %v6185_v43 = vadd.f32 %v3806_v25, %v8616_v27  ;;  %v3962_v30 = vmax.f32 %v6183_v12, 0.0 }
 0x368   : > { %v3965_v56 = vmax.f32 %v6184_v47, 0.0  ;;  %5957 = vmatpush3.bf16.msra.mxu1 %v7424_v11 }
 0x369   : > { %v3966_v58 = vmax.f32 %v6185_v43, 0.0 }
 0x36a   : > { %v4089_v8 = vpack.c.bf16 %v3965_v56, %v3961_v7 }
 0x36b   : > { %v4090_v32 = vpack.c.bf16 %v3966_v58, %v3962_v30  ;;  %v3810_v9 = vpop.f32.mrb[36].mxu1 }
 0x36c   : > { %v6186_v13 = vadd.f32 %v3810_v9, %v8613_v15  ;;  %v3812_v51 = vpop.f32.mrb[37].mxu1 }
 0x36d   : > { %v6187_v29 = vadd.f32 %v3812_v51, %v8616_v27  ;;  %v3814_v44 = vpop.f32.mrb[38].mxu1  ;;  %4772 = vmatprep.mubr.bf16.mxu0 %v4090_v32 }
 0x36e   : > { %v6188_v10 = vadd.f32 %v3814_v44, %v8613_v15  ;;  %v3816_v37 = vpop.f32.mrb[39].mxu1  ;;  %4773 = vmatmul.mubr.bf16.vlgmr.msra.gmra.mrb[64].mxu0 %v4089_v8  ;;  %v3969_v38 = vmax.f32 %v6186_v13, 0.0 }
 0x36f   : > { %v6189_v62 = vadd.f32 %v3816_v37, %v8616_v27  ;;  %v3970_v23 = vmax.f32 %v6187_v29, 0.0 }
 0x370   : > { %v3973_v63 = vmax.f32 %v6188_v10, 0.0 }
 0x371   : > { %v3974_v20 = vmax.f32 %v6189_v62, 0.0 }
 0x372   : > { %v4093_v19 = vpack.c.bf16 %v3973_v63, %v3969_v38 }
 0x373   : > { %v4094_v45 = vpack.c.bf16 %v3974_v20, %v3970_v23  ;;  %v3820_v35 = vpop.f32.mrb[40].mxu1 }
 0x374   : > { %v6190_v59 = vadd.f32 %v3820_v35, %v8613_v15  ;;  %v3822_v22 = vpop.f32.mrb[41].mxu1 }
 0x375   : > { %v6191_v41 = vadd.f32 %v3822_v22, %v8616_v27  ;;  %v3824_v5 = vpop.f32.mrb[42].mxu1  ;;  %4782 = vmatprep.mubr.bf16.mxu0 %v4094_v45 }
 0x376   : > { %v6192_v36 = vadd.f32 %v3824_v5, %v8613_v15  ;;  %v3826_v54 = vpop.f32.mrb[43].mxu1  ;;  %4783 = vmatmul.mubr.bf16.gmra.mrb[68].mxu0 %v4093_v19  ;;  %v3977_v55 = vmax.f32 %v6190_v59, 0.0 }
 0x377   : > { %v6193_v1 = vadd.f32 %v3826_v54, %v8616_v27  ;;  %v3978_v17 = vmax.f32 %v6191_v41, 0.0 }
 0x378   : > { %v3981_v21 = vmax.f32 %v6192_v36, 0.0 }
 0x379   : > { %v3982_v18 = vmax.f32 %v6193_v1, 0.0 }
 0x37a   : > { %v4097_v57 = vpack.c.bf16 %v3981_v21, %v3977_v55 }
 0x37b   : > { %v4098_v24 = vpack.c.bf16 %v3982_v18, %v3978_v17  ;;  %v3830_v26 = vpop.f32.mrb[44].mxu1 }
 0x37c   : > { %v6194_v4 = vadd.f32 %v3830_v26, %v8613_v15  ;;  %v3832_v60 = vpop.f32.mrb[45].mxu1 }
 0x37d   : > { %v6195_v40 = vadd.f32 %v3832_v60, %v8616_v27  ;;  %v3834_v48 = vpop.f32.mrb[46].mxu1  ;;  %4792 = vmatprep.mubr.bf16.mxu0 %v4098_v24 }
 0x37e   : > { %v6196_v3 = vadd.f32 %v3834_v48, %v8613_v15  ;;  %v3836_v50 = vpop.f32.mrb[47].mxu1  ;;  %4793 = vmatmul.mubr.bf16.gmra.mrb[72].mxu0 %v4097_v57  ;;  %v3985_v12 = vmax.f32 %v6194_v4, 0.0 }
 0x37f   : > { %v6197_v16 = vadd.f32 %v3836_v50, %v8616_v27  ;;  %v3986_v47 = vmax.f32 %v6195_v40, 0.0 }
 0x380   : > { %v3989_v14 = vmax.f32 %v6196_v3, 0.0 }
 0x381   : > { %v3990_v25 = vmax.f32 %v6197_v16, 0.0 }
 0x382   : > { %v4101_v46 = vpack.c.bf16 %v3989_v14, %v3985_v12 }
 0x383   : > { %v4102_v52 = vpack.c.bf16 %v3990_v25, %v3986_v47  ;;  %v3840_v49 = vpop.f32.mrb[48].mxu1 }
 0x384   : > { %v6198_v43 = vadd.f32 %v3840_v49, %v8613_v15  ;;  %v3842_v7 = vpop.f32.mrb[49].mxu1 }
 0x385   : > { %v6199_v56 = vadd.f32 %v3842_v7, %v8616_v27  ;;  %v3844_v30 = vpop.f32.mrb[50].mxu1  ;;  %4802 = vmatprep.mubr.bf16.mxu0 %v4102_v52 }
 0x386   : > { %v6200_v58 = vadd.f32 %v3844_v30, %v8613_v15  ;;  %v3846_v6 = vpop.f32.mrb[51].mxu1  ;;  %4803 = vmatmul.mubr.bf16.gmra.mrb[76].mxu0 %v4101_v46  ;;  %v3993_v33 = vmax.f32 %v6198_v43, 0.0 }
 0x387   : > { %v6201_v8 = vadd.f32 %v3846_v6, %v8616_v27  ;;  %v3994_v9 = vmax.f32 %v6199_v56, 0.0 }
 0x388   : > { %v3997_v32 = vmax.f32 %v6200_v58, 0.0 }
 0x389   : > { %v3998_v13 = vmax.f32 %v6201_v8, 0.0 }
 0x38a   : > { %v4105_v51 = vpack.c.bf16 %v3997_v32, %v3993_v33 }
 0x38b   : > { %v4106_v29 = vpack.c.bf16 %v3998_v13, %v3994_v9  ;;  %v3850_v44 = vpop.f32.mrb[52].mxu1 }
 0x38c   : > { %v6202_v61 = vadd.f32 %v3850_v44, %v8613_v15  ;;  %v3852_v10 = vpop.f32.mrb[53].mxu1 }
 0x38d   : > { %v6203_v37 = vadd.f32 %v3852_v10, %v8616_v27  ;;  %v3854_v34 = vpop.f32.mrb[54].mxu1  ;;  %4812 = vmatprep.mubr.bf16.mxu0 %v4106_v29 }
 0x38e   : > { %v6204_v62 = vadd.f32 %v3854_v34, %v8613_v15  ;;  %v3856_v38 = vpop.f32.mrb[55].mxu1  ;;  %4813 = vmatmul.mubr.bf16.gmra.mrb[80].mxu0 %v4105_v51  ;;  %v4001_v23 = vmax.f32 %v6202_v61, 0.0 }
 0x38f   : > { %v6205_v63 = vadd.f32 %v3856_v38, %v8616_v27  ;;  %v4002_v0 = vmax.f32 %v6203_v37, 0.0 }
 0x390   : > { %v4005_v20 = vmax.f32 %v6204_v62, 0.0 }
 0x391   : > { %v4006_v19 = vmax.f32 %v6205_v63, 0.0 }
 0x392   : > { %v4109_v39 = vpack.c.bf16 %v4005_v20, %v4001_v23 }
 0x393   : > { %v4110_v45 = vpack.c.bf16 %v4006_v19, %v4002_v0  ;;  %v3860_v35 = vpop.f32.mrb[56].mxu1 }
 0x394   : > { %v6206_v59 = vadd.f32 %v3860_v35, %v8613_v15  ;;  %v3862_v22 = vpop.f32.mrb[57].mxu1 }
 0x395   : > { %v6207_v41 = vadd.f32 %v3862_v22, %v8616_v27  ;;  %v3864_v5 = vpop.f32.mrb[58].mxu1  ;;  %4822 = vmatprep.mubr.bf16.mxu0 %v4110_v45 }
 0x396   : > { %v6208_v42 = vadd.f32 %v3864_v5, %v8613_v15  ;;  %v3866_v36 = vpop.f32.mrb[59].mxu1  ;;  %4823 = vmatmul.mubr.bf16.gmra.mrb[84].mxu0 %v4109_v39  ;;  %v4009_v31 = vmax.f32 %v6206_v59, 0.0 }
 0x397   : > { %v6209_v54 = vadd.f32 %v3866_v36, %v8616_v27  ;;  %v4010_v55 = vmax.f32 %v6207_v41, 0.0 }
 0x398   : > { %v4013_v1 = vmax.f32 %v6208_v42, 0.0 }
 0x399   : > { %v4014_v21 = vmax.f32 %v6209_v54, 0.0 }
 0x39a   : > { %v4113_v17 = vpack.c.bf16 %v4013_v1, %v4009_v31 }
 0x39b   : > { %v4114_v18 = vpack.c.bf16 %v4014_v21, %v4010_v55  ;;  %v3870_v11 = vpop.f32.mrb[60].mxu1 }
 0x39c   : > { %v6210_v57 = vadd.f32 %v3870_v11, %v8613_v15  ;;  %v3872_v24 = vpop.f32.mrb[61].mxu1 }
 0x39d   : > { %v6211_v26 = vadd.f32 %v3872_v24, %v8616_v27  ;;  %v3874_v4 = vpop.f32.mrb[62].mxu1  ;;  %4832 = vmatprep.mubr.bf16.mxu0 %v4114_v18 }
 0x39e   : > { %v6212_v60 = vadd.f32 %v3874_v4, %v8613_v15  ;;  %v3876_v40 = vpop.f32.mrb[63].mxu1  ;;  %4833 = vmatmul.mubr.bf16.gmra.mrb[88].mxu0 %v4113_v17  ;;  %v4017_v3 = vmax.f32 %v6210_v57, 0.0 }
 0x39f   : > { %v6213_v48 = vadd.f32 %v3876_v40, %v8616_v27  ;;  %v4018_v16 = vmax.f32 %v6211_v26, 0.0 }
 0x3a0   : > { %v4021_v50 = vmax.f32 %v6212_v60, 0.0 }
 0x3a1   : > { %v4022_v12 = vmax.f32 %v6213_v48, 0.0 }
 0x3a2   : > { %v4117_v14 = vpack.c.bf16 %v4021_v50, %v4017_v3 }
 0x3a3   : > { %v4118_v47 = vpack.c.bf16 %v4022_v12, %v4018_v16  ;;  %v3880_v25 = vpop.f32.mrb[64].mxu1 }
 0x3a4   : > { %v6214_v46 = vadd.f32 %v3880_v25, %v8613_v15  ;;  %v3882_v52 = vpop.f32.mrb[65].mxu1 }
 0x3a5   : > { %v6215_v49 = vadd.f32 %v3882_v52, %v8616_v27  ;;  %v3884_v43 = vpop.f32.mrb[66].mxu1  ;;  %4842 = vmatprep.mubr.bf16.mxu0 %v4118_v47 }
 0x3a6   : > { %v6216_v7 = vadd.f32 %v3884_v43, %v8613_v15  ;;  %v3886_v56 = vpop.f32.mrb[67].mxu1  ;;  %4843 = vmatmul.mubr.bf16.gmra.mrb[92].mxu0 %v4117_v14  ;;  %v4025_v58 = vmax.f32 %v6214_v46, 0.0 }
 0x3a7   : > { %v6217_v30 = vadd.f32 %v3886_v56, %v8616_v27  ;;  %v4026_v8 = vmax.f32 %v6215_v49, 0.0 }
 0x3a8   : > { %v4029_v6 = vmax.f32 %v6216_v7, 0.0 }
 0x3a9   : > { %v4030_v33 = vmax.f32 %v6217_v30, 0.0 }
 0x3aa   : > { %v4121_v32 = vpack.c.bf16 %v4029_v6, %v4025_v58 }
 0x3ab   : > { %v4122_v9 = vpack.c.bf16 %v4030_v33, %v4026_v8  ;;  %v3890_v13 = vpop.f32.mrb[68].mxu1 }
 0x3ac   : > { %v6218_v51 = vadd.f32 %v3890_v13, %v8613_v15  ;;  %v3892_v29 = vpop.f32.mrb[69].mxu1 }
 0x3ad   : > { %v6219_v44 = vadd.f32 %v3892_v29, %v8616_v27  ;;  %v3894_v61 = vpop.f32.mrb[70].mxu1  ;;  %4852 = vmatprep.mubr.bf16.mxu0 %v4122_v9 }
 0x3ae   : > { %v6220_v10 = vadd.f32 %v3894_v61, %v8613_v15  ;;  %v3896_v37 = vpop.f32.mrb[71].mxu1  ;;  %4853 = vmatmul.mubr.bf16.gmra.mrb[96].mxu0 %v4121_v32  ;;  %v4033_v62 = vmax.f32 %v6218_v51, 0.0 }
 0x3af   : > { %v6221_v34 = vadd.f32 %v3896_v37, %v8616_v27  ;;  %v4034_v63 = vmax.f32 %v6219_v44, 0.0 }
 0x3b0   : > { %v4037_v38 = vmax.f32 %v6220_v10, 0.0 }
 0x3b1   : > { %v4038_v23 = vmax.f32 %v6221_v34, 0.0 }
 0x3b2   : > { %v4125_v20 = vpack.c.bf16 %v4037_v38, %v4033_v62 }
 0x3b3   : > { %v4126_v0 = vpack.c.bf16 %v4038_v23, %v4034_v63  ;;  %v3900_v19 = vpop.f32.mrb[72].mxu1 }
 0x3b4   : > { %v6222_v39 = vadd.f32 %v3900_v19, %v8613_v15  ;;  %v3902_v45 = vpop.f32.mrb[73].mxu1 }
 0x3b5   : > { %v6223_v35 = vadd.f32 %v3902_v45, %v8616_v27  ;;  %v3904_v59 = vpop.f32.mrb[74].mxu1  ;;  %4862 = vmatprep.mubr.bf16.mxu0 %v4126_v0 }
 0x3b6   : > { %v6224_v22 = vadd.f32 %v3904_v59, %v8613_v15  ;;  %v3906_v41 = vpop.f32.mrb[75].mxu1  ;;  %4863 = vmatmul.mubr.bf16.gmra.mrb[100].mxu0 %v4125_v20  ;;  %v4041_v42 = vmax.f32 %v6222_v39, 0.0 }
 0x3b7   : > { %v6225_v5 = vadd.f32 %v3906_v41, %v8616_v27  ;;  %v4042_v54 = vmax.f32 %v6223_v35, 0.0 }
 0x3b8   : > { %v4045_v36 = vmax.f32 %v6224_v22, 0.0 }
 0x3b9   : > { %v4046_v31 = vmax.f32 %v6225_v5, 0.0 }
 0x3ba   : > { %v4129_v1 = vpack.c.bf16 %v4045_v36, %v4041_v42 }
 0x3bb   : > { %v4130_v55 = vpack.c.bf16 %v4046_v31, %v4042_v54  ;;  %v3910_v21 = vpop.f32.mrb[76].mxu1 }
 0x3bc   : > { %v6226_v17 = vadd.f32 %v3910_v21, %v8613_v15  ;;  %v3912_v18 = vpop.f32.mrb[77].mxu1 }
 0x3bd   : > { %v6227_v11 = vadd.f32 %v3912_v18, %v8616_v27  ;;  %v3914_v57 = vpop.f32.mrb[78].mxu1  ;;  %4872 = vmatprep.mubr.bf16.mxu0 %v4130_v55 }
 0x3be   : > { %v6228_v24 = vadd.f32 %v3914_v57, %v8613_v15  ;;  %v3916_v26 = vpop.f32.mrb[79].mxu1  ;;  %4873 = vmatmul.mubr.bf16.gmra.mrb[104].mxu0 %v4129_v1  ;;  %v4049_v60 = vmax.f32 %v6226_v17, 0.0 }
 0x3bf   : > { %v6229_v4 = vadd.f32 %v3916_v26, %v8616_v27  ;;  %v4050_v48 = vmax.f32 %v6227_v11, 0.0 }
 0x3c0   : > { %v4053_v40 = vmax.f32 %v6228_v24, 0.0 }
 0x3c1   : > { %v4054_v3 = vmax.f32 %v6229_v4, 0.0 }
 0x3c2   : > { %v4133_v50 = vpack.c.bf16 %v4053_v40, %v4049_v60 }
 0x3c3   : > { %v4134_v16 = vpack.c.bf16 %v4054_v3, %v4050_v48  ;;  %v3920_v12 = vpop.f32.mrb[80].mxu1  ;;  %v4215_v3 = vld [vmem:[%s8884_s4] sm:$0x3] }
 0x3c4   : > { %v6230_v14 = vadd.f32 %v3920_v12, %v8613_v15  ;;  %v3922_v47 = vpop.f32.mrb[81].mxu1 }
 0x3c5   : > { %v6231_v25 = vadd.f32 %v3922_v47, %v8616_v27  ;;  %v3924_v46 = vpop.f32.mrb[82].mxu1  ;;  %4882 = vmatprep.mubr.bf16.mxu0 %v4134_v16 }
 0x3c6   : > { %v6232_v52 = vadd.f32 %v3924_v46, %v8613_v15  ;;  %v3926_v49 = vpop.f32.mrb[83].mxu1  ;;  %4883 = vmatmul.mubr.bf16.gmra.mrb[108].mxu0 %v4133_v50  ;;  %v4057_v7 = vmax.f32 %v6230_v14, 0.0  ;;  %v8687_v50 = vrot.slane %v4215_v3, %v701_v2 }
 0x3c7   : > { %v6233_v43 = vadd.f32 %v3926_v49, %v8616_v27  ;;  %v4058_v30 = vmax.f32 %v6231_v25, 0.0 }
 0x3c8   : > { %v4061_v56 = vmax.f32 %v6232_v52, 0.0 }
 0x3c9   : > { %v4062_v58 = vmax.f32 %v6233_v43, 0.0 }
 0x3ca   : > { %v4137_v6 = vpack.c.bf16 %v4061_v56, %v4057_v7 }
 0x3cb   : > { %v4138_v8 = vpack.c.bf16 %v4062_v58, %v4058_v30  ;;  %v3930_v33 = vpop.f32.mrb[84].mxu1 }
 0x3cc   : > { %v6234_v32 = vadd.f32 %v3930_v33, %v8613_v15  ;;  %v3932_v9 = vpop.f32.mrb[85].mxu1 }
 0x3cd   : > { %v6235_v13 = vadd.f32 %v3932_v9, %v8616_v27  ;;  %v3934_v51 = vpop.f32.mrb[86].mxu1  ;;  %4892 = vmatprep.mubr.bf16.mxu0 %v4138_v8 }
 0x3ce   : > { %v6236_v29 = vadd.f32 %v3934_v51, %v8613_v15  ;;  %v3936_v44 = vpop.f32.mrb[87].mxu1  ;;  %4893 = vmatmul.mubr.bf16.gmra.mrb[112].mxu0 %v4137_v6  ;;  %v4065_v10 = vmax.f32 %v6234_v32, 0.0 }
 0x3cf   : > { %v6237_v61 = vadd.f32 %v3936_v44, %v8616_v27  ;;  %v4066_v34 = vmax.f32 %v6235_v13, 0.0 }
 0x3d0   : > { %v4069_v37 = vmax.f32 %v6236_v29, 0.0 }
 0x3d1   : > { %v4070_v62 = vmax.f32 %v6237_v61, 0.0 }
 0x3d2   : > { %v4141_v38 = vpack.c.bf16 %v4069_v37, %v4065_v10 }
 0x3d3   : > { %v4142_v63 = vpack.c.bf16 %v4070_v62, %v4066_v34  ;;  %v3940_v23 = vpop.f32.mrb[88].mxu1 }
 0x3d4   : > { %v6238_v20 = vadd.f32 %v3940_v23, %v8613_v15  ;;  %v3942_v0 = vpop.f32.mrb[89].mxu1 }
 0x3d5   : > { %v6239_v19 = vadd.f32 %v3942_v0, %v8616_v27  ;;  %v3944_v39 = vpop.f32.mrb[90].mxu1  ;;  %4902 = vmatprep.mubr.bf16.mxu0 %v4142_v63 }
 0x3d6   : > { %v6240_v45 = vadd.f32 %v3944_v39, %v8613_v15  ;;  %v3946_v35 = vpop.f32.mrb[91].mxu1  ;;  %4903 = vmatmul.mubr.bf16.gmra.mrb[116].mxu0 %v4141_v38  ;;  %v4073_v22 = vmax.f32 %v6238_v20, 0.0 }
 0x3d7   : > { %v6241_v59 = vadd.f32 %v3946_v35, %v8616_v27  ;;  %v4074_v5 = vmax.f32 %v6239_v19, 0.0 }
 0x3d8   : > { %v4077_v41 = vmax.f32 %v6240_v45, 0.0 }
 0x3d9   : > { %v4078_v42 = vmax.f32 %v6241_v59, 0.0 }
 0x3da   : > { %v4145_v36 = vpack.c.bf16 %v4077_v41, %v4073_v22 }
 0x3db   : > { %v4146_v54 = vpack.c.bf16 %v4078_v42, %v4074_v5  ;;  %v3950_v31 = vpop.f32.mrb[92].mxu1 }
 0x3dc   : > { %v6242_v1 = vadd.f32 %v3950_v31, %v8613_v15  ;;  %v3952_v55 = vpop.f32.mrb[93].mxu1 }
 0x3dd   : > { %v6243_v21 = vadd.f32 %v3952_v55, %v8616_v27  ;;  %v3954_v17 = vpop.f32.mrb[94].mxu1  ;;  %4912 = vmatprep.mubr.bf16.mxu0 %v4146_v54 }
 0x3de   : > { %v6244_v18 = vadd.f32 %v3954_v17, %v8613_v15  ;;  %v3956_v11 = vpop.f32.mrb[95].mxu1  ;;  %4913 = vmatmul.mubr.bf16.gmra.mrb[120].mxu0 %v4145_v36  ;;  %v4081_v24 = vmax.f32 %v6242_v1, 0.0  ;;  %v8691_v15 = vrot.slane %v4215_v3, %v705_v53 }
 0x3df   : > { %v6245_v57 = vadd.f32 %v3956_v11, %v8616_v27  ;;  %v4082_v4 = vmax.f32 %v6243_v21, 0.0 }
 0x3e0   : > { %v4085_v26 = vmax.f32 %v6244_v18, 0.0 }
 0x3e1   : > { %v4086_v60 = vmax.f32 %v6245_v57, 0.0 }
 0x3e2   : > { %v4149_v40 = vpack.c.bf16 %v4085_v26, %v4081_v24 }
 0x3e3   : > { %v4150_v48 = vpack.c.bf16 %v4086_v60, %v4082_v4 }
 0x3e5   : > { %4922 = vmatprep.mubr.bf16.mxu0 %v4150_v48 }
 0x3e6   : > { %4923 = vmatmul.mubr.bf16.gmra.mrb[124].mxu0 %v4149_v40 }
 0x441   : > { %v4774_v27 = vpop.f32.mrb[64].mxu0 }
 0x442   : > { %v6246_v16 = vadd.f32 %v4774_v27, %v8687_v50  ;;  %v4776_v12 = vpop.f32.mrb[65].mxu0 }
 0x443   : > { %v6247_v14 = vadd.f32 %v4776_v12, %v8691_v15  ;;  %v4778_v47 = vpop.f32.mrb[66].mxu0 }
 0x444   : > { %v6248_v25 = vadd.f32 %v4778_v47, %v8687_v50  ;;  %v4780_v46 = vpop.f32.mrb[67].mxu0  ;;  %v4933_v49 = vmax.f32 %v6246_v16, 0.0 }
 0x445   : > { %v6249_v52 = vadd.f32 %v4780_v46, %v8691_v15  ;;  %v4934_v2 = vmax.f32 %v6247_v14, 0.0 }
 0x446   : > { %v4935_v43 = vmax.f32 %v6248_v25, 0.0 }
 0x447   : > { %v4936_v7 = vmax.f32 %v6249_v52, 0.0 }
 0x448   : > { %v4997_v56 = vpack.c.bf16 %v4935_v43, %v4933_v49 }
 0x449   : > { %v4998_v28 = vpack.c.bf16 %v4936_v7, %v4934_v2  ;;  %v4784_v53 = vpop.f32.mrb[68].mxu0 }
 0x44a   : > { %v6250_v30 = vadd.f32 %v4784_v53, %v8687_v50  ;;  %v4786_v58 = vpop.f32.mrb[69].mxu0 }
 0x44b   : > { %v6251_v6 = vadd.f32 %v4786_v58, %v8691_v15  ;;  %v4788_v8 = vpop.f32.mrb[70].mxu0  ;;  %5196 = vmatprep.mubr.bf16.mxu1 %v4998_v28 }
 0x44c   : > { %v6252_v33 = vadd.f32 %v4788_v8, %v8687_v50  ;;  %v4790_v32 = vpop.f32.mrb[71].mxu0  ;;  %5197 = vmatmul.mubr.bf16.vlgmr.msra.gmra.mrb[96].mxu1 %v4997_v56  ;;  %v4937_v13 = vmax.f32 %v6250_v30, 0.0 }
 0x44d   : > { %v6253_v9 = vadd.f32 %v4790_v32, %v8691_v15  ;;  %v4938_v29 = vmax.f32 %v6251_v6, 0.0 }
 0x44e   : > { %v4939_v51 = vmax.f32 %v6252_v33, 0.0 }
 0x44f   : > { %v4940_v44 = vmax.f32 %v6253_v9, 0.0 }
 0x450   : > { %v4999_v61 = vpack.c.bf16 %v4939_v51, %v4937_v13 }
 0x451   : > { %v5000_v10 = vpack.c.bf16 %v4940_v44, %v4938_v29  ;;  %v4794_v37 = vpop.f32.mrb[72].mxu0 }
 0x452   : > { %v6254_v34 = vadd.f32 %v4794_v37, %v8687_v50  ;;  %v4796_v62 = vpop.f32.mrb[73].mxu0 }
 0x453   : > { %v6255_v38 = vadd.f32 %v4796_v62, %v8691_v15  ;;  %v4798_v63 = vpop.f32.mrb[74].mxu0  ;;  %5204 = vmatprep.mubr.bf16.mxu1 %v5000_v10 }
 0x454   : > { %v6256_v23 = vadd.f32 %v4798_v63, %v8687_v50  ;;  %v4800_v20 = vpop.f32.mrb[75].mxu0  ;;  %5205 = vmatmul.mubr.bf16.gmra.mrb[100].mxu1 %v4999_v61  ;;  %v4941_v19 = vmax.f32 %v6254_v34, 0.0 }
 0x455   : > { %v6257_v0 = vadd.f32 %v4800_v20, %v8691_v15  ;;  %v4942_v45 = vmax.f32 %v6255_v38, 0.0 }
 0x456   : > { %v4943_v39 = vmax.f32 %v6256_v23, 0.0 }
 0x457   : > { %v4944_v35 = vmax.f32 %v6257_v0, 0.0 }
 0x458   : > { %v5001_v59 = vpack.c.bf16 %v4943_v39, %v4941_v19 }
 0x459   : > { %v5002_v22 = vpack.c.bf16 %v4944_v35, %v4942_v45  ;;  %v4804_v41 = vpop.f32.mrb[76].mxu0 }
 0x45a   : > { %v6258_v5 = vadd.f32 %v4804_v41, %v8687_v50  ;;  %v4806_v42 = vpop.f32.mrb[77].mxu0 }
 0x45b   : > { %v6259_v36 = vadd.f32 %v4806_v42, %v8691_v15  ;;  %v4808_v54 = vpop.f32.mrb[78].mxu0  ;;  %5212 = vmatprep.mubr.bf16.mxu1 %v5002_v22 }
 0x45c   : > { %v6260_v31 = vadd.f32 %v4808_v54, %v8687_v50  ;;  %v4810_v1 = vpop.f32.mrb[79].mxu0  ;;  %5213 = vmatmul.mubr.bf16.gmra.mrb[104].mxu1 %v5001_v59  ;;  %v4945_v21 = vmax.f32 %v6258_v5, 0.0 }
 0x45d   : > { %v6261_v55 = vadd.f32 %v4810_v1, %v8691_v15  ;;  %v4946_v18 = vmax.f32 %v6259_v36, 0.0 }
 0x45e   : > { %v4947_v17 = vmax.f32 %v6260_v31, 0.0 }
 0x45f   : > { %v4948_v11 = vmax.f32 %v6261_v55, 0.0 }
 0x460   : > { %v5003_v57 = vpack.c.bf16 %v4947_v17, %v4945_v21 }
 0x461   : > { %v5004_v24 = vpack.c.bf16 %v4948_v11, %v4946_v18  ;;  %v4814_v26 = vpop.f32.mrb[80].mxu0 }
 0x462   : > { %v6262_v4 = vadd.f32 %v4814_v26, %v8687_v50  ;;  %v4816_v60 = vpop.f32.mrb[81].mxu0 }
 0x463   : > { %v6263_v40 = vadd.f32 %v4816_v60, %v8691_v15  ;;  %v4818_v48 = vpop.f32.mrb[82].mxu0  ;;  %5220 = vmatprep.mubr.bf16.mxu1 %v5004_v24 }
 0x464   : > { %v6264_v3 = vadd.f32 %v4818_v48, %v8687_v50  ;;  %v4820_v27 = vpop.f32.mrb[83].mxu0  ;;  %5221 = vmatmul.mubr.bf16.gmra.mrb[108].mxu1 %v5003_v57  ;;  %v4949_v12 = vmax.f32 %v6262_v4, 0.0 }
 0x465   : > { %v6265_v16 = vadd.f32 %v4820_v27, %v8691_v15  ;;  %v4950_v47 = vmax.f32 %v6263_v40, 0.0 }
 0x466   : > { %v4951_v14 = vmax.f32 %v6264_v3, 0.0 }
 0x467   : > { %v4952_v25 = vmax.f32 %v6265_v16, 0.0 }
 0x468   : > { %v5005_v46 = vpack.c.bf16 %v4951_v14, %v4949_v12 }
 0x469   : > { %v5006_v52 = vpack.c.bf16 %v4952_v25, %v4950_v47  ;;  %v4824_v49 = vpop.f32.mrb[84].mxu0 }
 0x46a   : > { %v6266_v43 = vadd.f32 %v4824_v49, %v8687_v50  ;;  %v4826_v2 = vpop.f32.mrb[85].mxu0 }
 0x46b   : > { %v6267_v7 = vadd.f32 %v4826_v2, %v8691_v15  ;;  %v4828_v56 = vpop.f32.mrb[86].mxu0  ;;  %5228 = vmatprep.mubr.bf16.mxu1 %v5006_v52 }
 0x46c   : > { %v6268_v28 = vadd.f32 %v4828_v56, %v8687_v50  ;;  %v4830_v53 = vpop.f32.mrb[87].mxu0  ;;  %5229 = vmatmul.mubr.bf16.gmra.mrb[112].mxu1 %v5005_v46  ;;  %v4953_v58 = vmax.f32 %v6266_v43, 0.0 }
 0x46d   : > { %v6269_v30 = vadd.f32 %v4830_v53, %v8691_v15  ;;  %v4954_v8 = vmax.f32 %v6267_v7, 0.0 }
 0x46e   : > { %v4955_v6 = vmax.f32 %v6268_v28, 0.0 }
 0x46f   : > { %v4956_v33 = vmax.f32 %v6269_v30, 0.0 }
 0x470   : > { %v5007_v32 = vpack.c.bf16 %v4955_v6, %v4953_v58 }
 0x471   : > { %v5008_v9 = vpack.c.bf16 %v4956_v33, %v4954_v8  ;;  %v4834_v13 = vpop.f32.mrb[88].mxu0 }
 0x472   : > { %v6270_v51 = vadd.f32 %v4834_v13, %v8687_v50  ;;  %v4836_v29 = vpop.f32.mrb[89].mxu0 }
 0x473   : > { %v6271_v44 = vadd.f32 %v4836_v29, %v8691_v15  ;;  %v4838_v61 = vpop.f32.mrb[90].mxu0  ;;  %5236 = vmatprep.mubr.bf16.mxu1 %v5008_v9 }
 0x474   : > { %v6272_v10 = vadd.f32 %v4838_v61, %v8687_v50  ;;  %v4840_v37 = vpop.f32.mrb[91].mxu0  ;;  %5237 = vmatmul.mubr.bf16.gmra.mrb[116].mxu1 %v5007_v32  ;;  %v4957_v62 = vmax.f32 %v6270_v51, 0.0 }
 0x475   : > { %v6273_v34 = vadd.f32 %v4840_v37, %v8691_v15  ;;  %v4958_v63 = vmax.f32 %v6271_v44, 0.0 }
 0x476   : > { %v4959_v38 = vmax.f32 %v6272_v10, 0.0 }
 0x477   : > { %v4960_v23 = vmax.f32 %v6273_v34, 0.0 }
 0x478   : > { %v5009_v20 = vpack.c.bf16 %v4959_v38, %v4957_v62 }
 0x479   : > { %v5010_v0 = vpack.c.bf16 %v4960_v23, %v4958_v63  ;;  %v4844_v19 = vpop.f32.mrb[92].mxu0 }
 0x47a   : > { %v6274_v39 = vadd.f32 %v4844_v19, %v8687_v50  ;;  %v4846_v45 = vpop.f32.mrb[93].mxu0 }
 0x47b   : > { %v6275_v35 = vadd.f32 %v4846_v45, %v8691_v15  ;;  %v4848_v59 = vpop.f32.mrb[94].mxu0  ;;  %5244 = vmatprep.mubr.bf16.mxu1 %v5010_v0 }
 0x47c   : > { %v6276_v22 = vadd.f32 %v4848_v59, %v8687_v50  ;;  %v4850_v41 = vpop.f32.mrb[95].mxu0  ;;  %5245 = vmatmul.mubr.bf16.gmra.mrb[120].mxu1 %v5009_v20  ;;  %v4961_v42 = vmax.f32 %v6274_v39, 0.0 }
 0x47d   : > { %v6277_v5 = vadd.f32 %v4850_v41, %v8691_v15  ;;  %v4962_v54 = vmax.f32 %v6275_v35, 0.0 }
 0x47e   : > { %v4963_v36 = vmax.f32 %v6276_v22, 0.0 }
 0x47f   : > { %v4964_v31 = vmax.f32 %v6277_v5, 0.0 }
 0x480   : > { %v5011_v1 = vpack.c.bf16 %v4963_v36, %v4961_v42 }
 0x481   : > { %v5012_v55 = vpack.c.bf16 %v4964_v31, %v4962_v54  ;;  %v4854_v21 = vpop.f32.mrb[96].mxu0 }
 0x482   : > { %v6278_v17 = vadd.f32 %v4854_v21, %v8687_v50  ;;  %v4856_v18 = vpop.f32.mrb[97].mxu0 }
 0x483   : > { %v6279_v11 = vadd.f32 %v4856_v18, %v8691_v15  ;;  %v4858_v57 = vpop.f32.mrb[98].mxu0  ;;  %5252 = vmatprep.mubr.bf16.mxu1 %v5012_v55 }
 0x484   : > { %v6280_v24 = vadd.f32 %v4858_v57, %v8687_v50  ;;  %v4860_v26 = vpop.f32.mrb[99].mxu0  ;;  %5253 = vmatmul.mubr.bf16.gmra.mrb[124].mxu1 %v5011_v1  ;;  %v4965_v60 = vmax.f32 %v6278_v17, 0.0 }
 0x485   : > { %v6281_v4 = vadd.f32 %v4860_v26, %v8691_v15  ;;  %v4966_v48 = vmax.f32 %v6279_v11, 0.0 }
 0x486   : > { %v4967_v40 = vmax.f32 %v6280_v24, 0.0 }
 0x487   : > { %v4968_v3 = vmax.f32 %v6281_v4, 0.0 }
 0x488   : > { %v5013_v27 = vpack.c.bf16 %v4967_v40, %v4965_v60 }
 0x489   : > { %v5014_v16 = vpack.c.bf16 %v4968_v3, %v4966_v48  ;;  %v4864_v12 = vpop.f32.mrb[100].mxu0 }
 0x48a   : > { %v6282_v14 = vadd.f32 %v4864_v12, %v8687_v50  ;;  %v4866_v47 = vpop.f32.mrb[101].mxu0 }
 0x48b   : > { %v6283_v25 = vadd.f32 %v4866_v47, %v8691_v15  ;;  %v4868_v46 = vpop.f32.mrb[102].mxu0  ;;  %5260 = vmatprep.mubr.bf16.mxu1 %v5014_v16 }
 0x48c   : > { %v6284_v52 = vadd.f32 %v4868_v46, %v8687_v50  ;;  %v4870_v49 = vpop.f32.mrb[103].mxu0  ;;  %5261 = vmatmul.mubr.bf16.gmra.mrb[128].mxu1 %v5013_v27  ;;  %v4969_v2 = vmax.f32 %v6282_v14, 0.0 }
 0x48d   : > { %v6285_v43 = vadd.f32 %v4870_v49, %v8691_v15  ;;  %v4970_v56 = vmax.f32 %v6283_v25, 0.0 }
 0x48e   : > { %v4971_v7 = vmax.f32 %v6284_v52, 0.0 }
 0x48f   : > { %v4972_v28 = vmax.f32 %v6285_v43, 0.0 }
 0x490   : > { %v5015_v53 = vpack.c.bf16 %v4971_v7, %v4969_v2 }
 0x491   : > { %v5016_v30 = vpack.c.bf16 %v4972_v28, %v4970_v56  ;;  %v4874_v58 = vpop.f32.mrb[104].mxu0 }
 0x492   : > { %v6286_v6 = vadd.f32 %v4874_v58, %v8687_v50  ;;  %v4876_v8 = vpop.f32.mrb[105].mxu0 }
 0x493   : > { %v6287_v33 = vadd.f32 %v4876_v8, %v8691_v15  ;;  %v4878_v32 = vpop.f32.mrb[106].mxu0  ;;  %5268 = vmatprep.mubr.bf16.mxu1 %v5016_v30 }
 0x494   : > { %v6288_v9 = vadd.f32 %v4878_v32, %v8687_v50  ;;  %v4880_v13 = vpop.f32.mrb[107].mxu0  ;;  %5269 = vmatmul.mubr.bf16.gmra.mrb[132].mxu1 %v5015_v53  ;;  %v4973_v29 = vmax.f32 %v6286_v6, 0.0 }
 0x495   : > { %v6289_v51 = vadd.f32 %v4880_v13, %v8691_v15  ;;  %v4974_v61 = vmax.f32 %v6287_v33, 0.0 }
 0x496   : > { %v4975_v44 = vmax.f32 %v6288_v9, 0.0 }
 0x497   : > { %v4976_v10 = vmax.f32 %v6289_v51, 0.0 }
 0x498   : > { %v5017_v37 = vpack.c.bf16 %v4975_v44, %v4973_v29 }
 0x499   : > { %v5018_v34 = vpack.c.bf16 %v4976_v10, %v4974_v61  ;;  %v4884_v62 = vpop.f32.mrb[108].mxu0 }
 0x49a   : > { %v6290_v38 = vadd.f32 %v4884_v62, %v8687_v50  ;;  %v4886_v63 = vpop.f32.mrb[109].mxu0 }
 0x49b   : > { %v6291_v23 = vadd.f32 %v4886_v63, %v8691_v15  ;;  %v4888_v20 = vpop.f32.mrb[110].mxu0  ;;  %5276 = vmatprep.mubr.bf16.mxu1 %v5018_v34 }
 0x49c   : > { %v6292_v0 = vadd.f32 %v4888_v20, %v8687_v50  ;;  %v4890_v19 = vpop.f32.mrb[111].mxu0  ;;  %5277 = vmatmul.mubr.bf16.gmra.mrb[136].mxu1 %v5017_v37  ;;  %v4977_v45 = vmax.f32 %v6290_v38, 0.0 }
 0x49d   : > { %v6293_v39 = vadd.f32 %v4890_v19, %v8691_v15  ;;  %v4978_v59 = vmax.f32 %v6291_v23, 0.0 }
 0x49e   : > { %v4979_v35 = vmax.f32 %v6292_v0, 0.0 }
 0x49f   : > { %v4980_v22 = vmax.f32 %v6293_v39, 0.0 }
 0x4a0   : > { %v5019_v41 = vpack.c.bf16 %v4979_v35, %v4977_v45  ;;  %v8760_v35 = vld [vmem:[%s8886_s6] ss:$0 sm:$0xff] }
 0x4a1   : > { %v5020_v5 = vpack.c.bf16 %v4980_v22, %v4978_v59  ;;  %v4894_v42 = vpop.f32.mrb[112].mxu0 }
 0x4a2   : > { %v6294_v36 = vadd.f32 %v4894_v42, %v8687_v50  ;;  %v4896_v54 = vpop.f32.mrb[113].mxu0 }
 0x4a3   : > { %v6295_v31 = vadd.f32 %v4896_v54, %v8691_v15  ;;  %v4898_v1 = vpop.f32.mrb[114].mxu0  ;;  %5284 = vmatprep.mubr.bf16.mxu1 %v5020_v5 }
 0x4a4   : > { %v6296_v55 = vadd.f32 %v4898_v1, %v8687_v50  ;;  %v4900_v21 = vpop.f32.mrb[115].mxu0  ;;  %5285 = vmatmul.mubr.bf16.gmra.mrb[140].mxu1 %v5019_v41  ;;  %v4981_v18 = vmax.f32 %v6294_v36, 0.0 }
 0x4a5   : > { %v6297_v17 = vadd.f32 %v4900_v21, %v8691_v15  ;;  %v4982_v57 = vmax.f32 %v6295_v31, 0.0 }
 0x4a6   : > { %v4983_v11 = vmax.f32 %v6296_v55, 0.0 }
 0x4a7   : > { %v4984_v24 = vmax.f32 %v6297_v17, 0.0 }
 0x4a8   : > { %v5021_v26 = vpack.c.bf16 %v4983_v11, %v4981_v18 }
 0x4a9   : > { %v5022_v4 = vpack.c.bf16 %v4984_v24, %v4982_v57  ;;  %v4904_v60 = vpop.f32.mrb[116].mxu0 }
 0x4aa   : > { %v6298_v40 = vadd.f32 %v4904_v60, %v8687_v50  ;;  %v4906_v48 = vpop.f32.mrb[117].mxu0 }
 0x4ab   : > { %v6299_v3 = vadd.f32 %v4906_v48, %v8691_v15  ;;  %v4908_v27 = vpop.f32.mrb[118].mxu0  ;;  %5292 = vmatprep.mubr.bf16.mxu1 %v5022_v4 }
 0x4ac   : > { %v6300_v16 = vadd.f32 %v4908_v27, %v8687_v50  ;;  %v4910_v12 = vpop.f32.mrb[119].mxu0  ;;  %5293 = vmatmul.mubr.bf16.gmra.mrb[144].mxu1 %v5021_v26  ;;  %v4985_v47 = vmax.f32 %v6298_v40, 0.0 }
 0x4ad   : > { %v6301_v14 = vadd.f32 %v4910_v12, %v8691_v15  ;;  %v4986_v46 = vmax.f32 %v6299_v3, 0.0 }
 0x4ae   : > { %v4987_v25 = vmax.f32 %v6300_v16, 0.0 }
 0x4af   : > { %v4988_v52 = vmax.f32 %v6301_v14, 0.0 }
 0x4b0   : > { %v5023_v49 = vpack.c.bf16 %v4987_v25, %v4985_v47 }
 0x4b1   : > { %v5024_v43 = vpack.c.bf16 %v4988_v52, %v4986_v46  ;;  %v4914_v2 = vpop.f32.mrb[120].mxu0 }
 0x4b2   : > { %v6302_v7 = vadd.f32 %v4914_v2, %v8687_v50  ;;  %v4916_v56 = vpop.f32.mrb[121].mxu0 }
 0x4b3   : > { %v6303_v28 = vadd.f32 %v4916_v56, %v8691_v15  ;;  %v4918_v53 = vpop.f32.mrb[122].mxu0  ;;  %5300 = vmatprep.mubr.bf16.mxu1 %v5024_v43 }
 0x4b4   : > { %v6304_v30 = vadd.f32 %v4918_v53, %v8687_v50  ;;  %v4920_v58 = vpop.f32.mrb[123].mxu0  ;;  %5301 = vmatmul.mubr.bf16.gmra.mrb[148].mxu1 %v5023_v49  ;;  %v4989_v8 = vmax.f32 %v6302_v7, 0.0 }
 0x4b5   : > { %v6305_v6 = vadd.f32 %v4920_v58, %v8691_v15  ;;  %v4990_v32 = vmax.f32 %v6303_v28, 0.0 }
 0x4b6   : > { %v4991_v33 = vmax.f32 %v6304_v30, 0.0 }
 0x4b7   : > { %v4992_v9 = vmax.f32 %v6305_v6, 0.0 }
 0x4b8   : > { %v5025_v13 = vpack.c.bf16 %v4991_v33, %v4989_v8 }
 0x4b9   : > { %v5026_v51 = vpack.c.bf16 %v4992_v9, %v4990_v32  ;;  %v4924_v29 = vpop.f32.mrb[124].mxu0 }
 0x4ba   : > { %v6306_v44 = vadd.f32 %v4924_v29, %v8687_v50  ;;  %v4926_v61 = vpop.f32.mrb[125].mxu0 }
 0x4bb   : > { %v6307_v10 = vadd.f32 %v4926_v61, %v8691_v15  ;;  %v4928_v37 = vpop.f32.mrb[126].mxu0  ;;  %5308 = vmatprep.mubr.bf16.mxu1 %v5026_v51 }
 0x4bc   : > { %v6308_v34 = vadd.f32 %v4928_v37, %v8687_v50  ;;  %v4930_v62 = vpop.f32.mrb[127].mxu0  ;;  %5309 = vmatmul.mubr.bf16.gmra.mrb[152].mxu1 %v5025_v13  ;;  %v4993_v63 = vmax.f32 %v6306_v44, 0.0 }
 0x4bd   : > { %v6309_v38 = vadd.f32 %v4930_v62, %v8691_v15  ;;  %v4994_v20 = vmax.f32 %v6307_v10, 0.0 }
 0x4be   : > { %v4995_v23 = vmax.f32 %v6308_v34, 0.0 }
 0x4bf   : > { %v4996_v0 = vmax.f32 %v6309_v38, 0.0 }
 0x4c0   : > { %v5027_v19 = vpack.c.bf16 %v4995_v23, %v4993_v63 }
 0x4c1   : > { %v5028_v39 = vpack.c.bf16 %v4996_v0, %v4994_v20 }
 0x4c3   : > { %5316 = vmatprep.mubr.bf16.mxu1 %v5028_v39 }
 0x4c4   : > { %5317 = vmatmul.mubr.bf16.gmra.mrb[156].mxu1 %v5027_v19 }
 0x51f   : > { %v5958_v45 = vpop.f32.mrb[96].mxu1 }
 0x520   : > { %v5959_v59 = vpop.f32.mrb[97].mxu1 }
 0x521   : > { %v5960_v50 = vadd.f32 %v5959_v59, %v5958_v45  ;;  %v5961_v22 = vpop.f32.mrb[98].mxu1 }
 0x522   : > { %v5962_v41 = vpop.f32.mrb[99].mxu1 }
 0x523   : > { %v5199_v15 = vadd.f32 %v5960_v50, %v8760_v35  ;;  %v5963_v5 = vadd.f32 %v5962_v41, %v5961_v22 }
 0x525   : > { %v5325_v42 = vmax.f32 %v5199_v15, 0.0  ;;  %v5202_v36 = vadd.f32 %v5963_v5, %v8760_v35 }
 0x527   : > { %5357 = vst [vmem:[%s8765_s29] sm:$0xff] %v5325_v42  ;;  %v5326_v54 = vmax.f32 %v5202_v36, 0.0  ;;  %v5964_v31 = vpop.f32.mrb[100].mxu1 }
 0x528   : > { %v5965_v1 = vpop.f32.mrb[101].mxu1 }
 0x529   : > { %5358 = vst [vmem:[%s8765_s29 + $0x8] sm:$0xff] %v5326_v54  ;;  %v5966_v55 = vadd.f32 %v5965_v1, %v5964_v31  ;;  %v5967_v21 = vpop.f32.mrb[102].mxu1 }
 0x52a   : > { %v5968_v17 = vpop.f32.mrb[103].mxu1 }
 0x52b   : > { %v5207_v18 = vadd.f32 %v5966_v55, %v8760_v35  ;;  %v5969_v11 = vadd.f32 %v5968_v17, %v5967_v21 }
 0x52d   : > { %v5327_v57 = vmax.f32 %v5207_v18, 0.0  ;;  %v5210_v24 = vadd.f32 %v5969_v11, %v8760_v35 }
 0x52f   : > { %5359 = vst [vmem:[%s8765_s29 + $0x10] sm:$0xff] %v5327_v57  ;;  %v5328_v26 = vmax.f32 %v5210_v24, 0.0  ;;  %v5970_v4 = vpop.f32.mrb[104].mxu1 }
 0x530   : > { %v5971_v60 = vpop.f32.mrb[105].mxu1 }
 0x531   : > { %5360 = vst [vmem:[%s8765_s29 + $0x18] sm:$0xff] %v5328_v26  ;;  %v5972_v40 = vadd.f32 %v5971_v60, %v5970_v4  ;;  %v5973_v48 = vpop.f32.mrb[106].mxu1 }
 0x532   : > { %v5974_v3 = vpop.f32.mrb[107].mxu1 }
 0x533   : > { %v5215_v27 = vadd.f32 %v5972_v40, %v8760_v35  ;;  %v5975_v16 = vadd.f32 %v5974_v3, %v5973_v48 }
 0x535   : > { %v5329_v12 = vmax.f32 %v5215_v27, 0.0  ;;  %v5218_v14 = vadd.f32 %v5975_v16, %v8760_v35 }
 0x537   : > { %5361 = vst [vmem:[%s8765_s29 + $0x20] sm:$0xff] %v5329_v12  ;;  %v5330_v47 = vmax.f32 %v5218_v14, 0.0  ;;  %v5976_v25 = vpop.f32.mrb[108].mxu1 }
 0x538   : > { %v5977_v46 = vpop.f32.mrb[109].mxu1 }
 0x539   : > { %5362 = vst [vmem:[%s8765_s29 + $0x28] sm:$0xff] %v5330_v47  ;;  %v5978_v52 = vadd.f32 %v5977_v46, %v5976_v25  ;;  %v5979_v49 = vpop.f32.mrb[110].mxu1 }
 0x53a   : > { %v5980_v43 = vpop.f32.mrb[111].mxu1 }
 0x53b   : > { %v5223_v2 = vadd.f32 %v5978_v52, %v8760_v35  ;;  %v5981_v7 = vadd.f32 %v5980_v43, %v5979_v49 }
 0x53d   : > { %v5331_v56 = vmax.f32 %v5223_v2, 0.0  ;;  %v5226_v28 = vadd.f32 %v5981_v7, %v8760_v35 }
 0x53f   : > { %5363 = vst [vmem:[%s8765_s29 + $0x30] sm:$0xff] %v5331_v56  ;;  %v5332_v53 = vmax.f32 %v5226_v28, 0.0  ;;  %v5982_v30 = vpop.f32.mrb[112].mxu1 }
 0x540   : > { %v5983_v58 = vpop.f32.mrb[113].mxu1 }
 0x541   : > { %5364 = vst [vmem:[%s8765_s29 + $0x38] sm:$0xff] %v5332_v53  ;;  %v5984_v6 = vadd.f32 %v5983_v58, %v5982_v30  ;;  %v5985_v8 = vpop.f32.mrb[114].mxu1 }
 0x542   : > { %v5986_v33 = vpop.f32.mrb[115].mxu1 }
 0x543   : > { %v5231_v32 = vadd.f32 %v5984_v6, %v8760_v35  ;;  %v5987_v9 = vadd.f32 %v5986_v33, %v5985_v8 }
 0x545   : > { %v5333_v13 = vmax.f32 %v5231_v32, 0.0  ;;  %v5234_v51 = vadd.f32 %v5987_v9, %v8760_v35 }
 0x547   : > { %5365 = vst [vmem:[%s8765_s29 + $0x40] sm:$0xff] %v5333_v13  ;;  %v5334_v29 = vmax.f32 %v5234_v51, 0.0  ;;  %v5988_v44 = vpop.f32.mrb[116].mxu1 }
 0x548   : > { %v5989_v61 = vpop.f32.mrb[117].mxu1 }
 0x549   : > { %5366 = vst [vmem:[%s8765_s29 + $0x48] sm:$0xff] %v5334_v29  ;;  %v5990_v10 = vadd.f32 %v5989_v61, %v5988_v44  ;;  %v5991_v37 = vpop.f32.mrb[118].mxu1 }
 0x54a   : > { %v5992_v34 = vpop.f32.mrb[119].mxu1 }
 0x54b   : > { %v5239_v62 = vadd.f32 %v5990_v10, %v8760_v35  ;;  %v5993_v38 = vadd.f32 %v5992_v34, %v5991_v37 }
 0x54d   : > { %v5335_v63 = vmax.f32 %v5239_v62, 0.0  ;;  %v5242_v23 = vadd.f32 %v5993_v38, %v8760_v35 }
 0x54f   : > { %5367 = vst [vmem:[%s8765_s29 + $0x50] sm:$0xff] %v5335_v63  ;;  %v5336_v20 = vmax.f32 %v5242_v23, 0.0  ;;  %v5994_v0 = vpop.f32.mrb[120].mxu1 }
 0x550   : > { %v5995_v19 = vpop.f32.mrb[121].mxu1 }
 0x551   : > { %5368 = vst [vmem:[%s8765_s29 + $0x58] sm:$0xff] %v5336_v20  ;;  %v5996_v39 = vadd.f32 %v5995_v19, %v5994_v0  ;;  %v5997_v45 = vpop.f32.mrb[122].mxu1 }
 0x552   : > { %v5998_v59 = vpop.f32.mrb[123].mxu1 }
 0x553   : > { %v5247_v50 = vadd.f32 %v5996_v39, %v8760_v35  ;;  %v5999_v22 = vadd.f32 %v5998_v59, %v5997_v45 }
 0x555   : > { %v5337_v41 = vmax.f32 %v5247_v50, 0.0  ;;  %v5250_v15 = vadd.f32 %v5999_v22, %v8760_v35 }
 0x557   : > { %5369 = vst [vmem:[%s8765_s29 + $0x60] sm:$0xff] %v5337_v41  ;;  %v5338_v5 = vmax.f32 %v5250_v15, 0.0  ;;  %v6000_v42 = vpop.f32.mrb[124].mxu1 }
 0x558   : > { %v6001_v36 = vpop.f32.mrb[125].mxu1 }
 0x559   : > { %5370 = vst [vmem:[%s8765_s29 + $0x68] sm:$0xff] %v5338_v5  ;;  %v6002_v54 = vadd.f32 %v6001_v36, %v6000_v42  ;;  %v6003_v31 = vpop.f32.mrb[126].mxu1 }
 0x55a   : > { %v6004_v1 = vpop.f32.mrb[127].mxu1 }
 0x55b   : > { %v5255_v55 = vadd.f32 %v6002_v54, %v8760_v35  ;;  %v6005_v21 = vadd.f32 %v6004_v1, %v6003_v31 }
 0x55d   : > { %v5339_v17 = vmax.f32 %v5255_v55, 0.0  ;;  %v5258_v18 = vadd.f32 %v6005_v21, %v8760_v35 }
 0x55f   : > { %5371 = vst [vmem:[%s8765_s29 + $0x70] sm:$0xff] %v5339_v17  ;;  %v5340_v11 = vmax.f32 %v5258_v18, 0.0  ;;  %v6006_v57 = vpop.f32.mrb[128].mxu1 }
 0x560   : > { %v6007_v24 = vpop.f32.mrb[129].mxu1 }
 0x561   : > { %5372 = vst [vmem:[%s8765_s29 + $0x78] sm:$0xff] %v5340_v11  ;;  %v6008_v26 = vadd.f32 %v6007_v24, %v6006_v57  ;;  %v6009_v4 = vpop.f32.mrb[130].mxu1 }
 0x562   : > { %v6010_v60 = vpop.f32.mrb[131].mxu1 }
 0x563   : > { %v5263_v40 = vadd.f32 %v6008_v26, %v8760_v35  ;;  %v6011_v48 = vadd.f32 %v6010_v60, %v6009_v4 }
 0x565   : > { %v5341_v3 = vmax.f32 %v5263_v40, 0.0  ;;  %v5266_v27 = vadd.f32 %v6011_v48, %v8760_v35 }
 0x567   : > { %5373 = vst [vmem:[%s8765_s29 + $0x80] sm:$0xff] %v5341_v3  ;;  %v5342_v16 = vmax.f32 %v5266_v27, 0.0  ;;  %v6012_v12 = vpop.f32.mrb[132].mxu1 }
 0x568   : > { %v6013_v14 = vpop.f32.mrb[133].mxu1 }
 0x569   : > { %5374 = vst [vmem:[%s8765_s29 + $0x88] sm:$0xff] %v5342_v16  ;;  %v6014_v47 = vadd.f32 %v6013_v14, %v6012_v12  ;;  %v6015_v25 = vpop.f32.mrb[134].mxu1 }
 0x56a   : > { %v6016_v46 = vpop.f32.mrb[135].mxu1 }
 0x56b   : > { %v5271_v52 = vadd.f32 %v6014_v47, %v8760_v35  ;;  %v6017_v49 = vadd.f32 %v6016_v46, %v6015_v25 }
 0x56d   : > { %v5343_v43 = vmax.f32 %v5271_v52, 0.0  ;;  %v5274_v2 = vadd.f32 %v6017_v49, %v8760_v35 }
 0x56f   : > { %5375 = vst [vmem:[%s8765_s29 + $0x90] sm:$0xff] %v5343_v43  ;;  %v5344_v7 = vmax.f32 %v5274_v2, 0.0  ;;  %v6018_v56 = vpop.f32.mrb[136].mxu1 }
 0x570   : > { %v6019_v28 = vpop.f32.mrb[137].mxu1 }
 0x571   : > { %5376 = vst [vmem:[%s8765_s29 + $0x98] sm:$0xff] %v5344_v7  ;;  %v6020_v53 = vadd.f32 %v6019_v28, %v6018_v56  ;;  %v6021_v30 = vpop.f32.mrb[138].mxu1 }
 0x572   : > { %v6022_v58 = vpop.f32.mrb[139].mxu1 }
 0x573   : > { %v5279_v6 = vadd.f32 %v6020_v53, %v8760_v35  ;;  %v6023_v8 = vadd.f32 %v6022_v58, %v6021_v30 }
 0x575   : > { %v5345_v33 = vmax.f32 %v5279_v6, 0.0  ;;  %v5282_v32 = vadd.f32 %v6023_v8, %v8760_v35 }
 0x577   : > { %5377 = vst [vmem:[%s8765_s29 + $0xa0] sm:$0xff] %v5345_v33  ;;  %v5346_v9 = vmax.f32 %v5282_v32, 0.0  ;;  %v6024_v13 = vpop.f32.mrb[140].mxu1 }
 0x578   : > { %v6025_v51 = vpop.f32.mrb[141].mxu1 }
 0x579   : > { %5378 = vst [vmem:[%s8765_s29 + $0xa8] sm:$0xff] %v5346_v9  ;;  %v6026_v29 = vadd.f32 %v6025_v51, %v6024_v13  ;;  %v6027_v44 = vpop.f32.mrb[142].mxu1 }
 0x57a   : > { %v6028_v61 = vpop.f32.mrb[143].mxu1 }
 0x57b   : > { %v5287_v10 = vadd.f32 %v6026_v29, %v8760_v35  ;;  %v6029_v37 = vadd.f32 %v6028_v61, %v6027_v44 }
 0x57d   : > { %v5347_v34 = vmax.f32 %v5287_v10, 0.0  ;;  %v5290_v62 = vadd.f32 %v6029_v37, %v8760_v35 }
 0x57f   : > { %5379 = vst [vmem:[%s8765_s29 + $0xb0] sm:$0xff] %v5347_v34  ;;  %v5348_v38 = vmax.f32 %v5290_v62, 0.0  ;;  %v6030_v63 = vpop.f32.mrb[144].mxu1 }
 0x580   : > { %v6031_v23 = vpop.f32.mrb[145].mxu1 }
 0x581   : > { %5380 = vst [vmem:[%s8765_s29 + $0xb8] sm:$0xff] %v5348_v38  ;;  %v6032_v20 = vadd.f32 %v6031_v23, %v6030_v63  ;;  %v6033_v0 = vpop.f32.mrb[146].mxu1 }
 0x582   : > { %v6034_v19 = vpop.f32.mrb[147].mxu1 }
 0x583   : > { %v5295_v39 = vadd.f32 %v6032_v20, %v8760_v35  ;;  %v6035_v45 = vadd.f32 %v6034_v19, %v6033_v0 }
 0x585   : > { %v5349_v59 = vmax.f32 %v5295_v39, 0.0  ;;  %v5298_v50 = vadd.f32 %v6035_v45, %v8760_v35 }
 0x587   : > { %5381 = vst [vmem:[%s8765_s29 + $0xc0] sm:$0xff] %v5349_v59  ;;  %v5350_v22 = vmax.f32 %v5298_v50, 0.0  ;;  %v6036_v41 = vpop.f32.mrb[148].mxu1 }
 0x588   : > { %v6037_v15 = vpop.f32.mrb[149].mxu1 }
 0x589   : > { %5382 = vst [vmem:[%s8765_s29 + $0xc8] sm:$0xff] %v5350_v22  ;;  %v6038_v5 = vadd.f32 %v6037_v15, %v6036_v41  ;;  %v6039_v42 = vpop.f32.mrb[150].mxu1 }
 0x58a   : > { %v6040_v36 = vpop.f32.mrb[151].mxu1 }
 0x58b   : > { %v5303_v54 = vadd.f32 %v6038_v5, %v8760_v35  ;;  %v6041_v31 = vadd.f32 %v6040_v36, %v6039_v42 }
 0x58d   : > { %v5351_v1 = vmax.f32 %v5303_v54, 0.0  ;;  %v5306_v55 = vadd.f32 %v6041_v31, %v8760_v35 }
 0x58f   : > { %5383 = vst [vmem:[%s8765_s29 + $0xd0] sm:$0xff] %v5351_v1  ;;  %v5352_v21 = vmax.f32 %v5306_v55, 0.0  ;;  %v6042_v17 = vpop.f32.mrb[152].mxu1 }
 0x590   : > { %v6043_v18 = vpop.f32.mrb[153].mxu1 }
 0x591   : > { %5384 = vst [vmem:[%s8765_s29 + $0xd8] sm:$0xff] %v5352_v21  ;;  %v6044_v11 = vadd.f32 %v6043_v18, %v6042_v17  ;;  %v6045_v57 = vpop.f32.mrb[154].mxu1 }
 0x592   : > { %v6046_v24 = vpop.f32.mrb[155].mxu1 }
 0x593   : > { %v5311_v26 = vadd.f32 %v6044_v11, %v8760_v35  ;;  %v6047_v4 = vadd.f32 %v6046_v24, %v6045_v57 }
 0x595   : > { %v5353_v60 = vmax.f32 %v5311_v26, 0.0  ;;  %v5314_v40 = vadd.f32 %v6047_v4, %v8760_v35 }
 0x597   : > { %5385 = vst [vmem:[%s8765_s29 + $0xe0] sm:$0xff] %v5353_v60  ;;  %v5354_v48 = vmax.f32 %v5314_v40, 0.0  ;;  %v6048_v3 = vpop.f32.mrb[156].mxu1 }
 0x598   : > { %v6049_v27 = vpop.f32.mrb[157].mxu1 }
 0x599   : > { %5386 = vst [vmem:[%s8765_s29 + $0xe8] sm:$0xff] %v5354_v48  ;;  %v6050_v16 = vadd.f32 %v6049_v27, %v6048_v3  ;;  %v6051_v12 = vpop.f32.mrb[158].mxu1 }
 0x59a   : > { %v6052_v14 = vpop.f32.mrb[159].mxu1 }
 0x59b   : > { %v5319_v47 = vadd.f32 %v6050_v16, %v8760_v35  ;;  %v6053_v25 = vadd.f32 %v6052_v14, %v6051_v12 }
 0x59d   : > { %v5355_v46 = vmax.f32 %v5319_v47, 0.0  ;;  %v5322_v52 = vadd.f32 %v6053_v25, %v8760_v35 }
 0x59f   : > { %5387 = vst [vmem:[%s8765_s29 + $0xf0] sm:$0xff] %v5355_v46  ;;  %v5356_v49 = vmax.f32 %v5322_v52, 0.0 }
 0x5a1   : > { %5388 = vst [vmem:[%s8765_s29 + $0xf8] sm:$0xff] %v5356_v49 }
 0x5a2   : > { %7568 = shalt.err (!%p7565_p4)
}
 0x5a3   : > { %s7569_s14 = scalar_lea.hbm %s8832_s23, 4096  ;;  %s7573_s17 = scalar_lea.hbm %s8887_s7, 8192 }
 0x5a4   : > { %p7570_p9 = scmp.ne.s32.totalorder %s8832_s23, %s7569_s14  ;;  %p7574_p8 = scmp.lt.u32.totalorder %s8832_s23, %s8887_s7 }
 0x5a5   : > { %p7575_p13 = scmp.lt.u32.totalorder %s7573_s17, %s7569_s14  ;;  %p7577_p10 = scmp.lt.u32.totalorder %s7569_s14, %s8832_s23 }
 0x5a6   : > { %p7571_p0 = pnand %p7570_p9, %p7829_p5 }
 0x5a7   : > { %p7576_p6 = por %p7575_p13, %p7574_p8 }
 0x5a8   : > { %p7572_p11 = pneg %p7571_p0 }
 0x5a9   : > { %p7578_p3 = por %p7577_p10, %p7576_p6 }
 0x5ab   : > { %p7579_p7 = pnand %p7578_p3, %p7572_p11 }
 0x5ad   : > { %7582 = shalt.err (!%p7579_p7)
}
 0x5ae   : > { %s7645_s16 = smov 128   ;;  %s7646_s22 = smov 8  }
 0x5af   : > { %6743 = dma.vmem_to_hbm [thread:$0]  (%p7829_p5), %s8834_s10, 4096, %s8832_s23, %s5390_s12, %s7645_s16, %s7645_s16, %s7646_s22  }
 0x5b0 PF: > { %s5418_s30 = sand.u32 1, %s7617_s24   ;;  %p8932_p12 = scmp.ne.s32.totalorder %s8895_s8, 0 }
 0x5b1   : > { %p8933_p2 = scmp.ge.s32.totalorder %s7629_s27, 2  ;;  %s5419_s28 = scalar_lea.sflag [#allocation4], %s5418_s30 }
 0x5b3   : > { %p6760_p1 = pnand %p8933_p2, %p8932_p12 }
 0x5b5   : > { %7612 = dma.done.wait (!%p6760_p1), %s5419_s28, 4096  }
 0x5b6   : > { %7614 = vsyncadd (!%p6760_p1), %s5419_s28, 4294963200  ;;  %p22_p4 = scmp.ge.s32.totalorder %s7815_s13, 4   ;;  %s8934_s24 = smov %s7621_s25 }
 0x5b7   : > { %s8935_s25 = smov %s7625_s26  ;;  %s8936_s26 = smov %s7825_s18 }
 0x5b8   : > { %s8937_s27 = smov %s7815_s13  ;;  %24 = sbr.rel (!%p22_p4) target bundleno = 9 (0x9), region = 105 }
 0x5bf   :  { %5424 = vsyncpa [#allocation3], 1 }
 0x5c0   :  { %5426 = vsyncpa [#allocation3 + $0x1], 1 }
 0x5c1   :  { %5427 = vsyncpa [#allocation6], 1 }
 0x5c2   :  { %5428 = vsyncpa [#allocation9], 1 }
 0x5c3   :  { %5429 = vsyncpa [#allocation4], 1 }
 0x5c4   :  { %5431 = vsyncpa [#allocation4 + $0x1], 1 }

</bundles_post_ra>
